<compile_context>
chip_gen: v7x
topology: tpu7x:2x2x1
jax: 0.10.0
libtpu: 0.0.40
codegen_flags: <defaults>
</compile_context>

<pallas_src>
import math

import jax
import jax.numpy as jnp
from jax.experimental import pallas as pl
from jax.experimental.pallas import tpu as pltpu

# ----- small, forward-consistent configuration (scaled-down PyTorch defaults) ----
DEB_DIM = 64        # deb_dim
N2V_DIM = 16        # n2v_dim == Conv1d(c1) in_channels == required seq_len
HIDDEN = 32         # hidden_size
NUM_CLASSES = 4
NUM_LAYERS = 2

K1, C1_OUT = 5, 128     # c1 = Conv1d(n2v_dim, 128, 5)
K2, C2_OUT = 3, 64      # c2 = Conv1d(128, 64, 3)
FC1_OUT = 32            # fc1 = Linear(64, 32)


# ----- single fused kernel --------------------------------------------------------
def fused_forward_kernel(
        x_ref,                                            # (B, T, D)   f32
        wihF1_ref, wihB1_ref, whh1_ref, b1_ref,           # layer-1 LSTM weights
        wihF2_ref, wihB2_ref, whh2_ref, b2_ref,           # layer-2 LSTM weights
        c1w_ref, c1b_ref, c2w_ref, c2b_ref,               # conv weights
        fc1w_ref, fc1b_ref, fc2w_ref, fc2b_ref,           # head weights
        out_ref,                                          # (B, num_classes) f32
        xp_ref, hist1_ref, hist2_ref):                    # VMEM scratch
    B, T, D = x_ref.shape
    H = whh1_ref.shape[0] // 2
    two_h = 2 * H
    f32 = jnp.float32
    bf16 = jnp.bfloat16

    # ================= layer 1: hoisted per-time input projection ===============
    # xp_ref[t] = x[:, t, :] @ WihF1 + x[:, T-1-t, :] @ WihB1 + bias1
    # WihF1 / WihB1 are zero-padded into the interleaved 8H gate layout at init,
    # so the two dots simply add; bias is folded in here, OFF the serial chain.
    # (Per-t 2-D matmuls keep indexing/reshapes trivial; they are hoisted work,
    #  the latency-critical recurrence below stays 1 matmul + 1 sigmoid per step.)
    x_val = x_ref[...].astype(bf16)                       # (B, T, D), tiny
    wF1 = wihF1_ref[...]
    wB1 = wihB1_ref[...]
    bias1 = b1_ref[...]                                   # (1, 8H) f32
    for t in range(T):
        rt = T - 1 - t
        xp_ref[t] = (jnp.dot(x_val[:, t, :], wF1, preferred_element_type=f32)
                     + jnp.dot(x_val[:, rt, :], wB1, preferred_element_type=f32)
                     + bias1)

    # ================= fused bidirectional recurrence ============================
    # Carry h/c = [fwd | bwd] (B, 2H); one block-diagonal (2H, 8H) recurrent
    # matmul, one sigmoid pass on (B, 8H), tanh only on the g-block.
    def run_layer(whh_ref, hist_ref):
        w_bd = whh_ref[...]                               # (2H, 8H) bf16, hoisted
        h = jnp.zeros((B, two_h), f32)
        c = jnp.zeros((B, two_h), f32)
        for t in range(T):
            rt = T - 1 - t
            gates = xp_ref[t] + jnp.dot(h.astype(bf16), w_bd,
                                        preferred_element_type=f32)      # (B, 8H)
            sg = jax.nn.sigmoid(gates)                    # one EUP pass, full width
            i_g = sg[:, 0 * two_h:1 * two_h]
            f_g = sg[:, 1 * two_h:2 * two_h]
            o_g = sg[:, 3 * two_h:4 * two_h]
            g_g = jnp.tanh(gates[:, 2 * two_h:3 * two_h])
            c = f_g * c + i_g * g_g
            h = o_g * jnp.tanh(c)
            hist_ref[t, :, 0:H] = h[:, 0:H]               # fwd hidden for time t
            hist_ref[rt, :, H:two_h] = h[:, H:two_h]      # bwd hidden for time rt

    run_layer(whh1_ref, hist1_ref)

    # ================= layer 2: project layer-1 output, then recur ===============
    wF2 = wihF2_ref[...]
    wB2 = wihB2_ref[...]
    bias2 = b2_ref[...]
    for t in range(T):
        rt = T - 1 - t
        h_t = hist1_ref[t].astype(bf16)                   # (B, 2H)
        h_rt = hist1_ref[rt].astype(bf16)
        xp_ref[t] = (jnp.dot(h_t, wF2, preferred_element_type=f32)
                     + jnp.dot(h_rt, wB2, preferred_element_type=f32)
                     + bias2)

    run_layer(whh2_ref, hist2_ref)

    # ================= conv / pool / head, all VMEM-resident =====================
    # PyTorch feeds lstm_out (B, T, 2H) to Conv1d as NCL -> channels = T, length = 2H.
    K1T, C1 = c1w_ref.shape                               # (K1*T, 128)
    k1 = K1T // T
    l1 = two_h - k1 + 1                                   # 60
    hist2 = hist2_ref[...].astype(bf16)                   # bf16 BEFORE the transposes
    per_b = [hist2[:, b, :].T for b in range(B)]          # each (2H, T): [f, t]

    # conv1 as ONE im2col matmul: row (b*l1 + l), col (k*T + t) = lstm_out[b, t, l+k]
    m1 = jnp.concatenate(
        [jnp.concatenate([ab[k:k + l1, :] for k in range(k1)], axis=1)
         for ab in per_b], axis=0)                        # (B*l1, K1*T) = (120, 80) bf16
    y1 = jnp.dot(m1, c1w_ref[...], preferred_element_type=f32) + c1b_ref[...]
    y1 = jnp.maximum(y1, 0.0)                             # (B*l1, C1) = (120, 128)

    # MaxPool1d(3), floor semantics: window maxima then pick every 3rd start row.
    p1 = l1 // 3                                          # 20
    n1 = B * l1
    r = jnp.maximum(jnp.maximum(y1[0:n1 - 2, :], y1[1:n1 - 1, :]), y1[2:n1, :])
    pooled1 = jnp.concatenate(
        [r[b * l1 + 3 * p: b * l1 + 3 * p + 1, :]
         for b in range(B) for p in range(p1)], axis=0)   # (B*p1, C1) = (40, 128) f32

    # conv2 as ONE im2col matmul: contraction depth K2*C1 = 384.
    KC, C2 = c2w_ref.shape                                # (K2*C1, 64)
    k2 = KC // C1
    l2 = p1 - k2 + 1                                      # 18
    m2 = jnp.concatenate(
        [jnp.concatenate([pooled1[b * p1 + k: b * p1 + k + l2, :] for k in range(k2)],
                         axis=1)
         for b in range(B)], axis=0).astype(bf16)         # (B*l2, K2*C1) = (36, 384)
    y2 = jnp.dot(m2, c2w_ref[...], preferred_element_type=f32) + c2b_ref[...]
    y2 = jnp.maximum(y2, 0.0)                             # (B*l2, C2) = (36, 64)

    # MaxPool1d(3) followed by torch.max(dim=2): 18 = 3*6 -> all positions covered,
    # so it folds into a single global max over the conv2 length per batch.
    pooled2 = jnp.concatenate(
        [jnp.max(y2[b * l2:(b + 1) * l2, :], axis=0, keepdims=True) for b in range(B)],
        axis=0)                                           # (B, C2)

    h1 = jnp.maximum(
        jnp.dot(pooled2.astype(bf16), fc1w_ref[...], preferred_element_type=f32)
        + fc1b_ref[...], 0.0)                             # (B, 32)
    out_ref[...] = (jnp.dot(h1.astype(bf16), fc2w_ref[...], preferred_element_type=f32)
                    + fc2b_ref[...])                      # (B, num_classes)


# ----- parameters (deterministic synthetic init, PyTorch-like uniform bounds) ------
def init_params(key):
    keys = iter(jax.random.split(key, 64))

    def u(shape, fan_in):
        bound = 1.0 / math.sqrt(fan_in)
        return jax.random.uniform(next(keys), shape, jnp.float32, -bound, bound)

    def interleave_gates(mf, mb):
        # column layout [i_f, i_b | f_f, f_b | g_f, g_b | o_f, o_b], H each ->
        # fused-cell gate blocks are contiguous (2H wide) slices.
        parts = []
        for g in range(4):
            parts.append(mf[:, g * HIDDEN:(g + 1) * HIDDEN])
            parts.append(mb[:, g * HIDDEN:(g + 1) * HIDDEN])
        return jnp.concatenate(parts, axis=1)

    params = {}
    lstm = []
    in_dim = DEB_DIM
    for _ in range(NUM_LAYERS):
        wih_f = u((in_dim, 4 * HIDDEN), HIDDEN)        # == torch weight_ih (4H, Din).T
        wih_b = u((in_dim, 4 * HIDDEN), HIDDEN)
        whh_f = u((HIDDEN, 4 * HIDDEN), HIDDEN)        # == torch weight_hh (4H, H).T
        whh_b = u((HIDDEN, 4 * HIDDEN), HIDDEN)
        b_f = u((1, 4 * HIDDEN), HIDDEN) + u((1, 4 * HIDDEN), HIDDEN)   # b_ih + b_hh
        b_b = u((1, 4 * HIDDEN), HIDDEN) + u((1, 4 * HIDDEN), HIDDEN)
        zih = jnp.zeros_like(wih_f)
        zhh = jnp.zeros_like(whh_f)
        lstm.append(dict(
            # zero-padded per-direction input projections in the interleaved layout:
            # adding the two per-step contributions gives the full 8H gate input.
            wih_fwd=interleave_gates(wih_f, zih).astype(jnp.bfloat16),   # (Din, 8H)
            wih_bwd=interleave_gates(zih, wih_b).astype(jnp.bfloat16),   # (Din, 8H)
            # block-diagonal recurrent weight: h_f rows -> fwd gate cols only,
            # h_b rows -> bwd gate cols only (fuses both directions in ONE matmul).
            whh_bd=jnp.concatenate(
                [interleave_gates(whh_f, zhh),
                 interleave_gates(zhh, whh_b)], axis=0).astype(jnp.bfloat16),  # (2H, 8H)
            bias=interleave_gates(b_f, b_b),                              # (1, 8H) f32
        ))
        in_dim = 2 * HIDDEN
    params["lstm"] = lstm
    # c1 = Conv1d(n2v_dim, 128, 5): torch (C1, T, K1) pre-laid-out as (K1*T, C1),
    # row index k*T + t, so conv1 is a single im2col matmul.
    params["c1_w"] = u((K1 * N2V_DIM, C1_OUT), N2V_DIM * K1).astype(jnp.bfloat16)
    params["c1_b"] = u((1, C1_OUT), N2V_DIM * K1)
    # c2 = Conv1d(128, 64, 3): im2col layout (K2*C1, C2), row index k*C1 + c.
    params["c2_w"] = u((K2 * C1_OUT, C2_OUT), C1_OUT * K2).astype(jnp.bfloat16)
    params["c2_b"] = u((1, C2_OUT), C1_OUT * K2)
    # fc1 = Linear(64, 32), fc2 = Linear(32, num_classes); stored transposed.
    params["fc1_w"] = u((C2_OUT, FC1_OUT), C2_OUT).astype(jnp.bfloat16)
    params["fc1_b"] = u((1, FC1_OUT), C2_OUT)
    params["fc2_w"] = u((FC1_OUT, NUM_CLASSES), FC1_OUT).astype(jnp.bfloat16)
    params["fc2_b"] = u((1, NUM_CLASSES), FC1_OUT)
    return params


def _flat_param_list(params):
    flat = []
    for layer in params["lstm"]:
        flat += [layer["wih_fwd"], layer["wih_bwd"], layer["whh_bd"], layer["bias"]]
    flat += [params["c1_w"], params["c1_b"], params["c2_w"], params["c2_b"],
             params["fc1_w"], params["fc1_b"], params["fc2_w"], params["fc2_b"]]
    return flat


# ----- full forward: ONE fused pallas_call ------------------------------------------
@jax.jit
def forward(params, deberta_embeddings, node2vec_embeddings):
    # node2vec_embeddings is unused by the original PyTorch forward as well.
    del node2vec_embeddings
    B_, T_, D_ = deberta_embeddings.shape
    assert T_ == N2V_DIM, "Conv1d(c1) requires seq_len == n2v_dim (as in the PyTorch model)"
    assert D_ == DEB_DIM
    # self.do(deberta_embeddings): Dropout(p=0.2) is identity at inference.
    # No host-side transpose: the kernel consumes the batch_first (B, T, D) layout.
    flat = _flat_param_list(params)
    vmem = pl.BlockSpec(memory_space=pltpu.MemorySpace.VMEM)
    return pl.pallas_call(
        fused_forward_kernel,
        out_shape=jax.ShapeDtypeStruct((B_, NUM_CLASSES), jnp.float32),
        in_specs=[vmem] * (1 + len(flat)),
        out_specs=vmem,
        scratch_shapes=[
            pltpu.VMEM((T_, B_, 8 * HIDDEN), jnp.float32),   # hoisted gate input xp[t]
            pltpu.VMEM((T_, B_, 2 * HIDDEN), jnp.float32),   # layer-1 hidden history
            pltpu.VMEM((T_, B_, 2 * HIDDEN), jnp.float32),   # layer-2 hidden history
        ],
        # TODO(synk): if batch grows well beyond 2, add a leading grid axis over B
        # with dimension_semantics=("parallel",) (B-tile >= 8) so v7x's two
        # TensorCores both work, and set vmem_limit_bytes against v7x's 64 MiB.
    )(deberta_embeddings.astype(jnp.float32), *flat)


if __name__ == "__main__":
    key = jax.random.PRNGKey(0)
    k_deb, k_n2v, k_par = jax.random.split(key, 3)

    batch = 2
    seq = N2V_DIM  # seq_len must equal n2v_dim for the PyTorch model's c1 to accept lstm_out
    deberta = jax.random.normal(k_deb, (batch, seq, DEB_DIM), jnp.float32)
    node2vec = jax.random.normal(k_n2v, (batch, N2V_DIM), jnp.float32)  # unused (as in PyTorch)

    params = init_params(k_par)

    out = forward(params, deberta, node2vec)
    out = jax.block_until_ready(out)

    assert out.shape == (batch, NUM_CLASSES), out.shape
    assert bool(jnp.all(jnp.isfinite(out)))
    print("KERNEL_OK")
</pallas_src>

<mosaic_0001>
module attributes {stable_mosaic.version = 11 : i64} {
  func.func @fused_forward_kernel(%arg0: memref<2x16x64xf32, #tpu.memory_space<vmem>>, %arg1: memref<64x256xbf16, #tpu.memory_space<vmem>>, %arg2: memref<64x256xbf16, #tpu.memory_space<vmem>>, %arg3: memref<64x256xbf16, #tpu.memory_space<vmem>>, %arg4: memref<1x256xf32, #tpu.memory_space<vmem>>, %arg5: memref<64x256xbf16, #tpu.memory_space<vmem>>, %arg6: memref<64x256xbf16, #tpu.memory_space<vmem>>, %arg7: memref<64x256xbf16, #tpu.memory_space<vmem>>, %arg8: memref<1x256xf32, #tpu.memory_space<vmem>>, %arg9: memref<80x128xbf16, #tpu.memory_space<vmem>>, %arg10: memref<1x128xf32, #tpu.memory_space<vmem>>, %arg11: memref<384x64xbf16, #tpu.memory_space<vmem>>, %arg12: memref<1x64xf32, #tpu.memory_space<vmem>>, %arg13: memref<64x32xbf16, #tpu.memory_space<vmem>>, %arg14: memref<1x32xf32, #tpu.memory_space<vmem>>, %arg15: memref<32x4xbf16, #tpu.memory_space<vmem>>, %arg16: memref<1x4xf32, #tpu.memory_space<vmem>>, %arg17: memref<2x4xf32, #tpu.memory_space<vmem>>, %arg18: memref<16x2x256xf32, #tpu.memory_space<vmem>>, %arg19: memref<16x2x64xf32, #tpu.memory_space<vmem>>, %arg20: memref<16x2x64xf32, #tpu.memory_space<vmem>>) attributes {dimension_semantics = [], scalar_prefetch = 0 : i64, scratch_operands = 3 : i64, tpu.core_type = #tpu.core_type<tc>} {
    %c0 = arith.constant 0 : index
    %c0_0 = arith.constant 0 : index
    %c0_1 = arith.constant 0 : index
    %0 = vector.load %arg0[%c0, %c0_0, %c0_1] : memref<2x16x64xf32, #tpu.memory_space<vmem>>, vector<2x16x64xf32>
    %1 = arith.truncf %0 : vector<2x16x64xf32> to vector<2x16x64xbf16>
    %c0_2 = arith.constant 0 : index
    %c0_3 = arith.constant 0 : index
    %2 = vector.load %arg1[%c0_2, %c0_3] : memref<64x256xbf16, #tpu.memory_space<vmem>>, vector<64x256xbf16>
    %c0_4 = arith.constant 0 : index
    %c0_5 = arith.constant 0 : index
    %3 = vector.load %arg2[%c0_4, %c0_5] : memref<64x256xbf16, #tpu.memory_space<vmem>>, vector<64x256xbf16>
    %c0_6 = arith.constant 0 : index
    %c0_7 = arith.constant 0 : index
    %4 = vector.load %arg4[%c0_6, %c0_7] : memref<1x256xf32, #tpu.memory_space<vmem>>, vector<1x256xf32>
    %5 = vector.extract_strided_slice %1 {offsets = [0, 0, 0], sizes = [2, 1, 64], strides = [1, 1, 1]} : vector<2x16x64xbf16> to vector<2x1x64xbf16>
    %6 = vector.shape_cast %5 : vector<2x1x64xbf16> to vector<2x64xbf16>
    %cst = arith.constant dense<0.000000e+00> : vector<2x256xf32>
    %7 = tpu.matmul %6, %2, %cst {dimension_numbers = #tpu.dot_dimension_numbers<[1], [0], [0], [1], [0, 0, 1, 1], [], []>} : vector<2x64xbf16>, vector<64x256xbf16>, vector<2x256xf32> -> vector<2x256xf32>
    %8 = vector.extract_strided_slice %1 {offsets = [0, 15, 0], sizes = [2, 1, 64], strides = [1, 1, 1]} : vector<2x16x64xbf16> to vector<2x1x64xbf16>
    %9 = vector.shape_cast %8 : vector<2x1x64xbf16> to vector<2x64xbf16>
    %cst_8 = arith.constant dense<0.000000e+00> : vector<2x256xf32>
    %10 = tpu.matmul %9, %3, %cst_8 {dimension_numbers = #tpu.dot_dimension_numbers<[1], [0], [0], [1], [0, 0, 1, 1], [], []>} : vector<2x64xbf16>, vector<64x256xbf16>, vector<2x256xf32> -> vector<2x256xf32>
    %11 = arith.addf %7, %10 : vector<2x256xf32>
    %12 = vector.broadcast %4 : vector<1x256xf32> to vector<2x256xf32>
    %13 = arith.addf %11, %12 : vector<2x256xf32>
    %c0_9 = arith.constant 0 : index
    %c0_10 = arith.constant 0 : index
    %c0_11 = arith.constant 0 : index
    %14 = vector.load %arg18[%c0_9, %c0_10, %c0_11] : memref<16x2x256xf32, #tpu.memory_space<vmem>>, vector<1x2x256xf32>
    %15 = vector.shape_cast %14 : vector<1x2x256xf32> to vector<2x256xf32>
    %16 = vector.shape_cast %13 : vector<2x256xf32> to vector<1x2x256xf32>
    tpu.vector_store %arg18[%c0_9, %c0_10, %c0_11], %16 {strides = array<i32>} : memref<16x2x256xf32, #tpu.memory_space<vmem>>, vector<1x2x256xf32>,
    %17 = vector.extract_strided_slice %1 {offsets = [0, 1, 0], sizes = [2, 1, 64], strides = [1, 1, 1]} : vector<2x16x64xbf16> to vector<2x1x64xbf16>
    %18 = vector.shape_cast %17 : vector<2x1x64xbf16> to vector<2x64xbf16>
    %cst_12 = arith.constant dense<0.000000e+00> : vector<2x256xf32>
    %19 = tpu.matmul %18, %2, %cst_12 {dimension_numbers = #tpu.dot_dimension_numbers<[1], [0], [0], [1], [0, 0, 1, 1], [], []>} : vector<2x64xbf16>, vector<64x256xbf16>, vector<2x256xf32> -> vector<2x256xf32>
    %20 = vector.extract_strided_slice %1 {offsets = [0, 14, 0], sizes = [2, 1, 64], strides = [1, 1, 1]} : vector<2x16x64xbf16> to vector<2x1x64xbf16>
    %21 = vector.shape_cast %20 : vector<2x1x64xbf16> to vector<2x64xbf16>
    %cst_13 = arith.constant dense<0.000000e+00> : vector<2x256xf32>
    %22 = tpu.matmul %21, %3, %cst_13 {dimension_numbers = #tpu.dot_dimension_numbers<[1], [0], [0], [1], [0, 0, 1, 1], [], []>} : vector<2x64xbf16>, vector<64x256xbf16>, vector<2x256xf32> -> vector<2x256xf32>
    %23 = arith.addf %19, %22 : vector<2x256xf32>
    %24 = vector.broadcast %4 : vector<1x256xf32> to vector<2x256xf32>
    %25 = arith.addf %23, %24 : vector<2x256xf32>
    %c1 = arith.constant 1 : index
    %c0_14 = arith.constant 0 : index
    %c0_15 = arith.constant 0 : index
    %26 = vector.load %arg18[%c1, %c0_14, %c0_15] : memref<16x2x256xf32, #tpu.memory_space<vmem>>, vector<1x2x256xf32>
    %27 = vector.shape_cast %26 : vector<1x2x256xf32> to vector<2x256xf32>
    %28 = vector.shape_cast %25 : vector<2x256xf32> to vector<1x2x256xf32>
    tpu.vector_store %arg18[%c1, %c0_14, %c0_15], %28 {strides = array<i32>} : memref<16x2x256xf32, #tpu.memory_space<vmem>>, vector<1x2x256xf32>,
    %29 = vector.extract_strided_slice %1 {offsets = [0, 2, 0], sizes = [2, 1, 64], strides = [1, 1, 1]} : vector<2x16x64xbf16> to vector<2x1x64xbf16>
    %30 = vector.shape_cast %29 : vector<2x1x64xbf16> to vector<2x64xbf16>
    %cst_16 = arith.constant dense<0.000000e+00> : vector<2x256xf32>
    %31 = tpu.matmul %30, %2, %cst_16 {dimension_numbers = #tpu.dot_dimension_numbers<[1], [0], [0], [1], [0, 0, 1, 1], [], []>} : vector<2x64xbf16>, vector<64x256xbf16>, vector<2x256xf32> -> vector<2x256xf32>
    %32 = vector.extract_strided_slice %1 {offsets = [0, 13, 0], sizes = [2, 1, 64], strides = [1, 1, 1]} : vector<2x16x64xbf16> to vector<2x1x64xbf16>
    %33 = vector.shape_cast %32 : vector<2x1x64xbf16> to vector<2x64xbf16>
    %cst_17 = arith.constant dense<0.000000e+00> : vector<2x256xf32>
    %34 = tpu.matmul %33, %3, %cst_17 {dimension_numbers = #tpu.dot_dimension_numbers<[1], [0], [0], [1], [0, 0, 1, 1], [], []>} : vector<2x64xbf16>, vector<64x256xbf16>, vector<2x256xf32> -> vector<2x256xf32>
    %35 = arith.addf %31, %34 : vector<2x256xf32>
    %36 = vector.broadcast %4 : vector<1x256xf32> to vector<2x256xf32>
    %37 = arith.addf %35, %36 : vector<2x256xf32>
    %c2 = arith.constant 2 : index
    %c0_18 = arith.constant 0 : index
    %c0_19 = arith.constant 0 : index
    %38 = vector.load %arg18[%c2, %c0_18, %c0_19] : memref<16x2x256xf32, #tpu.memory_space<vmem>>, vector<1x2x256xf32>
    %39 = vector.shape_cast %38 : vector<1x2x256xf32> to vector<2x256xf32>
    %40 = vector.shape_cast %37 : vector<2x256xf32> to vector<1x2x256xf32>
    tpu.vector_store %arg18[%c2, %c0_18, %c0_19], %40 {strides = array<i32>} : memref<16x2x256xf32, #tpu.memory_space<vmem>>, vector<1x2x256xf32>,
    %41 = vector.extract_strided_slice %1 {offsets = [0, 3, 0], sizes = [2, 1, 64], strides = [1, 1, 1]} : vector<2x16x64xbf16> to vector<2x1x64xbf16>
    %42 = vector.shape_cast %41 : vector<2x1x64xbf16> to vector<2x64xbf16>
    %cst_20 = arith.constant dense<0.000000e+00> : vector<2x256xf32>
    %43 = tpu.matmul %42, %2, %cst_20 {dimension_numbers = #tpu.dot_dimension_numbers<[1], [0], [0], [1], [0, 0, 1, 1], [], []>} : vector<2x64xbf16>, vector<64x256xbf16>, vector<2x256xf32> -> vector<2x256xf32>
    %44 = vector.extract_strided_slice %1 {offsets = [0, 12, 0], sizes = [2, 1, 64], strides = [1, 1, 1]} : vector<2x16x64xbf16> to vector<2x1x64xbf16>
    %45 = vector.shape_cast %44 : vector<2x1x64xbf16> to vector<2x64xbf16>
    %cst_21 = arith.constant dense<0.000000e+00> : vector<2x256xf32>
    %46 = tpu.matmul %45, %3, %cst_21 {dimension_numbers = #tpu.dot_dimension_numbers<[1], [0], [0], [1], [0, 0, 1, 1], [], []>} : vector<2x64xbf16>, vector<64x256xbf16>, vector<2x256xf32> -> vector<2x256xf32>
    %47 = arith.addf %43, %46 : vector<2x256xf32>
    %48 = vector.broadcast %4 : vector<1x256xf32> to vector<2x256xf32>
    %49 = arith.addf %47, %48 : vector<2x256xf32>
    %c3 = arith.constant 3 : index
    %c0_22 = arith.constant 0 : index
    %c0_23 = arith.constant 0 : index
    %50 = vector.load %arg18[%c3, %c0_22, %c0_23] : memref<16x2x256xf32, #tpu.memory_space<vmem>>, vector<1x2x256xf32>
    %51 = vector.shape_cast %50 : vector<1x2x256xf32> to vector<2x256xf32>
    %52 = vector.shape_cast %49 : vector<2x256xf32> to vector<1x2x256xf32>
    tpu.vector_store %arg18[%c3, %c0_22, %c0_23], %52 {strides = array<i32>} : memref<16x2x256xf32, #tpu.memory_space<vmem>>, vector<1x2x256xf32>,
    %53 = vector.extract_strided_slice %1 {offsets = [0, 4, 0], sizes = [2, 1, 64], strides = [1, 1, 1]} : vector<2x16x64xbf16> to vector<2x1x64xbf16>
    %54 = vector.shape_cast %53 : vector<2x1x64xbf16> to vector<2x64xbf16>
    %cst_24 = arith.constant dense<0.000000e+00> : vector<2x256xf32>
    %55 = tpu.matmul %54, %2, %cst_24 {dimension_numbers = #tpu.dot_dimension_numbers<[1], [0], [0], [1], [0, 0, 1, 1], [], []>} : vector<2x64xbf16>, vector<64x256xbf16>, vector<2x256xf32> -> vector<2x256xf32>
    %56 = vector.extract_strided_slice %1 {offsets = [0, 11, 0], sizes = [2, 1, 64], strides = [1, 1, 1]} : vector<2x16x64xbf16> to vector<2x1x64xbf16>
    %57 = vector.shape_cast %56 : vector<2x1x64xbf16> to vector<2x64xbf16>
    %cst_25 = arith.constant dense<0.000000e+00> : vector<2x256xf32>
    %58 = tpu.matmul %57, %3, %cst_25 {dimension_numbers = #tpu.dot_dimension_numbers<[1], [0], [0], [1], [0, 0, 1, 1], [], []>} : vector<2x64xbf16>, vector<64x256xbf16>, vector<2x256xf32> -> vector<2x256xf32>
    %59 = arith.addf %55, %58 : vector<2x256xf32>
    %60 = vector.broadcast %4 : vector<1x256xf32> to vector<2x256xf32>
    %61 = arith.addf %59, %60 : vector<2x256xf32>
    %c4 = arith.constant 4 : index
    %c0_26 = arith.constant 0 : index
    %c0_27 = arith.constant 0 : index
    %62 = vector.load %arg18[%c4, %c0_26, %c0_27] : memref<16x2x256xf32, #tpu.memory_space<vmem>>, vector<1x2x256xf32>
    %63 = vector.shape_cast %62 : vector<1x2x256xf32> to vector<2x256xf32>
    %64 = vector.shape_cast %61 : vector<2x256xf32> to vector<1x2x256xf32>
    tpu.vector_store %arg18[%c4, %c0_26, %c0_27], %64 {strides = array<i32>} : memref<16x2x256xf32, #tpu.memory_space<vmem>>, vector<1x2x256xf32>,
    %65 = vector.extract_strided_slice %1 {offsets = [0, 5, 0], sizes = [2, 1, 64], strides = [1, 1, 1]} : vector<2x16x64xbf16> to vector<2x1x64xbf16>
    %66 = vector.shape_cast %65 : vector<2x1x64xbf16> to vector<2x64xbf16>
    %cst_28 = arith.constant dense<0.000000e+00> : vector<2x256xf32>
    %67 = tpu.matmul %66, %2, %cst_28 {dimension_numbers = #tpu.dot_dimension_numbers<[1], [0], [0], [1], [0, 0, 1, 1], [], []>} : vector<2x64xbf16>, vector<64x256xbf16>, vector<2x256xf32> -> vector<2x256xf32>
    %68 = vector.extract_strided_slice %1 {offsets = [0, 10, 0], sizes = [2, 1, 64], strides = [1, 1, 1]} : vector<2x16x64xbf16> to vector<2x1x64xbf16>
    %69 = vector.shape_cast %68 : vector<2x1x64xbf16> to vector<2x64xbf16>
    %cst_29 = arith.constant dense<0.000000e+00> : vector<2x256xf32>
    %70 = tpu.matmul %69, %3, %cst_29 {dimension_numbers = #tpu.dot_dimension_numbers<[1], [0], [0], [1], [0, 0, 1, 1], [], []>} : vector<2x64xbf16>, vector<64x256xbf16>, vector<2x256xf32> -> vector<2x256xf32>
    %71 = arith.addf %67, %70 : vector<2x256xf32>
    %72 = vector.broadcast %4 : vector<1x256xf32> to vector<2x256xf32>
    %73 = arith.addf %71, %72 : vector<2x256xf32>
    %c5 = arith.constant 5 : index
    %c0_30 = arith.constant 0 : index
    %c0_31 = arith.constant 0 : index
    %74 = vector.load %arg18[%c5, %c0_30, %c0_31] : memref<16x2x256xf32, #tpu.memory_space<vmem>>, vector<1x2x256xf32>
    %75 = vector.shape_cast %74 : vector<1x2x256xf32> to vector<2x256xf32>
    %76 = vector.shape_cast %73 : vector<2x256xf32> to vector<1x2x256xf32>
    tpu.vector_store %arg18[%c5, %c0_30, %c0_31], %76 {strides = array<i32>} : memref<16x2x256xf32, #tpu.memory_space<vmem>>, vector<1x2x256xf32>,
    %77 = vector.extract_strided_slice %1 {offsets = [0, 6, 0], sizes = [2, 1, 64], strides = [1, 1, 1]} : vector<2x16x64xbf16> to vector<2x1x64xbf16>
    %78 = vector.shape_cast %77 : vector<2x1x64xbf16> to vector<2x64xbf16>
    %cst_32 = arith.constant dense<0.000000e+00> : vector<2x256xf32>
    %79 = tpu.matmul %78, %2, %cst_32 {dimension_numbers = #tpu.dot_dimension_numbers<[1], [0], [0], [1], [0, 0, 1, 1], [], []>} : vector<2x64xbf16>, vector<64x256xbf16>, vector<2x256xf32> -> vector<2x256xf32>
    %80 = vector.extract_strided_slice %1 {offsets = [0, 9, 0], sizes = [2, 1, 64], strides = [1, 1, 1]} : vector<2x16x64xbf16> to vector<2x1x64xbf16>
    %81 = vector.shape_cast %80 : vector<2x1x64xbf16> to vector<2x64xbf16>
    %cst_33 = arith.constant dense<0.000000e+00> : vector<2x256xf32>
    %82 = tpu.matmul %81, %3, %cst_33 {dimension_numbers = #tpu.dot_dimension_numbers<[1], [0], [0], [1], [0, 0, 1, 1], [], []>} : vector<2x64xbf16>, vector<64x256xbf16>, vector<2x256xf32> -> vector<2x256xf32>
    %83 = arith.addf %79, %82 : vector<2x256xf32>
    %84 = vector.broadcast %4 : vector<1x256xf32> to vector<2x256xf32>
    %85 = arith.addf %83, %84 : vector<2x256xf32>
    %c6 = arith.constant 6 : index
    %c0_34 = arith.constant 0 : index
    %c0_35 = arith.constant 0 : index
    %86 = vector.load %arg18[%c6, %c0_34, %c0_35] : memref<16x2x256xf32, #tpu.memory_space<vmem>>, vector<1x2x256xf32>
    %87 = vector.shape_cast %86 : vector<1x2x256xf32> to vector<2x256xf32>
    %88 = vector.shape_cast %85 : vector<2x256xf32> to vector<1x2x256xf32>
    tpu.vector_store %arg18[%c6, %c0_34, %c0_35], %88 {strides = array<i32>} : memref<16x2x256xf32, #tpu.memory_space<vmem>>, vector<1x2x256xf32>,
    %89 = vector.extract_strided_slice %1 {offsets = [0, 7, 0], sizes = [2, 1, 64], strides = [1, 1, 1]} : vector<2x16x64xbf16> to vector<2x1x64xbf16>
    %90 = vector.shape_cast %89 : vector<2x1x64xbf16> to vector<2x64xbf16>
    %cst_36 = arith.constant dense<0.000000e+00> : vector<2x256xf32>
    %91 = tpu.matmul %90, %2, %cst_36 {dimension_numbers = #tpu.dot_dimension_numbers<[1], [0], [0], [1], [0, 0, 1, 1], [], []>} : vector<2x64xbf16>, vector<64x256xbf16>, vector<2x256xf32> -> vector<2x256xf32>
    %92 = vector.extract_strided_slice %1 {offsets = [0, 8, 0], sizes = [2, 1, 64], strides = [1, 1, 1]} : vector<2x16x64xbf16> to vector<2x1x64xbf16>
    %93 = vector.shape_cast %92 : vector<2x1x64xbf16> to vector<2x64xbf16>
    %cst_37 = arith.constant dense<0.000000e+00> : vector<2x256xf32>
    %94 = tpu.matmul %93, %3, %cst_37 {dimension_numbers = #tpu.dot_dimension_numbers<[1], [0], [0], [1], [0, 0, 1, 1], [], []>} : vector<2x64xbf16>, vector<64x256xbf16>, vector<2x256xf32> -> vector<2x256xf32>
    %95 = arith.addf %91, %94 : vector<2x256xf32>
    %96 = vector.broadcast %4 : vector<1x256xf32> to vector<2x256xf32>
    %97 = arith.addf %95, %96 : vector<2x256xf32>
    %c7 = arith.constant 7 : index
    %c0_38 = arith.constant 0 : index
    %c0_39 = arith.constant 0 : index
    %98 = vector.load %arg18[%c7, %c0_38, %c0_39] : memref<16x2x256xf32, #tpu.memory_space<vmem>>, vector<1x2x256xf32>
    %99 = vector.shape_cast %98 : vector<1x2x256xf32> to vector<2x256xf32>
    %100 = vector.shape_cast %97 : vector<2x256xf32> to vector<1x2x256xf32>
    tpu.vector_store %arg18[%c7, %c0_38, %c0_39], %100 {strides = array<i32>} : memref<16x2x256xf32, #tpu.memory_space<vmem>>, vector<1x2x256xf32>,
    %101 = vector.extract_strided_slice %1 {offsets = [0, 8, 0], sizes = [2, 1, 64], strides = [1, 1, 1]} : vector<2x16x64xbf16> to vector<2x1x64xbf16>
    %102 = vector.shape_cast %101 : vector<2x1x64xbf16> to vector<2x64xbf16>
    %cst_40 = arith.constant dense<0.000000e+00> : vector<2x256xf32>
    %103 = tpu.matmul %102, %2, %cst_40 {dimension_numbers = #tpu.dot_dimension_numbers<[1], [0], [0], [1], [0, 0, 1, 1], [], []>} : vector<2x64xbf16>, vector<64x256xbf16>, vector<2x256xf32> -> vector<2x256xf32>
    %104 = vector.extract_strided_slice %1 {offsets = [0, 7, 0], sizes = [2, 1, 64], strides = [1, 1, 1]} : vector<2x16x64xbf16> to vector<2x1x64xbf16>
    %105 = vector.shape_cast %104 : vector<2x1x64xbf16> to vector<2x64xbf16>
    %cst_41 = arith.constant dense<0.000000e+00> : vector<2x256xf32>
    %106 = tpu.matmul %105, %3, %cst_41 {dimension_numbers = #tpu.dot_dimension_numbers<[1], [0], [0], [1], [0, 0, 1, 1], [], []>} : vector<2x64xbf16>, vector<64x256xbf16>, vector<2x256xf32> -> vector<2x256xf32>
    %107 = arith.addf %103, %106 : vector<2x256xf32>
    %108 = vector.broadcast %4 : vector<1x256xf32> to vector<2x256xf32>
    %109 = arith.addf %107, %108 : vector<2x256xf32>
    %c8 = arith.constant 8 : index
    %c0_42 = arith.constant 0 : index
    %c0_43 = arith.constant 0 : index
    %110 = vector.load %arg18[%c8, %c0_42, %c0_43] : memref<16x2x256xf32, #tpu.memory_space<vmem>>, vector<1x2x256xf32>
    %111 = vector.shape_cast %110 : vector<1x2x256xf32> to vector<2x256xf32>
    %112 = vector.shape_cast %109 : vector<2x256xf32> to vector<1x2x256xf32>
    tpu.vector_store %arg18[%c8, %c0_42, %c0_43], %112 {strides = array<i32>} : memref<16x2x256xf32, #tpu.memory_space<vmem>>, vector<1x2x256xf32>,
    %113 = vector.extract_strided_slice %1 {offsets = [0, 9, 0], sizes = [2, 1, 64], strides = [1, 1, 1]} : vector<2x16x64xbf16> to vector<2x1x64xbf16>
    %114 = vector.shape_cast %113 : vector<2x1x64xbf16> to vector<2x64xbf16>
    %cst_44 = arith.constant dense<0.000000e+00> : vector<2x256xf32>
    %115 = tpu.matmul %114, %2, %cst_44 {dimension_numbers = #tpu.dot_dimension_numbers<[1], [0], [0], [1], [0, 0, 1, 1], [], []>} : vector<2x64xbf16>, vector<64x256xbf16>, vector<2x256xf32> -> vector<2x256xf32>
    %116 = vector.extract_strided_slice %1 {offsets = [0, 6, 0], sizes = [2, 1, 64], strides = [1, 1, 1]} : vector<2x16x64xbf16> to vector<2x1x64xbf16>
    %117 = vector.shape_cast %116 : vector<2x1x64xbf16> to vector<2x64xbf16>
    %cst_45 = arith.constant dense<0.000000e+00> : vector<2x256xf32>
    %118 = tpu.matmul %117, %3, %cst_45 {dimension_numbers = #tpu.dot_dimension_numbers<[1], [0], [0], [1], [0, 0, 1, 1], [], []>} : vector<2x64xbf16>, vector<64x256xbf16>, vector<2x256xf32> -> vector<2x256xf32>
    %119 = arith.addf %115, %118 : vector<2x256xf32>
    %120 = vector.broadcast %4 : vector<1x256xf32> to vector<2x256xf32>
    %121 = arith.addf %119, %120 : vector<2x256xf32>
    %c9 = arith.constant 9 : index
    %c0_46 = arith.constant 0 : index
    %c0_47 = arith.constant 0 : index
    %122 = vector.load %arg18[%c9, %c0_46, %c0_47] : memref<16x2x256xf32, #tpu.memory_space<vmem>>, vector<1x2x256xf32>
    %123 = vector.shape_cast %122 : vector<1x2x256xf32> to vector<2x256xf32>
    %124 = vector.shape_cast %121 : vector<2x256xf32> to vector<1x2x256xf32>
    tpu.vector_store %arg18[%c9, %c0_46, %c0_47], %124 {strides = array<i32>} : memref<16x2x256xf32, #tpu.memory_space<vmem>>, vector<1x2x256xf32>,
    %125 = vector.extract_strided_slice %1 {offsets = [0, 10, 0], sizes = [2, 1, 64], strides = [1, 1, 1]} : vector<2x16x64xbf16> to vector<2x1x64xbf16>
    %126 = vector.shape_cast %125 : vector<2x1x64xbf16> to vector<2x64xbf16>
    %cst_48 = arith.constant dense<0.000000e+00> : vector<2x256xf32>
    %127 = tpu.matmul %126, %2, %cst_48 {dimension_numbers = #tpu.dot_dimension_numbers<[1], [0], [0], [1], [0, 0, 1, 1], [], []>} : vector<2x64xbf16>, vector<64x256xbf16>, vector<2x256xf32> -> vector<2x256xf32>
    %128 = vector.extract_strided_slice %1 {offsets = [0, 5, 0], sizes = [2, 1, 64], strides = [1, 1, 1]} : vector<2x16x64xbf16> to vector<2x1x64xbf16>
    %129 = vector.shape_cast %128 : vector<2x1x64xbf16> to vector<2x64xbf16>
    %cst_49 = arith.constant dense<0.000000e+00> : vector<2x256xf32>
    %130 = tpu.matmul %129, %3, %cst_49 {dimension_numbers = #tpu.dot_dimension_numbers<[1], [0], [0], [1], [0, 0, 1, 1], [], []>} : vector<2x64xbf16>, vector<64x256xbf16>, vector<2x256xf32> -> vector<2x256xf32>
    %131 = arith.addf %127, %130 : vector<2x256xf32>
    %132 = vector.broadcast %4 : vector<1x256xf32> to vector<2x256xf32>
    %133 = arith.addf %131, %132 : vector<2x256xf32>
    %c10 = arith.constant 10 : index
    %c0_50 = arith.constant 0 : index
    %c0_51 = arith.constant 0 : index
    %134 = vector.load %arg18[%c10, %c0_50, %c0_51] : memref<16x2x256xf32, #tpu.memory_space<vmem>>, vector<1x2x256xf32>
    %135 = vector.shape_cast %134 : vector<1x2x256xf32> to vector<2x256xf32>
    %136 = vector.shape_cast %133 : vector<2x256xf32> to vector<1x2x256xf32>
    tpu.vector_store %arg18[%c10, %c0_50, %c0_51], %136 {strides = array<i32>} : memref<16x2x256xf32, #tpu.memory_space<vmem>>, vector<1x2x256xf32>,
    %137 = vector.extract_strided_slice %1 {offsets = [0, 11, 0], sizes = [2, 1, 64], strides = [1, 1, 1]} : vector<2x16x64xbf16> to vector<2x1x64xbf16>
    %138 = vector.shape_cast %137 : vector<2x1x64xbf16> to vector<2x64xbf16>
    %cst_52 = arith.constant dense<0.000000e+00> : vector<2x256xf32>
    %139 = tpu.matmul %138, %2, %cst_52 {dimension_numbers = #tpu.dot_dimension_numbers<[1], [0], [0], [1], [0, 0, 1, 1], [], []>} : vector<2x64xbf16>, vector<64x256xbf16>, vector<2x256xf32> -> vector<2x256xf32>
    %140 = vector.extract_strided_slice %1 {offsets = [0, 4, 0], sizes = [2, 1, 64], strides = [1, 1, 1]} : vector<2x16x64xbf16> to vector<2x1x64xbf16>
    %141 = vector.shape_cast %140 : vector<2x1x64xbf16> to vector<2x64xbf16>
    %cst_53 = arith.constant dense<0.000000e+00> : vector<2x256xf32>
    %142 = tpu.matmul %141, %3, %cst_53 {dimension_numbers = #tpu.dot_dimension_numbers<[1], [0], [0], [1], [0, 0, 1, 1], [], []>} : vector<2x64xbf16>, vector<64x256xbf16>, vector<2x256xf32> -> vector<2x256xf32>
    %143 = arith.addf %139, %142 : vector<2x256xf32>
    %144 = vector.broadcast %4 : vector<1x256xf32> to vector<2x256xf32>
    %145 = arith.addf %143, %144 : vector<2x256xf32>
    %c11 = arith.constant 11 : index
    %c0_54 = arith.constant 0 : index
    %c0_55 = arith.constant 0 : index
    %146 = vector.load %arg18[%c11, %c0_54, %c0_55] : memref<16x2x256xf32, #tpu.memory_space<vmem>>, vector<1x2x256xf32>
    %147 = vector.shape_cast %146 : vector<1x2x256xf32> to vector<2x256xf32>
    %148 = vector.shape_cast %145 : vector<2x256xf32> to vector<1x2x256xf32>
    tpu.vector_store %arg18[%c11, %c0_54, %c0_55], %148 {strides = array<i32>} : memref<16x2x256xf32, #tpu.memory_space<vmem>>, vector<1x2x256xf32>,
    %149 = vector.extract_strided_slice %1 {offsets = [0, 12, 0], sizes = [2, 1, 64], strides = [1, 1, 1]} : vector<2x16x64xbf16> to vector<2x1x64xbf16>
    %150 = vector.shape_cast %149 : vector<2x1x64xbf16> to vector<2x64xbf16>
    %cst_56 = arith.constant dense<0.000000e+00> : vector<2x256xf32>
    %151 = tpu.matmul %150, %2, %cst_56 {dimension_numbers = #tpu.dot_dimension_numbers<[1], [0], [0], [1], [0, 0, 1, 1], [], []>} : vector<2x64xbf16>, vector<64x256xbf16>, vector<2x256xf32> -> vector<2x256xf32>
    %152 = vector.extract_strided_slice %1 {offsets = [0, 3, 0], sizes = [2, 1, 64], strides = [1, 1, 1]} : vector<2x16x64xbf16> to vector<2x1x64xbf16>
    %153 = vector.shape_cast %152 : vector<2x1x64xbf16> to vector<2x64xbf16>
    %cst_57 = arith.constant dense<0.000000e+00> : vector<2x256xf32>
    %154 = tpu.matmul %153, %3, %cst_57 {dimension_numbers = #tpu.dot_dimension_numbers<[1], [0], [0], [1], [0, 0, 1, 1], [], []>} : vector<2x64xbf16>, vector<64x256xbf16>, vector<2x256xf32> -> vector<2x256xf32>
    %155 = arith.addf %151, %154 : vector<2x256xf32>
    %156 = vector.broadcast %4 : vector<1x256xf32> to vector<2x256xf32>
    %157 = arith.addf %155, %156 : vector<2x256xf32>
    %c12 = arith.constant 12 : index
    %c0_58 = arith.constant 0 : index
    %c0_59 = arith.constant 0 : index
    %158 = vector.load %arg18[%c12, %c0_58, %c0_59] : memref<16x2x256xf32, #tpu.memory_space<vmem>>, vector<1x2x256xf32>
    %159 = vector.shape_cast %158 : vector<1x2x256xf32> to vector<2x256xf32>
    %160 = vector.shape_cast %157 : vector<2x256xf32> to vector<1x2x256xf32>
    tpu.vector_store %arg18[%c12, %c0_58, %c0_59], %160 {strides = array<i32>} : memref<16x2x256xf32, #tpu.memory_space<vmem>>, vector<1x2x256xf32>,
    %161 = vector.extract_strided_slice %1 {offsets = [0, 13, 0], sizes = [2, 1, 64], strides = [1, 1, 1]} : vector<2x16x64xbf16> to vector<2x1x64xbf16>
    %162 = vector.shape_cast %161 : vector<2x1x64xbf16> to vector<2x64xbf16>
    %cst_60 = arith.constant dense<0.000000e+00> : vector<2x256xf32>
    %163 = tpu.matmul %162, %2, %cst_60 {dimension_numbers = #tpu.dot_dimension_numbers<[1], [0], [0], [1], [0, 0, 1, 1], [], []>} : vector<2x64xbf16>, vector<64x256xbf16>, vector<2x256xf32> -> vector<2x256xf32>
    %164 = vector.extract_strided_slice %1 {offsets = [0, 2, 0], sizes = [2, 1, 64], strides = [1, 1, 1]} : vector<2x16x64xbf16> to vector<2x1x64xbf16>
    %165 = vector.shape_cast %164 : vector<2x1x64xbf16> to vector<2x64xbf16>
    %cst_61 = arith.constant dense<0.000000e+00> : vector<2x256xf32>
    %166 = tpu.matmul %165, %3, %cst_61 {dimension_numbers = #tpu.dot_dimension_numbers<[1], [0], [0], [1], [0, 0, 1, 1], [], []>} : vector<2x64xbf16>, vector<64x256xbf16>, vector<2x256xf32> -> vector<2x256xf32>
    %167 = arith.addf %163, %166 : vector<2x256xf32>
    %168 = vector.broadcast %4 : vector<1x256xf32> to vector<2x256xf32>
    %169 = arith.addf %167, %168 : vector<2x256xf32>
    %c13 = arith.constant 13 : index
    %c0_62 = arith.constant 0 : index
    %c0_63 = arith.constant 0 : index
    %170 = vector.load %arg18[%c13, %c0_62, %c0_63] : memref<16x2x256xf32, #tpu.memory_space<vmem>>, vector<1x2x256xf32>
    %171 = vector.shape_cast %170 : vector<1x2x256xf32> to vector<2x256xf32>
    %172 = vector.shape_cast %169 : vector<2x256xf32> to vector<1x2x256xf32>
    tpu.vector_store %arg18[%c13, %c0_62, %c0_63], %172 {strides = array<i32>} : memref<16x2x256xf32, #tpu.memory_space<vmem>>, vector<1x2x256xf32>,
    %173 = vector.extract_strided_slice %1 {offsets = [0, 14, 0], sizes = [2, 1, 64], strides = [1, 1, 1]} : vector<2x16x64xbf16> to vector<2x1x64xbf16>
    %174 = vector.shape_cast %173 : vector<2x1x64xbf16> to vector<2x64xbf16>
    %cst_64 = arith.constant dense<0.000000e+00> : vector<2x256xf32>
    %175 = tpu.matmul %174, %2, %cst_64 {dimension_numbers = #tpu.dot_dimension_numbers<[1], [0], [0], [1], [0, 0, 1, 1], [], []>} : vector<2x64xbf16>, vector<64x256xbf16>, vector<2x256xf32> -> vector<2x256xf32>
    %176 = vector.extract_strided_slice %1 {offsets = [0, 1, 0], sizes = [2, 1, 64], strides = [1, 1, 1]} : vector<2x16x64xbf16> to vector<2x1x64xbf16>
    %177 = vector.shape_cast %176 : vector<2x1x64xbf16> to vector<2x64xbf16>
    %cst_65 = arith.constant dense<0.000000e+00> : vector<2x256xf32>
    %178 = tpu.matmul %177, %3, %cst_65 {dimension_numbers = #tpu.dot_dimension_numbers<[1], [0], [0], [1], [0, 0, 1, 1], [], []>} : vector<2x64xbf16>, vector<64x256xbf16>, vector<2x256xf32> -> vector<2x256xf32>
    %179 = arith.addf %175, %178 : vector<2x256xf32>
    %180 = vector.broadcast %4 : vector<1x256xf32> to vector<2x256xf32>
    %181 = arith.addf %179, %180 : vector<2x256xf32>
    %c14 = arith.constant 14 : index
    %c0_66 = arith.constant 0 : index
    %c0_67 = arith.constant 0 : index
    %182 = vector.load %arg18[%c14, %c0_66, %c0_67] : memref<16x2x256xf32, #tpu.memory_space<vmem>>, vector<1x2x256xf32>
    %183 = vector.shape_cast %182 : vector<1x2x256xf32> to vector<2x256xf32>
    %184 = vector.shape_cast %181 : vector<2x256xf32> to vector<1x2x256xf32>
    tpu.vector_store %arg18[%c14, %c0_66, %c0_67], %184 {strides = array<i32>} : memref<16x2x256xf32, #tpu.memory_space<vmem>>, vector<1x2x256xf32>,
    %185 = vector.extract_strided_slice %1 {offsets = [0, 15, 0], sizes = [2, 1, 64], strides = [1, 1, 1]} : vector<2x16x64xbf16> to vector<2x1x64xbf16>
    %186 = vector.shape_cast %185 : vector<2x1x64xbf16> to vector<2x64xbf16>
    %cst_68 = arith.constant dense<0.000000e+00> : vector<2x256xf32>
    %187 = tpu.matmul %186, %2, %cst_68 {dimension_numbers = #tpu.dot_dimension_numbers<[1], [0], [0], [1], [0, 0, 1, 1], [], []>} : vector<2x64xbf16>, vector<64x256xbf16>, vector<2x256xf32> -> vector<2x256xf32>
    %188 = vector.extract_strided_slice %1 {offsets = [0, 0, 0], sizes = [2, 1, 64], strides = [1, 1, 1]} : vector<2x16x64xbf16> to vector<2x1x64xbf16>
    %189 = vector.shape_cast %188 : vector<2x1x64xbf16> to vector<2x64xbf16>
    %cst_69 = arith.constant dense<0.000000e+00> : vector<2x256xf32>
    %190 = tpu.matmul %189, %3, %cst_69 {dimension_numbers = #tpu.dot_dimension_numbers<[1], [0], [0], [1], [0, 0, 1, 1], [], []>} : vector<2x64xbf16>, vector<64x256xbf16>, vector<2x256xf32> -> vector<2x256xf32>
    %191 = arith.addf %187, %190 : vector<2x256xf32>
    %192 = vector.broadcast %4 : vector<1x256xf32> to vector<2x256xf32>
    %193 = arith.addf %191, %192 : vector<2x256xf32>
    %c15 = arith.constant 15 : index
    %c0_70 = arith.constant 0 : index
    %c0_71 = arith.constant 0 : index
    %194 = vector.load %arg18[%c15, %c0_70, %c0_71] : memref<16x2x256xf32, #tpu.memory_space<vmem>>, vector<1x2x256xf32>
    %195 = vector.shape_cast %194 : vector<1x2x256xf32> to vector<2x256xf32>
    %196 = vector.shape_cast %193 : vector<2x256xf32> to vector<1x2x256xf32>
    tpu.vector_store %arg18[%c15, %c0_70, %c0_71], %196 {strides = array<i32>} : memref<16x2x256xf32, #tpu.memory_space<vmem>>, vector<1x2x256xf32>,
    %c0_72 = arith.constant 0 : index
    %c0_73 = arith.constant 0 : index
    %197 = vector.load %arg3[%c0_72, %c0_73] : memref<64x256xbf16, #tpu.memory_space<vmem>>, vector<64x256xbf16>
    %cst_74 = arith.constant 0.000000e+00 : f32
    %198 = vector.broadcast %cst_74 : f32 to vector<2x64xf32>
    %cst_75 = arith.constant 0.000000e+00 : f32
    %199 = vector.broadcast %cst_75 : f32 to vector<2x64xf32>
    %c0_76 = arith.constant 0 : index
    %c0_77 = arith.constant 0 : index
    %c0_78 = arith.constant 0 : index
    %200 = vector.load %arg18[%c0_76, %c0_77, %c0_78] : memref<16x2x256xf32, #tpu.memory_space<vmem>>, vector<1x2x256xf32>
    %201 = vector.shape_cast %200 : vector<1x2x256xf32> to vector<2x256xf32>
    %202 = arith.truncf %198 : vector<2x64xf32> to vector<2x64xbf16>
    %cst_79 = arith.constant dense<0.000000e+00> : vector<2x256xf32>
    %203 = tpu.matmul %202, %197, %cst_79 {dimension_numbers = #tpu.dot_dimension_numbers<[1], [0], [0], [1], [0, 0, 1, 1], [], []>} : vector<2x64xbf16>, vector<64x256xbf16>, vector<2x256xf32> -> vector<2x256xf32>
    %204 = arith.addf %201, %203 : vector<2x256xf32>
    %205 = arith.negf %204 : vector<2x256xf32>
    %206 = math.exp %205 : vector<2x256xf32>
    %cst_80 = arith.constant 1.000000e+00 : f32
    %207 = vector.broadcast %cst_80 : f32 to vector<2x256xf32>
    %208 = arith.addf %207, %206 : vector<2x256xf32>
    %209 = arith.divf %207, %208 : vector<2x256xf32>
    %210 = vector.extract_strided_slice %209 {offsets = [0, 0], sizes = [2, 64], strides = [1, 1]} : vector<2x256xf32> to vector<2x64xf32>
    %211 = vector.extract_strided_slice %209 {offsets = [0, 64], sizes = [2, 64], strides = [1, 1]} : vector<2x256xf32> to vector<2x64xf32>
    %212 = vector.extract_strided_slice %209 {offsets = [0, 192], sizes = [2, 64], strides = [1, 1]} : vector<2x256xf32> to vector<2x64xf32>
    %213 = vector.extract_strided_slice %204 {offsets = [0, 128], sizes = [2, 64], strides = [1, 1]} : vector<2x256xf32> to vector<2x64xf32>
    %214 = math.tanh %213 : vector<2x64xf32>
    %215 = arith.mulf %211, %199 : vector<2x64xf32>
    %216 = arith.mulf %210, %214 : vector<2x64xf32>
    %217 = arith.addf %215, %216 : vector<2x64xf32>
    %218 = math.tanh %217 : vector<2x64xf32>
    %219 = arith.mulf %212, %218 : vector<2x64xf32>
    %220 = vector.extract_strided_slice %219 {offsets = [0, 0], sizes = [2, 32], strides = [1, 1]} : vector<2x64xf32> to vector<2x32xf32>
    %c0_81 = arith.constant 0 : index
    %c0_82 = arith.constant 0 : index
    %c0_83 = arith.constant 0 : index
    %221 = vector.load %arg19[%c0_81, %c0_82, %c0_83] : memref<16x2x64xf32, #tpu.memory_space<vmem>>, vector<1x2x32xf32>
    %222 = vector.shape_cast %221 : vector<1x2x32xf32> to vector<2x32xf32>
    %223 = vector.shape_cast %220 : vector<2x32xf32> to vector<1x2x32xf32>
    tpu.vector_store %arg19[%c0_81, %c0_82, %c0_83], %223 {strides = array<i32>} : memref<16x2x64xf32, #tpu.memory_space<vmem>>, vector<1x2x32xf32>,
    %224 = vector.extract_strided_slice %219 {offsets = [0, 32], sizes = [2, 32], strides = [1, 1]} : vector<2x64xf32> to vector<2x32xf32>
    %c15_84 = arith.constant 15 : index
    %c0_85 = arith.constant 0 : index
    %c32 = arith.constant 32 : index
    %225 = vector.load %arg19[%c15_84, %c0_85, %c32] : memref<16x2x64xf32, #tpu.memory_space<vmem>>, vector<1x2x32xf32>
    %226 = vector.shape_cast %225 : vector<1x2x32xf32> to vector<2x32xf32>
    %227 = vector.shape_cast %224 : vector<2x32xf32> to vector<1x2x32xf32>
    tpu.vector_store %arg19[%c15_84, %c0_85, %c32], %227 {strides = array<i32>} : memref<16x2x64xf32, #tpu.memory_space<vmem>>, vector<1x2x32xf32>,
    %c1_86 = arith.constant 1 : index
    %c0_87 = arith.constant 0 : index
    %c0_88 = arith.constant 0 : index
    %228 = vector.load %arg18[%c1_86, %c0_87, %c0_88] : memref<16x2x256xf32, #tpu.memory_space<vmem>>, vector<1x2x256xf32>
    %229 = vector.shape_cast %228 : vector<1x2x256xf32> to vector<2x256xf32>
    %230 = arith.truncf %219 : vector<2x64xf32> to vector<2x64xbf16>
    %cst_89 = arith.constant dense<0.000000e+00> : vector<2x256xf32>
    %231 = tpu.matmul %230, %197, %cst_89 {dimension_numbers = #tpu.dot_dimension_numbers<[1], [0], [0], [1], [0, 0, 1, 1], [], []>} : vector<2x64xbf16>, vector<64x256xbf16>, vector<2x256xf32> -> vector<2x256xf32>
    %232 = arith.addf %229, %231 : vector<2x256xf32>
    %233 = arith.negf %232 : vector<2x256xf32>
    %234 = math.exp %233 : vector<2x256xf32>
    %cst_90 = arith.constant 1.000000e+00 : f32
    %235 = vector.broadcast %cst_90 : f32 to vector<2x256xf32>
    %236 = arith.addf %235, %234 : vector<2x256xf32>
    %237 = arith.divf %235, %236 : vector<2x256xf32>
    %238 = vector.extract_strided_slice %237 {offsets = [0, 0], sizes = [2, 64], strides = [1, 1]} : vector<2x256xf32> to vector<2x64xf32>
    %239 = vector.extract_strided_slice %237 {offsets = [0, 64], sizes = [2, 64], strides = [1, 1]} : vector<2x256xf32> to vector<2x64xf32>
    %240 = vector.extract_strided_slice %237 {offsets = [0, 192], sizes = [2, 64], strides = [1, 1]} : vector<2x256xf32> to vector<2x64xf32>
    %241 = vector.extract_strided_slice %232 {offsets = [0, 128], sizes = [2, 64], strides = [1, 1]} : vector<2x256xf32> to vector<2x64xf32>
    %242 = math.tanh %241 : vector<2x64xf32>
    %243 = arith.mulf %239, %217 : vector<2x64xf32>
    %244 = arith.mulf %238, %242 : vector<2x64xf32>
    %245 = arith.addf %243, %244 : vector<2x64xf32>
    %246 = math.tanh %245 : vector<2x64xf32>
    %247 = arith.mulf %240, %246 : vector<2x64xf32>
    %248 = vector.extract_strided_slice %247 {offsets = [0, 0], sizes = [2, 32], strides = [1, 1]} : vector<2x64xf32> to vector<2x32xf32>
    %c1_91 = arith.constant 1 : index
    %c0_92 = arith.constant 0 : index
    %c0_93 = arith.constant 0 : index
    %249 = vector.load %arg19[%c1_91, %c0_92, %c0_93] : memref<16x2x64xf32, #tpu.memory_space<vmem>>, vector<1x2x32xf32>
    %250 = vector.shape_cast %249 : vector<1x2x32xf32> to vector<2x32xf32>
    %251 = vector.shape_cast %248 : vector<2x32xf32> to vector<1x2x32xf32>
    tpu.vector_store %arg19[%c1_91, %c0_92, %c0_93], %251 {strides = array<i32>} : memref<16x2x64xf32, #tpu.memory_space<vmem>>, vector<1x2x32xf32>,
    %252 = vector.extract_strided_slice %247 {offsets = [0, 32], sizes = [2, 32], strides = [1, 1]} : vector<2x64xf32> to vector<2x32xf32>
    %c14_94 = arith.constant 14 : index
    %c0_95 = arith.constant 0 : index
    %c32_96 = arith.constant 32 : index
    %253 = vector.load %arg19[%c14_94, %c0_95, %c32_96] : memref<16x2x64xf32, #tpu.memory_space<vmem>>, vector<1x2x32xf32>
    %254 = vector.shape_cast %253 : vector<1x2x32xf32> to vector<2x32xf32>
    %255 = vector.shape_cast %252 : vector<2x32xf32> to vector<1x2x32xf32>
    tpu.vector_store %arg19[%c14_94, %c0_95, %c32_96], %255 {strides = array<i32>} : memref<16x2x64xf32, #tpu.memory_space<vmem>>, vector<1x2x32xf32>,
    %c2_97 = arith.constant 2 : index
    %c0_98 = arith.constant 0 : index
    %c0_99 = arith.constant 0 : index
    %256 = vector.load %arg18[%c2_97, %c0_98, %c0_99] : memref<16x2x256xf32, #tpu.memory_space<vmem>>, vector<1x2x256xf32>
    %257 = vector.shape_cast %256 : vector<1x2x256xf32> to vector<2x256xf32>
    %258 = arith.truncf %247 : vector<2x64xf32> to vector<2x64xbf16>
    %cst_100 = arith.constant dense<0.000000e+00> : vector<2x256xf32>
    %259 = tpu.matmul %258, %197, %cst_100 {dimension_numbers = #tpu.dot_dimension_numbers<[1], [0], [0], [1], [0, 0, 1, 1], [], []>} : vector<2x64xbf16>, vector<64x256xbf16>, vector<2x256xf32> -> vector<2x256xf32>
    %260 = arith.addf %257, %259 : vector<2x256xf32>
    %261 = arith.negf %260 : vector<2x256xf32>
    %262 = math.exp %261 : vector<2x256xf32>
    %cst_101 = arith.constant 1.000000e+00 : f32
    %263 = vector.broadcast %cst_101 : f32 to vector<2x256xf32>
    %264 = arith.addf %263, %262 : vector<2x256xf32>
    %265 = arith.divf %263, %264 : vector<2x256xf32>
    %266 = vector.extract_strided_slice %265 {offsets = [0, 0], sizes = [2, 64], strides = [1, 1]} : vector<2x256xf32> to vector<2x64xf32>
    %267 = vector.extract_strided_slice %265 {offsets = [0, 64], sizes = [2, 64], strides = [1, 1]} : vector<2x256xf32> to vector<2x64xf32>
    %268 = vector.extract_strided_slice %265 {offsets = [0, 192], sizes = [2, 64], strides = [1, 1]} : vector<2x256xf32> to vector<2x64xf32>
    %269 = vector.extract_strided_slice %260 {offsets = [0, 128], sizes = [2, 64], strides = [1, 1]} : vector<2x256xf32> to vector<2x64xf32>
    %270 = math.tanh %269 : vector<2x64xf32>
    %271 = arith.mulf %267, %245 : vector<2x64xf32>
    %272 = arith.mulf %266, %270 : vector<2x64xf32>
    %273 = arith.addf %271, %272 : vector<2x64xf32>
    %274 = math.tanh %273 : vector<2x64xf32>
    %275 = arith.mulf %268, %274 : vector<2x64xf32>
    %276 = vector.extract_strided_slice %275 {offsets = [0, 0], sizes = [2, 32], strides = [1, 1]} : vector<2x64xf32> to vector<2x32xf32>
    %c2_102 = arith.constant 2 : index
    %c0_103 = arith.constant 0 : index
    %c0_104 = arith.constant 0 : index
    %277 = vector.load %arg19[%c2_102, %c0_103, %c0_104] : memref<16x2x64xf32, #tpu.memory_space<vmem>>, vector<1x2x32xf32>
    %278 = vector.shape_cast %277 : vector<1x2x32xf32> to vector<2x32xf32>
    %279 = vector.shape_cast %276 : vector<2x32xf32> to vector<1x2x32xf32>
    tpu.vector_store %arg19[%c2_102, %c0_103, %c0_104], %279 {strides = array<i32>} : memref<16x2x64xf32, #tpu.memory_space<vmem>>, vector<1x2x32xf32>,
    %280 = vector.extract_strided_slice %275 {offsets = [0, 32], sizes = [2, 32], strides = [1, 1]} : vector<2x64xf32> to vector<2x32xf32>
    %c13_105 = arith.constant 13 : index
    %c0_106 = arith.constant 0 : index
    %c32_107 = arith.constant 32 : index
    %281 = vector.load %arg19[%c13_105, %c0_106, %c32_107] : memref<16x2x64xf32, #tpu.memory_space<vmem>>, vector<1x2x32xf32>
    %282 = vector.shape_cast %281 : vector<1x2x32xf32> to vector<2x32xf32>
    %283 = vector.shape_cast %280 : vector<2x32xf32> to vector<1x2x32xf32>
    tpu.vector_store %arg19[%c13_105, %c0_106, %c32_107], %283 {strides = array<i32>} : memref<16x2x64xf32, #tpu.memory_space<vmem>>, vector<1x2x32xf32>,
    %c3_108 = arith.constant 3 : index
    %c0_109 = arith.constant 0 : index
    %c0_110 = arith.constant 0 : index
    %284 = vector.load %arg18[%c3_108, %c0_109, %c0_110] : memref<16x2x256xf32, #tpu.memory_space<vmem>>, vector<1x2x256xf32>
    %285 = vector.shape_cast %284 : vector<1x2x256xf32> to vector<2x256xf32>
    %286 = arith.truncf %275 : vector<2x64xf32> to vector<2x64xbf16>
    %cst_111 = arith.constant dense<0.000000e+00> : vector<2x256xf32>
    %287 = tpu.matmul %286, %197, %cst_111 {dimension_numbers = #tpu.dot_dimension_numbers<[1], [0], [0], [1], [0, 0, 1, 1], [], []>} : vector<2x64xbf16>, vector<64x256xbf16>, vector<2x256xf32> -> vector<2x256xf32>
    %288 = arith.addf %285, %287 : vector<2x256xf32>
    %289 = arith.negf %288 : vector<2x256xf32>
    %290 = math.exp %289 : vector<2x256xf32>
    %cst_112 = arith.constant 1.000000e+00 : f32
    %291 = vector.broadcast %cst_112 : f32 to vector<2x256xf32>
    %292 = arith.addf %291, %290 : vector<2x256xf32>
    %293 = arith.divf %291, %292 : vector<2x256xf32>
    %294 = vector.extract_strided_slice %293 {offsets = [0, 0], sizes = [2, 64], strides = [1, 1]} : vector<2x256xf32> to vector<2x64xf32>
    %295 = vector.extract_strided_slice %293 {offsets = [0, 64], sizes = [2, 64], strides = [1, 1]} : vector<2x256xf32> to vector<2x64xf32>
    %296 = vector.extract_strided_slice %293 {offsets = [0, 192], sizes = [2, 64], strides = [1, 1]} : vector<2x256xf32> to vector<2x64xf32>
    %297 = vector.extract_strided_slice %288 {offsets = [0, 128], sizes = [2, 64], strides = [1, 1]} : vector<2x256xf32> to vector<2x64xf32>
    %298 = math.tanh %297 : vector<2x64xf32>
    %299 = arith.mulf %295, %273 : vector<2x64xf32>
    %300 = arith.mulf %294, %298 : vector<2x64xf32>
    %301 = arith.addf %299, %300 : vector<2x64xf32>
    %302 = math.tanh %301 : vector<2x64xf32>
    %303 = arith.mulf %296, %302 : vector<2x64xf32>
    %304 = vector.extract_strided_slice %303 {offsets = [0, 0], sizes = [2, 32], strides = [1, 1]} : vector<2x64xf32> to vector<2x32xf32>
    %c3_113 = arith.constant 3 : index
    %c0_114 = arith.constant 0 : index
    %c0_115 = arith.constant 0 : index
    %305 = vector.load %arg19[%c3_113, %c0_114, %c0_115] : memref<16x2x64xf32, #tpu.memory_space<vmem>>, vector<1x2x32xf32>
    %306 = vector.shape_cast %305 : vector<1x2x32xf32> to vector<2x32xf32>
    %307 = vector.shape_cast %304 : vector<2x32xf32> to vector<1x2x32xf32>
    tpu.vector_store %arg19[%c3_113, %c0_114, %c0_115], %307 {strides = array<i32>} : memref<16x2x64xf32, #tpu.memory_space<vmem>>, vector<1x2x32xf32>,
    %308 = vector.extract_strided_slice %303 {offsets = [0, 32], sizes = [2, 32], strides = [1, 1]} : vector<2x64xf32> to vector<2x32xf32>
    %c12_116 = arith.constant 12 : index
    %c0_117 = arith.constant 0 : index
    %c32_118 = arith.constant 32 : index
    %309 = vector.load %arg19[%c12_116, %c0_117, %c32_118] : memref<16x2x64xf32, #tpu.memory_space<vmem>>, vector<1x2x32xf32>
    %310 = vector.shape_cast %309 : vector<1x2x32xf32> to vector<2x32xf32>
    %311 = vector.shape_cast %308 : vector<2x32xf32> to vector<1x2x32xf32>
    tpu.vector_store %arg19[%c12_116, %c0_117, %c32_118], %311 {strides = array<i32>} : memref<16x2x64xf32, #tpu.memory_space<vmem>>, vector<1x2x32xf32>,
    %c4_119 = arith.constant 4 : index
    %c0_120 = arith.constant 0 : index
    %c0_121 = arith.constant 0 : index
    %312 = vector.load %arg18[%c4_119, %c0_120, %c0_121] : memref<16x2x256xf32, #tpu.memory_space<vmem>>, vector<1x2x256xf32>
    %313 = vector.shape_cast %312 : vector<1x2x256xf32> to vector<2x256xf32>
    %314 = arith.truncf %303 : vector<2x64xf32> to vector<2x64xbf16>
    %cst_122 = arith.constant dense<0.000000e+00> : vector<2x256xf32>
    %315 = tpu.matmul %314, %197, %cst_122 {dimension_numbers = #tpu.dot_dimension_numbers<[1], [0], [0], [1], [0, 0, 1, 1], [], []>} : vector<2x64xbf16>, vector<64x256xbf16>, vector<2x256xf32> -> vector<2x256xf32>
    %316 = arith.addf %313, %315 : vector<2x256xf32>
    %317 = arith.negf %316 : vector<2x256xf32>
    %318 = math.exp %317 : vector<2x256xf32>
    %cst_123 = arith.constant 1.000000e+00 : f32
    %319 = vector.broadcast %cst_123 : f32 to vector<2x256xf32>
    %320 = arith.addf %319, %318 : vector<2x256xf32>
    %321 = arith.divf %319, %320 : vector<2x256xf32>
    %322 = vector.extract_strided_slice %321 {offsets = [0, 0], sizes = [2, 64], strides = [1, 1]} : vector<2x256xf32> to vector<2x64xf32>
    %323 = vector.extract_strided_slice %321 {offsets = [0, 64], sizes = [2, 64], strides = [1, 1]} : vector<2x256xf32> to vector<2x64xf32>
    %324 = vector.extract_strided_slice %321 {offsets = [0, 192], sizes = [2, 64], strides = [1, 1]} : vector<2x256xf32> to vector<2x64xf32>
    %325 = vector.extract_strided_slice %316 {offsets = [0, 128], sizes = [2, 64], strides = [1, 1]} : vector<2x256xf32> to vector<2x64xf32>
    %326 = math.tanh %325 : vector<2x64xf32>
    %327 = arith.mulf %323, %301 : vector<2x64xf32>
    %328 = arith.mulf %322, %326 : vector<2x64xf32>
    %329 = arith.addf %327, %328 : vector<2x64xf32>
    %330 = math.tanh %329 : vector<2x64xf32>
    %331 = arith.mulf %324, %330 : vector<2x64xf32>
    %332 = vector.extract_strided_slice %331 {offsets = [0, 0], sizes = [2, 32], strides = [1, 1]} : vector<2x64xf32> to vector<2x32xf32>
    %c4_124 = arith.constant 4 : index
    %c0_125 = arith.constant 0 : index
    %c0_126 = arith.constant 0 : index
    %333 = vector.load %arg19[%c4_124, %c0_125, %c0_126] : memref<16x2x64xf32, #tpu.memory_space<vmem>>, vector<1x2x32xf32>
    %334 = vector.shape_cast %333 : vector<1x2x32xf32> to vector<2x32xf32>
    %335 = vector.shape_cast %332 : vector<2x32xf32> to vector<1x2x32xf32>
    tpu.vector_store %arg19[%c4_124, %c0_125, %c0_126], %335 {strides = array<i32>} : memref<16x2x64xf32, #tpu.memory_space<vmem>>, vector<1x2x32xf32>,
    %336 = vector.extract_strided_slice %331 {offsets = [0, 32], sizes = [2, 32], strides = [1, 1]} : vector<2x64xf32> to vector<2x32xf32>
    %c11_127 = arith.constant 11 : index
    %c0_128 = arith.constant 0 : index
    %c32_129 = arith.constant 32 : index
    %337 = vector.load %arg19[%c11_127, %c0_128, %c32_129] : memref<16x2x64xf32, #tpu.memory_space<vmem>>, vector<1x2x32xf32>
    %338 = vector.shape_cast %337 : vector<1x2x32xf32> to vector<2x32xf32>
    %339 = vector.shape_cast %336 : vector<2x32xf32> to vector<1x2x32xf32>
    tpu.vector_store %arg19[%c11_127, %c0_128, %c32_129], %339 {strides = array<i32>} : memref<16x2x64xf32, #tpu.memory_space<vmem>>, vector<1x2x32xf32>,
    %c5_130 = arith.constant 5 : index
    %c0_131 = arith.constant 0 : index
    %c0_132 = arith.constant 0 : index
    %340 = vector.load %arg18[%c5_130, %c0_131, %c0_132] : memref<16x2x256xf32, #tpu.memory_space<vmem>>, vector<1x2x256xf32>
    %341 = vector.shape_cast %340 : vector<1x2x256xf32> to vector<2x256xf32>
    %342 = arith.truncf %331 : vector<2x64xf32> to vector<2x64xbf16>
    %cst_133 = arith.constant dense<0.000000e+00> : vector<2x256xf32>
    %343 = tpu.matmul %342, %197, %cst_133 {dimension_numbers = #tpu.dot_dimension_numbers<[1], [0], [0], [1], [0, 0, 1, 1], [], []>} : vector<2x64xbf16>, vector<64x256xbf16>, vector<2x256xf32> -> vector<2x256xf32>
    %344 = arith.addf %341, %343 : vector<2x256xf32>
    %345 = arith.negf %344 : vector<2x256xf32>
    %346 = math.exp %345 : vector<2x256xf32>
    %cst_134 = arith.constant 1.000000e+00 : f32
    %347 = vector.broadcast %cst_134 : f32 to vector<2x256xf32>
    %348 = arith.addf %347, %346 : vector<2x256xf32>
    %349 = arith.divf %347, %348 : vector<2x256xf32>
    %350 = vector.extract_strided_slice %349 {offsets = [0, 0], sizes = [2, 64], strides = [1, 1]} : vector<2x256xf32> to vector<2x64xf32>
    %351 = vector.extract_strided_slice %349 {offsets = [0, 64], sizes = [2, 64], strides = [1, 1]} : vector<2x256xf32> to vector<2x64xf32>
    %352 = vector.extract_strided_slice %349 {offsets = [0, 192], sizes = [2, 64], strides = [1, 1]} : vector<2x256xf32> to vector<2x64xf32>
    %353 = vector.extract_strided_slice %344 {offsets = [0, 128], sizes = [2, 64], strides = [1, 1]} : vector<2x256xf32> to vector<2x64xf32>
    %354 = math.tanh %353 : vector<2x64xf32>
    %355 = arith.mulf %351, %329 : vector<2x64xf32>
    %356 = arith.mulf %350, %354 : vector<2x64xf32>
    %357 = arith.addf %355, %356 : vector<2x64xf32>
    %358 = math.tanh %357 : vector<2x64xf32>
    %359 = arith.mulf %352, %358 : vector<2x64xf32>
    %360 = vector.extract_strided_slice %359 {offsets = [0, 0], sizes = [2, 32], strides = [1, 1]} : vector<2x64xf32> to vector<2x32xf32>
    %c5_135 = arith.constant 5 : index
    %c0_136 = arith.constant 0 : index
    %c0_137 = arith.constant 0 : index
    %361 = vector.load %arg19[%c5_135, %c0_136, %c0_137] : memref<16x2x64xf32, #tpu.memory_space<vmem>>, vector<1x2x32xf32>
    %362 = vector.shape_cast %361 : vector<1x2x32xf32> to vector<2x32xf32>
    %363 = vector.shape_cast %360 : vector<2x32xf32> to vector<1x2x32xf32>
    tpu.vector_store %arg19[%c5_135, %c0_136, %c0_137], %363 {strides = array<i32>} : memref<16x2x64xf32, #tpu.memory_space<vmem>>, vector<1x2x32xf32>,
    %364 = vector.extract_strided_slice %359 {offsets = [0, 32], sizes = [2, 32], strides = [1, 1]} : vector<2x64xf32> to vector<2x32xf32>
    %c10_138 = arith.constant 10 : index
    %c0_139 = arith.constant 0 : index
    %c32_140 = arith.constant 32 : index
    %365 = vector.load %arg19[%c10_138, %c0_139, %c32_140] : memref<16x2x64xf32, #tpu.memory_space<vmem>>, vector<1x2x32xf32>
    %366 = vector.shape_cast %365 : vector<1x2x32xf32> to vector<2x32xf32>
    %367 = vector.shape_cast %364 : vector<2x32xf32> to vector<1x2x32xf32>
    tpu.vector_store %arg19[%c10_138, %c0_139, %c32_140], %367 {strides = array<i32>} : memref<16x2x64xf32, #tpu.memory_space<vmem>>, vector<1x2x32xf32>,
    %c6_141 = arith.constant 6 : index
    %c0_142 = arith.constant 0 : index
    %c0_143 = arith.constant 0 : index
    %368 = vector.load %arg18[%c6_141, %c0_142, %c0_143] : memref<16x2x256xf32, #tpu.memory_space<vmem>>, vector<1x2x256xf32>
    %369 = vector.shape_cast %368 : vector<1x2x256xf32> to vector<2x256xf32>
    %370 = arith.truncf %359 : vector<2x64xf32> to vector<2x64xbf16>
    %cst_144 = arith.constant dense<0.000000e+00> : vector<2x256xf32>
    %371 = tpu.matmul %370, %197, %cst_144 {dimension_numbers = #tpu.dot_dimension_numbers<[1], [0], [0], [1], [0, 0, 1, 1], [], []>} : vector<2x64xbf16>, vector<64x256xbf16>, vector<2x256xf32> -> vector<2x256xf32>
    %372 = arith.addf %369, %371 : vector<2x256xf32>
    %373 = arith.negf %372 : vector<2x256xf32>
    %374 = math.exp %373 : vector<2x256xf32>
    %cst_145 = arith.constant 1.000000e+00 : f32
    %375 = vector.broadcast %cst_145 : f32 to vector<2x256xf32>
    %376 = arith.addf %375, %374 : vector<2x256xf32>
    %377 = arith.divf %375, %376 : vector<2x256xf32>
    %378 = vector.extract_strided_slice %377 {offsets = [0, 0], sizes = [2, 64], strides = [1, 1]} : vector<2x256xf32> to vector<2x64xf32>
    %379 = vector.extract_strided_slice %377 {offsets = [0, 64], sizes = [2, 64], strides = [1, 1]} : vector<2x256xf32> to vector<2x64xf32>
    %380 = vector.extract_strided_slice %377 {offsets = [0, 192], sizes = [2, 64], strides = [1, 1]} : vector<2x256xf32> to vector<2x64xf32>
    %381 = vector.extract_strided_slice %372 {offsets = [0, 128], sizes = [2, 64], strides = [1, 1]} : vector<2x256xf32> to vector<2x64xf32>
    %382 = math.tanh %381 : vector<2x64xf32>
    %383 = arith.mulf %379, %357 : vector<2x64xf32>
    %384 = arith.mulf %378, %382 : vector<2x64xf32>
    %385 = arith.addf %383, %384 : vector<2x64xf32>
    %386 = math.tanh %385 : vector<2x64xf32>
    %387 = arith.mulf %380, %386 : vector<2x64xf32>
    %388 = vector.extract_strided_slice %387 {offsets = [0, 0], sizes = [2, 32], strides = [1, 1]} : vector<2x64xf32> to vector<2x32xf32>
    %c6_146 = arith.constant 6 : index
    %c0_147 = arith.constant 0 : index
    %c0_148 = arith.constant 0 : index
    %389 = vector.load %arg19[%c6_146, %c0_147, %c0_148] : memref<16x2x64xf32, #tpu.memory_space<vmem>>, vector<1x2x32xf32>
    %390 = vector.shape_cast %389 : vector<1x2x32xf32> to vector<2x32xf32>
    %391 = vector.shape_cast %388 : vector<2x32xf32> to vector<1x2x32xf32>
    tpu.vector_store %arg19[%c6_146, %c0_147, %c0_148], %391 {strides = array<i32>} : memref<16x2x64xf32, #tpu.memory_space<vmem>>, vector<1x2x32xf32>,
    %392 = vector.extract_strided_slice %387 {offsets = [0, 32], sizes = [2, 32], strides = [1, 1]} : vector<2x64xf32> to vector<2x32xf32>
    %c9_149 = arith.constant 9 : index
    %c0_150 = arith.constant 0 : index
    %c32_151 = arith.constant 32 : index
    %393 = vector.load %arg19[%c9_149, %c0_150, %c32_151] : memref<16x2x64xf32, #tpu.memory_space<vmem>>, vector<1x2x32xf32>
    %394 = vector.shape_cast %393 : vector<1x2x32xf32> to vector<2x32xf32>
    %395 = vector.shape_cast %392 : vector<2x32xf32> to vector<1x2x32xf32>
    tpu.vector_store %arg19[%c9_149, %c0_150, %c32_151], %395 {strides = array<i32>} : memref<16x2x64xf32, #tpu.memory_space<vmem>>, vector<1x2x32xf32>,
    %c7_152 = arith.constant 7 : index
    %c0_153 = arith.constant 0 : index
    %c0_154 = arith.constant 0 : index
    %396 = vector.load %arg18[%c7_152, %c0_153, %c0_154] : memref<16x2x256xf32, #tpu.memory_space<vmem>>, vector<1x2x256xf32>
    %397 = vector.shape_cast %396 : vector<1x2x256xf32> to vector<2x256xf32>
    %398 = arith.truncf %387 : vector<2x64xf32> to vector<2x64xbf16>
    %cst_155 = arith.constant dense<0.000000e+00> : vector<2x256xf32>
    %399 = tpu.matmul %398, %197, %cst_155 {dimension_numbers = #tpu.dot_dimension_numbers<[1], [0], [0], [1], [0, 0, 1, 1], [], []>} : vector<2x64xbf16>, vector<64x256xbf16>, vector<2x256xf32> -> vector<2x256xf32>
    %400 = arith.addf %397, %399 : vector<2x256xf32>
    %401 = arith.negf %400 : vector<2x256xf32>
    %402 = math.exp %401 : vector<2x256xf32>
    %cst_156 = arith.constant 1.000000e+00 : f32
    %403 = vector.broadcast %cst_156 : f32 to vector<2x256xf32>
    %404 = arith.addf %403, %402 : vector<2x256xf32>
    %405 = arith.divf %403, %404 : vector<2x256xf32>
    %406 = vector.extract_strided_slice %405 {offsets = [0, 0], sizes = [2, 64], strides = [1, 1]} : vector<2x256xf32> to vector<2x64xf32>
    %407 = vector.extract_strided_slice %405 {offsets = [0, 64], sizes = [2, 64], strides = [1, 1]} : vector<2x256xf32> to vector<2x64xf32>
    %408 = vector.extract_strided_slice %405 {offsets = [0, 192], sizes = [2, 64], strides = [1, 1]} : vector<2x256xf32> to vector<2x64xf32>
    %409 = vector.extract_strided_slice %400 {offsets = [0, 128], sizes = [2, 64], strides = [1, 1]} : vector<2x256xf32> to vector<2x64xf32>
    %410 = math.tanh %409 : vector<2x64xf32>
    %411 = arith.mulf %407, %385 : vector<2x64xf32>
    %412 = arith.mulf %406, %410 : vector<2x64xf32>
    %413 = arith.addf %411, %412 : vector<2x64xf32>
    %414 = math.tanh %413 : vector<2x64xf32>
    %415 = arith.mulf %408, %414 : vector<2x64xf32>
    %416 = vector.extract_strided_slice %415 {offsets = [0, 0], sizes = [2, 32], strides = [1, 1]} : vector<2x64xf32> to vector<2x32xf32>
    %c7_157 = arith.constant 7 : index
    %c0_158 = arith.constant 0 : index
    %c0_159 = arith.constant 0 : index
    %417 = vector.load %arg19[%c7_157, %c0_158, %c0_159] : memref<16x2x64xf32, #tpu.memory_space<vmem>>, vector<1x2x32xf32>
    %418 = vector.shape_cast %417 : vector<1x2x32xf32> to vector<2x32xf32>
    %419 = vector.shape_cast %416 : vector<2x32xf32> to vector<1x2x32xf32>
    tpu.vector_store %arg19[%c7_157, %c0_158, %c0_159], %419 {strides = array<i32>} : memref<16x2x64xf32, #tpu.memory_space<vmem>>, vector<1x2x32xf32>,
    %420 = vector.extract_strided_slice %415 {offsets = [0, 32], sizes = [2, 32], strides = [1, 1]} : vector<2x64xf32> to vector<2x32xf32>
    %c8_160 = arith.constant 8 : index
    %c0_161 = arith.constant 0 : index
    %c32_162 = arith.constant 32 : index
    %421 = vector.load %arg19[%c8_160, %c0_161, %c32_162] : memref<16x2x64xf32, #tpu.memory_space<vmem>>, vector<1x2x32xf32>
    %422 = vector.shape_cast %421 : vector<1x2x32xf32> to vector<2x32xf32>
    %423 = vector.shape_cast %420 : vector<2x32xf32> to vector<1x2x32xf32>
    tpu.vector_store %arg19[%c8_160, %c0_161, %c32_162], %423 {strides = array<i32>} : memref<16x2x64xf32, #tpu.memory_space<vmem>>, vector<1x2x32xf32>,
    %c8_163 = arith.constant 8 : index
    %c0_164 = arith.constant 0 : index
    %c0_165 = arith.constant 0 : index
    %424 = vector.load %arg18[%c8_163, %c0_164, %c0_165] : memref<16x2x256xf32, #tpu.memory_space<vmem>>, vector<1x2x256xf32>
    %425 = vector.shape_cast %424 : vector<1x2x256xf32> to vector<2x256xf32>
    %426 = arith.truncf %415 : vector<2x64xf32> to vector<2x64xbf16>
    %cst_166 = arith.constant dense<0.000000e+00> : vector<2x256xf32>
    %427 = tpu.matmul %426, %197, %cst_166 {dimension_numbers = #tpu.dot_dimension_numbers<[1], [0], [0], [1], [0, 0, 1, 1], [], []>} : vector<2x64xbf16>, vector<64x256xbf16>, vector<2x256xf32> -> vector<2x256xf32>
    %428 = arith.addf %425, %427 : vector<2x256xf32>
    %429 = arith.negf %428 : vector<2x256xf32>
    %430 = math.exp %429 : vector<2x256xf32>
    %cst_167 = arith.constant 1.000000e+00 : f32
    %431 = vector.broadcast %cst_167 : f32 to vector<2x256xf32>
    %432 = arith.addf %431, %430 : vector<2x256xf32>
    %433 = arith.divf %431, %432 : vector<2x256xf32>
    %434 = vector.extract_strided_slice %433 {offsets = [0, 0], sizes = [2, 64], strides = [1, 1]} : vector<2x256xf32> to vector<2x64xf32>
    %435 = vector.extract_strided_slice %433 {offsets = [0, 64], sizes = [2, 64], strides = [1, 1]} : vector<2x256xf32> to vector<2x64xf32>
    %436 = vector.extract_strided_slice %433 {offsets = [0, 192], sizes = [2, 64], strides = [1, 1]} : vector<2x256xf32> to vector<2x64xf32>
    %437 = vector.extract_strided_slice %428 {offsets = [0, 128], sizes = [2, 64], strides = [1, 1]} : vector<2x256xf32> to vector<2x64xf32>
    %438 = math.tanh %437 : vector<2x64xf32>
    %439 = arith.mulf %435, %413 : vector<2x64xf32>
    %440 = arith.mulf %434, %438 : vector<2x64xf32>
    %441 = arith.addf %439, %440 : vector<2x64xf32>
    %442 = math.tanh %441 : vector<2x64xf32>
    %443 = arith.mulf %436, %442 : vector<2x64xf32>
    %444 = vector.extract_strided_slice %443 {offsets = [0, 0], sizes = [2, 32], strides = [1, 1]} : vector<2x64xf32> to vector<2x32xf32>
    %c8_168 = arith.constant 8 : index
    %c0_169 = arith.constant 0 : index
    %c0_170 = arith.constant 0 : index
    %445 = vector.load %arg19[%c8_168, %c0_169, %c0_170] : memref<16x2x64xf32, #tpu.memory_space<vmem>>, vector<1x2x32xf32>
    %446 = vector.shape_cast %445 : vector<1x2x32xf32> to vector<2x32xf32>
    %447 = vector.shape_cast %444 : vector<2x32xf32> to vector<1x2x32xf32>
    tpu.vector_store %arg19[%c8_168, %c0_169, %c0_170], %447 {strides = array<i32>} : memref<16x2x64xf32, #tpu.memory_space<vmem>>, vector<1x2x32xf32>,
    %448 = vector.extract_strided_slice %443 {offsets = [0, 32], sizes = [2, 32], strides = [1, 1]} : vector<2x64xf32> to vector<2x32xf32>
    %c7_171 = arith.constant 7 : index
    %c0_172 = arith.constant 0 : index
    %c32_173 = arith.constant 32 : index
    %449 = vector.load %arg19[%c7_171, %c0_172, %c32_173] : memref<16x2x64xf32, #tpu.memory_space<vmem>>, vector<1x2x32xf32>
    %450 = vector.shape_cast %449 : vector<1x2x32xf32> to vector<2x32xf32>
    %451 = vector.shape_cast %448 : vector<2x32xf32> to vector<1x2x32xf32>
    tpu.vector_store %arg19[%c7_171, %c0_172, %c32_173], %451 {strides = array<i32>} : memref<16x2x64xf32, #tpu.memory_space<vmem>>, vector<1x2x32xf32>,
    %c9_174 = arith.constant 9 : index
    %c0_175 = arith.constant 0 : index
    %c0_176 = arith.constant 0 : index
    %452 = vector.load %arg18[%c9_174, %c0_175, %c0_176] : memref<16x2x256xf32, #tpu.memory_space<vmem>>, vector<1x2x256xf32>
    %453 = vector.shape_cast %452 : vector<1x2x256xf32> to vector<2x256xf32>
    %454 = arith.truncf %443 : vector<2x64xf32> to vector<2x64xbf16>
    %cst_177 = arith.constant dense<0.000000e+00> : vector<2x256xf32>
    %455 = tpu.matmul %454, %197, %cst_177 {dimension_numbers = #tpu.dot_dimension_numbers<[1], [0], [0], [1], [0, 0, 1, 1], [], []>} : vector<2x64xbf16>, vector<64x256xbf16>, vector<2x256xf32> -> vector<2x256xf32>
    %456 = arith.addf %453, %455 : vector<2x256xf32>
    %457 = arith.negf %456 : vector<2x256xf32>
    %458 = math.exp %457 : vector<2x256xf32>
    %cst_178 = arith.constant 1.000000e+00 : f32
    %459 = vector.broadcast %cst_178 : f32 to vector<2x256xf32>
    %460 = arith.addf %459, %458 : vector<2x256xf32>
    %461 = arith.divf %459, %460 : vector<2x256xf32>
    %462 = vector.extract_strided_slice %461 {offsets = [0, 0], sizes = [2, 64], strides = [1, 1]} : vector<2x256xf32> to vector<2x64xf32>
    %463 = vector.extract_strided_slice %461 {offsets = [0, 64], sizes = [2, 64], strides = [1, 1]} : vector<2x256xf32> to vector<2x64xf32>
    %464 = vector.extract_strided_slice %461 {offsets = [0, 192], sizes = [2, 64], strides = [1, 1]} : vector<2x256xf32> to vector<2x64xf32>
    %465 = vector.extract_strided_slice %456 {offsets = [0, 128], sizes = [2, 64], strides = [1, 1]} : vector<2x256xf32> to vector<2x64xf32>
    %466 = math.tanh %465 : vector<2x64xf32>
    %467 = arith.mulf %463, %441 : vector<2x64xf32>
    %468 = arith.mulf %462, %466 : vector<2x64xf32>
    %469 = arith.addf %467, %468 : vector<2x64xf32>
    %470 = math.tanh %469 : vector<2x64xf32>
    %471 = arith.mulf %464, %470 : vector<2x64xf32>
    %472 = vector.extract_strided_slice %471 {offsets = [0, 0], sizes = [2, 32], strides = [1, 1]} : vector<2x64xf32> to vector<2x32xf32>
    %c9_179 = arith.constant 9 : index
    %c0_180 = arith.constant 0 : index
    %c0_181 = arith.constant 0 : index
    %473 = vector.load %arg19[%c9_179, %c0_180, %c0_181] : memref<16x2x64xf32, #tpu.memory_space<vmem>>, vector<1x2x32xf32>
    %474 = vector.shape_cast %473 : vector<1x2x32xf32> to vector<2x32xf32>
    %475 = vector.shape_cast %472 : vector<2x32xf32> to vector<1x2x32xf32>
    tpu.vector_store %arg19[%c9_179, %c0_180, %c0_181], %475 {strides = array<i32>} : memref<16x2x64xf32, #tpu.memory_space<vmem>>, vector<1x2x32xf32>,
    %476 = vector.extract_strided_slice %471 {offsets = [0, 32], sizes = [2, 32], strides = [1, 1]} : vector<2x64xf32> to vector<2x32xf32>
    %c6_182 = arith.constant 6 : index
    %c0_183 = arith.constant 0 : index
    %c32_184 = arith.constant 32 : index
    %477 = vector.load %arg19[%c6_182, %c0_183, %c32_184] : memref<16x2x64xf32, #tpu.memory_space<vmem>>, vector<1x2x32xf32>
    %478 = vector.shape_cast %477 : vector<1x2x32xf32> to vector<2x32xf32>
    %479 = vector.shape_cast %476 : vector<2x32xf32> to vector<1x2x32xf32>
    tpu.vector_store %arg19[%c6_182, %c0_183, %c32_184], %479 {strides = array<i32>} : memref<16x2x64xf32, #tpu.memory_space<vmem>>, vector<1x2x32xf32>,
    %c10_185 = arith.constant 10 : index
    %c0_186 = arith.constant 0 : index
    %c0_187 = arith.constant 0 : index
    %480 = vector.load %arg18[%c10_185, %c0_186, %c0_187] : memref<16x2x256xf32, #tpu.memory_space<vmem>>, vector<1x2x256xf32>
    %481 = vector.shape_cast %480 : vector<1x2x256xf32> to vector<2x256xf32>
    %482 = arith.truncf %471 : vector<2x64xf32> to vector<2x64xbf16>
    %cst_188 = arith.constant dense<0.000000e+00> : vector<2x256xf32>
    %483 = tpu.matmul %482, %197, %cst_188 {dimension_numbers = #tpu.dot_dimension_numbers<[1], [0], [0], [1], [0, 0, 1, 1], [], []>} : vector<2x64xbf16>, vector<64x256xbf16>, vector<2x256xf32> -> vector<2x256xf32>
    %484 = arith.addf %481, %483 : vector<2x256xf32>
    %485 = arith.negf %484 : vector<2x256xf32>
    %486 = math.exp %485 : vector<2x256xf32>
    %cst_189 = arith.constant 1.000000e+00 : f32
    %487 = vector.broadcast %cst_189 : f32 to vector<2x256xf32>
    %488 = arith.addf %487, %486 : vector<2x256xf32>
    %489 = arith.divf %487, %488 : vector<2x256xf32>
    %490 = vector.extract_strided_slice %489 {offsets = [0, 0], sizes = [2, 64], strides = [1, 1]} : vector<2x256xf32> to vector<2x64xf32>
    %491 = vector.extract_strided_slice %489 {offsets = [0, 64], sizes = [2, 64], strides = [1, 1]} : vector<2x256xf32> to vector<2x64xf32>
    %492 = vector.extract_strided_slice %489 {offsets = [0, 192], sizes = [2, 64], strides = [1, 1]} : vector<2x256xf32> to vector<2x64xf32>
    %493 = vector.extract_strided_slice %484 {offsets = [0, 128], sizes = [2, 64], strides = [1, 1]} : vector<2x256xf32> to vector<2x64xf32>
    %494 = math.tanh %493 : vector<2x64xf32>
    %495 = arith.mulf %491, %469 : vector<2x64xf32>
    %496 = arith.mulf %490, %494 : vector<2x64xf32>
    %497 = arith.addf %495, %496 : vector<2x64xf32>
    %498 = math.tanh %497 : vector<2x64xf32>
    %499 = arith.mulf %492, %498 : vector<2x64xf32>
    %500 = vector.extract_strided_slice %499 {offsets = [0, 0], sizes = [2, 32], strides = [1, 1]} : vector<2x64xf32> to vector<2x32xf32>
    %c10_190 = arith.constant 10 : index
    %c0_191 = arith.constant 0 : index
    %c0_192 = arith.constant 0 : index
    %501 = vector.load %arg19[%c10_190, %c0_191, %c0_192] : memref<16x2x64xf32, #tpu.memory_space<vmem>>, vector<1x2x32xf32>
    %502 = vector.shape_cast %501 : vector<1x2x32xf32> to vector<2x32xf32>
    %503 = vector.shape_cast %500 : vector<2x32xf32> to vector<1x2x32xf32>
    tpu.vector_store %arg19[%c10_190, %c0_191, %c0_192], %503 {strides = array<i32>} : memref<16x2x64xf32, #tpu.memory_space<vmem>>, vector<1x2x32xf32>,
    %504 = vector.extract_strided_slice %499 {offsets = [0, 32], sizes = [2, 32], strides = [1, 1]} : vector<2x64xf32> to vector<2x32xf32>
    %c5_193 = arith.constant 5 : index
    %c0_194 = arith.constant 0 : index
    %c32_195 = arith.constant 32 : index
    %505 = vector.load %arg19[%c5_193, %c0_194, %c32_195] : memref<16x2x64xf32, #tpu.memory_space<vmem>>, vector<1x2x32xf32>
    %506 = vector.shape_cast %505 : vector<1x2x32xf32> to vector<2x32xf32>
    %507 = vector.shape_cast %504 : vector<2x32xf32> to vector<1x2x32xf32>
    tpu.vector_store %arg19[%c5_193, %c0_194, %c32_195], %507 {strides = array<i32>} : memref<16x2x64xf32, #tpu.memory_space<vmem>>, vector<1x2x32xf32>,
    %c11_196 = arith.constant 11 : index
    %c0_197 = arith.constant 0 : index
    %c0_198 = arith.constant 0 : index
    %508 = vector.load %arg18[%c11_196, %c0_197, %c0_198] : memref<16x2x256xf32, #tpu.memory_space<vmem>>, vector<1x2x256xf32>
    %509 = vector.shape_cast %508 : vector<1x2x256xf32> to vector<2x256xf32>
    %510 = arith.truncf %499 : vector<2x64xf32> to vector<2x64xbf16>
    %cst_199 = arith.constant dense<0.000000e+00> : vector<2x256xf32>
    %511 = tpu.matmul %510, %197, %cst_199 {dimension_numbers = #tpu.dot_dimension_numbers<[1], [0], [0], [1], [0, 0, 1, 1], [], []>} : vector<2x64xbf16>, vector<64x256xbf16>, vector<2x256xf32> -> vector<2x256xf32>
    %512 = arith.addf %509, %511 : vector<2x256xf32>
    %513 = arith.negf %512 : vector<2x256xf32>
    %514 = math.exp %513 : vector<2x256xf32>
    %cst_200 = arith.constant 1.000000e+00 : f32
    %515 = vector.broadcast %cst_200 : f32 to vector<2x256xf32>
    %516 = arith.addf %515, %514 : vector<2x256xf32>
    %517 = arith.divf %515, %516 : vector<2x256xf32>
    %518 = vector.extract_strided_slice %517 {offsets = [0, 0], sizes = [2, 64], strides = [1, 1]} : vector<2x256xf32> to vector<2x64xf32>
    %519 = vector.extract_strided_slice %517 {offsets = [0, 64], sizes = [2, 64], strides = [1, 1]} : vector<2x256xf32> to vector<2x64xf32>
    %520 = vector.extract_strided_slice %517 {offsets = [0, 192], sizes = [2, 64], strides = [1, 1]} : vector<2x256xf32> to vector<2x64xf32>
    %521 = vector.extract_strided_slice %512 {offsets = [0, 128], sizes = [2, 64], strides = [1, 1]} : vector<2x256xf32> to vector<2x64xf32>
    %522 = math.tanh %521 : vector<2x64xf32>
    %523 = arith.mulf %519, %497 : vector<2x64xf32>
    %524 = arith.mulf %518, %522 : vector<2x64xf32>
    %525 = arith.addf %523, %524 : vector<2x64xf32>
    %526 = math.tanh %525 : vector<2x64xf32>
    %527 = arith.mulf %520, %526 : vector<2x64xf32>
    %528 = vector.extract_strided_slice %527 {offsets = [0, 0], sizes = [2, 32], strides = [1, 1]} : vector<2x64xf32> to vector<2x32xf32>
    %c11_201 = arith.constant 11 : index
    %c0_202 = arith.constant 0 : index
    %c0_203 = arith.constant 0 : index
    %529 = vector.load %arg19[%c11_201, %c0_202, %c0_203] : memref<16x2x64xf32, #tpu.memory_space<vmem>>, vector<1x2x32xf32>
    %530 = vector.shape_cast %529 : vector<1x2x32xf32> to vector<2x32xf32>
    %531 = vector.shape_cast %528 : vector<2x32xf32> to vector<1x2x32xf32>
    tpu.vector_store %arg19[%c11_201, %c0_202, %c0_203], %531 {strides = array<i32>} : memref<16x2x64xf32, #tpu.memory_space<vmem>>, vector<1x2x32xf32>,
    %532 = vector.extract_strided_slice %527 {offsets = [0, 32], sizes = [2, 32], strides = [1, 1]} : vector<2x64xf32> to vector<2x32xf32>
    %c4_204 = arith.constant 4 : index
    %c0_205 = arith.constant 0 : index
    %c32_206 = arith.constant 32 : index
    %533 = vector.load %arg19[%c4_204, %c0_205, %c32_206] : memref<16x2x64xf32, #tpu.memory_space<vmem>>, vector<1x2x32xf32>
    %534 = vector.shape_cast %533 : vector<1x2x32xf32> to vector<2x32xf32>
    %535 = vector.shape_cast %532 : vector<2x32xf32> to vector<1x2x32xf32>
    tpu.vector_store %arg19[%c4_204, %c0_205, %c32_206], %535 {strides = array<i32>} : memref<16x2x64xf32, #tpu.memory_space<vmem>>, vector<1x2x32xf32>,
    %c12_207 = arith.constant 12 : index
    %c0_208 = arith.constant 0 : index
    %c0_209 = arith.constant 0 : index
    %536 = vector.load %arg18[%c12_207, %c0_208, %c0_209] : memref<16x2x256xf32, #tpu.memory_space<vmem>>, vector<1x2x256xf32>
    %537 = vector.shape_cast %536 : vector<1x2x256xf32> to vector<2x256xf32>
    %538 = arith.truncf %527 : vector<2x64xf32> to vector<2x64xbf16>
    %cst_210 = arith.constant dense<0.000000e+00> : vector<2x256xf32>
    %539 = tpu.matmul %538, %197, %cst_210 {dimension_numbers = #tpu.dot_dimension_numbers<[1], [0], [0], [1], [0, 0, 1, 1], [], []>} : vector<2x64xbf16>, vector<64x256xbf16>, vector<2x256xf32> -> vector<2x256xf32>
    %540 = arith.addf %537, %539 : vector<2x256xf32>
    %541 = arith.negf %540 : vector<2x256xf32>
    %542 = math.exp %541 : vector<2x256xf32>
    %cst_211 = arith.constant 1.000000e+00 : f32
    %543 = vector.broadcast %cst_211 : f32 to vector<2x256xf32>
    %544 = arith.addf %543, %542 : vector<2x256xf32>
    %545 = arith.divf %543, %544 : vector<2x256xf32>
    %546 = vector.extract_strided_slice %545 {offsets = [0, 0], sizes = [2, 64], strides = [1, 1]} : vector<2x256xf32> to vector<2x64xf32>
    %547 = vector.extract_strided_slice %545 {offsets = [0, 64], sizes = [2, 64], strides = [1, 1]} : vector<2x256xf32> to vector<2x64xf32>
    %548 = vector.extract_strided_slice %545 {offsets = [0, 192], sizes = [2, 64], strides = [1, 1]} : vector<2x256xf32> to vector<2x64xf32>
    %549 = vector.extract_strided_slice %540 {offsets = [0, 128], sizes = [2, 64], strides = [1, 1]} : vector<2x256xf32> to vector<2x64xf32>
    %550 = math.tanh %549 : vector<2x64xf32>
    %551 = arith.mulf %547, %525 : vector<2x64xf32>
    %552 = arith.mulf %546, %550 : vector<2x64xf32>
    %553 = arith.addf %551, %552 : vector<2x64xf32>
    %554 = math.tanh %553 : vector<2x64xf32>
    %555 = arith.mulf %548, %554 : vector<2x64xf32>
    %556 = vector.extract_strided_slice %555 {offsets = [0, 0], sizes = [2, 32], strides = [1, 1]} : vector<2x64xf32> to vector<2x32xf32>
    %c12_212 = arith.constant 12 : index
    %c0_213 = arith.constant 0 : index
    %c0_214 = arith.constant 0 : index
    %557 = vector.load %arg19[%c12_212, %c0_213, %c0_214] : memref<16x2x64xf32, #tpu.memory_space<vmem>>, vector<1x2x32xf32>
    %558 = vector.shape_cast %557 : vector<1x2x32xf32> to vector<2x32xf32>
    %559 = vector.shape_cast %556 : vector<2x32xf32> to vector<1x2x32xf32>
    tpu.vector_store %arg19[%c12_212, %c0_213, %c0_214], %559 {strides = array<i32>} : memref<16x2x64xf32, #tpu.memory_space<vmem>>, vector<1x2x32xf32>,
    %560 = vector.extract_strided_slice %555 {offsets = [0, 32], sizes = [2, 32], strides = [1, 1]} : vector<2x64xf32> to vector<2x32xf32>
    %c3_215 = arith.constant 3 : index
    %c0_216 = arith.constant 0 : index
    %c32_217 = arith.constant 32 : index
    %561 = vector.load %arg19[%c3_215, %c0_216, %c32_217] : memref<16x2x64xf32, #tpu.memory_space<vmem>>, vector<1x2x32xf32>
    %562 = vector.shape_cast %561 : vector<1x2x32xf32> to vector<2x32xf32>
    %563 = vector.shape_cast %560 : vector<2x32xf32> to vector<1x2x32xf32>
    tpu.vector_store %arg19[%c3_215, %c0_216, %c32_217], %563 {strides = array<i32>} : memref<16x2x64xf32, #tpu.memory_space<vmem>>, vector<1x2x32xf32>,
    %c13_218 = arith.constant 13 : index
    %c0_219 = arith.constant 0 : index
    %c0_220 = arith.constant 0 : index
    %564 = vector.load %arg18[%c13_218, %c0_219, %c0_220] : memref<16x2x256xf32, #tpu.memory_space<vmem>>, vector<1x2x256xf32>
    %565 = vector.shape_cast %564 : vector<1x2x256xf32> to vector<2x256xf32>
    %566 = arith.truncf %555 : vector<2x64xf32> to vector<2x64xbf16>
    %cst_221 = arith.constant dense<0.000000e+00> : vector<2x256xf32>
    %567 = tpu.matmul %566, %197, %cst_221 {dimension_numbers = #tpu.dot_dimension_numbers<[1], [0], [0], [1], [0, 0, 1, 1], [], []>} : vector<2x64xbf16>, vector<64x256xbf16>, vector<2x256xf32> -> vector<2x256xf32>
    %568 = arith.addf %565, %567 : vector<2x256xf32>
    %569 = arith.negf %568 : vector<2x256xf32>
    %570 = math.exp %569 : vector<2x256xf32>
    %cst_222 = arith.constant 1.000000e+00 : f32
    %571 = vector.broadcast %cst_222 : f32 to vector<2x256xf32>
    %572 = arith.addf %571, %570 : vector<2x256xf32>
    %573 = arith.divf %571, %572 : vector<2x256xf32>
    %574 = vector.extract_strided_slice %573 {offsets = [0, 0], sizes = [2, 64], strides = [1, 1]} : vector<2x256xf32> to vector<2x64xf32>
    %575 = vector.extract_strided_slice %573 {offsets = [0, 64], sizes = [2, 64], strides = [1, 1]} : vector<2x256xf32> to vector<2x64xf32>
    %576 = vector.extract_strided_slice %573 {offsets = [0, 192], sizes = [2, 64], strides = [1, 1]} : vector<2x256xf32> to vector<2x64xf32>
    %577 = vector.extract_strided_slice %568 {offsets = [0, 128], sizes = [2, 64], strides = [1, 1]} : vector<2x256xf32> to vector<2x64xf32>
    %578 = math.tanh %577 : vector<2x64xf32>
    %579 = arith.mulf %575, %553 : vector<2x64xf32>
    %580 = arith.mulf %574, %578 : vector<2x64xf32>
    %581 = arith.addf %579, %580 : vector<2x64xf32>
    %582 = math.tanh %581 : vector<2x64xf32>
    %583 = arith.mulf %576, %582 : vector<2x64xf32>
    %584 = vector.extract_strided_slice %583 {offsets = [0, 0], sizes = [2, 32], strides = [1, 1]} : vector<2x64xf32> to vector<2x32xf32>
    %c13_223 = arith.constant 13 : index
    %c0_224 = arith.constant 0 : index
    %c0_225 = arith.constant 0 : index
    %585 = vector.load %arg19[%c13_223, %c0_224, %c0_225] : memref<16x2x64xf32, #tpu.memory_space<vmem>>, vector<1x2x32xf32>
    %586 = vector.shape_cast %585 : vector<1x2x32xf32> to vector<2x32xf32>
    %587 = vector.shape_cast %584 : vector<2x32xf32> to vector<1x2x32xf32>
    tpu.vector_store %arg19[%c13_223, %c0_224, %c0_225], %587 {strides = array<i32>} : memref<16x2x64xf32, #tpu.memory_space<vmem>>, vector<1x2x32xf32>,
    %588 = vector.extract_strided_slice %583 {offsets = [0, 32], sizes = [2, 32], strides = [1, 1]} : vector<2x64xf32> to vector<2x32xf32>
    %c2_226 = arith.constant 2 : index
    %c0_227 = arith.constant 0 : index
    %c32_228 = arith.constant 32 : index
    %589 = vector.load %arg19[%c2_226, %c0_227, %c32_228] : memref<16x2x64xf32, #tpu.memory_space<vmem>>, vector<1x2x32xf32>
    %590 = vector.shape_cast %589 : vector<1x2x32xf32> to vector<2x32xf32>
    %591 = vector.shape_cast %588 : vector<2x32xf32> to vector<1x2x32xf32>
    tpu.vector_store %arg19[%c2_226, %c0_227, %c32_228], %591 {strides = array<i32>} : memref<16x2x64xf32, #tpu.memory_space<vmem>>, vector<1x2x32xf32>,
    %c14_229 = arith.constant 14 : index
    %c0_230 = arith.constant 0 : index
    %c0_231 = arith.constant 0 : index
    %592 = vector.load %arg18[%c14_229, %c0_230, %c0_231] : memref<16x2x256xf32, #tpu.memory_space<vmem>>, vector<1x2x256xf32>
    %593 = vector.shape_cast %592 : vector<1x2x256xf32> to vector<2x256xf32>
    %594 = arith.truncf %583 : vector<2x64xf32> to vector<2x64xbf16>
    %cst_232 = arith.constant dense<0.000000e+00> : vector<2x256xf32>
    %595 = tpu.matmul %594, %197, %cst_232 {dimension_numbers = #tpu.dot_dimension_numbers<[1], [0], [0], [1], [0, 0, 1, 1], [], []>} : vector<2x64xbf16>, vector<64x256xbf16>, vector<2x256xf32> -> vector<2x256xf32>
    %596 = arith.addf %593, %595 : vector<2x256xf32>
    %597 = arith.negf %596 : vector<2x256xf32>
    %598 = math.exp %597 : vector<2x256xf32>
    %cst_233 = arith.constant 1.000000e+00 : f32
    %599 = vector.broadcast %cst_233 : f32 to vector<2x256xf32>
    %600 = arith.addf %599, %598 : vector<2x256xf32>
    %601 = arith.divf %599, %600 : vector<2x256xf32>
    %602 = vector.extract_strided_slice %601 {offsets = [0, 0], sizes = [2, 64], strides = [1, 1]} : vector<2x256xf32> to vector<2x64xf32>
    %603 = vector.extract_strided_slice %601 {offsets = [0, 64], sizes = [2, 64], strides = [1, 1]} : vector<2x256xf32> to vector<2x64xf32>
    %604 = vector.extract_strided_slice %601 {offsets = [0, 192], sizes = [2, 64], strides = [1, 1]} : vector<2x256xf32> to vector<2x64xf32>
    %605 = vector.extract_strided_slice %596 {offsets = [0, 128], sizes = [2, 64], strides = [1, 1]} : vector<2x256xf32> to vector<2x64xf32>
    %606 = math.tanh %605 : vector<2x64xf32>
    %607 = arith.mulf %603, %581 : vector<2x64xf32>
    %608 = arith.mulf %602, %606 : vector<2x64xf32>
    %609 = arith.addf %607, %608 : vector<2x64xf32>
    %610 = math.tanh %609 : vector<2x64xf32>
    %611 = arith.mulf %604, %610 : vector<2x64xf32>
    %612 = vector.extract_strided_slice %611 {offsets = [0, 0], sizes = [2, 32], strides = [1, 1]} : vector<2x64xf32> to vector<2x32xf32>
    %c14_234 = arith.constant 14 : index
    %c0_235 = arith.constant 0 : index
    %c0_236 = arith.constant 0 : index
    %613 = vector.load %arg19[%c14_234, %c0_235, %c0_236] : memref<16x2x64xf32, #tpu.memory_space<vmem>>, vector<1x2x32xf32>
    %614 = vector.shape_cast %613 : vector<1x2x32xf32> to vector<2x32xf32>
    %615 = vector.shape_cast %612 : vector<2x32xf32> to vector<1x2x32xf32>
    tpu.vector_store %arg19[%c14_234, %c0_235, %c0_236], %615 {strides = array<i32>} : memref<16x2x64xf32, #tpu.memory_space<vmem>>, vector<1x2x32xf32>,
    %616 = vector.extract_strided_slice %611 {offsets = [0, 32], sizes = [2, 32], strides = [1, 1]} : vector<2x64xf32> to vector<2x32xf32>
    %c1_237 = arith.constant 1 : index
    %c0_238 = arith.constant 0 : index
    %c32_239 = arith.constant 32 : index
    %617 = vector.load %arg19[%c1_237, %c0_238, %c32_239] : memref<16x2x64xf32, #tpu.memory_space<vmem>>, vector<1x2x32xf32>
    %618 = vector.shape_cast %617 : vector<1x2x32xf32> to vector<2x32xf32>
    %619 = vector.shape_cast %616 : vector<2x32xf32> to vector<1x2x32xf32>
    tpu.vector_store %arg19[%c1_237, %c0_238, %c32_239], %619 {strides = array<i32>} : memref<16x2x64xf32, #tpu.memory_space<vmem>>, vector<1x2x32xf32>,
    %c15_240 = arith.constant 15 : index
    %c0_241 = arith.constant 0 : index
    %c0_242 = arith.constant 0 : index
    %620 = vector.load %arg18[%c15_240, %c0_241, %c0_242] : memref<16x2x256xf32, #tpu.memory_space<vmem>>, vector<1x2x256xf32>
    %621 = vector.shape_cast %620 : vector<1x2x256xf32> to vector<2x256xf32>
    %622 = arith.truncf %611 : vector<2x64xf32> to vector<2x64xbf16>
    %cst_243 = arith.constant dense<0.000000e+00> : vector<2x256xf32>
    %623 = tpu.matmul %622, %197, %cst_243 {dimension_numbers = #tpu.dot_dimension_numbers<[1], [0], [0], [1], [0, 0, 1, 1], [], []>} : vector<2x64xbf16>, vector<64x256xbf16>, vector<2x256xf32> -> vector<2x256xf32>
    %624 = arith.addf %621, %623 : vector<2x256xf32>
    %625 = arith.negf %624 : vector<2x256xf32>
    %626 = math.exp %625 : vector<2x256xf32>
    %cst_244 = arith.constant 1.000000e+00 : f32
    %627 = vector.broadcast %cst_244 : f32 to vector<2x256xf32>
    %628 = arith.addf %627, %626 : vector<2x256xf32>
    %629 = arith.divf %627, %628 : vector<2x256xf32>
    %630 = vector.extract_strided_slice %629 {offsets = [0, 0], sizes = [2, 64], strides = [1, 1]} : vector<2x256xf32> to vector<2x64xf32>
    %631 = vector.extract_strided_slice %629 {offsets = [0, 64], sizes = [2, 64], strides = [1, 1]} : vector<2x256xf32> to vector<2x64xf32>
    %632 = vector.extract_strided_slice %629 {offsets = [0, 192], sizes = [2, 64], strides = [1, 1]} : vector<2x256xf32> to vector<2x64xf32>
    %633 = vector.extract_strided_slice %624 {offsets = [0, 128], sizes = [2, 64], strides = [1, 1]} : vector<2x256xf32> to vector<2x64xf32>
    %634 = math.tanh %633 : vector<2x64xf32>
    %635 = arith.mulf %631, %609 : vector<2x64xf32>
    %636 = arith.mulf %630, %634 : vector<2x64xf32>
    %637 = arith.addf %635, %636 : vector<2x64xf32>
    %638 = math.tanh %637 : vector<2x64xf32>
    %639 = arith.mulf %632, %638 : vector<2x64xf32>
    %640 = vector.extract_strided_slice %639 {offsets = [0, 0], sizes = [2, 32], strides = [1, 1]} : vector<2x64xf32> to vector<2x32xf32>
    %c15_245 = arith.constant 15 : index
    %c0_246 = arith.constant 0 : index
    %c0_247 = arith.constant 0 : index
    %641 = vector.load %arg19[%c15_245, %c0_246, %c0_247] : memref<16x2x64xf32, #tpu.memory_space<vmem>>, vector<1x2x32xf32>
    %642 = vector.shape_cast %641 : vector<1x2x32xf32> to vector<2x32xf32>
    %643 = vector.shape_cast %640 : vector<2x32xf32> to vector<1x2x32xf32>
    tpu.vector_store %arg19[%c15_245, %c0_246, %c0_247], %643 {strides = array<i32>} : memref<16x2x64xf32, #tpu.memory_space<vmem>>, vector<1x2x32xf32>,
    %644 = vector.extract_strided_slice %639 {offsets = [0, 32], sizes = [2, 32], strides = [1, 1]} : vector<2x64xf32> to vector<2x32xf32>
    %c0_248 = arith.constant 0 : index
    %c0_249 = arith.constant 0 : index
    %c32_250 = arith.constant 32 : index
    %645 = vector.load %arg19[%c0_248, %c0_249, %c32_250] : memref<16x2x64xf32, #tpu.memory_space<vmem>>, vector<1x2x32xf32>
    %646 = vector.shape_cast %645 : vector<1x2x32xf32> to vector<2x32xf32>
    %647 = vector.shape_cast %644 : vector<2x32xf32> to vector<1x2x32xf32>
    tpu.vector_store %arg19[%c0_248, %c0_249, %c32_250], %647 {strides = array<i32>} : memref<16x2x64xf32, #tpu.memory_space<vmem>>, vector<1x2x32xf32>,
    %c0_251 = arith.constant 0 : index
    %c0_252 = arith.constant 0 : index
    %648 = vector.load %arg5[%c0_251, %c0_252] : memref<64x256xbf16, #tpu.memory_space<vmem>>, vector<64x256xbf16>
    %c0_253 = arith.constant 0 : index
    %c0_254 = arith.constant 0 : index
    %649 = vector.load %arg6[%c0_253, %c0_254] : memref<64x256xbf16, #tpu.memory_space<vmem>>, vector<64x256xbf16>
    %c0_255 = arith.constant 0 : index
    %c0_256 = arith.constant 0 : index
    %650 = vector.load %arg8[%c0_255, %c0_256] : memref<1x256xf32, #tpu.memory_space<vmem>>, vector<1x256xf32>
    %c0_257 = arith.constant 0 : index
    %c0_258 = arith.constant 0 : index
    %c0_259 = arith.constant 0 : index
    %651 = vector.load %arg19[%c0_257, %c0_258, %c0_259] : memref<16x2x64xf32, #tpu.memory_space<vmem>>, vector<1x2x64xf32>
    %652 = vector.shape_cast %651 : vector<1x2x64xf32> to vector<2x64xf32>
    %653 = arith.truncf %652 : vector<2x64xf32> to vector<2x64xbf16>
    %c15_260 = arith.constant 15 : index
    %c0_261 = arith.constant 0 : index
    %c0_262 = arith.constant 0 : index
    %654 = vector.load %arg19[%c15_260, %c0_261, %c0_262] : memref<16x2x64xf32, #tpu.memory_space<vmem>>, vector<1x2x64xf32>
    %655 = vector.shape_cast %654 : vector<1x2x64xf32> to vector<2x64xf32>
    %656 = arith.truncf %655 : vector<2x64xf32> to vector<2x64xbf16>
    %cst_263 = arith.constant dense<0.000000e+00> : vector<2x256xf32>
    %657 = tpu.matmul %653, %648, %cst_263 {dimension_numbers = #tpu.dot_dimension_numbers<[1], [0], [0], [1], [0, 0, 1, 1], [], []>} : vector<2x64xbf16>, vector<64x256xbf16>, vector<2x256xf32> -> vector<2x256xf32>
    %cst_264 = arith.constant dense<0.000000e+00> : vector<2x256xf32>
    %658 = tpu.matmul %656, %649, %cst_264 {dimension_numbers = #tpu.dot_dimension_numbers<[1], [0], [0], [1], [0, 0, 1, 1], [], []>} : vector<2x64xbf16>, vector<64x256xbf16>, vector<2x256xf32> -> vector<2x256xf32>
    %659 = arith.addf %657, %658 : vector<2x256xf32>
    %660 = vector.broadcast %650 : vector<1x256xf32> to vector<2x256xf32>
    %661 = arith.addf %659, %660 : vector<2x256xf32>
    %c0_265 = arith.constant 0 : index
    %c0_266 = arith.constant 0 : index
    %c0_267 = arith.constant 0 : index
    %662 = vector.load %arg18[%c0_265, %c0_266, %c0_267] : memref<16x2x256xf32, #tpu.memory_space<vmem>>, vector<1x2x256xf32>
    %663 = vector.shape_cast %662 : vector<1x2x256xf32> to vector<2x256xf32>
    %664 = vector.shape_cast %661 : vector<2x256xf32> to vector<1x2x256xf32>
    tpu.vector_store %arg18[%c0_265, %c0_266, %c0_267], %664 {strides = array<i32>} : memref<16x2x256xf32, #tpu.memory_space<vmem>>, vector<1x2x256xf32>,
    %c1_268 = arith.constant 1 : index
    %c0_269 = arith.constant 0 : index
    %c0_270 = arith.constant 0 : index
    %665 = vector.load %arg19[%c1_268, %c0_269, %c0_270] : memref<16x2x64xf32, #tpu.memory_space<vmem>>, vector<1x2x64xf32>
    %666 = vector.shape_cast %665 : vector<1x2x64xf32> to vector<2x64xf32>
    %667 = arith.truncf %666 : vector<2x64xf32> to vector<2x64xbf16>
    %c14_271 = arith.constant 14 : index
    %c0_272 = arith.constant 0 : index
    %c0_273 = arith.constant 0 : index
    %668 = vector.load %arg19[%c14_271, %c0_272, %c0_273] : memref<16x2x64xf32, #tpu.memory_space<vmem>>, vector<1x2x64xf32>
    %669 = vector.shape_cast %668 : vector<1x2x64xf32> to vector<2x64xf32>
    %670 = arith.truncf %669 : vector<2x64xf32> to vector<2x64xbf16>
    %cst_274 = arith.constant dense<0.000000e+00> : vector<2x256xf32>
    %671 = tpu.matmul %667, %648, %cst_274 {dimension_numbers = #tpu.dot_dimension_numbers<[1], [0], [0], [1], [0, 0, 1, 1], [], []>} : vector<2x64xbf16>, vector<64x256xbf16>, vector<2x256xf32> -> vector<2x256xf32>
    %cst_275 = arith.constant dense<0.000000e+00> : vector<2x256xf32>
    %672 = tpu.matmul %670, %649, %cst_275 {dimension_numbers = #tpu.dot_dimension_numbers<[1], [0], [0], [1], [0, 0, 1, 1], [], []>} : vector<2x64xbf16>, vector<64x256xbf16>, vector<2x256xf32> -> vector<2x256xf32>
    %673 = arith.addf %671, %672 : vector<2x256xf32>
    %674 = vector.broadcast %650 : vector<1x256xf32> to vector<2x256xf32>
    %675 = arith.addf %673, %674 : vector<2x256xf32>
    %c1_276 = arith.constant 1 : index
    %c0_277 = arith.constant 0 : index
    %c0_278 = arith.constant 0 : index
    %676 = vector.load %arg18[%c1_276, %c0_277, %c0_278] : memref<16x2x256xf32, #tpu.memory_space<vmem>>, vector<1x2x256xf32>
    %677 = vector.shape_cast %676 : vector<1x2x256xf32> to vector<2x256xf32>
    %678 = vector.shape_cast %675 : vector<2x256xf32> to vector<1x2x256xf32>
    tpu.vector_store %arg18[%c1_276, %c0_277, %c0_278], %678 {strides = array<i32>} : memref<16x2x256xf32, #tpu.memory_space<vmem>>, vector<1x2x256xf32>,
    %c2_279 = arith.constant 2 : index
    %c0_280 = arith.constant 0 : index
    %c0_281 = arith.constant 0 : index
    %679 = vector.load %arg19[%c2_279, %c0_280, %c0_281] : memref<16x2x64xf32, #tpu.memory_space<vmem>>, vector<1x2x64xf32>
    %680 = vector.shape_cast %679 : vector<1x2x64xf32> to vector<2x64xf32>
    %681 = arith.truncf %680 : vector<2x64xf32> to vector<2x64xbf16>
    %c13_282 = arith.constant 13 : index
    %c0_283 = arith.constant 0 : index
    %c0_284 = arith.constant 0 : index
    %682 = vector.load %arg19[%c13_282, %c0_283, %c0_284] : memref<16x2x64xf32, #tpu.memory_space<vmem>>, vector<1x2x64xf32>
    %683 = vector.shape_cast %682 : vector<1x2x64xf32> to vector<2x64xf32>
    %684 = arith.truncf %683 : vector<2x64xf32> to vector<2x64xbf16>
    %cst_285 = arith.constant dense<0.000000e+00> : vector<2x256xf32>
    %685 = tpu.matmul %681, %648, %cst_285 {dimension_numbers = #tpu.dot_dimension_numbers<[1], [0], [0], [1], [0, 0, 1, 1], [], []>} : vector<2x64xbf16>, vector<64x256xbf16>, vector<2x256xf32> -> vector<2x256xf32>
    %cst_286 = arith.constant dense<0.000000e+00> : vector<2x256xf32>
    %686 = tpu.matmul %684, %649, %cst_286 {dimension_numbers = #tpu.dot_dimension_numbers<[1], [0], [0], [1], [0, 0, 1, 1], [], []>} : vector<2x64xbf16>, vector<64x256xbf16>, vector<2x256xf32> -> vector<2x256xf32>
    %687 = arith.addf %685, %686 : vector<2x256xf32>
    %688 = vector.broadcast %650 : vector<1x256xf32> to vector<2x256xf32>
    %689 = arith.addf %687, %688 : vector<2x256xf32>
    %c2_287 = arith.constant 2 : index
    %c0_288 = arith.constant 0 : index
    %c0_289 = arith.constant 0 : index
    %690 = vector.load %arg18[%c2_287, %c0_288, %c0_289] : memref<16x2x256xf32, #tpu.memory_space<vmem>>, vector<1x2x256xf32>
    %691 = vector.shape_cast %690 : vector<1x2x256xf32> to vector<2x256xf32>
    %692 = vector.shape_cast %689 : vector<2x256xf32> to vector<1x2x256xf32>
    tpu.vector_store %arg18[%c2_287, %c0_288, %c0_289], %692 {strides = array<i32>} : memref<16x2x256xf32, #tpu.memory_space<vmem>>, vector<1x2x256xf32>,
    %c3_290 = arith.constant 3 : index
    %c0_291 = arith.constant 0 : index
    %c0_292 = arith.constant 0 : index
    %693 = vector.load %arg19[%c3_290, %c0_291, %c0_292] : memref<16x2x64xf32, #tpu.memory_space<vmem>>, vector<1x2x64xf32>
    %694 = vector.shape_cast %693 : vector<1x2x64xf32> to vector<2x64xf32>
    %695 = arith.truncf %694 : vector<2x64xf32> to vector<2x64xbf16>
    %c12_293 = arith.constant 12 : index
    %c0_294 = arith.constant 0 : index
    %c0_295 = arith.constant 0 : index
    %696 = vector.load %arg19[%c12_293, %c0_294, %c0_295] : memref<16x2x64xf32, #tpu.memory_space<vmem>>, vector<1x2x64xf32>
    %697 = vector.shape_cast %696 : vector<1x2x64xf32> to vector<2x64xf32>
    %698 = arith.truncf %697 : vector<2x64xf32> to vector<2x64xbf16>
    %cst_296 = arith.constant dense<0.000000e+00> : vector<2x256xf32>
    %699 = tpu.matmul %695, %648, %cst_296 {dimension_numbers = #tpu.dot_dimension_numbers<[1], [0], [0], [1], [0, 0, 1, 1], [], []>} : vector<2x64xbf16>, vector<64x256xbf16>, vector<2x256xf32> -> vector<2x256xf32>
    %cst_297 = arith.constant dense<0.000000e+00> : vector<2x256xf32>
    %700 = tpu.matmul %698, %649, %cst_297 {dimension_numbers = #tpu.dot_dimension_numbers<[1], [0], [0], [1], [0, 0, 1, 1], [], []>} : vector<2x64xbf16>, vector<64x256xbf16>, vector<2x256xf32> -> vector<2x256xf32>
    %701 = arith.addf %699, %700 : vector<2x256xf32>
    %702 = vector.broadcast %650 : vector<1x256xf32> to vector<2x256xf32>
    %703 = arith.addf %701, %702 : vector<2x256xf32>
    %c3_298 = arith.constant 3 : index
    %c0_299 = arith.constant 0 : index
    %c0_300 = arith.constant 0 : index
    %704 = vector.load %arg18[%c3_298, %c0_299, %c0_300] : memref<16x2x256xf32, #tpu.memory_space<vmem>>, vector<1x2x256xf32>
    %705 = vector.shape_cast %704 : vector<1x2x256xf32> to vector<2x256xf32>
    %706 = vector.shape_cast %703 : vector<2x256xf32> to vector<1x2x256xf32>
    tpu.vector_store %arg18[%c3_298, %c0_299, %c0_300], %706 {strides = array<i32>} : memref<16x2x256xf32, #tpu.memory_space<vmem>>, vector<1x2x256xf32>,
    %c4_301 = arith.constant 4 : index
    %c0_302 = arith.constant 0 : index
    %c0_303 = arith.constant 0 : index
    %707 = vector.load %arg19[%c4_301, %c0_302, %c0_303] : memref<16x2x64xf32, #tpu.memory_space<vmem>>, vector<1x2x64xf32>
    %708 = vector.shape_cast %707 : vector<1x2x64xf32> to vector<2x64xf32>
    %709 = arith.truncf %708 : vector<2x64xf32> to vector<2x64xbf16>
    %c11_304 = arith.constant 11 : index
    %c0_305 = arith.constant 0 : index
    %c0_306 = arith.constant 0 : index
    %710 = vector.load %arg19[%c11_304, %c0_305, %c0_306] : memref<16x2x64xf32, #tpu.memory_space<vmem>>, vector<1x2x64xf32>
    %711 = vector.shape_cast %710 : vector<1x2x64xf32> to vector<2x64xf32>
    %712 = arith.truncf %711 : vector<2x64xf32> to vector<2x64xbf16>
    %cst_307 = arith.constant dense<0.000000e+00> : vector<2x256xf32>
    %713 = tpu.matmul %709, %648, %cst_307 {dimension_numbers = #tpu.dot_dimension_numbers<[1], [0], [0], [1], [0, 0, 1, 1], [], []>} : vector<2x64xbf16>, vector<64x256xbf16>, vector<2x256xf32> -> vector<2x256xf32>
    %cst_308 = arith.constant dense<0.000000e+00> : vector<2x256xf32>
    %714 = tpu.matmul %712, %649, %cst_308 {dimension_numbers = #tpu.dot_dimension_numbers<[1], [0], [0], [1], [0, 0, 1, 1], [], []>} : vector<2x64xbf16>, vector<64x256xbf16>, vector<2x256xf32> -> vector<2x256xf32>
    %715 = arith.addf %713, %714 : vector<2x256xf32>
    %716 = vector.broadcast %650 : vector<1x256xf32> to vector<2x256xf32>
    %717 = arith.addf %715, %716 : vector<2x256xf32>
    %c4_309 = arith.constant 4 : index
    %c0_310 = arith.constant 0 : index
    %c0_311 = arith.constant 0 : index
    %718 = vector.load %arg18[%c4_309, %c0_310, %c0_311] : memref<16x2x256xf32, #tpu.memory_space<vmem>>, vector<1x2x256xf32>
    %719 = vector.shape_cast %718 : vector<1x2x256xf32> to vector<2x256xf32>
    %720 = vector.shape_cast %717 : vector<2x256xf32> to vector<1x2x256xf32>
    tpu.vector_store %arg18[%c4_309, %c0_310, %c0_311], %720 {strides = array<i32>} : memref<16x2x256xf32, #tpu.memory_space<vmem>>, vector<1x2x256xf32>,
    %c5_312 = arith.constant 5 : index
    %c0_313 = arith.constant 0 : index
    %c0_314 = arith.constant 0 : index
    %721 = vector.load %arg19[%c5_312, %c0_313, %c0_314] : memref<16x2x64xf32, #tpu.memory_space<vmem>>, vector<1x2x64xf32>
    %722 = vector.shape_cast %721 : vector<1x2x64xf32> to vector<2x64xf32>
    %723 = arith.truncf %722 : vector<2x64xf32> to vector<2x64xbf16>
    %c10_315 = arith.constant 10 : index
    %c0_316 = arith.constant 0 : index
    %c0_317 = arith.constant 0 : index
    %724 = vector.load %arg19[%c10_315, %c0_316, %c0_317] : memref<16x2x64xf32, #tpu.memory_space<vmem>>, vector<1x2x64xf32>
    %725 = vector.shape_cast %724 : vector<1x2x64xf32> to vector<2x64xf32>
    %726 = arith.truncf %725 : vector<2x64xf32> to vector<2x64xbf16>
    %cst_318 = arith.constant dense<0.000000e+00> : vector<2x256xf32>
    %727 = tpu.matmul %723, %648, %cst_318 {dimension_numbers = #tpu.dot_dimension_numbers<[1], [0], [0], [1], [0, 0, 1, 1], [], []>} : vector<2x64xbf16>, vector<64x256xbf16>, vector<2x256xf32> -> vector<2x256xf32>
    %cst_319 = arith.constant dense<0.000000e+00> : vector<2x256xf32>
    %728 = tpu.matmul %726, %649, %cst_319 {dimension_numbers = #tpu.dot_dimension_numbers<[1], [0], [0], [1], [0, 0, 1, 1], [], []>} : vector<2x64xbf16>, vector<64x256xbf16>, vector<2x256xf32> -> vector<2x256xf32>
    %729 = arith.addf %727, %728 : vector<2x256xf32>
    %730 = vector.broadcast %650 : vector<1x256xf32> to vector<2x256xf32>
    %731 = arith.addf %729, %730 : vector<2x256xf32>
    %c5_320 = arith.constant 5 : index
    %c0_321 = arith.constant 0 : index
    %c0_322 = arith.constant 0 : index
    %732 = vector.load %arg18[%c5_320, %c0_321, %c0_322] : memref<16x2x256xf32, #tpu.memory_space<vmem>>, vector<1x2x256xf32>
    %733 = vector.shape_cast %732 : vector<1x2x256xf32> to vector<2x256xf32>
    %734 = vector.shape_cast %731 : vector<2x256xf32> to vector<1x2x256xf32>
    tpu.vector_store %arg18[%c5_320, %c0_321, %c0_322], %734 {strides = array<i32>} : memref<16x2x256xf32, #tpu.memory_space<vmem>>, vector<1x2x256xf32>,
    %c6_323 = arith.constant 6 : index
    %c0_324 = arith.constant 0 : index
    %c0_325 = arith.constant 0 : index
    %735 = vector.load %arg19[%c6_323, %c0_324, %c0_325] : memref<16x2x64xf32, #tpu.memory_space<vmem>>, vector<1x2x64xf32>
    %736 = vector.shape_cast %735 : vector<1x2x64xf32> to vector<2x64xf32>
    %737 = arith.truncf %736 : vector<2x64xf32> to vector<2x64xbf16>
    %c9_326 = arith.constant 9 : index
    %c0_327 = arith.constant 0 : index
    %c0_328 = arith.constant 0 : index
    %738 = vector.load %arg19[%c9_326, %c0_327, %c0_328] : memref<16x2x64xf32, #tpu.memory_space<vmem>>, vector<1x2x64xf32>
    %739 = vector.shape_cast %738 : vector<1x2x64xf32> to vector<2x64xf32>
    %740 = arith.truncf %739 : vector<2x64xf32> to vector<2x64xbf16>
    %cst_329 = arith.constant dense<0.000000e+00> : vector<2x256xf32>
    %741 = tpu.matmul %737, %648, %cst_329 {dimension_numbers = #tpu.dot_dimension_numbers<[1], [0], [0], [1], [0, 0, 1, 1], [], []>} : vector<2x64xbf16>, vector<64x256xbf16>, vector<2x256xf32> -> vector<2x256xf32>
    %cst_330 = arith.constant dense<0.000000e+00> : vector<2x256xf32>
    %742 = tpu.matmul %740, %649, %cst_330 {dimension_numbers = #tpu.dot_dimension_numbers<[1], [0], [0], [1], [0, 0, 1, 1], [], []>} : vector<2x64xbf16>, vector<64x256xbf16>, vector<2x256xf32> -> vector<2x256xf32>
    %743 = arith.addf %741, %742 : vector<2x256xf32>
    %744 = vector.broadcast %650 : vector<1x256xf32> to vector<2x256xf32>
    %745 = arith.addf %743, %744 : vector<2x256xf32>
    %c6_331 = arith.constant 6 : index
    %c0_332 = arith.constant 0 : index
    %c0_333 = arith.constant 0 : index
    %746 = vector.load %arg18[%c6_331, %c0_332, %c0_333] : memref<16x2x256xf32, #tpu.memory_space<vmem>>, vector<1x2x256xf32>
    %747 = vector.shape_cast %746 : vector<1x2x256xf32> to vector<2x256xf32>
    %748 = vector.shape_cast %745 : vector<2x256xf32> to vector<1x2x256xf32>
    tpu.vector_store %arg18[%c6_331, %c0_332, %c0_333], %748 {strides = array<i32>} : memref<16x2x256xf32, #tpu.memory_space<vmem>>, vector<1x2x256xf32>,
    %c7_334 = arith.constant 7 : index
    %c0_335 = arith.constant 0 : index
    %c0_336 = arith.constant 0 : index
    %749 = vector.load %arg19[%c7_334, %c0_335, %c0_336] : memref<16x2x64xf32, #tpu.memory_space<vmem>>, vector<1x2x64xf32>
    %750 = vector.shape_cast %749 : vector<1x2x64xf32> to vector<2x64xf32>
    %751 = arith.truncf %750 : vector<2x64xf32> to vector<2x64xbf16>
    %c8_337 = arith.constant 8 : index
    %c0_338 = arith.constant 0 : index
    %c0_339 = arith.constant 0 : index
    %752 = vector.load %arg19[%c8_337, %c0_338, %c0_339] : memref<16x2x64xf32, #tpu.memory_space<vmem>>, vector<1x2x64xf32>
    %753 = vector.shape_cast %752 : vector<1x2x64xf32> to vector<2x64xf32>
    %754 = arith.truncf %753 : vector<2x64xf32> to vector<2x64xbf16>
    %cst_340 = arith.constant dense<0.000000e+00> : vector<2x256xf32>
    %755 = tpu.matmul %751, %648, %cst_340 {dimension_numbers = #tpu.dot_dimension_numbers<[1], [0], [0], [1], [0, 0, 1, 1], [], []>} : vector<2x64xbf16>, vector<64x256xbf16>, vector<2x256xf32> -> vector<2x256xf32>
    %cst_341 = arith.constant dense<0.000000e+00> : vector<2x256xf32>
    %756 = tpu.matmul %754, %649, %cst_341 {dimension_numbers = #tpu.dot_dimension_numbers<[1], [0], [0], [1], [0, 0, 1, 1], [], []>} : vector<2x64xbf16>, vector<64x256xbf16>, vector<2x256xf32> -> vector<2x256xf32>
    %757 = arith.addf %755, %756 : vector<2x256xf32>
    %758 = vector.broadcast %650 : vector<1x256xf32> to vector<2x256xf32>
    %759 = arith.addf %757, %758 : vector<2x256xf32>
    %c7_342 = arith.constant 7 : index
    %c0_343 = arith.constant 0 : index
    %c0_344 = arith.constant 0 : index
    %760 = vector.load %arg18[%c7_342, %c0_343, %c0_344] : memref<16x2x256xf32, #tpu.memory_space<vmem>>, vector<1x2x256xf32>
    %761 = vector.shape_cast %760 : vector<1x2x256xf32> to vector<2x256xf32>
    %762 = vector.shape_cast %759 : vector<2x256xf32> to vector<1x2x256xf32>
    tpu.vector_store %arg18[%c7_342, %c0_343, %c0_344], %762 {strides = array<i32>} : memref<16x2x256xf32, #tpu.memory_space<vmem>>, vector<1x2x256xf32>,
    %c8_345 = arith.constant 8 : index
    %c0_346 = arith.constant 0 : index
    %c0_347 = arith.constant 0 : index
    %763 = vector.load %arg19[%c8_345, %c0_346, %c0_347] : memref<16x2x64xf32, #tpu.memory_space<vmem>>, vector<1x2x64xf32>
    %764 = vector.shape_cast %763 : vector<1x2x64xf32> to vector<2x64xf32>
    %765 = arith.truncf %764 : vector<2x64xf32> to vector<2x64xbf16>
    %c7_348 = arith.constant 7 : index
    %c0_349 = arith.constant 0 : index
    %c0_350 = arith.constant 0 : index
    %766 = vector.load %arg19[%c7_348, %c0_349, %c0_350] : memref<16x2x64xf32, #tpu.memory_space<vmem>>, vector<1x2x64xf32>
    %767 = vector.shape_cast %766 : vector<1x2x64xf32> to vector<2x64xf32>
    %768 = arith.truncf %767 : vector<2x64xf32> to vector<2x64xbf16>
    %cst_351 = arith.constant dense<0.000000e+00> : vector<2x256xf32>
    %769 = tpu.matmul %765, %648, %cst_351 {dimension_numbers = #tpu.dot_dimension_numbers<[1], [0], [0], [1], [0, 0, 1, 1], [], []>} : vector<2x64xbf16>, vector<64x256xbf16>, vector<2x256xf32> -> vector<2x256xf32>
    %cst_352 = arith.constant dense<0.000000e+00> : vector<2x256xf32>
    %770 = tpu.matmul %768, %649, %cst_352 {dimension_numbers = #tpu.dot_dimension_numbers<[1], [0], [0], [1], [0, 0, 1, 1], [], []>} : vector<2x64xbf16>, vector<64x256xbf16>, vector<2x256xf32> -> vector<2x256xf32>
    %771 = arith.addf %769, %770 : vector<2x256xf32>
    %772 = vector.broadcast %650 : vector<1x256xf32> to vector<2x256xf32>
    %773 = arith.addf %771, %772 : vector<2x256xf32>
    %c8_353 = arith.constant 8 : index
    %c0_354 = arith.constant 0 : index
    %c0_355 = arith.constant 0 : index
    %774 = vector.load %arg18[%c8_353, %c0_354, %c0_355] : memref<16x2x256xf32, #tpu.memory_space<vmem>>, vector<1x2x256xf32>
    %775 = vector.shape_cast %774 : vector<1x2x256xf32> to vector<2x256xf32>
    %776 = vector.shape_cast %773 : vector<2x256xf32> to vector<1x2x256xf32>
    tpu.vector_store %arg18[%c8_353, %c0_354, %c0_355], %776 {strides = array<i32>} : memref<16x2x256xf32, #tpu.memory_space<vmem>>, vector<1x2x256xf32>,
    %c9_356 = arith.constant 9 : index
    %c0_357 = arith.constant 0 : index
    %c0_358 = arith.constant 0 : index
    %777 = vector.load %arg19[%c9_356, %c0_357, %c0_358] : memref<16x2x64xf32, #tpu.memory_space<vmem>>, vector<1x2x64xf32>
    %778 = vector.shape_cast %777 : vector<1x2x64xf32> to vector<2x64xf32>
    %779 = arith.truncf %778 : vector<2x64xf32> to vector<2x64xbf16>
    %c6_359 = arith.constant 6 : index
    %c0_360 = arith.constant 0 : index
    %c0_361 = arith.constant 0 : index
    %780 = vector.load %arg19[%c6_359, %c0_360, %c0_361] : memref<16x2x64xf32, #tpu.memory_space<vmem>>, vector<1x2x64xf32>
    %781 = vector.shape_cast %780 : vector<1x2x64xf32> to vector<2x64xf32>
    %782 = arith.truncf %781 : vector<2x64xf32> to vector<2x64xbf16>
    %cst_362 = arith.constant dense<0.000000e+00> : vector<2x256xf32>
    %783 = tpu.matmul %779, %648, %cst_362 {dimension_numbers = #tpu.dot_dimension_numbers<[1], [0], [0], [1], [0, 0, 1, 1], [], []>} : vector<2x64xbf16>, vector<64x256xbf16>, vector<2x256xf32> -> vector<2x256xf32>
    %cst_363 = arith.constant dense<0.000000e+00> : vector<2x256xf32>
    %784 = tpu.matmul %782, %649, %cst_363 {dimension_numbers = #tpu.dot_dimension_numbers<[1], [0], [0], [1], [0, 0, 1, 1], [], []>} : vector<2x64xbf16>, vector<64x256xbf16>, vector<2x256xf32> -> vector<2x256xf32>
    %785 = arith.addf %783, %784 : vector<2x256xf32>
    %786 = vector.broadcast %650 : vector<1x256xf32> to vector<2x256xf32>
    %787 = arith.addf %785, %786 : vector<2x256xf32>
    %c9_364 = arith.constant 9 : index
    %c0_365 = arith.constant 0 : index
    %c0_366 = arith.constant 0 : index
    %788 = vector.load %arg18[%c9_364, %c0_365, %c0_366] : memref<16x2x256xf32, #tpu.memory_space<vmem>>, vector<1x2x256xf32>
    %789 = vector.shape_cast %788 : vector<1x2x256xf32> to vector<2x256xf32>
    %790 = vector.shape_cast %787 : vector<2x256xf32> to vector<1x2x256xf32>
    tpu.vector_store %arg18[%c9_364, %c0_365, %c0_366], %790 {strides = array<i32>} : memref<16x2x256xf32, #tpu.memory_space<vmem>>, vector<1x2x256xf32>,
    %c10_367 = arith.constant 10 : index
    %c0_368 = arith.constant 0 : index
    %c0_369 = arith.constant 0 : index
    %791 = vector.load %arg19[%c10_367, %c0_368, %c0_369] : memref<16x2x64xf32, #tpu.memory_space<vmem>>, vector<1x2x64xf32>
    %792 = vector.shape_cast %791 : vector<1x2x64xf32> to vector<2x64xf32>
    %793 = arith.truncf %792 : vector<2x64xf32> to vector<2x64xbf16>
    %c5_370 = arith.constant 5 : index
    %c0_371 = arith.constant 0 : index
    %c0_372 = arith.constant 0 : index
    %794 = vector.load %arg19[%c5_370, %c0_371, %c0_372] : memref<16x2x64xf32, #tpu.memory_space<vmem>>, vector<1x2x64xf32>
    %795 = vector.shape_cast %794 : vector<1x2x64xf32> to vector<2x64xf32>
    %796 = arith.truncf %795 : vector<2x64xf32> to vector<2x64xbf16>
    %cst_373 = arith.constant dense<0.000000e+00> : vector<2x256xf32>
    %797 = tpu.matmul %793, %648, %cst_373 {dimension_numbers = #tpu.dot_dimension_numbers<[1], [0], [0], [1], [0, 0, 1, 1], [], []>} : vector<2x64xbf16>, vector<64x256xbf16>, vector<2x256xf32> -> vector<2x256xf32>
    %cst_374 = arith.constant dense<0.000000e+00> : vector<2x256xf32>
    %798 = tpu.matmul %796, %649, %cst_374 {dimension_numbers = #tpu.dot_dimension_numbers<[1], [0], [0], [1], [0, 0, 1, 1], [], []>} : vector<2x64xbf16>, vector<64x256xbf16>, vector<2x256xf32> -> vector<2x256xf32>
    %799 = arith.addf %797, %798 : vector<2x256xf32>
    %800 = vector.broadcast %650 : vector<1x256xf32> to vector<2x256xf32>
    %801 = arith.addf %799, %800 : vector<2x256xf32>
    %c10_375 = arith.constant 10 : index
    %c0_376 = arith.constant 0 : index
    %c0_377 = arith.constant 0 : index
    %802 = vector.load %arg18[%c10_375, %c0_376, %c0_377] : memref<16x2x256xf32, #tpu.memory_space<vmem>>, vector<1x2x256xf32>
    %803 = vector.shape_cast %802 : vector<1x2x256xf32> to vector<2x256xf32>
    %804 = vector.shape_cast %801 : vector<2x256xf32> to vector<1x2x256xf32>
    tpu.vector_store %arg18[%c10_375, %c0_376, %c0_377], %804 {strides = array<i32>} : memref<16x2x256xf32, #tpu.memory_space<vmem>>, vector<1x2x256xf32>,
    %c11_378 = arith.constant 11 : index
    %c0_379 = arith.constant 0 : index
    %c0_380 = arith.constant 0 : index
    %805 = vector.load %arg19[%c11_378, %c0_379, %c0_380] : memref<16x2x64xf32, #tpu.memory_space<vmem>>, vector<1x2x64xf32>
    %806 = vector.shape_cast %805 : vector<1x2x64xf32> to vector<2x64xf32>
    %807 = arith.truncf %806 : vector<2x64xf32> to vector<2x64xbf16>
    %c4_381 = arith.constant 4 : index
    %c0_382 = arith.constant 0 : index
    %c0_383 = arith.constant 0 : index
    %808 = vector.load %arg19[%c4_381, %c0_382, %c0_383] : memref<16x2x64xf32, #tpu.memory_space<vmem>>, vector<1x2x64xf32>
    %809 = vector.shape_cast %808 : vector<1x2x64xf32> to vector<2x64xf32>
    %810 = arith.truncf %809 : vector<2x64xf32> to vector<2x64xbf16>
    %cst_384 = arith.constant dense<0.000000e+00> : vector<2x256xf32>
    %811 = tpu.matmul %807, %648, %cst_384 {dimension_numbers = #tpu.dot_dimension_numbers<[1], [0], [0], [1], [0, 0, 1, 1], [], []>} : vector<2x64xbf16>, vector<64x256xbf16>, vector<2x256xf32> -> vector<2x256xf32>
    %cst_385 = arith.constant dense<0.000000e+00> : vector<2x256xf32>
    %812 = tpu.matmul %810, %649, %cst_385 {dimension_numbers = #tpu.dot_dimension_numbers<[1], [0], [0], [1], [0, 0, 1, 1], [], []>} : vector<2x64xbf16>, vector<64x256xbf16>, vector<2x256xf32> -> vector<2x256xf32>
    %813 = arith.addf %811, %812 : vector<2x256xf32>
    %814 = vector.broadcast %650 : vector<1x256xf32> to vector<2x256xf32>
    %815 = arith.addf %813, %814 : vector<2x256xf32>
    %c11_386 = arith.constant 11 : index
    %c0_387 = arith.constant 0 : index
    %c0_388 = arith.constant 0 : index
    %816 = vector.load %arg18[%c11_386, %c0_387, %c0_388] : memref<16x2x256xf32, #tpu.memory_space<vmem>>, vector<1x2x256xf32>
    %817 = vector.shape_cast %816 : vector<1x2x256xf32> to vector<2x256xf32>
    %818 = vector.shape_cast %815 : vector<2x256xf32> to vector<1x2x256xf32>
    tpu.vector_store %arg18[%c11_386, %c0_387, %c0_388], %818 {strides = array<i32>} : memref<16x2x256xf32, #tpu.memory_space<vmem>>, vector<1x2x256xf32>,
    %c12_389 = arith.constant 12 : index
    %c0_390 = arith.constant 0 : index
    %c0_391 = arith.constant 0 : index
    %819 = vector.load %arg19[%c12_389, %c0_390, %c0_391] : memref<16x2x64xf32, #tpu.memory_space<vmem>>, vector<1x2x64xf32>
    %820 = vector.shape_cast %819 : vector<1x2x64xf32> to vector<2x64xf32>
    %821 = arith.truncf %820 : vector<2x64xf32> to vector<2x64xbf16>
    %c3_392 = arith.constant 3 : index
    %c0_393 = arith.constant 0 : index
    %c0_394 = arith.constant 0 : index
    %822 = vector.load %arg19[%c3_392, %c0_393, %c0_394] : memref<16x2x64xf32, #tpu.memory_space<vmem>>, vector<1x2x64xf32>
    %823 = vector.shape_cast %822 : vector<1x2x64xf32> to vector<2x64xf32>
    %824 = arith.truncf %823 : vector<2x64xf32> to vector<2x64xbf16>
    %cst_395 = arith.constant dense<0.000000e+00> : vector<2x256xf32>
    %825 = tpu.matmul %821, %648, %cst_395 {dimension_numbers = #tpu.dot_dimension_numbers<[1], [0], [0], [1], [0, 0, 1, 1], [], []>} : vector<2x64xbf16>, vector<64x256xbf16>, vector<2x256xf32> -> vector<2x256xf32>
    %cst_396 = arith.constant dense<0.000000e+00> : vector<2x256xf32>
    %826 = tpu.matmul %824, %649, %cst_396 {dimension_numbers = #tpu.dot_dimension_numbers<[1], [0], [0], [1], [0, 0, 1, 1], [], []>} : vector<2x64xbf16>, vector<64x256xbf16>, vector<2x256xf32> -> vector<2x256xf32>
    %827 = arith.addf %825, %826 : vector<2x256xf32>
    %828 = vector.broadcast %650 : vector<1x256xf32> to vector<2x256xf32>
    %829 = arith.addf %827, %828 : vector<2x256xf32>
    %c12_397 = arith.constant 12 : index
    %c0_398 = arith.constant 0 : index
    %c0_399 = arith.constant 0 : index
    %830 = vector.load %arg18[%c12_397, %c0_398, %c0_399] : memref<16x2x256xf32, #tpu.memory_space<vmem>>, vector<1x2x256xf32>
    %831 = vector.shape_cast %830 : vector<1x2x256xf32> to vector<2x256xf32>
    %832 = vector.shape_cast %829 : vector<2x256xf32> to vector<1x2x256xf32>
    tpu.vector_store %arg18[%c12_397, %c0_398, %c0_399], %832 {strides = array<i32>} : memref<16x2x256xf32, #tpu.memory_space<vmem>>, vector<1x2x256xf32>,
    %c13_400 = arith.constant 13 : index
    %c0_401 = arith.constant 0 : index
    %c0_402 = arith.constant 0 : index
    %833 = vector.load %arg19[%c13_400, %c0_401, %c0_402] : memref<16x2x64xf32, #tpu.memory_space<vmem>>, vector<1x2x64xf32>
    %834 = vector.shape_cast %833 : vector<1x2x64xf32> to vector<2x64xf32>
    %835 = arith.truncf %834 : vector<2x64xf32> to vector<2x64xbf16>
    %c2_403 = arith.constant 2 : index
    %c0_404 = arith.constant 0 : index
    %c0_405 = arith.constant 0 : index
    %836 = vector.load %arg19[%c2_403, %c0_404, %c0_405] : memref<16x2x64xf32, #tpu.memory_space<vmem>>, vector<1x2x64xf32>
    %837 = vector.shape_cast %836 : vector<1x2x64xf32> to vector<2x64xf32>
    %838 = arith.truncf %837 : vector<2x64xf32> to vector<2x64xbf16>
    %cst_406 = arith.constant dense<0.000000e+00> : vector<2x256xf32>
    %839 = tpu.matmul %835, %648, %cst_406 {dimension_numbers = #tpu.dot_dimension_numbers<[1], [0], [0], [1], [0, 0, 1, 1], [], []>} : vector<2x64xbf16>, vector<64x256xbf16>, vector<2x256xf32> -> vector<2x256xf32>
    %cst_407 = arith.constant dense<0.000000e+00> : vector<2x256xf32>
    %840 = tpu.matmul %838, %649, %cst_407 {dimension_numbers = #tpu.dot_dimension_numbers<[1], [0], [0], [1], [0, 0, 1, 1], [], []>} : vector<2x64xbf16>, vector<64x256xbf16>, vector<2x256xf32> -> vector<2x256xf32>
    %841 = arith.addf %839, %840 : vector<2x256xf32>
    %842 = vector.broadcast %650 : vector<1x256xf32> to vector<2x256xf32>
    %843 = arith.addf %841, %842 : vector<2x256xf32>
    %c13_408 = arith.constant 13 : index
    %c0_409 = arith.constant 0 : index
    %c0_410 = arith.constant 0 : index
    %844 = vector.load %arg18[%c13_408, %c0_409, %c0_410] : memref<16x2x256xf32, #tpu.memory_space<vmem>>, vector<1x2x256xf32>
    %845 = vector.shape_cast %844 : vector<1x2x256xf32> to vector<2x256xf32>
    %846 = vector.shape_cast %843 : vector<2x256xf32> to vector<1x2x256xf32>
    tpu.vector_store %arg18[%c13_408, %c0_409, %c0_410], %846 {strides = array<i32>} : memref<16x2x256xf32, #tpu.memory_space<vmem>>, vector<1x2x256xf32>,
    %c14_411 = arith.constant 14 : index
    %c0_412 = arith.constant 0 : index
    %c0_413 = arith.constant 0 : index
    %847 = vector.load %arg19[%c14_411, %c0_412, %c0_413] : memref<16x2x64xf32, #tpu.memory_space<vmem>>, vector<1x2x64xf32>
    %848 = vector.shape_cast %847 : vector<1x2x64xf32> to vector<2x64xf32>
    %849 = arith.truncf %848 : vector<2x64xf32> to vector<2x64xbf16>
    %c1_414 = arith.constant 1 : index
    %c0_415 = arith.constant 0 : index
    %c0_416 = arith.constant 0 : index
    %850 = vector.load %arg19[%c1_414, %c0_415, %c0_416] : memref<16x2x64xf32, #tpu.memory_space<vmem>>, vector<1x2x64xf32>
    %851 = vector.shape_cast %850 : vector<1x2x64xf32> to vector<2x64xf32>
    %852 = arith.truncf %851 : vector<2x64xf32> to vector<2x64xbf16>
    %cst_417 = arith.constant dense<0.000000e+00> : vector<2x256xf32>
    %853 = tpu.matmul %849, %648, %cst_417 {dimension_numbers = #tpu.dot_dimension_numbers<[1], [0], [0], [1], [0, 0, 1, 1], [], []>} : vector<2x64xbf16>, vector<64x256xbf16>, vector<2x256xf32> -> vector<2x256xf32>
    %cst_418 = arith.constant dense<0.000000e+00> : vector<2x256xf32>
    %854 = tpu.matmul %852, %649, %cst_418 {dimension_numbers = #tpu.dot_dimension_numbers<[1], [0], [0], [1], [0, 0, 1, 1], [], []>} : vector<2x64xbf16>, vector<64x256xbf16>, vector<2x256xf32> -> vector<2x256xf32>
    %855 = arith.addf %853, %854 : vector<2x256xf32>
    %856 = vector.broadcast %650 : vector<1x256xf32> to vector<2x256xf32>
    %857 = arith.addf %855, %856 : vector<2x256xf32>
    %c14_419 = arith.constant 14 : index
    %c0_420 = arith.constant 0 : index
    %c0_421 = arith.constant 0 : index
    %858 = vector.load %arg18[%c14_419, %c0_420, %c0_421] : memref<16x2x256xf32, #tpu.memory_space<vmem>>, vector<1x2x256xf32>
    %859 = vector.shape_cast %858 : vector<1x2x256xf32> to vector<2x256xf32>
    %860 = vector.shape_cast %857 : vector<2x256xf32> to vector<1x2x256xf32>
    tpu.vector_store %arg18[%c14_419, %c0_420, %c0_421], %860 {strides = array<i32>} : memref<16x2x256xf32, #tpu.memory_space<vmem>>, vector<1x2x256xf32>,
    %c15_422 = arith.constant 15 : index
    %c0_423 = arith.constant 0 : index
    %c0_424 = arith.constant 0 : index
    %861 = vector.load %arg19[%c15_422, %c0_423, %c0_424] : memref<16x2x64xf32, #tpu.memory_space<vmem>>, vector<1x2x64xf32>
    %862 = vector.shape_cast %861 : vector<1x2x64xf32> to vector<2x64xf32>
    %863 = arith.truncf %862 : vector<2x64xf32> to vector<2x64xbf16>
    %c0_425 = arith.constant 0 : index
    %c0_426 = arith.constant 0 : index
    %c0_427 = arith.constant 0 : index
    %864 = vector.load %arg19[%c0_425, %c0_426, %c0_427] : memref<16x2x64xf32, #tpu.memory_space<vmem>>, vector<1x2x64xf32>
    %865 = vector.shape_cast %864 : vector<1x2x64xf32> to vector<2x64xf32>
    %866 = arith.truncf %865 : vector<2x64xf32> to vector<2x64xbf16>
    %cst_428 = arith.constant dense<0.000000e+00> : vector<2x256xf32>
    %867 = tpu.matmul %863, %648, %cst_428 {dimension_numbers = #tpu.dot_dimension_numbers<[1], [0], [0], [1], [0, 0, 1, 1], [], []>} : vector<2x64xbf16>, vector<64x256xbf16>, vector<2x256xf32> -> vector<2x256xf32>
    %cst_429 = arith.constant dense<0.000000e+00> : vector<2x256xf32>
    %868 = tpu.matmul %866, %649, %cst_429 {dimension_numbers = #tpu.dot_dimension_numbers<[1], [0], [0], [1], [0, 0, 1, 1], [], []>} : vector<2x64xbf16>, vector<64x256xbf16>, vector<2x256xf32> -> vector<2x256xf32>
    %869 = arith.addf %867, %868 : vector<2x256xf32>
    %870 = vector.broadcast %650 : vector<1x256xf32> to vector<2x256xf32>
    %871 = arith.addf %869, %870 : vector<2x256xf32>
    %c15_430 = arith.constant 15 : index
    %c0_431 = arith.constant 0 : index
    %c0_432 = arith.constant 0 : index
    %872 = vector.load %arg18[%c15_430, %c0_431, %c0_432] : memref<16x2x256xf32, #tpu.memory_space<vmem>>, vector<1x2x256xf32>
    %873 = vector.shape_cast %872 : vector<1x2x256xf32> to vector<2x256xf32>
    %874 = vector.shape_cast %871 : vector<2x256xf32> to vector<1x2x256xf32>
    tpu.vector_store %arg18[%c15_430, %c0_431, %c0_432], %874 {strides = array<i32>} : memref<16x2x256xf32, #tpu.memory_space<vmem>>, vector<1x2x256xf32>,
    %c0_433 = arith.constant 0 : index
    %c0_434 = arith.constant 0 : index
    %875 = vector.load %arg7[%c0_433, %c0_434] : memref<64x256xbf16, #tpu.memory_space<vmem>>, vector<64x256xbf16>
    %cst_435 = arith.constant 0.000000e+00 : f32
    %876 = vector.broadcast %cst_435 : f32 to vector<2x64xf32>
    %cst_436 = arith.constant 0.000000e+00 : f32
    %877 = vector.broadcast %cst_436 : f32 to vector<2x64xf32>
    %c0_437 = arith.constant 0 : index
    %c0_438 = arith.constant 0 : index
    %c0_439 = arith.constant 0 : index
    %878 = vector.load %arg18[%c0_437, %c0_438, %c0_439] : memref<16x2x256xf32, #tpu.memory_space<vmem>>, vector<1x2x256xf32>
    %879 = vector.shape_cast %878 : vector<1x2x256xf32> to vector<2x256xf32>
    %880 = arith.truncf %876 : vector<2x64xf32> to vector<2x64xbf16>
    %cst_440 = arith.constant dense<0.000000e+00> : vector<2x256xf32>
    %881 = tpu.matmul %880, %875, %cst_440 {dimension_numbers = #tpu.dot_dimension_numbers<[1], [0], [0], [1], [0, 0, 1, 1], [], []>} : vector<2x64xbf16>, vector<64x256xbf16>, vector<2x256xf32> -> vector<2x256xf32>
    %882 = arith.addf %879, %881 : vector<2x256xf32>
    %883 = arith.negf %882 : vector<2x256xf32>
    %884 = math.exp %883 : vector<2x256xf32>
    %cst_441 = arith.constant 1.000000e+00 : f32
    %885 = vector.broadcast %cst_441 : f32 to vector<2x256xf32>
    %886 = arith.addf %885, %884 : vector<2x256xf32>
    %887 = arith.divf %885, %886 : vector<2x256xf32>
    %888 = vector.extract_strided_slice %887 {offsets = [0, 0], sizes = [2, 64], strides = [1, 1]} : vector<2x256xf32> to vector<2x64xf32>
    %889 = vector.extract_strided_slice %887 {offsets = [0, 64], sizes = [2, 64], strides = [1, 1]} : vector<2x256xf32> to vector<2x64xf32>
    %890 = vector.extract_strided_slice %887 {offsets = [0, 192], sizes = [2, 64], strides = [1, 1]} : vector<2x256xf32> to vector<2x64xf32>
    %891 = vector.extract_strided_slice %882 {offsets = [0, 128], sizes = [2, 64], strides = [1, 1]} : vector<2x256xf32> to vector<2x64xf32>
    %892 = math.tanh %891 : vector<2x64xf32>
    %893 = arith.mulf %889, %877 : vector<2x64xf32>
    %894 = arith.mulf %888, %892 : vector<2x64xf32>
    %895 = arith.addf %893, %894 : vector<2x64xf32>
    %896 = math.tanh %895 : vector<2x64xf32>
    %897 = arith.mulf %890, %896 : vector<2x64xf32>
    %898 = vector.extract_strided_slice %897 {offsets = [0, 0], sizes = [2, 32], strides = [1, 1]} : vector<2x64xf32> to vector<2x32xf32>
    %c0_442 = arith.constant 0 : index
    %c0_443 = arith.constant 0 : index
    %c0_444 = arith.constant 0 : index
    %899 = vector.load %arg20[%c0_442, %c0_443, %c0_444] : memref<16x2x64xf32, #tpu.memory_space<vmem>>, vector<1x2x32xf32>
    %900 = vector.shape_cast %899 : vector<1x2x32xf32> to vector<2x32xf32>
    %901 = vector.shape_cast %898 : vector<2x32xf32> to vector<1x2x32xf32>
    tpu.vector_store %arg20[%c0_442, %c0_443, %c0_444], %901 {strides = array<i32>} : memref<16x2x64xf32, #tpu.memory_space<vmem>>, vector<1x2x32xf32>,
    %902 = vector.extract_strided_slice %897 {offsets = [0, 32], sizes = [2, 32], strides = [1, 1]} : vector<2x64xf32> to vector<2x32xf32>
    %c15_445 = arith.constant 15 : index
    %c0_446 = arith.constant 0 : index
    %c32_447 = arith.constant 32 : index
    %903 = vector.load %arg20[%c15_445, %c0_446, %c32_447] : memref<16x2x64xf32, #tpu.memory_space<vmem>>, vector<1x2x32xf32>
    %904 = vector.shape_cast %903 : vector<1x2x32xf32> to vector<2x32xf32>
    %905 = vector.shape_cast %902 : vector<2x32xf32> to vector<1x2x32xf32>
    tpu.vector_store %arg20[%c15_445, %c0_446, %c32_447], %905 {strides = array<i32>} : memref<16x2x64xf32, #tpu.memory_space<vmem>>, vector<1x2x32xf32>,
    %c1_448 = arith.constant 1 : index
    %c0_449 = arith.constant 0 : index
    %c0_450 = arith.constant 0 : index
    %906 = vector.load %arg18[%c1_448, %c0_449, %c0_450] : memref<16x2x256xf32, #tpu.memory_space<vmem>>, vector<1x2x256xf32>
    %907 = vector.shape_cast %906 : vector<1x2x256xf32> to vector<2x256xf32>
    %908 = arith.truncf %897 : vector<2x64xf32> to vector<2x64xbf16>
    %cst_451 = arith.constant dense<0.000000e+00> : vector<2x256xf32>
    %909 = tpu.matmul %908, %875, %cst_451 {dimension_numbers = #tpu.dot_dimension_numbers<[1], [0], [0], [1], [0, 0, 1, 1], [], []>} : vector<2x64xbf16>, vector<64x256xbf16>, vector<2x256xf32> -> vector<2x256xf32>
    %910 = arith.addf %907, %909 : vector<2x256xf32>
    %911 = arith.negf %910 : vector<2x256xf32>
    %912 = math.exp %911 : vector<2x256xf32>
    %cst_452 = arith.constant 1.000000e+00 : f32
    %913 = vector.broadcast %cst_452 : f32 to vector<2x256xf32>
    %914 = arith.addf %913, %912 : vector<2x256xf32>
    %915 = arith.divf %913, %914 : vector<2x256xf32>
    %916 = vector.extract_strided_slice %915 {offsets = [0, 0], sizes = [2, 64], strides = [1, 1]} : vector<2x256xf32> to vector<2x64xf32>
    %917 = vector.extract_strided_slice %915 {offsets = [0, 64], sizes = [2, 64], strides = [1, 1]} : vector<2x256xf32> to vector<2x64xf32>
    %918 = vector.extract_strided_slice %915 {offsets = [0, 192], sizes = [2, 64], strides = [1, 1]} : vector<2x256xf32> to vector<2x64xf32>
    %919 = vector.extract_strided_slice %910 {offsets = [0, 128], sizes = [2, 64], strides = [1, 1]} : vector<2x256xf32> to vector<2x64xf32>
    %920 = math.tanh %919 : vector<2x64xf32>
    %921 = arith.mulf %917, %895 : vector<2x64xf32>
    %922 = arith.mulf %916, %920 : vector<2x64xf32>
    %923 = arith.addf %921, %922 : vector<2x64xf32>
    %924 = math.tanh %923 : vector<2x64xf32>
    %925 = arith.mulf %918, %924 : vector<2x64xf32>
    %926 = vector.extract_strided_slice %925 {offsets = [0, 0], sizes = [2, 32], strides = [1, 1]} : vector<2x64xf32> to vector<2x32xf32>
    %c1_453 = arith.constant 1 : index
    %c0_454 = arith.constant 0 : index
    %c0_455 = arith.constant 0 : index
    %927 = vector.load %arg20[%c1_453, %c0_454, %c0_455] : memref<16x2x64xf32, #tpu.memory_space<vmem>>, vector<1x2x32xf32>
    %928 = vector.shape_cast %927 : vector<1x2x32xf32> to vector<2x32xf32>
    %929 = vector.shape_cast %926 : vector<2x32xf32> to vector<1x2x32xf32>
    tpu.vector_store %arg20[%c1_453, %c0_454, %c0_455], %929 {strides = array<i32>} : memref<16x2x64xf32, #tpu.memory_space<vmem>>, vector<1x2x32xf32>,
    %930 = vector.extract_strided_slice %925 {offsets = [0, 32], sizes = [2, 32], strides = [1, 1]} : vector<2x64xf32> to vector<2x32xf32>
    %c14_456 = arith.constant 14 : index
    %c0_457 = arith.constant 0 : index
    %c32_458 = arith.constant 32 : index
    %931 = vector.load %arg20[%c14_456, %c0_457, %c32_458] : memref<16x2x64xf32, #tpu.memory_space<vmem>>, vector<1x2x32xf32>
    %932 = vector.shape_cast %931 : vector<1x2x32xf32> to vector<2x32xf32>
    %933 = vector.shape_cast %930 : vector<2x32xf32> to vector<1x2x32xf32>
    tpu.vector_store %arg20[%c14_456, %c0_457, %c32_458], %933 {strides = array<i32>} : memref<16x2x64xf32, #tpu.memory_space<vmem>>, vector<1x2x32xf32>,
    %c2_459 = arith.constant 2 : index
    %c0_460 = arith.constant 0 : index
    %c0_461 = arith.constant 0 : index
    %934 = vector.load %arg18[%c2_459, %c0_460, %c0_461] : memref<16x2x256xf32, #tpu.memory_space<vmem>>, vector<1x2x256xf32>
    %935 = vector.shape_cast %934 : vector<1x2x256xf32> to vector<2x256xf32>
    %936 = arith.truncf %925 : vector<2x64xf32> to vector<2x64xbf16>
    %cst_462 = arith.constant dense<0.000000e+00> : vector<2x256xf32>
    %937 = tpu.matmul %936, %875, %cst_462 {dimension_numbers = #tpu.dot_dimension_numbers<[1], [0], [0], [1], [0, 0, 1, 1], [], []>} : vector<2x64xbf16>, vector<64x256xbf16>, vector<2x256xf32> -> vector<2x256xf32>
    %938 = arith.addf %935, %937 : vector<2x256xf32>
    %939 = arith.negf %938 : vector<2x256xf32>
    %940 = math.exp %939 : vector<2x256xf32>
    %cst_463 = arith.constant 1.000000e+00 : f32
    %941 = vector.broadcast %cst_463 : f32 to vector<2x256xf32>
    %942 = arith.addf %941, %940 : vector<2x256xf32>
    %943 = arith.divf %941, %942 : vector<2x256xf32>
    %944 = vector.extract_strided_slice %943 {offsets = [0, 0], sizes = [2, 64], strides = [1, 1]} : vector<2x256xf32> to vector<2x64xf32>
    %945 = vector.extract_strided_slice %943 {offsets = [0, 64], sizes = [2, 64], strides = [1, 1]} : vector<2x256xf32> to vector<2x64xf32>
    %946 = vector.extract_strided_slice %943 {offsets = [0, 192], sizes = [2, 64], strides = [1, 1]} : vector<2x256xf32> to vector<2x64xf32>
    %947 = vector.extract_strided_slice %938 {offsets = [0, 128], sizes = [2, 64], strides = [1, 1]} : vector<2x256xf32> to vector<2x64xf32>
    %948 = math.tanh %947 : vector<2x64xf32>
    %949 = arith.mulf %945, %923 : vector<2x64xf32>
    %950 = arith.mulf %944, %948 : vector<2x64xf32>
    %951 = arith.addf %949, %950 : vector<2x64xf32>
    %952 = math.tanh %951 : vector<2x64xf32>
    %953 = arith.mulf %946, %952 : vector<2x64xf32>
    %954 = vector.extract_strided_slice %953 {offsets = [0, 0], sizes = [2, 32], strides = [1, 1]} : vector<2x64xf32> to vector<2x32xf32>
    %c2_464 = arith.constant 2 : index
    %c0_465 = arith.constant 0 : index
    %c0_466 = arith.constant 0 : index
    %955 = vector.load %arg20[%c2_464, %c0_465, %c0_466] : memref<16x2x64xf32, #tpu.memory_space<vmem>>, vector<1x2x32xf32>
    %956 = vector.shape_cast %955 : vector<1x2x32xf32> to vector<2x32xf32>
    %957 = vector.shape_cast %954 : vector<2x32xf32> to vector<1x2x32xf32>
    tpu.vector_store %arg20[%c2_464, %c0_465, %c0_466], %957 {strides = array<i32>} : memref<16x2x64xf32, #tpu.memory_space<vmem>>, vector<1x2x32xf32>,
    %958 = vector.extract_strided_slice %953 {offsets = [0, 32], sizes = [2, 32], strides = [1, 1]} : vector<2x64xf32> to vector<2x32xf32>
    %c13_467 = arith.constant 13 : index
    %c0_468 = arith.constant 0 : index
    %c32_469 = arith.constant 32 : index
    %959 = vector.load %arg20[%c13_467, %c0_468, %c32_469] : memref<16x2x64xf32, #tpu.memory_space<vmem>>, vector<1x2x32xf32>
    %960 = vector.shape_cast %959 : vector<1x2x32xf32> to vector<2x32xf32>
    %961 = vector.shape_cast %958 : vector<2x32xf32> to vector<1x2x32xf32>
    tpu.vector_store %arg20[%c13_467, %c0_468, %c32_469], %961 {strides = array<i32>} : memref<16x2x64xf32, #tpu.memory_space<vmem>>, vector<1x2x32xf32>,
    %c3_470 = arith.constant 3 : index
    %c0_471 = arith.constant 0 : index
    %c0_472 = arith.constant 0 : index
    %962 = vector.load %arg18[%c3_470, %c0_471, %c0_472] : memref<16x2x256xf32, #tpu.memory_space<vmem>>, vector<1x2x256xf32>
    %963 = vector.shape_cast %962 : vector<1x2x256xf32> to vector<2x256xf32>
    %964 = arith.truncf %953 : vector<2x64xf32> to vector<2x64xbf16>
    %cst_473 = arith.constant dense<0.000000e+00> : vector<2x256xf32>
    %965 = tpu.matmul %964, %875, %cst_473 {dimension_numbers = #tpu.dot_dimension_numbers<[1], [0], [0], [1], [0, 0, 1, 1], [], []>} : vector<2x64xbf16>, vector<64x256xbf16>, vector<2x256xf32> -> vector<2x256xf32>
    %966 = arith.addf %963, %965 : vector<2x256xf32>
    %967 = arith.negf %966 : vector<2x256xf32>
    %968 = math.exp %967 : vector<2x256xf32>
    %cst_474 = arith.constant 1.000000e+00 : f32
    %969 = vector.broadcast %cst_474 : f32 to vector<2x256xf32>
    %970 = arith.addf %969, %968 : vector<2x256xf32>
    %971 = arith.divf %969, %970 : vector<2x256xf32>
    %972 = vector.extract_strided_slice %971 {offsets = [0, 0], sizes = [2, 64], strides = [1, 1]} : vector<2x256xf32> to vector<2x64xf32>
    %973 = vector.extract_strided_slice %971 {offsets = [0, 64], sizes = [2, 64], strides = [1, 1]} : vector<2x256xf32> to vector<2x64xf32>
    %974 = vector.extract_strided_slice %971 {offsets = [0, 192], sizes = [2, 64], strides = [1, 1]} : vector<2x256xf32> to vector<2x64xf32>
    %975 = vector.extract_strided_slice %966 {offsets = [0, 128], sizes = [2, 64], strides = [1, 1]} : vector<2x256xf32> to vector<2x64xf32>
    %976 = math.tanh %975 : vector<2x64xf32>
    %977 = arith.mulf %973, %951 : vector<2x64xf32>
    %978 = arith.mulf %972, %976 : vector<2x64xf32>
    %979 = arith.addf %977, %978 : vector<2x64xf32>
    %980 = math.tanh %979 : vector<2x64xf32>
    %981 = arith.mulf %974, %980 : vector<2x64xf32>
    %982 = vector.extract_strided_slice %981 {offsets = [0, 0], sizes = [2, 32], strides = [1, 1]} : vector<2x64xf32> to vector<2x32xf32>
    %c3_475 = arith.constant 3 : index
    %c0_476 = arith.constant 0 : index
    %c0_477 = arith.constant 0 : index
    %983 = vector.load %arg20[%c3_475, %c0_476, %c0_477] : memref<16x2x64xf32, #tpu.memory_space<vmem>>, vector<1x2x32xf32>
    %984 = vector.shape_cast %983 : vector<1x2x32xf32> to vector<2x32xf32>
    %985 = vector.shape_cast %982 : vector<2x32xf32> to vector<1x2x32xf32>
    tpu.vector_store %arg20[%c3_475, %c0_476, %c0_477], %985 {strides = array<i32>} : memref<16x2x64xf32, #tpu.memory_space<vmem>>, vector<1x2x32xf32>,
    %986 = vector.extract_strided_slice %981 {offsets = [0, 32], sizes = [2, 32], strides = [1, 1]} : vector<2x64xf32> to vector<2x32xf32>
    %c12_478 = arith.constant 12 : index
    %c0_479 = arith.constant 0 : index
    %c32_480 = arith.constant 32 : index
    %987 = vector.load %arg20[%c12_478, %c0_479, %c32_480] : memref<16x2x64xf32, #tpu.memory_space<vmem>>, vector<1x2x32xf32>
    %988 = vector.shape_cast %987 : vector<1x2x32xf32> to vector<2x32xf32>
    %989 = vector.shape_cast %986 : vector<2x32xf32> to vector<1x2x32xf32>
    tpu.vector_store %arg20[%c12_478, %c0_479, %c32_480], %989 {strides = array<i32>} : memref<16x2x64xf32, #tpu.memory_space<vmem>>, vector<1x2x32xf32>,
    %c4_481 = arith.constant 4 : index
    %c0_482 = arith.constant 0 : index
    %c0_483 = arith.constant 0 : index
    %990 = vector.load %arg18[%c4_481, %c0_482, %c0_483] : memref<16x2x256xf32, #tpu.memory_space<vmem>>, vector<1x2x256xf32>
    %991 = vector.shape_cast %990 : vector<1x2x256xf32> to vector<2x256xf32>
    %992 = arith.truncf %981 : vector<2x64xf32> to vector<2x64xbf16>
    %cst_484 = arith.constant dense<0.000000e+00> : vector<2x256xf32>
    %993 = tpu.matmul %992, %875, %cst_484 {dimension_numbers = #tpu.dot_dimension_numbers<[1], [0], [0], [1], [0, 0, 1, 1], [], []>} : vector<2x64xbf16>, vector<64x256xbf16>, vector<2x256xf32> -> vector<2x256xf32>
    %994 = arith.addf %991, %993 : vector<2x256xf32>
    %995 = arith.negf %994 : vector<2x256xf32>
    %996 = math.exp %995 : vector<2x256xf32>
    %cst_485 = arith.constant 1.000000e+00 : f32
    %997 = vector.broadcast %cst_485 : f32 to vector<2x256xf32>
    %998 = arith.addf %997, %996 : vector<2x256xf32>
    %999 = arith.divf %997, %998 : vector<2x256xf32>
    %1000 = vector.extract_strided_slice %999 {offsets = [0, 0], sizes = [2, 64], strides = [1, 1]} : vector<2x256xf32> to vector<2x64xf32>
    %1001 = vector.extract_strided_slice %999 {offsets = [0, 64], sizes = [2, 64], strides = [1, 1]} : vector<2x256xf32> to vector<2x64xf32>
    %1002 = vector.extract_strided_slice %999 {offsets = [0, 192], sizes = [2, 64], strides = [1, 1]} : vector<2x256xf32> to vector<2x64xf32>
    %1003 = vector.extract_strided_slice %994 {offsets = [0, 128], sizes = [2, 64], strides = [1, 1]} : vector<2x256xf32> to vector<2x64xf32>
    %1004 = math.tanh %1003 : vector<2x64xf32>
    %1005 = arith.mulf %1001, %979 : vector<2x64xf32>
    %1006 = arith.mulf %1000, %1004 : vector<2x64xf32>
    %1007 = arith.addf %1005, %1006 : vector<2x64xf32>
    %1008 = math.tanh %1007 : vector<2x64xf32>
    %1009 = arith.mulf %1002, %1008 : vector<2x64xf32>
    %1010 = vector.extract_strided_slice %1009 {offsets = [0, 0], sizes = [2, 32], strides = [1, 1]} : vector<2x64xf32> to vector<2x32xf32>
    %c4_486 = arith.constant 4 : index
    %c0_487 = arith.constant 0 : index
    %c0_488 = arith.constant 0 : index
    %1011 = vector.load %arg20[%c4_486, %c0_487, %c0_488] : memref<16x2x64xf32, #tpu.memory_space<vmem>>, vector<1x2x32xf32>
    %1012 = vector.shape_cast %1011 : vector<1x2x32xf32> to vector<2x32xf32>
    %1013 = vector.shape_cast %1010 : vector<2x32xf32> to vector<1x2x32xf32>
    tpu.vector_store %arg20[%c4_486, %c0_487, %c0_488], %1013 {strides = array<i32>} : memref<16x2x64xf32, #tpu.memory_space<vmem>>, vector<1x2x32xf32>,
    %1014 = vector.extract_strided_slice %1009 {offsets = [0, 32], sizes = [2, 32], strides = [1, 1]} : vector<2x64xf32> to vector<2x32xf32>
    %c11_489 = arith.constant 11 : index
    %c0_490 = arith.constant 0 : index
    %c32_491 = arith.constant 32 : index
    %1015 = vector.load %arg20[%c11_489, %c0_490, %c32_491] : memref<16x2x64xf32, #tpu.memory_space<vmem>>, vector<1x2x32xf32>
    %1016 = vector.shape_cast %1015 : vector<1x2x32xf32> to vector<2x32xf32>
    %1017 = vector.shape_cast %1014 : vector<2x32xf32> to vector<1x2x32xf32>
    tpu.vector_store %arg20[%c11_489, %c0_490, %c32_491], %1017 {strides = array<i32>} : memref<16x2x64xf32, #tpu.memory_space<vmem>>, vector<1x2x32xf32>,
    %c5_492 = arith.constant 5 : index
    %c0_493 = arith.constant 0 : index
    %c0_494 = arith.constant 0 : index
    %1018 = vector.load %arg18[%c5_492, %c0_493, %c0_494] : memref<16x2x256xf32, #tpu.memory_space<vmem>>, vector<1x2x256xf32>
    %1019 = vector.shape_cast %1018 : vector<1x2x256xf32> to vector<2x256xf32>
    %1020 = arith.truncf %1009 : vector<2x64xf32> to vector<2x64xbf16>
    %cst_495 = arith.constant dense<0.000000e+00> : vector<2x256xf32>
    %1021 = tpu.matmul %1020, %875, %cst_495 {dimension_numbers = #tpu.dot_dimension_numbers<[1], [0], [0], [1], [0, 0, 1, 1], [], []>} : vector<2x64xbf16>, vector<64x256xbf16>, vector<2x256xf32> -> vector<2x256xf32>
    %1022 = arith.addf %1019, %1021 : vector<2x256xf32>
    %1023 = arith.negf %1022 : vector<2x256xf32>
    %1024 = math.exp %1023 : vector<2x256xf32>
    %cst_496 = arith.constant 1.000000e+00 : f32
    %1025 = vector.broadcast %cst_496 : f32 to vector<2x256xf32>
    %1026 = arith.addf %1025, %1024 : vector<2x256xf32>
    %1027 = arith.divf %1025, %1026 : vector<2x256xf32>
    %1028 = vector.extract_strided_slice %1027 {offsets = [0, 0], sizes = [2, 64], strides = [1, 1]} : vector<2x256xf32> to vector<2x64xf32>
    %1029 = vector.extract_strided_slice %1027 {offsets = [0, 64], sizes = [2, 64], strides = [1, 1]} : vector<2x256xf32> to vector<2x64xf32>
    %1030 = vector.extract_strided_slice %1027 {offsets = [0, 192], sizes = [2, 64], strides = [1, 1]} : vector<2x256xf32> to vector<2x64xf32>
    %1031 = vector.extract_strided_slice %1022 {offsets = [0, 128], sizes = [2, 64], strides = [1, 1]} : vector<2x256xf32> to vector<2x64xf32>
    %1032 = math.tanh %1031 : vector<2x64xf32>
    %1033 = arith.mulf %1029, %1007 : vector<2x64xf32>
    %1034 = arith.mulf %1028, %1032 : vector<2x64xf32>
    %1035 = arith.addf %1033, %1034 : vector<2x64xf32>
    %1036 = math.tanh %1035 : vector<2x64xf32>
    %1037 = arith.mulf %1030, %1036 : vector<2x64xf32>
    %1038 = vector.extract_strided_slice %1037 {offsets = [0, 0], sizes = [2, 32], strides = [1, 1]} : vector<2x64xf32> to vector<2x32xf32>
    %c5_497 = arith.constant 5 : index
    %c0_498 = arith.constant 0 : index
    %c0_499 = arith.constant 0 : index
    %1039 = vector.load %arg20[%c5_497, %c0_498, %c0_499] : memref<16x2x64xf32, #tpu.memory_space<vmem>>, vector<1x2x32xf32>
    %1040 = vector.shape_cast %1039 : vector<1x2x32xf32> to vector<2x32xf32>
    %1041 = vector.shape_cast %1038 : vector<2x32xf32> to vector<1x2x32xf32>
    tpu.vector_store %arg20[%c5_497, %c0_498, %c0_499], %1041 {strides = array<i32>} : memref<16x2x64xf32, #tpu.memory_space<vmem>>, vector<1x2x32xf32>,
    %1042 = vector.extract_strided_slice %1037 {offsets = [0, 32], sizes = [2, 32], strides = [1, 1]} : vector<2x64xf32> to vector<2x32xf32>
    %c10_500 = arith.constant 10 : index
    %c0_501 = arith.constant 0 : index
    %c32_502 = arith.constant 32 : index
    %1043 = vector.load %arg20[%c10_500, %c0_501, %c32_502] : memref<16x2x64xf32, #tpu.memory_space<vmem>>, vector<1x2x32xf32>
    %1044 = vector.shape_cast %1043 : vector<1x2x32xf32> to vector<2x32xf32>
    %1045 = vector.shape_cast %1042 : vector<2x32xf32> to vector<1x2x32xf32>
    tpu.vector_store %arg20[%c10_500, %c0_501, %c32_502], %1045 {strides = array<i32>} : memref<16x2x64xf32, #tpu.memory_space<vmem>>, vector<1x2x32xf32>,
    %c6_503 = arith.constant 6 : index
    %c0_504 = arith.constant 0 : index
    %c0_505 = arith.constant 0 : index
    %1046 = vector.load %arg18[%c6_503, %c0_504, %c0_505] : memref<16x2x256xf32, #tpu.memory_space<vmem>>, vector<1x2x256xf32>
    %1047 = vector.shape_cast %1046 : vector<1x2x256xf32> to vector<2x256xf32>
    %1048 = arith.truncf %1037 : vector<2x64xf32> to vector<2x64xbf16>
    %cst_506 = arith.constant dense<0.000000e+00> : vector<2x256xf32>
    %1049 = tpu.matmul %1048, %875, %cst_506 {dimension_numbers = #tpu.dot_dimension_numbers<[1], [0], [0], [1], [0, 0, 1, 1], [], []>} : vector<2x64xbf16>, vector<64x256xbf16>, vector<2x256xf32> -> vector<2x256xf32>
    %1050 = arith.addf %1047, %1049 : vector<2x256xf32>
    %1051 = arith.negf %1050 : vector<2x256xf32>
    %1052 = math.exp %1051 : vector<2x256xf32>
    %cst_507 = arith.constant 1.000000e+00 : f32
    %1053 = vector.broadcast %cst_507 : f32 to vector<2x256xf32>
    %1054 = arith.addf %1053, %1052 : vector<2x256xf32>
    %1055 = arith.divf %1053, %1054 : vector<2x256xf32>
    %1056 = vector.extract_strided_slice %1055 {offsets = [0, 0], sizes = [2, 64], strides = [1, 1]} : vector<2x256xf32> to vector<2x64xf32>
    %1057 = vector.extract_strided_slice %1055 {offsets = [0, 64], sizes = [2, 64], strides = [1, 1]} : vector<2x256xf32> to vector<2x64xf32>
    %1058 = vector.extract_strided_slice %1055 {offsets = [0, 192], sizes = [2, 64], strides = [1, 1]} : vector<2x256xf32> to vector<2x64xf32>
    %1059 = vector.extract_strided_slice %1050 {offsets = [0, 128], sizes = [2, 64], strides = [1, 1]} : vector<2x256xf32> to vector<2x64xf32>
    %1060 = math.tanh %1059 : vector<2x64xf32>
    %1061 = arith.mulf %1057, %1035 : vector<2x64xf32>
    %1062 = arith.mulf %1056, %1060 : vector<2x64xf32>
    %1063 = arith.addf %1061, %1062 : vector<2x64xf32>
    %1064 = math.tanh %1063 : vector<2x64xf32>
    %1065 = arith.mulf %1058, %1064 : vector<2x64xf32>
    %1066 = vector.extract_strided_slice %1065 {offsets = [0, 0], sizes = [2, 32], strides = [1, 1]} : vector<2x64xf32> to vector<2x32xf32>
    %c6_508 = arith.constant 6 : index
    %c0_509 = arith.constant 0 : index
    %c0_510 = arith.constant 0 : index
    %1067 = vector.load %arg20[%c6_508, %c0_509, %c0_510] : memref<16x2x64xf32, #tpu.memory_space<vmem>>, vector<1x2x32xf32>
    %1068 = vector.shape_cast %1067 : vector<1x2x32xf32> to vector<2x32xf32>
    %1069 = vector.shape_cast %1066 : vector<2x32xf32> to vector<1x2x32xf32>
    tpu.vector_store %arg20[%c6_508, %c0_509, %c0_510], %1069 {strides = array<i32>} : memref<16x2x64xf32, #tpu.memory_space<vmem>>, vector<1x2x32xf32>,
    %1070 = vector.extract_strided_slice %1065 {offsets = [0, 32], sizes = [2, 32], strides = [1, 1]} : vector<2x64xf32> to vector<2x32xf32>
    %c9_511 = arith.constant 9 : index
    %c0_512 = arith.constant 0 : index
    %c32_513 = arith.constant 32 : index
    %1071 = vector.load %arg20[%c9_511, %c0_512, %c32_513] : memref<16x2x64xf32, #tpu.memory_space<vmem>>, vector<1x2x32xf32>
    %1072 = vector.shape_cast %1071 : vector<1x2x32xf32> to vector<2x32xf32>
    %1073 = vector.shape_cast %1070 : vector<2x32xf32> to vector<1x2x32xf32>
    tpu.vector_store %arg20[%c9_511, %c0_512, %c32_513], %1073 {strides = array<i32>} : memref<16x2x64xf32, #tpu.memory_space<vmem>>, vector<1x2x32xf32>,
    %c7_514 = arith.constant 7 : index
    %c0_515 = arith.constant 0 : index
    %c0_516 = arith.constant 0 : index
    %1074 = vector.load %arg18[%c7_514, %c0_515, %c0_516] : memref<16x2x256xf32, #tpu.memory_space<vmem>>, vector<1x2x256xf32>
    %1075 = vector.shape_cast %1074 : vector<1x2x256xf32> to vector<2x256xf32>
    %1076 = arith.truncf %1065 : vector<2x64xf32> to vector<2x64xbf16>
    %cst_517 = arith.constant dense<0.000000e+00> : vector<2x256xf32>
    %1077 = tpu.matmul %1076, %875, %cst_517 {dimension_numbers = #tpu.dot_dimension_numbers<[1], [0], [0], [1], [0, 0, 1, 1], [], []>} : vector<2x64xbf16>, vector<64x256xbf16>, vector<2x256xf32> -> vector<2x256xf32>
    %1078 = arith.addf %1075, %1077 : vector<2x256xf32>
    %1079 = arith.negf %1078 : vector<2x256xf32>
    %1080 = math.exp %1079 : vector<2x256xf32>
    %cst_518 = arith.constant 1.000000e+00 : f32
    %1081 = vector.broadcast %cst_518 : f32 to vector<2x256xf32>
    %1082 = arith.addf %1081, %1080 : vector<2x256xf32>
    %1083 = arith.divf %1081, %1082 : vector<2x256xf32>
    %1084 = vector.extract_strided_slice %1083 {offsets = [0, 0], sizes = [2, 64], strides = [1, 1]} : vector<2x256xf32> to vector<2x64xf32>
    %1085 = vector.extract_strided_slice %1083 {offsets = [0, 64], sizes = [2, 64], strides = [1, 1]} : vector<2x256xf32> to vector<2x64xf32>
    %1086 = vector.extract_strided_slice %1083 {offsets = [0, 192], sizes = [2, 64], strides = [1, 1]} : vector<2x256xf32> to vector<2x64xf32>
    %1087 = vector.extract_strided_slice %1078 {offsets = [0, 128], sizes = [2, 64], strides = [1, 1]} : vector<2x256xf32> to vector<2x64xf32>
    %1088 = math.tanh %1087 : vector<2x64xf32>
    %1089 = arith.mulf %1085, %1063 : vector<2x64xf32>
    %1090 = arith.mulf %1084, %1088 : vector<2x64xf32>
    %1091 = arith.addf %1089, %1090 : vector<2x64xf32>
    %1092 = math.tanh %1091 : vector<2x64xf32>
    %1093 = arith.mulf %1086, %1092 : vector<2x64xf32>
    %1094 = vector.extract_strided_slice %1093 {offsets = [0, 0], sizes = [2, 32], strides = [1, 1]} : vector<2x64xf32> to vector<2x32xf32>
    %c7_519 = arith.constant 7 : index
    %c0_520 = arith.constant 0 : index
    %c0_521 = arith.constant 0 : index
    %1095 = vector.load %arg20[%c7_519, %c0_520, %c0_521] : memref<16x2x64xf32, #tpu.memory_space<vmem>>, vector<1x2x32xf32>
    %1096 = vector.shape_cast %1095 : vector<1x2x32xf32> to vector<2x32xf32>
    %1097 = vector.shape_cast %1094 : vector<2x32xf32> to vector<1x2x32xf32>
    tpu.vector_store %arg20[%c7_519, %c0_520, %c0_521], %1097 {strides = array<i32>} : memref<16x2x64xf32, #tpu.memory_space<vmem>>, vector<1x2x32xf32>,
    %1098 = vector.extract_strided_slice %1093 {offsets = [0, 32], sizes = [2, 32], strides = [1, 1]} : vector<2x64xf32> to vector<2x32xf32>
    %c8_522 = arith.constant 8 : index
    %c0_523 = arith.constant 0 : index
    %c32_524 = arith.constant 32 : index
    %1099 = vector.load %arg20[%c8_522, %c0_523, %c32_524] : memref<16x2x64xf32, #tpu.memory_space<vmem>>, vector<1x2x32xf32>
    %1100 = vector.shape_cast %1099 : vector<1x2x32xf32> to vector<2x32xf32>
    %1101 = vector.shape_cast %1098 : vector<2x32xf32> to vector<1x2x32xf32>
    tpu.vector_store %arg20[%c8_522, %c0_523, %c32_524], %1101 {strides = array<i32>} : memref<16x2x64xf32, #tpu.memory_space<vmem>>, vector<1x2x32xf32>,
    %c8_525 = arith.constant 8 : index
    %c0_526 = arith.constant 0 : index
    %c0_527 = arith.constant 0 : index
    %1102 = vector.load %arg18[%c8_525, %c0_526, %c0_527] : memref<16x2x256xf32, #tpu.memory_space<vmem>>, vector<1x2x256xf32>
    %1103 = vector.shape_cast %1102 : vector<1x2x256xf32> to vector<2x256xf32>
    %1104 = arith.truncf %1093 : vector<2x64xf32> to vector<2x64xbf16>
    %cst_528 = arith.constant dense<0.000000e+00> : vector<2x256xf32>
    %1105 = tpu.matmul %1104, %875, %cst_528 {dimension_numbers = #tpu.dot_dimension_numbers<[1], [0], [0], [1], [0, 0, 1, 1], [], []>} : vector<2x64xbf16>, vector<64x256xbf16>, vector<2x256xf32> -> vector<2x256xf32>
    %1106 = arith.addf %1103, %1105 : vector<2x256xf32>
    %1107 = arith.negf %1106 : vector<2x256xf32>
    %1108 = math.exp %1107 : vector<2x256xf32>
    %cst_529 = arith.constant 1.000000e+00 : f32
    %1109 = vector.broadcast %cst_529 : f32 to vector<2x256xf32>
    %1110 = arith.addf %1109, %1108 : vector<2x256xf32>
    %1111 = arith.divf %1109, %1110 : vector<2x256xf32>
    %1112 = vector.extract_strided_slice %1111 {offsets = [0, 0], sizes = [2, 64], strides = [1, 1]} : vector<2x256xf32> to vector<2x64xf32>
    %1113 = vector.extract_strided_slice %1111 {offsets = [0, 64], sizes = [2, 64], strides = [1, 1]} : vector<2x256xf32> to vector<2x64xf32>
    %1114 = vector.extract_strided_slice %1111 {offsets = [0, 192], sizes = [2, 64], strides = [1, 1]} : vector<2x256xf32> to vector<2x64xf32>
    %1115 = vector.extract_strided_slice %1106 {offsets = [0, 128], sizes = [2, 64], strides = [1, 1]} : vector<2x256xf32> to vector<2x64xf32>
    %1116 = math.tanh %1115 : vector<2x64xf32>
    %1117 = arith.mulf %1113, %1091 : vector<2x64xf32>
    %1118 = arith.mulf %1112, %1116 : vector<2x64xf32>
    %1119 = arith.addf %1117, %1118 : vector<2x64xf32>
    %1120 = math.tanh %1119 : vector<2x64xf32>
    %1121 = arith.mulf %1114, %1120 : vector<2x64xf32>
    %1122 = vector.extract_strided_slice %1121 {offsets = [0, 0], sizes = [2, 32], strides = [1, 1]} : vector<2x64xf32> to vector<2x32xf32>
    %c8_530 = arith.constant 8 : index
    %c0_531 = arith.constant 0 : index
    %c0_532 = arith.constant 0 : index
    %1123 = vector.load %arg20[%c8_530, %c0_531, %c0_532] : memref<16x2x64xf32, #tpu.memory_space<vmem>>, vector<1x2x32xf32>
    %1124 = vector.shape_cast %1123 : vector<1x2x32xf32> to vector<2x32xf32>
    %1125 = vector.shape_cast %1122 : vector<2x32xf32> to vector<1x2x32xf32>
    tpu.vector_store %arg20[%c8_530, %c0_531, %c0_532], %1125 {strides = array<i32>} : memref<16x2x64xf32, #tpu.memory_space<vmem>>, vector<1x2x32xf32>,
    %1126 = vector.extract_strided_slice %1121 {offsets = [0, 32], sizes = [2, 32], strides = [1, 1]} : vector<2x64xf32> to vector<2x32xf32>
    %c7_533 = arith.constant 7 : index
    %c0_534 = arith.constant 0 : index
    %c32_535 = arith.constant 32 : index
    %1127 = vector.load %arg20[%c7_533, %c0_534, %c32_535] : memref<16x2x64xf32, #tpu.memory_space<vmem>>, vector<1x2x32xf32>
    %1128 = vector.shape_cast %1127 : vector<1x2x32xf32> to vector<2x32xf32>
    %1129 = vector.shape_cast %1126 : vector<2x32xf32> to vector<1x2x32xf32>
    tpu.vector_store %arg20[%c7_533, %c0_534, %c32_535], %1129 {strides = array<i32>} : memref<16x2x64xf32, #tpu.memory_space<vmem>>, vector<1x2x32xf32>,
    %c9_536 = arith.constant 9 : index
    %c0_537 = arith.constant 0 : index
    %c0_538 = arith.constant 0 : index
    %1130 = vector.load %arg18[%c9_536, %c0_537, %c0_538] : memref<16x2x256xf32, #tpu.memory_space<vmem>>, vector<1x2x256xf32>
    %1131 = vector.shape_cast %1130 : vector<1x2x256xf32> to vector<2x256xf32>
    %1132 = arith.truncf %1121 : vector<2x64xf32> to vector<2x64xbf16>
    %cst_539 = arith.constant dense<0.000000e+00> : vector<2x256xf32>
    %1133 = tpu.matmul %1132, %875, %cst_539 {dimension_numbers = #tpu.dot_dimension_numbers<[1], [0], [0], [1], [0, 0, 1, 1], [], []>} : vector<2x64xbf16>, vector<64x256xbf16>, vector<2x256xf32> -> vector<2x256xf32>
    %1134 = arith.addf %1131, %1133 : vector<2x256xf32>
    %1135 = arith.negf %1134 : vector<2x256xf32>
    %1136 = math.exp %1135 : vector<2x256xf32>
    %cst_540 = arith.constant 1.000000e+00 : f32
    %1137 = vector.broadcast %cst_540 : f32 to vector<2x256xf32>
    %1138 = arith.addf %1137, %1136 : vector<2x256xf32>
    %1139 = arith.divf %1137, %1138 : vector<2x256xf32>
    %1140 = vector.extract_strided_slice %1139 {offsets = [0, 0], sizes = [2, 64], strides = [1, 1]} : vector<2x256xf32> to vector<2x64xf32>
    %1141 = vector.extract_strided_slice %1139 {offsets = [0, 64], sizes = [2, 64], strides = [1, 1]} : vector<2x256xf32> to vector<2x64xf32>
    %1142 = vector.extract_strided_slice %1139 {offsets = [0, 192], sizes = [2, 64], strides = [1, 1]} : vector<2x256xf32> to vector<2x64xf32>
    %1143 = vector.extract_strided_slice %1134 {offsets = [0, 128], sizes = [2, 64], strides = [1, 1]} : vector<2x256xf32> to vector<2x64xf32>
    %1144 = math.tanh %1143 : vector<2x64xf32>
    %1145 = arith.mulf %1141, %1119 : vector<2x64xf32>
    %1146 = arith.mulf %1140, %1144 : vector<2x64xf32>
    %1147 = arith.addf %1145, %1146 : vector<2x64xf32>
    %1148 = math.tanh %1147 : vector<2x64xf32>
    %1149 = arith.mulf %1142, %1148 : vector<2x64xf32>
    %1150 = vector.extract_strided_slice %1149 {offsets = [0, 0], sizes = [2, 32], strides = [1, 1]} : vector<2x64xf32> to vector<2x32xf32>
    %c9_541 = arith.constant 9 : index
    %c0_542 = arith.constant 0 : index
    %c0_543 = arith.constant 0 : index
    %1151 = vector.load %arg20[%c9_541, %c0_542, %c0_543] : memref<16x2x64xf32, #tpu.memory_space<vmem>>, vector<1x2x32xf32>
    %1152 = vector.shape_cast %1151 : vector<1x2x32xf32> to vector<2x32xf32>
    %1153 = vector.shape_cast %1150 : vector<2x32xf32> to vector<1x2x32xf32>
    tpu.vector_store %arg20[%c9_541, %c0_542, %c0_543], %1153 {strides = array<i32>} : memref<16x2x64xf32, #tpu.memory_space<vmem>>, vector<1x2x32xf32>,
    %1154 = vector.extract_strided_slice %1149 {offsets = [0, 32], sizes = [2, 32], strides = [1, 1]} : vector<2x64xf32> to vector<2x32xf32>
    %c6_544 = arith.constant 6 : index
    %c0_545 = arith.constant 0 : index
    %c32_546 = arith.constant 32 : index
    %1155 = vector.load %arg20[%c6_544, %c0_545, %c32_546] : memref<16x2x64xf32, #tpu.memory_space<vmem>>, vector<1x2x32xf32>
    %1156 = vector.shape_cast %1155 : vector<1x2x32xf32> to vector<2x32xf32>
    %1157 = vector.shape_cast %1154 : vector<2x32xf32> to vector<1x2x32xf32>
    tpu.vector_store %arg20[%c6_544, %c0_545, %c32_546], %1157 {strides = array<i32>} : memref<16x2x64xf32, #tpu.memory_space<vmem>>, vector<1x2x32xf32>,
    %c10_547 = arith.constant 10 : index
    %c0_548 = arith.constant 0 : index
    %c0_549 = arith.constant 0 : index
    %1158 = vector.load %arg18[%c10_547, %c0_548, %c0_549] : memref<16x2x256xf32, #tpu.memory_space<vmem>>, vector<1x2x256xf32>
    %1159 = vector.shape_cast %1158 : vector<1x2x256xf32> to vector<2x256xf32>
    %1160 = arith.truncf %1149 : vector<2x64xf32> to vector<2x64xbf16>
    %cst_550 = arith.constant dense<0.000000e+00> : vector<2x256xf32>
    %1161 = tpu.matmul %1160, %875, %cst_550 {dimension_numbers = #tpu.dot_dimension_numbers<[1], [0], [0], [1], [0, 0, 1, 1], [], []>} : vector<2x64xbf16>, vector<64x256xbf16>, vector<2x256xf32> -> vector<2x256xf32>
    %1162 = arith.addf %1159, %1161 : vector<2x256xf32>
    %1163 = arith.negf %1162 : vector<2x256xf32>
    %1164 = math.exp %1163 : vector<2x256xf32>
    %cst_551 = arith.constant 1.000000e+00 : f32
    %1165 = vector.broadcast %cst_551 : f32 to vector<2x256xf32>
    %1166 = arith.addf %1165, %1164 : vector<2x256xf32>
    %1167 = arith.divf %1165, %1166 : vector<2x256xf32>
    %1168 = vector.extract_strided_slice %1167 {offsets = [0, 0], sizes = [2, 64], strides = [1, 1]} : vector<2x256xf32> to vector<2x64xf32>
    %1169 = vector.extract_strided_slice %1167 {offsets = [0, 64], sizes = [2, 64], strides = [1, 1]} : vector<2x256xf32> to vector<2x64xf32>
    %1170 = vector.extract_strided_slice %1167 {offsets = [0, 192], sizes = [2, 64], strides = [1, 1]} : vector<2x256xf32> to vector<2x64xf32>
    %1171 = vector.extract_strided_slice %1162 {offsets = [0, 128], sizes = [2, 64], strides = [1, 1]} : vector<2x256xf32> to vector<2x64xf32>
    %1172 = math.tanh %1171 : vector<2x64xf32>
    %1173 = arith.mulf %1169, %1147 : vector<2x64xf32>
    %1174 = arith.mulf %1168, %1172 : vector<2x64xf32>
    %1175 = arith.addf %1173, %1174 : vector<2x64xf32>
    %1176 = math.tanh %1175 : vector<2x64xf32>
    %1177 = arith.mulf %1170, %1176 : vector<2x64xf32>
    %1178 = vector.extract_strided_slice %1177 {offsets = [0, 0], sizes = [2, 32], strides = [1, 1]} : vector<2x64xf32> to vector<2x32xf32>
    %c10_552 = arith.constant 10 : index
    %c0_553 = arith.constant 0 : index
    %c0_554 = arith.constant 0 : index
    %1179 = vector.load %arg20[%c10_552, %c0_553, %c0_554] : memref<16x2x64xf32, #tpu.memory_space<vmem>>, vector<1x2x32xf32>
    %1180 = vector.shape_cast %1179 : vector<1x2x32xf32> to vector<2x32xf32>
    %1181 = vector.shape_cast %1178 : vector<2x32xf32> to vector<1x2x32xf32>
    tpu.vector_store %arg20[%c10_552, %c0_553, %c0_554], %1181 {strides = array<i32>} : memref<16x2x64xf32, #tpu.memory_space<vmem>>, vector<1x2x32xf32>,
    %1182 = vector.extract_strided_slice %1177 {offsets = [0, 32], sizes = [2, 32], strides = [1, 1]} : vector<2x64xf32> to vector<2x32xf32>
    %c5_555 = arith.constant 5 : index
    %c0_556 = arith.constant 0 : index
    %c32_557 = arith.constant 32 : index
    %1183 = vector.load %arg20[%c5_555, %c0_556, %c32_557] : memref<16x2x64xf32, #tpu.memory_space<vmem>>, vector<1x2x32xf32>
    %1184 = vector.shape_cast %1183 : vector<1x2x32xf32> to vector<2x32xf32>
    %1185 = vector.shape_cast %1182 : vector<2x32xf32> to vector<1x2x32xf32>
    tpu.vector_store %arg20[%c5_555, %c0_556, %c32_557], %1185 {strides = array<i32>} : memref<16x2x64xf32, #tpu.memory_space<vmem>>, vector<1x2x32xf32>,
    %c11_558 = arith.constant 11 : index
    %c0_559 = arith.constant 0 : index
    %c0_560 = arith.constant 0 : index
    %1186 = vector.load %arg18[%c11_558, %c0_559, %c0_560] : memref<16x2x256xf32, #tpu.memory_space<vmem>>, vector<1x2x256xf32>
    %1187 = vector.shape_cast %1186 : vector<1x2x256xf32> to vector<2x256xf32>
    %1188 = arith.truncf %1177 : vector<2x64xf32> to vector<2x64xbf16>
    %cst_561 = arith.constant dense<0.000000e+00> : vector<2x256xf32>
    %1189 = tpu.matmul %1188, %875, %cst_561 {dimension_numbers = #tpu.dot_dimension_numbers<[1], [0], [0], [1], [0, 0, 1, 1], [], []>} : vector<2x64xbf16>, vector<64x256xbf16>, vector<2x256xf32> -> vector<2x256xf32>
    %1190 = arith.addf %1187, %1189 : vector<2x256xf32>
    %1191 = arith.negf %1190 : vector<2x256xf32>
    %1192 = math.exp %1191 : vector<2x256xf32>
    %cst_562 = arith.constant 1.000000e+00 : f32
    %1193 = vector.broadcast %cst_562 : f32 to vector<2x256xf32>
    %1194 = arith.addf %1193, %1192 : vector<2x256xf32>
    %1195 = arith.divf %1193, %1194 : vector<2x256xf32>
    %1196 = vector.extract_strided_slice %1195 {offsets = [0, 0], sizes = [2, 64], strides = [1, 1]} : vector<2x256xf32> to vector<2x64xf32>
    %1197 = vector.extract_strided_slice %1195 {offsets = [0, 64], sizes = [2, 64], strides = [1, 1]} : vector<2x256xf32> to vector<2x64xf32>
    %1198 = vector.extract_strided_slice %1195 {offsets = [0, 192], sizes = [2, 64], strides = [1, 1]} : vector<2x256xf32> to vector<2x64xf32>
    %1199 = vector.extract_strided_slice %1190 {offsets = [0, 128], sizes = [2, 64], strides = [1, 1]} : vector<2x256xf32> to vector<2x64xf32>
    %1200 = math.tanh %1199 : vector<2x64xf32>
    %1201 = arith.mulf %1197, %1175 : vector<2x64xf32>
    %1202 = arith.mulf %1196, %1200 : vector<2x64xf32>
    %1203 = arith.addf %1201, %1202 : vector<2x64xf32>
    %1204 = math.tanh %1203 : vector<2x64xf32>
    %1205 = arith.mulf %1198, %1204 : vector<2x64xf32>
    %1206 = vector.extract_strided_slice %1205 {offsets = [0, 0], sizes = [2, 32], strides = [1, 1]} : vector<2x64xf32> to vector<2x32xf32>
    %c11_563 = arith.constant 11 : index
    %c0_564 = arith.constant 0 : index
    %c0_565 = arith.constant 0 : index
    %1207 = vector.load %arg20[%c11_563, %c0_564, %c0_565] : memref<16x2x64xf32, #tpu.memory_space<vmem>>, vector<1x2x32xf32>
    %1208 = vector.shape_cast %1207 : vector<1x2x32xf32> to vector<2x32xf32>
    %1209 = vector.shape_cast %1206 : vector<2x32xf32> to vector<1x2x32xf32>
    tpu.vector_store %arg20[%c11_563, %c0_564, %c0_565], %1209 {strides = array<i32>} : memref<16x2x64xf32, #tpu.memory_space<vmem>>, vector<1x2x32xf32>,
    %1210 = vector.extract_strided_slice %1205 {offsets = [0, 32], sizes = [2, 32], strides = [1, 1]} : vector<2x64xf32> to vector<2x32xf32>
    %c4_566 = arith.constant 4 : index
    %c0_567 = arith.constant 0 : index
    %c32_568 = arith.constant 32 : index
    %1211 = vector.load %arg20[%c4_566, %c0_567, %c32_568] : memref<16x2x64xf32, #tpu.memory_space<vmem>>, vector<1x2x32xf32>
    %1212 = vector.shape_cast %1211 : vector<1x2x32xf32> to vector<2x32xf32>
    %1213 = vector.shape_cast %1210 : vector<2x32xf32> to vector<1x2x32xf32>
    tpu.vector_store %arg20[%c4_566, %c0_567, %c32_568], %1213 {strides = array<i32>} : memref<16x2x64xf32, #tpu.memory_space<vmem>>, vector<1x2x32xf32>,
    %c12_569 = arith.constant 12 : index
    %c0_570 = arith.constant 0 : index
    %c0_571 = arith.constant 0 : index
    %1214 = vector.load %arg18[%c12_569, %c0_570, %c0_571] : memref<16x2x256xf32, #tpu.memory_space<vmem>>, vector<1x2x256xf32>
    %1215 = vector.shape_cast %1214 : vector<1x2x256xf32> to vector<2x256xf32>
    %1216 = arith.truncf %1205 : vector<2x64xf32> to vector<2x64xbf16>
    %cst_572 = arith.constant dense<0.000000e+00> : vector<2x256xf32>
    %1217 = tpu.matmul %1216, %875, %cst_572 {dimension_numbers = #tpu.dot_dimension_numbers<[1], [0], [0], [1], [0, 0, 1, 1], [], []>} : vector<2x64xbf16>, vector<64x256xbf16>, vector<2x256xf32> -> vector<2x256xf32>
    %1218 = arith.addf %1215, %1217 : vector<2x256xf32>
    %1219 = arith.negf %1218 : vector<2x256xf32>
    %1220 = math.exp %1219 : vector<2x256xf32>
    %cst_573 = arith.constant 1.000000e+00 : f32
    %1221 = vector.broadcast %cst_573 : f32 to vector<2x256xf32>
    %1222 = arith.addf %1221, %1220 : vector<2x256xf32>
    %1223 = arith.divf %1221, %1222 : vector<2x256xf32>
    %1224 = vector.extract_strided_slice %1223 {offsets = [0, 0], sizes = [2, 64], strides = [1, 1]} : vector<2x256xf32> to vector<2x64xf32>
    %1225 = vector.extract_strided_slice %1223 {offsets = [0, 64], sizes = [2, 64], strides = [1, 1]} : vector<2x256xf32> to vector<2x64xf32>
    %1226 = vector.extract_strided_slice %1223 {offsets = [0, 192], sizes = [2, 64], strides = [1, 1]} : vector<2x256xf32> to vector<2x64xf32>
    %1227 = vector.extract_strided_slice %1218 {offsets = [0, 128], sizes = [2, 64], strides = [1, 1]} : vector<2x256xf32> to vector<2x64xf32>
    %1228 = math.tanh %1227 : vector<2x64xf32>
    %1229 = arith.mulf %1225, %1203 : vector<2x64xf32>
    %1230 = arith.mulf %1224, %1228 : vector<2x64xf32>
    %1231 = arith.addf %1229, %1230 : vector<2x64xf32>
    %1232 = math.tanh %1231 : vector<2x64xf32>
    %1233 = arith.mulf %1226, %1232 : vector<2x64xf32>
    %1234 = vector.extract_strided_slice %1233 {offsets = [0, 0], sizes = [2, 32], strides = [1, 1]} : vector<2x64xf32> to vector<2x32xf32>
    %c12_574 = arith.constant 12 : index
    %c0_575 = arith.constant 0 : index
    %c0_576 = arith.constant 0 : index
    %1235 = vector.load %arg20[%c12_574, %c0_575, %c0_576] : memref<16x2x64xf32, #tpu.memory_space<vmem>>, vector<1x2x32xf32>
    %1236 = vector.shape_cast %1235 : vector<1x2x32xf32> to vector<2x32xf32>
    %1237 = vector.shape_cast %1234 : vector<2x32xf32> to vector<1x2x32xf32>
    tpu.vector_store %arg20[%c12_574, %c0_575, %c0_576], %1237 {strides = array<i32>} : memref<16x2x64xf32, #tpu.memory_space<vmem>>, vector<1x2x32xf32>,
    %1238 = vector.extract_strided_slice %1233 {offsets = [0, 32], sizes = [2, 32], strides = [1, 1]} : vector<2x64xf32> to vector<2x32xf32>
    %c3_577 = arith.constant 3 : index
    %c0_578 = arith.constant 0 : index
    %c32_579 = arith.constant 32 : index
    %1239 = vector.load %arg20[%c3_577, %c0_578, %c32_579] : memref<16x2x64xf32, #tpu.memory_space<vmem>>, vector<1x2x32xf32>
    %1240 = vector.shape_cast %1239 : vector<1x2x32xf32> to vector<2x32xf32>
    %1241 = vector.shape_cast %1238 : vector<2x32xf32> to vector<1x2x32xf32>
    tpu.vector_store %arg20[%c3_577, %c0_578, %c32_579], %1241 {strides = array<i32>} : memref<16x2x64xf32, #tpu.memory_space<vmem>>, vector<1x2x32xf32>,
    %c13_580 = arith.constant 13 : index
    %c0_581 = arith.constant 0 : index
    %c0_582 = arith.constant 0 : index
    %1242 = vector.load %arg18[%c13_580, %c0_581, %c0_582] : memref<16x2x256xf32, #tpu.memory_space<vmem>>, vector<1x2x256xf32>
    %1243 = vector.shape_cast %1242 : vector<1x2x256xf32> to vector<2x256xf32>
    %1244 = arith.truncf %1233 : vector<2x64xf32> to vector<2x64xbf16>
    %cst_583 = arith.constant dense<0.000000e+00> : vector<2x256xf32>
    %1245 = tpu.matmul %1244, %875, %cst_583 {dimension_numbers = #tpu.dot_dimension_numbers<[1], [0], [0], [1], [0, 0, 1, 1], [], []>} : vector<2x64xbf16>, vector<64x256xbf16>, vector<2x256xf32> -> vector<2x256xf32>
    %1246 = arith.addf %1243, %1245 : vector<2x256xf32>
    %1247 = arith.negf %1246 : vector<2x256xf32>
    %1248 = math.exp %1247 : vector<2x256xf32>
    %cst_584 = arith.constant 1.000000e+00 : f32
    %1249 = vector.broadcast %cst_584 : f32 to vector<2x256xf32>
    %1250 = arith.addf %1249, %1248 : vector<2x256xf32>
    %1251 = arith.divf %1249, %1250 : vector<2x256xf32>
    %1252 = vector.extract_strided_slice %1251 {offsets = [0, 0], sizes = [2, 64], strides = [1, 1]} : vector<2x256xf32> to vector<2x64xf32>
    %1253 = vector.extract_strided_slice %1251 {offsets = [0, 64], sizes = [2, 64], strides = [1, 1]} : vector<2x256xf32> to vector<2x64xf32>
    %1254 = vector.extract_strided_slice %1251 {offsets = [0, 192], sizes = [2, 64], strides = [1, 1]} : vector<2x256xf32> to vector<2x64xf32>
    %1255 = vector.extract_strided_slice %1246 {offsets = [0, 128], sizes = [2, 64], strides = [1, 1]} : vector<2x256xf32> to vector<2x64xf32>
    %1256 = math.tanh %1255 : vector<2x64xf32>
    %1257 = arith.mulf %1253, %1231 : vector<2x64xf32>
    %1258 = arith.mulf %1252, %1256 : vector<2x64xf32>
    %1259 = arith.addf %1257, %1258 : vector<2x64xf32>
    %1260 = math.tanh %1259 : vector<2x64xf32>
    %1261 = arith.mulf %1254, %1260 : vector<2x64xf32>
    %1262 = vector.extract_strided_slice %1261 {offsets = [0, 0], sizes = [2, 32], strides = [1, 1]} : vector<2x64xf32> to vector<2x32xf32>
    %c13_585 = arith.constant 13 : index
    %c0_586 = arith.constant 0 : index
    %c0_587 = arith.constant 0 : index
    %1263 = vector.load %arg20[%c13_585, %c0_586, %c0_587] : memref<16x2x64xf32, #tpu.memory_space<vmem>>, vector<1x2x32xf32>
    %1264 = vector.shape_cast %1263 : vector<1x2x32xf32> to vector<2x32xf32>
    %1265 = vector.shape_cast %1262 : vector<2x32xf32> to vector<1x2x32xf32>
    tpu.vector_store %arg20[%c13_585, %c0_586, %c0_587], %1265 {strides = array<i32>} : memref<16x2x64xf32, #tpu.memory_space<vmem>>, vector<1x2x32xf32>,
    %1266 = vector.extract_strided_slice %1261 {offsets = [0, 32], sizes = [2, 32], strides = [1, 1]} : vector<2x64xf32> to vector<2x32xf32>
    %c2_588 = arith.constant 2 : index
    %c0_589 = arith.constant 0 : index
    %c32_590 = arith.constant 32 : index
    %1267 = vector.load %arg20[%c2_588, %c0_589, %c32_590] : memref<16x2x64xf32, #tpu.memory_space<vmem>>, vector<1x2x32xf32>
    %1268 = vector.shape_cast %1267 : vector<1x2x32xf32> to vector<2x32xf32>
    %1269 = vector.shape_cast %1266 : vector<2x32xf32> to vector<1x2x32xf32>
    tpu.vector_store %arg20[%c2_588, %c0_589, %c32_590], %1269 {strides = array<i32>} : memref<16x2x64xf32, #tpu.memory_space<vmem>>, vector<1x2x32xf32>,
    %c14_591 = arith.constant 14 : index
    %c0_592 = arith.constant 0 : index
    %c0_593 = arith.constant 0 : index
    %1270 = vector.load %arg18[%c14_591, %c0_592, %c0_593] : memref<16x2x256xf32, #tpu.memory_space<vmem>>, vector<1x2x256xf32>
    %1271 = vector.shape_cast %1270 : vector<1x2x256xf32> to vector<2x256xf32>
    %1272 = arith.truncf %1261 : vector<2x64xf32> to vector<2x64xbf16>
    %cst_594 = arith.constant dense<0.000000e+00> : vector<2x256xf32>
    %1273 = tpu.matmul %1272, %875, %cst_594 {dimension_numbers = #tpu.dot_dimension_numbers<[1], [0], [0], [1], [0, 0, 1, 1], [], []>} : vector<2x64xbf16>, vector<64x256xbf16>, vector<2x256xf32> -> vector<2x256xf32>
    %1274 = arith.addf %1271, %1273 : vector<2x256xf32>
    %1275 = arith.negf %1274 : vector<2x256xf32>
    %1276 = math.exp %1275 : vector<2x256xf32>
    %cst_595 = arith.constant 1.000000e+00 : f32
    %1277 = vector.broadcast %cst_595 : f32 to vector<2x256xf32>
    %1278 = arith.addf %1277, %1276 : vector<2x256xf32>
    %1279 = arith.divf %1277, %1278 : vector<2x256xf32>
    %1280 = vector.extract_strided_slice %1279 {offsets = [0, 0], sizes = [2, 64], strides = [1, 1]} : vector<2x256xf32> to vector<2x64xf32>
    %1281 = vector.extract_strided_slice %1279 {offsets = [0, 64], sizes = [2, 64], strides = [1, 1]} : vector<2x256xf32> to vector<2x64xf32>
    %1282 = vector.extract_strided_slice %1279 {offsets = [0, 192], sizes = [2, 64], strides = [1, 1]} : vector<2x256xf32> to vector<2x64xf32>
    %1283 = vector.extract_strided_slice %1274 {offsets = [0, 128], sizes = [2, 64], strides = [1, 1]} : vector<2x256xf32> to vector<2x64xf32>
    %1284 = math.tanh %1283 : vector<2x64xf32>
    %1285 = arith.mulf %1281, %1259 : vector<2x64xf32>
    %1286 = arith.mulf %1280, %1284 : vector<2x64xf32>
    %1287 = arith.addf %1285, %1286 : vector<2x64xf32>
    %1288 = math.tanh %1287 : vector<2x64xf32>
    %1289 = arith.mulf %1282, %1288 : vector<2x64xf32>
    %1290 = vector.extract_strided_slice %1289 {offsets = [0, 0], sizes = [2, 32], strides = [1, 1]} : vector<2x64xf32> to vector<2x32xf32>
    %c14_596 = arith.constant 14 : index
    %c0_597 = arith.constant 0 : index
    %c0_598 = arith.constant 0 : index
    %1291 = vector.load %arg20[%c14_596, %c0_597, %c0_598] : memref<16x2x64xf32, #tpu.memory_space<vmem>>, vector<1x2x32xf32>
    %1292 = vector.shape_cast %1291 : vector<1x2x32xf32> to vector<2x32xf32>
    %1293 = vector.shape_cast %1290 : vector<2x32xf32> to vector<1x2x32xf32>
    tpu.vector_store %arg20[%c14_596, %c0_597, %c0_598], %1293 {strides = array<i32>} : memref<16x2x64xf32, #tpu.memory_space<vmem>>, vector<1x2x32xf32>,
    %1294 = vector.extract_strided_slice %1289 {offsets = [0, 32], sizes = [2, 32], strides = [1, 1]} : vector<2x64xf32> to vector<2x32xf32>
    %c1_599 = arith.constant 1 : index
    %c0_600 = arith.constant 0 : index
    %c32_601 = arith.constant 32 : index
    %1295 = vector.load %arg20[%c1_599, %c0_600, %c32_601] : memref<16x2x64xf32, #tpu.memory_space<vmem>>, vector<1x2x32xf32>
    %1296 = vector.shape_cast %1295 : vector<1x2x32xf32> to vector<2x32xf32>
    %1297 = vector.shape_cast %1294 : vector<2x32xf32> to vector<1x2x32xf32>
    tpu.vector_store %arg20[%c1_599, %c0_600, %c32_601], %1297 {strides = array<i32>} : memref<16x2x64xf32, #tpu.memory_space<vmem>>, vector<1x2x32xf32>,
    %c15_602 = arith.constant 15 : index
    %c0_603 = arith.constant 0 : index
    %c0_604 = arith.constant 0 : index
    %1298 = vector.load %arg18[%c15_602, %c0_603, %c0_604] : memref<16x2x256xf32, #tpu.memory_space<vmem>>, vector<1x2x256xf32>
    %1299 = vector.shape_cast %1298 : vector<1x2x256xf32> to vector<2x256xf32>
    %1300 = arith.truncf %1289 : vector<2x64xf32> to vector<2x64xbf16>
    %cst_605 = arith.constant dense<0.000000e+00> : vector<2x256xf32>
    %1301 = tpu.matmul %1300, %875, %cst_605 {dimension_numbers = #tpu.dot_dimension_numbers<[1], [0], [0], [1], [0, 0, 1, 1], [], []>} : vector<2x64xbf16>, vector<64x256xbf16>, vector<2x256xf32> -> vector<2x256xf32>
    %1302 = arith.addf %1299, %1301 : vector<2x256xf32>
    %1303 = arith.negf %1302 : vector<2x256xf32>
    %1304 = math.exp %1303 : vector<2x256xf32>
    %cst_606 = arith.constant 1.000000e+00 : f32
    %1305 = vector.broadcast %cst_606 : f32 to vector<2x256xf32>
    %1306 = arith.addf %1305, %1304 : vector<2x256xf32>
    %1307 = arith.divf %1305, %1306 : vector<2x256xf32>
    %1308 = vector.extract_strided_slice %1307 {offsets = [0, 0], sizes = [2, 64], strides = [1, 1]} : vector<2x256xf32> to vector<2x64xf32>
    %1309 = vector.extract_strided_slice %1307 {offsets = [0, 64], sizes = [2, 64], strides = [1, 1]} : vector<2x256xf32> to vector<2x64xf32>
    %1310 = vector.extract_strided_slice %1307 {offsets = [0, 192], sizes = [2, 64], strides = [1, 1]} : vector<2x256xf32> to vector<2x64xf32>
    %1311 = vector.extract_strided_slice %1302 {offsets = [0, 128], sizes = [2, 64], strides = [1, 1]} : vector<2x256xf32> to vector<2x64xf32>
    %1312 = math.tanh %1311 : vector<2x64xf32>
    %1313 = arith.mulf %1309, %1287 : vector<2x64xf32>
    %1314 = arith.mulf %1308, %1312 : vector<2x64xf32>
    %1315 = arith.addf %1313, %1314 : vector<2x64xf32>
    %1316 = math.tanh %1315 : vector<2x64xf32>
    %1317 = arith.mulf %1310, %1316 : vector<2x64xf32>
    %1318 = vector.extract_strided_slice %1317 {offsets = [0, 0], sizes = [2, 32], strides = [1, 1]} : vector<2x64xf32> to vector<2x32xf32>
    %c15_607 = arith.constant 15 : index
    %c0_608 = arith.constant 0 : index
    %c0_609 = arith.constant 0 : index
    %1319 = vector.load %arg20[%c15_607, %c0_608, %c0_609] : memref<16x2x64xf32, #tpu.memory_space<vmem>>, vector<1x2x32xf32>
    %1320 = vector.shape_cast %1319 : vector<1x2x32xf32> to vector<2x32xf32>
    %1321 = vector.shape_cast %1318 : vector<2x32xf32> to vector<1x2x32xf32>
    tpu.vector_store %arg20[%c15_607, %c0_608, %c0_609], %1321 {strides = array<i32>} : memref<16x2x64xf32, #tpu.memory_space<vmem>>, vector<1x2x32xf32>,
    %1322 = vector.extract_strided_slice %1317 {offsets = [0, 32], sizes = [2, 32], strides = [1, 1]} : vector<2x64xf32> to vector<2x32xf32>
    %c0_610 = arith.constant 0 : index
    %c0_611 = arith.constant 0 : index
    %c32_612 = arith.constant 32 : index
    %1323 = vector.load %arg20[%c0_610, %c0_611, %c32_612] : memref<16x2x64xf32, #tpu.memory_space<vmem>>, vector<1x2x32xf32>
    %1324 = vector.shape_cast %1323 : vector<1x2x32xf32> to vector<2x32xf32>
    %1325 = vector.shape_cast %1322 : vector<2x32xf32> to vector<1x2x32xf32>
    tpu.vector_store %arg20[%c0_610, %c0_611, %c32_612], %1325 {strides = array<i32>} : memref<16x2x64xf32, #tpu.memory_space<vmem>>, vector<1x2x32xf32>,
    %c0_613 = arith.constant 0 : index
    %c0_614 = arith.constant 0 : index
    %c0_615 = arith.constant 0 : index
    %1326 = vector.load %arg20[%c0_613, %c0_614, %c0_615] : memref<16x2x64xf32, #tpu.memory_space<vmem>>, vector<16x2x64xf32>
    %1327 = arith.truncf %1326 : vector<16x2x64xf32> to vector<16x2x64xbf16>
    %1328 = vector.extract_strided_slice %1327 {offsets = [0, 0, 0], sizes = [16, 1, 64], strides = [1, 1, 1]} : vector<16x2x64xbf16> to vector<16x1x64xbf16>
    %1329 = vector.shape_cast %1328 : vector<16x1x64xbf16> to vector<16x64xbf16>
    %1330 = tpu.transpose %1329, [1, 0] : vector<16x64xbf16> -> vector<64x16xbf16>
    %1331 = vector.extract_strided_slice %1327 {offsets = [0, 1, 0], sizes = [16, 1, 64], strides = [1, 1, 1]} : vector<16x2x64xbf16> to vector<16x1x64xbf16>
    %1332 = vector.shape_cast %1331 : vector<16x1x64xbf16> to vector<16x64xbf16>
    %1333 = tpu.transpose %1332, [1, 0] : vector<16x64xbf16> -> vector<64x16xbf16>
    %1334 = vector.extract_strided_slice %1330 {offsets = [0, 0], sizes = [60, 16], strides = [1, 1]} : vector<64x16xbf16> to vector<60x16xbf16>
    %1335 = vector.extract_strided_slice %1330 {offsets = [1, 0], sizes = [60, 16], strides = [1, 1]} : vector<64x16xbf16> to vector<60x16xbf16>
    %1336 = vector.extract_strided_slice %1330 {offsets = [2, 0], sizes = [60, 16], strides = [1, 1]} : vector<64x16xbf16> to vector<60x16xbf16>
    %1337 = vector.extract_strided_slice %1330 {offsets = [3, 0], sizes = [60, 16], strides = [1, 1]} : vector<64x16xbf16> to vector<60x16xbf16>
    %1338 = vector.extract_strided_slice %1330 {offsets = [4, 0], sizes = [60, 16], strides = [1, 1]} : vector<64x16xbf16> to vector<60x16xbf16>
    %1339 = tpu.concatenate %1334, %1335, %1336, %1337, %1338 in 1 : vector<60x16xbf16>, vector<60x16xbf16>, vector<60x16xbf16>, vector<60x16xbf16>, vector<60x16xbf16> -> vector<60x80xbf16>
    %1340 = vector.extract_strided_slice %1333 {offsets = [0, 0], sizes = [60, 16], strides = [1, 1]} : vector<64x16xbf16> to vector<60x16xbf16>
    %1341 = vector.extract_strided_slice %1333 {offsets = [1, 0], sizes = [60, 16], strides = [1, 1]} : vector<64x16xbf16> to vector<60x16xbf16>
    %1342 = vector.extract_strided_slice %1333 {offsets = [2, 0], sizes = [60, 16], strides = [1, 1]} : vector<64x16xbf16> to vector<60x16xbf16>
    %1343 = vector.extract_strided_slice %1333 {offsets = [3, 0], sizes = [60, 16], strides = [1, 1]} : vector<64x16xbf16> to vector<60x16xbf16>
    %1344 = vector.extract_strided_slice %1333 {offsets = [4, 0], sizes = [60, 16], strides = [1, 1]} : vector<64x16xbf16> to vector<60x16xbf16>
    %1345 = tpu.concatenate %1340, %1341, %1342, %1343, %1344 in 1 : vector<60x16xbf16>, vector<60x16xbf16>, vector<60x16xbf16>, vector<60x16xbf16>, vector<60x16xbf16> -> vector<60x80xbf16>
    %1346 = tpu.concatenate %1339, %1345 in 0 : vector<60x80xbf16>, vector<60x80xbf16> -> vector<120x80xbf16>
    %c0_616 = arith.constant 0 : index
    %c0_617 = arith.constant 0 : index
    %1347 = vector.load %arg9[%c0_616, %c0_617] : memref<80x128xbf16, #tpu.memory_space<vmem>>, vector<80x128xbf16>
    %cst_618 = arith.constant dense<0.000000e+00> : vector<120x128xf32>
    %1348 = tpu.matmul %1346, %1347, %cst_618 {dimension_numbers = #tpu.dot_dimension_numbers<[1], [0], [0], [1], [0, 0, 1, 1], [], []>} : vector<120x80xbf16>, vector<80x128xbf16>, vector<120x128xf32> -> vector<120x128xf32>
    %c0_619 = arith.constant 0 : index
    %c0_620 = arith.constant 0 : index
    %1349 = vector.load %arg10[%c0_619, %c0_620] : memref<1x128xf32, #tpu.memory_space<vmem>>, vector<1x128xf32>
    %1350 = vector.broadcast %1349 : vector<1x128xf32> to vector<120x128xf32>
    %1351 = arith.addf %1348, %1350 : vector<120x128xf32>
    %cst_621 = arith.constant 0.000000e+00 : f32
    %1352 = vector.broadcast %cst_621 : f32 to vector<120x128xf32>
    %1353 = arith.maximumf %1351, %1352 : vector<120x128xf32>
    %1354 = vector.extract_strided_slice %1353 {offsets = [0, 0], sizes = [118, 128], strides = [1, 1]} : vector<120x128xf32> to vector<118x128xf32>
    %1355 = vector.extract_strided_slice %1353 {offsets = [1, 0], sizes = [118, 128], strides = [1, 1]} : vector<120x128xf32> to vector<118x128xf32>
    %1356 = arith.maximumf %1354, %1355 : vector<118x128xf32>
    %1357 = vector.extract_strided_slice %1353 {offsets = [2, 0], sizes = [118, 128], strides = [1, 1]} : vector<120x128xf32> to vector<118x128xf32>
    %1358 = arith.maximumf %1356, %1357 : vector<118x128xf32>
    %1359 = vector.extract_strided_slice %1358 {offsets = [0, 0], sizes = [1, 128], strides = [1, 1]} : vector<118x128xf32> to vector<1x128xf32>
    %1360 = vector.extract_strided_slice %1358 {offsets = [3, 0], sizes = [1, 128], strides = [1, 1]} : vector<118x128xf32> to vector<1x128xf32>
    %1361 = vector.extract_strided_slice %1358 {offsets = [6, 0], sizes = [1, 128], strides = [1, 1]} : vector<118x128xf32> to vector<1x128xf32>
    %1362 = vector.extract_strided_slice %1358 {offsets = [9, 0], sizes = [1, 128], strides = [1, 1]} : vector<118x128xf32> to vector<1x128xf32>
    %1363 = vector.extract_strided_slice %1358 {offsets = [12, 0], sizes = [1, 128], strides = [1, 1]} : vector<118x128xf32> to vector<1x128xf32>
    %1364 = vector.extract_strided_slice %1358 {offsets = [15, 0], sizes = [1, 128], strides = [1, 1]} : vector<118x128xf32> to vector<1x128xf32>
    %1365 = vector.extract_strided_slice %1358 {offsets = [18, 0], sizes = [1, 128], strides = [1, 1]} : vector<118x128xf32> to vector<1x128xf32>
    %1366 = vector.extract_strided_slice %1358 {offsets = [21, 0], sizes = [1, 128], strides = [1, 1]} : vector<118x128xf32> to vector<1x128xf32>
    %1367 = vector.extract_strided_slice %1358 {offsets = [24, 0], sizes = [1, 128], strides = [1, 1]} : vector<118x128xf32> to vector<1x128xf32>
    %1368 = vector.extract_strided_slice %1358 {offsets = [27, 0], sizes = [1, 128], strides = [1, 1]} : vector<118x128xf32> to vector<1x128xf32>
    %1369 = vector.extract_strided_slice %1358 {offsets = [30, 0], sizes = [1, 128], strides = [1, 1]} : vector<118x128xf32> to vector<1x128xf32>
    %1370 = vector.extract_strided_slice %1358 {offsets = [33, 0], sizes = [1, 128], strides = [1, 1]} : vector<118x128xf32> to vector<1x128xf32>
    %1371 = vector.extract_strided_slice %1358 {offsets = [36, 0], sizes = [1, 128], strides = [1, 1]} : vector<118x128xf32> to vector<1x128xf32>
    %1372 = vector.extract_strided_slice %1358 {offsets = [39, 0], sizes = [1, 128], strides = [1, 1]} : vector<118x128xf32> to vector<1x128xf32>
    %1373 = vector.extract_strided_slice %1358 {offsets = [42, 0], sizes = [1, 128], strides = [1, 1]} : vector<118x128xf32> to vector<1x128xf32>
    %1374 = vector.extract_strided_slice %1358 {offsets = [45, 0], sizes = [1, 128], strides = [1, 1]} : vector<118x128xf32> to vector<1x128xf32>
    %1375 = vector.extract_strided_slice %1358 {offsets = [48, 0], sizes = [1, 128], strides = [1, 1]} : vector<118x128xf32> to vector<1x128xf32>
    %1376 = vector.extract_strided_slice %1358 {offsets = [51, 0], sizes = [1, 128], strides = [1, 1]} : vector<118x128xf32> to vector<1x128xf32>
    %1377 = vector.extract_strided_slice %1358 {offsets = [54, 0], sizes = [1, 128], strides = [1, 1]} : vector<118x128xf32> to vector<1x128xf32>
    %1378 = vector.extract_strided_slice %1358 {offsets = [57, 0], sizes = [1, 128], strides = [1, 1]} : vector<118x128xf32> to vector<1x128xf32>
    %1379 = vector.extract_strided_slice %1358 {offsets = [60, 0], sizes = [1, 128], strides = [1, 1]} : vector<118x128xf32> to vector<1x128xf32>
    %1380 = vector.extract_strided_slice %1358 {offsets = [63, 0], sizes = [1, 128], strides = [1, 1]} : vector<118x128xf32> to vector<1x128xf32>
    %1381 = vector.extract_strided_slice %1358 {offsets = [66, 0], sizes = [1, 128], strides = [1, 1]} : vector<118x128xf32> to vector<1x128xf32>
    %1382 = vector.extract_strided_slice %1358 {offsets = [69, 0], sizes = [1, 128], strides = [1, 1]} : vector<118x128xf32> to vector<1x128xf32>
    %1383 = vector.extract_strided_slice %1358 {offsets = [72, 0], sizes = [1, 128], strides = [1, 1]} : vector<118x128xf32> to vector<1x128xf32>
    %1384 = vector.extract_strided_slice %1358 {offsets = [75, 0], sizes = [1, 128], strides = [1, 1]} : vector<118x128xf32> to vector<1x128xf32>
    %1385 = vector.extract_strided_slice %1358 {offsets = [78, 0], sizes = [1, 128], strides = [1, 1]} : vector<118x128xf32> to vector<1x128xf32>
    %1386 = vector.extract_strided_slice %1358 {offsets = [81, 0], sizes = [1, 128], strides = [1, 1]} : vector<118x128xf32> to vector<1x128xf32>
    %1387 = vector.extract_strided_slice %1358 {offsets = [84, 0], sizes = [1, 128], strides = [1, 1]} : vector<118x128xf32> to vector<1x128xf32>
    %1388 = vector.extract_strided_slice %1358 {offsets = [87, 0], sizes = [1, 128], strides = [1, 1]} : vector<118x128xf32> to vector<1x128xf32>
    %1389 = vector.extract_strided_slice %1358 {offsets = [90, 0], sizes = [1, 128], strides = [1, 1]} : vector<118x128xf32> to vector<1x128xf32>
    %1390 = vector.extract_strided_slice %1358 {offsets = [93, 0], sizes = [1, 128], strides = [1, 1]} : vector<118x128xf32> to vector<1x128xf32>
    %1391 = vector.extract_strided_slice %1358 {offsets = [96, 0], sizes = [1, 128], strides = [1, 1]} : vector<118x128xf32> to vector<1x128xf32>
    %1392 = vector.extract_strided_slice %1358 {offsets = [99, 0], sizes = [1, 128], strides = [1, 1]} : vector<118x128xf32> to vector<1x128xf32>
    %1393 = vector.extract_strided_slice %1358 {offsets = [102, 0], sizes = [1, 128], strides = [1, 1]} : vector<118x128xf32> to vector<1x128xf32>
    %1394 = vector.extract_strided_slice %1358 {offsets = [105, 0], sizes = [1, 128], strides = [1, 1]} : vector<118x128xf32> to vector<1x128xf32>
    %1395 = vector.extract_strided_slice %1358 {offsets = [108, 0], sizes = [1, 128], strides = [1, 1]} : vector<118x128xf32> to vector<1x128xf32>
    %1396 = vector.extract_strided_slice %1358 {offsets = [111, 0], sizes = [1, 128], strides = [1, 1]} : vector<118x128xf32> to vector<1x128xf32>
    %1397 = vector.extract_strided_slice %1358 {offsets = [114, 0], sizes = [1, 128], strides = [1, 1]} : vector<118x128xf32> to vector<1x128xf32>
    %1398 = vector.extract_strided_slice %1358 {offsets = [117, 0], sizes = [1, 128], strides = [1, 1]} : vector<118x128xf32> to vector<1x128xf32>
    %1399 = tpu.concatenate %1359, %1360, %1361, %1362, %1363, %1364, %1365, %1366, %1367, %1368, %1369, %1370, %1371, %1372, %1373, %1374 in 0 : vector<1x128xf32>, vector<1x128xf32>, vector<1x128xf32>, vector<1x128xf32>, vector<1x128xf32>, vector<1x128xf32>, vector<1x128xf32>, vector<1x128xf32>, vector<1x128xf32>, vector<1x128xf32>, vector<1x128xf32>, vector<1x128xf32>, vector<1x128xf32>, vector<1x128xf32>, vector<1x128xf32>, vector<1x128xf32> -> vector<16x128xf32>
    %1400 = tpu.concatenate %1375, %1376, %1377, %1378, %1379, %1380, %1381, %1382, %1383, %1384, %1385, %1386, %1387, %1388, %1389, %1390 in 0 : vector<1x128xf32>, vector<1x128xf32>, vector<1x128xf32>, vector<1x128xf32>, vector<1x128xf32>, vector<1x128xf32>, vector<1x128xf32>, vector<1x128xf32>, vector<1x128xf32>, vector<1x128xf32>, vector<1x128xf32>, vector<1x128xf32>, vector<1x128xf32>, vector<1x128xf32>, vector<1x128xf32>, vector<1x128xf32> -> vector<16x128xf32>
    %1401 = tpu.concatenate %1391, %1392, %1393, %1394, %1395, %1396, %1397, %1398 in 0 : vector<1x128xf32>, vector<1x128xf32>, vector<1x128xf32>, vector<1x128xf32>, vector<1x128xf32>, vector<1x128xf32>, vector<1x128xf32>, vector<1x128xf32> -> vector<8x128xf32>
    %1402 = tpu.concatenate %1399, %1400, %1401 in 0 : vector<16x128xf32>, vector<16x128xf32>, vector<8x128xf32> -> vector<40x128xf32>
    %1403 = vector.extract_strided_slice %1402 {offsets = [0, 0], sizes = [18, 128], strides = [1, 1]} : vector<40x128xf32> to vector<18x128xf32>
    %1404 = vector.extract_strided_slice %1402 {offsets = [1, 0], sizes = [18, 128], strides = [1, 1]} : vector<40x128xf32> to vector<18x128xf32>
    %1405 = vector.extract_strided_slice %1402 {offsets = [2, 0], sizes = [18, 128], strides = [1, 1]} : vector<40x128xf32> to vector<18x128xf32>
    %1406 = tpu.concatenate %1403, %1404, %1405 in 1 : vector<18x128xf32>, vector<18x128xf32>, vector<18x128xf32> -> vector<18x384xf32>
    %1407 = vector.extract_strided_slice %1402 {offsets = [20, 0], sizes = [18, 128], strides = [1, 1]} : vector<40x128xf32> to vector<18x128xf32>
    %1408 = vector.extract_strided_slice %1402 {offsets = [21, 0], sizes = [18, 128], strides = [1, 1]} : vector<40x128xf32> to vector<18x128xf32>
    %1409 = vector.extract_strided_slice %1402 {offsets = [22, 0], sizes = [18, 128], strides = [1, 1]} : vector<40x128xf32> to vector<18x128xf32>
    %1410 = tpu.concatenate %1407, %1408, %1409 in 1 : vector<18x128xf32>, vector<18x128xf32>, vector<18x128xf32> -> vector<18x384xf32>
    %1411 = tpu.concatenate %1406, %1410 in 0 : vector<18x384xf32>, vector<18x384xf32> -> vector<36x384xf32>
    %1412 = arith.truncf %1411 : vector<36x384xf32> to vector<36x384xbf16>
    %c0_622 = arith.constant 0 : index
    %c0_623 = arith.constant 0 : index
    %1413 = vector.load %arg11[%c0_622, %c0_623] : memref<384x64xbf16, #tpu.memory_space<vmem>>, vector<384x64xbf16>
    %cst_624 = arith.constant dense<0.000000e+00> : vector<36x64xf32>
    %1414 = tpu.matmul %1412, %1413, %cst_624 {dimension_numbers = #tpu.dot_dimension_numbers<[1], [0], [0], [1], [0, 0, 1, 1], [], []>} : vector<36x384xbf16>, vector<384x64xbf16>, vector<36x64xf32> -> vector<36x64xf32>
    %c0_625 = arith.constant 0 : index
    %c0_626 = arith.constant 0 : index
    %1415 = vector.load %arg12[%c0_625, %c0_626] : memref<1x64xf32, #tpu.memory_space<vmem>>, vector<1x64xf32>
    %1416 = vector.broadcast %1415 : vector<1x64xf32> to vector<36x64xf32>
    %1417 = arith.addf %1414, %1416 : vector<36x64xf32>
    %cst_627 = arith.constant 0.000000e+00 : f32
    %1418 = vector.broadcast %cst_627 : f32 to vector<36x64xf32>
    %1419 = arith.maximumf %1417, %1418 : vector<36x64xf32>
    %1420 = vector.extract_strided_slice %1419 {offsets = [0, 0], sizes = [18, 64], strides = [1, 1]} : vector<36x64xf32> to vector<18x64xf32>
    %cst_628 = arith.constant dense<0xFF800000> : vector<64xf32>
    %1421 = vector.multi_reduction <maximumf>, %1420, %cst_628 [0] : vector<18x64xf32> to vector<64xf32>
    %1422 = vector.shape_cast %1421 : vector<64xf32> to vector<1x64xf32>
    %1423 = vector.extract_strided_slice %1419 {offsets = [18, 0], sizes = [18, 64], strides = [1, 1]} : vector<36x64xf32> to vector<18x64xf32>
    %cst_629 = arith.constant dense<0xFF800000> : vector<64xf32>
    %1424 = vector.multi_reduction <maximumf>, %1423, %cst_629 [0] : vector<18x64xf32> to vector<64xf32>
    %1425 = vector.shape_cast %1424 : vector<64xf32> to vector<1x64xf32>
    %1426 = tpu.concatenate %1422, %1425 in 0 : vector<1x64xf32>, vector<1x64xf32> -> vector<2x64xf32>
    %1427 = arith.truncf %1426 : vector<2x64xf32> to vector<2x64xbf16>
    %c0_630 = arith.constant 0 : index
    %c0_631 = arith.constant 0 : index
    %1428 = vector.load %arg13[%c0_630, %c0_631] : memref<64x32xbf16, #tpu.memory_space<vmem>>, vector<64x32xbf16>
    %cst_632 = arith.constant dense<0.000000e+00> : vector<2x32xf32>
    %1429 = tpu.matmul %1427, %1428, %cst_632 {dimension_numbers = #tpu.dot_dimension_numbers<[1], [0], [0], [1], [0, 0, 1, 1], [], []>} : vector<2x64xbf16>, vector<64x32xbf16>, vector<2x32xf32> -> vector<2x32xf32>
    %c0_633 = arith.constant 0 : index
    %c0_634 = arith.constant 0 : index
    %1430 = vector.load %arg14[%c0_633, %c0_634] : memref<1x32xf32, #tpu.memory_space<vmem>>, vector<1x32xf32>
    %1431 = vector.broadcast %1430 : vector<1x32xf32> to vector<2x32xf32>
    %1432 = arith.addf %1429, %1431 : vector<2x32xf32>
    %cst_635 = arith.constant 0.000000e+00 : f32
    %1433 = vector.broadcast %cst_635 : f32 to vector<2x32xf32>
    %1434 = arith.maximumf %1432, %1433 : vector<2x32xf32>
    %1435 = arith.truncf %1434 : vector<2x32xf32> to vector<2x32xbf16>
    %c0_636 = arith.constant 0 : index
    %c0_637 = arith.constant 0 : index
    %1436 = vector.load %arg15[%c0_636, %c0_637] : memref<32x4xbf16, #tpu.memory_space<vmem>>, vector<32x4xbf16>
    %cst_638 = arith.constant dense<0.000000e+00> : vector<2x4xf32>
    %1437 = tpu.matmul %1435, %1436, %cst_638 {dimension_numbers = #tpu.dot_dimension_numbers<[1], [0], [0], [1], [0, 0, 1, 1], [], []>} : vector<2x32xbf16>, vector<32x4xbf16>, vector<2x4xf32> -> vector<2x4xf32>
    %c0_639 = arith.constant 0 : index
    %c0_640 = arith.constant 0 : index
    %1438 = vector.load %arg16[%c0_639, %c0_640] : memref<1x4xf32, #tpu.memory_space<vmem>>, vector<1x4xf32>
    %1439 = vector.broadcast %1438 : vector<1x4xf32> to vector<2x4xf32>
    %1440 = arith.addf %1437, %1439 : vector<2x4xf32>
    %c0_641 = arith.constant 0 : index
    %c0_642 = arith.constant 0 : index
    %1441 = vector.load %arg17[%c0_641, %c0_642] : memref<2x4xf32, #tpu.memory_space<vmem>>, vector<2x4xf32>
    tpu.vector_store %arg17[%c0_641, %c0_642], %1440 {strides = array<i32>} : memref<2x4xf32, #tpu.memory_space<vmem>>, vector<2x4xf32>,
    return
  }
}

</mosaic_0001>

<bundles_post_ra>
// kernel: forward.1
= control target key start
LH: loop header
LB: loop body
LE: loop exit
PB: predicated region body
PF: predicated region fallthrough
CT: control target
= control target key end

     0   :  { %s11516_s0 = inlined_call_operand.hbm [shape: f32[2,16,64], index: 0, kind: input, shape index: {}]   ;;  %s11517_s1 = inlined_call_operand.vmem [shape: bf16[64,256], index: 1, kind: input, shape index: {}]   ;;  %s11518_s2 = inlined_call_operand.vmem [shape: bf16[64,256], index: 2, kind: input, shape index: {}]   ;;  %s11519_s3 = inlined_call_operand.vmem [shape: bf16[64,256], index: 3, kind: input, shape index: {}]   ;;  %s11520_s4 = inlined_call_operand.hbm [shape: f32[1,256], index: 4, kind: input, shape index: {}]   ;;  %s11521_s5 = inlined_call_operand.vmem [shape: bf16[64,256], index: 5, kind: input, shape index: {}]   ;;  %s11522_s6 = inlined_call_operand.vmem [shape: bf16[64,256], index: 6, kind: input, shape index: {}]   ;;  %s11523_s7 = inlined_call_operand.vmem [shape: bf16[64,256], index: 7, kind: input, shape index: {}]   ;;  %s11524_s8 = inlined_call_operand.vmem [shape: f32[1,256], index: 8, kind: input, shape index: {}]   ;;  %s11525_s9 = inlined_call_operand.hbm [shape: bf16[80,128], index: 9, kind: input, shape index: {}]   ;;  %s11526_s10 = inlined_call_operand.hbm [shape: f32[1,128], index: 10, kind: input, shape index: {}]   ;;  %s11527_s11 = inlined_call_operand.vmem [shape: bf16[384,64], index: 11, kind: input, shape index: {}]   ;;  %s11528_s12 = inlined_call_operand.hbm [shape: f32[1,64], index: 12, kind: input, shape index: {}]   ;;  %s11529_s13 = inlined_call_operand.vmem [shape: bf16[64,32], index: 13, kind: input, shape index: {}]   ;;  %s11530_s14 = inlined_call_operand.hbm [shape: f32[1,32], index: 14, kind: input, shape index: {}]   ;;  %s11531_s15 = inlined_call_operand.vmem [shape: bf16[32,4], index: 15, kind: input, shape index: {}]   ;;  %s11532_s16 = inlined_call_operand.hbm [shape: f32[1,4], index: 16, kind: input, shape index: {}]   ;;  %s11533_s17 = inlined_call_operand.hbm [shape: f32[2,4], index: 17, kind: output, shape index: {}]  }
   0x1   :  { %11536 = sst [smem:[#allocation23_spill]] %s11516_s0 }
   0x2   :  { %11537 = sst [smem:[#allocation24_spill]] %s11517_s1 }
   0x3   :  { %22 = vsyncpa [#allocation6], 0 }
   0x4   :  { %23 = vsyncpa [#allocation9], 0 }
   0x5   :  { %24 = vsyncpa [#allocation12], 0 }
   0x6   :  { %25 = vsyncpa [#allocation15], 0 }
   0x7   :  { %26 = vsyncpa [#allocation7], 0  ;;  %s9098_s24 = smov [#allocation8]   ;;  %s9099_s26 = smov [#allocation11]  }
   0x8   :  { %s51_s25 = sshll.u32 %s9098_s24, 4  ;;  %s81_s27 = sshll.u32 %s9099_s26, 4  ;;  %s52_s25 = int_to_ptr.vmem [resolvable:$true] %s51_s25  ;;  %s82_s27 = int_to_ptr.vmem [resolvable:$true] %s81_s27 }
   0x9   :  { %s8912_s0 = scalar_lea.hbm %s11520_s4, 32 }
   0xa   :  { %p8913_p0 = scmp.ne.s32.totalorder %s11520_s4, %s8912_s0  ;;  %p8916_p1 = scmp.lt.u32.totalorder %s8912_s0, %s11520_s4 }
   0xc   :  { %p8918_p2 = pnand %p8916_p1, %p8913_p0 }
   0xe   :  { %8921 = shalt.err (!%p8918_p2)
}
   0xf   :  { %s8922_s20 = scalar_lea.vmem %s52_s25, 32  ;;  %p8927_p4 = scmp.lt.s32.totalorder %s52_s25, %s52_s25 }
  0x10   :  { %p8923_p3 = scmp.ne.s32.totalorder %s52_s25, %s8922_s20  ;;  %p8928_p5 = scmp.lt.s32.totalorder %s8922_s20, %s8922_s20 }
  0x12   :  { %p8929_p6 = por %p8928_p5, %p8927_p4 }
  0x14   :  { %p8930_p7 = pnand %p8929_p6, %p8923_p3 }
  0x16   :  { %8933 = shalt.err (!%p8930_p7)
}
  0x17   :  { %54 = dma.hbm_to_vmem [thread:$0]  %s11520_s4, 32, %s52_s25, [#allocation9]  }
  0x18   :  { %s8934_s26 = scalar_lea.hbm %s11526_s10, 16 }
  0x19   :  { %p8935_p8 = scmp.ne.s32.totalorder %s11526_s10, %s8934_s26  ;;  %p8938_p9 = scmp.lt.u32.totalorder %s8934_s26, %s11526_s10 }
  0x1b   :  { %p8940_p10 = pnand %p8938_p9, %p8935_p8 }
  0x1d   :  { %8943 = shalt.err (!%p8940_p10)
}
  0x1e   :  { %s8944_s18 = scalar_lea.vmem %s82_s27, 16  ;;  %s8948_s19 = scalar_lea.vmem %s82_s27, 32 }
  0x1f   :  { %p8945_p11 = scmp.ne.s32.totalorder %s82_s27, %s8944_s18  ;;  %p8949_p12 = scmp.lt.s32.totalorder %s82_s27, %s82_s27 }
  0x20   :  { %p8950_p13 = scmp.lt.s32.totalorder %s8948_s19, %s8944_s18 }
  0x22   :  { %p8951_p0 = por %p8950_p13, %p8949_p12 }
  0x24   :  { %p8952_p1 = pnand %p8951_p0, %p8945_p11 }
  0x26   :  { %8955 = shalt.err (!%p8952_p1)
}
  0x27   :  { %84 = dma.hbm_to_vmem [thread:$0]  %s11526_s10, 16, %s82_s27, [#allocation12]  }
  0x28   :  { %s9100_s1 = smov [#allocation14]   ;;  %s9101_s21 = smov [#allocation5]  }
  0x29   :  { %s105_s20 = sshll.u32 %s9100_s1, 4  ;;  %s32_s22 = sshll.u32 %s9101_s21, 4  ;;  %s106_s20 = int_to_ptr.vmem [resolvable:$true] %s105_s20  ;;  %s9231_s22 = int_to_ptr.vmem [resolvable:$true] %s32_s22 }
  0x2a   :  { %s8956_s26 = scalar_lea.hbm %s11530_s14, 16 }
  0x2b   :  { %p8957_p2 = scmp.ne.s32.totalorder %s11530_s14, %s8956_s26  ;;  %p8960_p3 = scmp.lt.u32.totalorder %s8956_s26, %s11530_s14 }
  0x2d   :  { %p8962_p4 = pnand %p8960_p3, %p8957_p2 }
  0x2f   :  { %8965 = shalt.err (!%p8962_p4)
}
  0x30   :  { %s8966_s10 = scalar_lea.vmem %s106_s20, 16  ;;  %s8970_s27 = scalar_lea.vmem %s106_s20, 32 }
  0x31   :  { %p8967_p5 = scmp.ne.s32.totalorder %s106_s20, %s8966_s10  ;;  %p8971_p6 = scmp.lt.s32.totalorder %s106_s20, %s106_s20 }
  0x32   :  { %p8972_p7 = scmp.lt.s32.totalorder %s8970_s27, %s8966_s10 }
  0x34   :  { %p8973_p8 = por %p8972_p7, %p8971_p6 }
  0x36   :  { %p8974_p9 = pnand %p8973_p8, %p8967_p5 }
  0x38   :  { %8977 = shalt.err (!%p8974_p9)
}
  0x39   :  { %108 = dma.hbm_to_vmem [thread:$0]  %s11530_s14, 16, %s106_s20, [#allocation15]  }
  0x3a   :  { %s11538_s1 = sld [smem:[#allocation23_spill]] }
  0x40   :  { %s8978_s21 = scalar_lea.hbm %s11538_s1, 512 }
  0x41   :  { %p8979_p10 = scmp.ne.s32.totalorder %s11538_s1, %s8978_s21  ;;  %p8982_p11 = scmp.lt.u32.totalorder %s8978_s21, %s11538_s1 }
  0x43   :  { %p8984_p12 = pnand %p8982_p11, %p8979_p10 }
  0x45   :  { %8987 = shalt.err (!%p8984_p12)
}
  0x46   :  { %s8988_s29 = scalar_lea.vmem %s9231_s22, 512  ;;  %p8993_p0 = scmp.lt.s32.totalorder %s9231_s22, %s9231_s22 }
  0x47   :  { %p8989_p13 = scmp.ne.s32.totalorder %s9231_s22, %s8988_s29  ;;  %p8994_p1 = scmp.lt.s32.totalorder %s8988_s29, %s8988_s29 }
  0x49   :  { %p8995_p2 = por %p8994_p1, %p8993_p0 }
  0x4b   :  { %p8996_p3 = pnand %p8995_p2, %p8989_p13 }
  0x4d   :  { %8999 = shalt.err (!%p8996_p3)
}
  0x4e   :  { %s9102_s14 = smov 128   ;;  %s9103_s20 = smov 8  }
  0x4f   :  { %38 = dma.hbm_to_vmem [thread:$0]  %s11538_s1, 512, %s9231_s22, [#allocation6], %s9102_s14, %s9102_s14, %s9103_s20  }
  0x50   :  { %s9104_s10 = smov [#allocation10]   ;;  %s9000_s4 = scalar_lea.hbm %s11525_s9, 640 }
  0x51   :  { %s68_s27 = sshll.u32 %s9104_s10, 4  ;;  %p9001_p4 = scmp.ne.s32.totalorder %s11525_s9, %s9000_s4  ;;  %s69_s27 = int_to_ptr.vmem [resolvable:$true] %s68_s27 }
  0x52   :  { %p9004_p5 = scmp.lt.u32.totalorder %s9000_s4, %s11525_s9 }
  0x54   :  { %p9006_p6 = pnand %p9004_p5, %p9001_p4 }
  0x56   :  { %9009 = shalt.err (!%p9006_p6)
}
  0x57   :  { %s9010_s26 = scalar_lea.vmem %s69_s27, 640  ;;  %p9015_p8 = scmp.lt.s32.totalorder %s69_s27, %s69_s27 }
  0x58   :  { %p9011_p7 = scmp.ne.s32.totalorder %s69_s27, %s9010_s26  ;;  %p9016_p9 = scmp.lt.s32.totalorder %s9010_s26, %s9010_s26 }
  0x5a   :  { %p9017_p10 = por %p9016_p9, %p9015_p8 }
  0x5c   :  { %p9018_p11 = pnand %p9017_p10, %p9011_p7 }
  0x5e   :  { %9021 = shalt.err (!%p9018_p11)
}
  0x5f   :  { %s9105_s22 = smov 64   ;;  %s9106_s1 = smov 4  }
  0x60   :  { %74 = dma.hbm_to_vmem [thread:$0]  %s11525_s9, 640, %s69_s27, [#allocation9], %s9105_s22, %s9105_s22, %s9106_s1  }
  0x61   :  { %s9107_s14 = smov [#allocation13]   ;;  %s9108_s0 = smov [#allocation16]  }
  0x62   :  { %s93_s20 = sshll.u32 %s9107_s14, 4  ;;  %s117_s30 = sshll.u32 %s9108_s0, 4  ;;  %s94_s20 = int_to_ptr.vmem [resolvable:$true] %s93_s20  ;;  %s118_s30 = int_to_ptr.vmem [resolvable:$true] %s117_s30 }
  0x63   :  { %s9022_s19 = scalar_lea.hbm %s11528_s12, 16 }
  0x64   :  { %p9023_p12 = scmp.ne.s32.totalorder %s11528_s12, %s9022_s19  ;;  %p9026_p13 = scmp.lt.u32.totalorder %s9022_s19, %s11528_s12 }
  0x66   :  { %p9028_p0 = pnand %p9026_p13, %p9023_p12 }
  0x68   :  { %9031 = shalt.err (!%p9028_p0)
}
  0x69   :  { %s9032_s9 = scalar_lea.vmem %s94_s20, 16  ;;  %s9036_s27 = scalar_lea.vmem %s94_s20, 32 }
  0x6a   :  { %p9033_p1 = scmp.ne.s32.totalorder %s94_s20, %s9032_s9  ;;  %p9037_p2 = scmp.lt.s32.totalorder %s94_s20, %s94_s20 }
  0x6b   :  { %p9038_p3 = scmp.lt.s32.totalorder %s9036_s27, %s9032_s9 }
  0x6d   :  { %p9039_p4 = por %p9038_p3, %p9037_p2 }
  0x6f   :  { %p9040_p5 = pnand %p9039_p4, %p9033_p1 }
  0x71   :  { %9043 = shalt.err (!%p9040_p5)
}
  0x72   :  { %96 = dma.hbm_to_vmem [thread:$0]  %s11528_s12, 16, %s94_s20, [#allocation12]  }
  0x73   :  { %s9044_s29 = scalar_lea.hbm %s11532_s16, 16 }
  0x74   :  { %p9045_p6 = scmp.ne.s32.totalorder %s11532_s16, %s9044_s29  ;;  %p9048_p7 = scmp.lt.u32.totalorder %s9044_s29, %s11532_s16 }
  0x76   :  { %p9050_p8 = pnand %p9048_p7, %p9045_p6 }
  0x78   :  { %9053 = shalt.err (!%p9050_p8)
}
  0x79   :  { %s9054_s19 = scalar_lea.vmem %s118_s30, 16  ;;  %s9058_s4 = scalar_lea.vmem %s118_s30, 32 }
  0x7a   :  { %p9055_p9 = scmp.ne.s32.totalorder %s118_s30, %s9054_s19  ;;  %p9059_p10 = scmp.lt.s32.totalorder %s118_s30, %s118_s30 }
  0x7b   :  { %p9060_p11 = scmp.lt.s32.totalorder %s9058_s4, %s9054_s19 }
  0x7d   :  { %p9061_p12 = por %p9060_p11, %p9059_p10 }
  0x7f   :  { %p9062_p13 = pnand %p9061_p12, %p9055_p9 }
  0x81   :  { %9065 = shalt.err (!%p9062_p13)
}
  0x82   :  { %120 = dma.hbm_to_vmem [thread:$0]  %s11532_s16, 16, %s118_s30, [#allocation15]  }
  0x83   :  { %9088 = dma.done.wait [#allocation6], 512  }
  0x84   :  { %9089 = vsyncadd [#allocation6], 4294966784 }
  0x85   :  { %9090 = dma.done.wait [#allocation9], 672  }
  0x86   :  { %9091 = vsyncadd [#allocation9], 4294966624 }
  0x87   :  { %9092 = dma.done.wait [#allocation12], 32  }
  0x88   :  { %9093 = vsyncadd [#allocation12], 4294967264 }
  0x89   :  { %9094 = dma.done.wait [#allocation15], 32  }
  0x8a   :  { %9095 = vsyncadd [#allocation15], 4294967264  ;;  %v9109_v0 = vmov 0   ;;  %v9305_v1 = vld [vmem:[%s11518_s2 + $0x4] ss:$8 sps:$4 sm:$0xff]   ;;  %s11539_s30 = sld [smem:[#allocation24_spill]] }
  0x8b   :  { %251 = vmatprep.mubr.bf16.mxu0 %v9109_v0  ;;  %340 = vmatprep.mubr.bf16.mxu1 %v9109_v0  ;;  %v9316_v3 = vld [vmem:[%s11518_s2] ss:$8 sps:$4 sm:$0xff]   ;;  %v9327_v5 = vld [vmem:[%s11518_s2 + $0x14] ss:$8 sps:$4 sm:$0xff]   ;;  %v9339_v7 = vld [vmem:[%s11518_s2 + $0x10] ss:$8 sps:$4 sm:$0xff]  }
  0x8c   :  { %219 = vmatprep.subr.bf16.mxu0 %v9305_v1  ;;  %v9351_v9 = vld [vmem:[%s11518_s2 + $0x24] ss:$8 sps:$4 sm:$0xff]   ;;  %v9361_v11 = vld [vmem:[%s11518_s2 + $0x20] ss:$8 sps:$4 sm:$0xff]   ;;  %v9373_v13 = vld [vmem:[%s11518_s2 + $0x34] ss:$8 sps:$4 sm:$0xff]  }
  0x8d   :  { %220 = vmatpush1.bf16.msra.mxu0 %v9316_v3  ;;  %v9385_v15 = vld [vmem:[%s11518_s2 + $0x30] ss:$8 sps:$4 sm:$0xff]   ;;  %v143_v17 = vld [vmem:[#allocation5] sm:$0xff]  ;;  %v144_v18 = vld [vmem:[#allocation5 + $0x8] sm:$0xff]  ;;  %vm172_vm0 = vcmask 1041409   ;;  %vm215_vm1 = vcmask 523264  }
  0x8e   :  { %221 = vmatprep.subr.bf16.mxu0 %v9327_v5  ;;  %v145_v19 = vld [vmem:[#allocation5 + $0x10] sm:$0xff]  ;;  %v146_v20 = vld [vmem:[#allocation5 + $0x18] sm:$0xff]  ;;  %v147_v21 = vpack.c.bf16 %v144_v18, %v143_v17  ;;  %vm2057_vm2 = vcmask 254976   ;;  %vm2060_vm3 = vcmask 517376   ;;  %vm6734_vm4 = vcmask 1042434   ;;  %s9112_s29 = smov 16  }
  0x8f   :  { %v148_v22 = vpack.c.bf16 %v146_v20, %v145_v19  ;;  %vm6737_vm5 = vcmask 1043459   ;;  %vm6740_vm6 = vcmask 1044484   ;;  %vm6743_vm7 = vcmask 1045509   ;;  %s9113_s14 = smov 48   ;;  %s9116_s18 = smov [#allocation17]  }
  0x90   :  { %v9310_v2 = vld [vmem:[%s11539_s30 + $0x4] ss:$8 sps:$4 sm:$0xff]   ;;  %v9321_v4 = vld [vmem:[%s11539_s30] ss:$8 sps:$4 sm:$0xff]   ;;  %v9334_v6 = vld [vmem:[%s11539_s30 + $0x14] ss:$8 sps:$4 sm:$0xff]   ;;  %v9396_v23 = vunpack.c.h.b16 %v147_v21  ;;  %v9400_v25 = vunpack.c.l.b16 %v147_v21 }
  0x91   :  { %308 = vmatprep.subr.bf16.mxu1 %v9310_v2  ;;  %v9345_v8 = vld [vmem:[%s11539_s30 + $0x10] ss:$8 sps:$4 sm:$0xff]   ;;  %v9356_v10 = vld [vmem:[%s11539_s30 + $0x24] ss:$8 sps:$4 sm:$0xff]   ;;  %v9366_v12 = vld [vmem:[%s11539_s30 + $0x20] ss:$8 sps:$4 sm:$0xff]   ;;  %222 = vmatpush1.bf16.msra.mxu0 %v9339_v7  ;;  %v9398_v24 = vunpack.c.h.b16 %v148_v22  ;;  %v9402_v26 = vunpack.c.l.b16 %v148_v22 }
  0x92   :  { %309 = vmatpush1.bf16.msra.mxu1 %v9321_v4  ;;  %223 = vmatprep.subr.bf16.mxu0 %v9351_v9  ;;  %v9380_v14 = vld [vmem:[%s11539_s30 + $0x34] ss:$8 sps:$4 sm:$0xff]   ;;  %v9390_v16 = vld [vmem:[%s11539_s30 + $0x30] ss:$8 sps:$4 sm:$0xff]   ;;  %v170_v27 = vrot.slane %v9396_v23, 7  ;;  %v374_v34 = vrot.slane %v9396_v23, 6 }
  0x93   :  { %310 = vmatprep.subr.bf16.mxu1 %v9334_v6  ;;  %v171_v28 = vrot.slane %v9398_v24, 6  ;;  %v262_v29 = vrot.slane %v9402_v26, 7  ;;  %v706_v35 = vrot.slane %v9396_v23, 3  ;;  %v707_v36 = vrot.slane %v9398_v24, 2  ;;  %s8095_s19 = sshll.u32 %s9116_s18, 4  ;;  %s8096_s19 = int_to_ptr.vmem [resolvable:$true] %s8095_s19 }
  0x94   :  { %v375_v37 = vrot.slane %v9398_v24, 5  ;;  %v422_v38 = vrot.slane %v9400_v25, 1  ;;  %v484_v39 = vrot.slane %v9396_v23, 5  ;;  %v817_v40 = vrot.slane %v9396_v23, 2  ;;  %p9071_p1 = scmp.lt.s32.totalorder %s8096_s19, %s8096_s19 }
  0x95   :  { %224 = vmatpush1.bf16.msra.mxu0 %v9361_v11  ;;  %v173_v30 = vsel %vm172_vm0, %v171_v28, %v170_v27  ;;  %v263_v31 = vsel %vm172_vm0, %v262_v29, %v9400_v25  ;;  %v485_v41 = vrot.slane %v9398_v24, 4  ;;  %v9437_v42 = vsel %vm172_vm0, %v707_v36, %v706_v35 }
  0x96   :  { %311 = vmatpush1.bf16.msra.mxu1 %v9345_v8  ;;  %225 = vmatprep.subr.bf16.mxu0 %v9373_v13  ;;  %v9414_v32 = vpack.c.b16 %v173_v30, %v173_v30  ;;  %v9416_v33 = vpack.c.b16 %v263_v31, %v263_v31  ;;  %v818_v43 = vrot.slane %v9398_v24, 1  ;;  %v532_v44 = vrot.slane %v9400_v25, 2 }
  0x97   :  { %312 = vmatprep.subr.bf16.mxu1 %v9356_v10  ;;  %v865_v45 = vrot.slane %v9400_v25, 5  ;;  %v866_v47 = vrot.slane %v9402_v26, 4  ;;  %v928_v48 = vrot.slane %v9396_v23, 1  ;;  %v533_v49 = vrot.slane %v9402_v26, 1 }
  0x98   :  { %v9445_v46 = vsel %vm172_vm0, %v818_v43, %v817_v40  ;;  %v975_v50 = vrot.slane %v9400_v25, 6  ;;  %v976_v51 = vrot.slane %v9402_v26, 5  ;;  %v1038_v52 = vrot.slane %v9398_v24, 7 }
  0x99   :  { %226 = vmatpush1.bf16.msra.mxu0 %v9385_v15  ;;  %v9456_v53 = vsel %vm172_vm0, %v866_v47, %v865_v45  ;;  %v9460_v54 = vsel %vm172_vm0, %v9398_v24, %v928_v48  ;;  %v1085_v55 = vrot.slane %v9400_v25, 7  ;;  %v1086_v56 = vrot.slane %v9402_v26, 6  ;;  %v165_v45 = vld [vmem:[#allocation8] sm:$0x3] }
  0x9a   :  { %313 = vmatpush1.bf16.msra.mxu1 %v9366_v12  ;;  %381 = vmatprep.subr.bf16.mxu0 %v9305_v1  ;;  %v9465_v57 = vsel %vm172_vm0, %v976_v51, %v975_v50  ;;  %v9469_v58 = vsel %vm172_vm0, %v1038_v52, %v9396_v23  ;;  %v376_v59 = vsel %vm172_vm0, %v375_v37, %v374_v34  ;;  %v595_v21 = vrot.slane %v9396_v23, 4 }
  0x9b   :  { %314 = vmatprep.subr.bf16.mxu1 %v9380_v14  ;;  %v423_v60 = vsel %vm172_vm0, %v9402_v26, %v422_v38  ;;  %v9477_v61 = vsel %vm172_vm0, %v1086_v56, %v1085_v55  ;;  %v9481_v62 = vpack.c.b16 %v376_v59, %v376_v59  ;;  %v486_v17 = vsel %vm172_vm0, %v485_v41, %v484_v39 }
  0x9c   :  { %8115 = vmatmul.mubr.msk.bf16.vlgmr.msra.gmra.mrb[0].mxu0 %vm215_vm1, %v9414_v32  ;;  %v9483_v63 = vpack.c.b16 %v423_v60, %v423_v60  ;;  %v534_v18 = vsel %vm172_vm0, %v533_v49, %v532_v44  ;;  %v9509_v19 = vpack.c.b16 %v486_v17, %v486_v17  ;;  %v596_v22 = vrot.slane %v9398_v24, 3  ;;  %v8887_v60 = vld [vmem:[%s11518_s2 + $0x10] ss:$8 sps:$4 sm:$0xff]   ;;  %v8889_v17 = vld [vmem:[%s11518_s2 + $0x24] ss:$8 sps:$4 sm:$0xff]  }
  0x9d   :  { %382 = vmatpush1.bf16.msra.mxu0 %v9316_v3  ;;  %413 = vmatprep.mubr.bf16.mxu0 %v9109_v0  ;;  %v9511_v20 = vpack.c.b16 %v534_v18, %v534_v18  ;;  %v643_v27 = vrot.slane %v9400_v25, 3  ;;  %v644_v28 = vrot.slane %v9402_v26, 2  ;;  %v754_v31 = vrot.slane %v9400_v25, 4  ;;  %v8890_v18 = vld [vmem:[%s11539_s30 + $0x24] ss:$8 sps:$4 sm:$0xff]  }
  0x9e   :  { %315 = vmatpush1.bf16.msra.mxu1 %v9390_v16  ;;  %383 = vmatprep.subr.bf16.mxu0 %v9327_v5  ;;  %v597_v29 = vsel %vm172_vm0, %v596_v22, %v595_v21  ;;  %v755_v34 = vrot.slane %v9402_v26, 3  ;;  %v9572_v36 = vpack.c.b16 %v9437_v42, %v9437_v42  ;;  %v9600_v26 = vpack.c.b16 %v9445_v46, %v9445_v46  ;;  %v8891_v22 = vld [vmem:[%s11518_s2 + $0x20] ss:$8 sps:$4 sm:$0xff]  }
  0x9f   :  { %428 = vmatprep.subr.bf16.mxu1 %v9310_v2  ;;  %v645_v30 = vsel %vm172_vm0, %v644_v28, %v643_v27  ;;  %v9541_v23 = vpack.c.b16 %v597_v29, %v597_v29  ;;  %v9604_v37 = vpack.c.b16 %v9456_v53, %v9456_v53  ;;  %v9630_v38 = vpack.c.b16 %v9460_v54, %v9460_v54  ;;  %v8892_v27 = vld [vmem:[%s11539_s30 + $0x20] ss:$8 sps:$4 sm:$0xff]   ;;  %v8893_v28 = vld [vmem:[%s11518_s2 + $0x34] ss:$8 sps:$4 sm:$0xff]   ;;  %v9877_v29 = vld [vmem:[%s11519_s3 + $0x4] ss:$8 sps:$4 sm:$0xff]  }
  0xa0   :  { %v9543_v24 = vpack.c.b16 %v645_v30, %v645_v30  ;;  %v756_v35 = vsel %vm172_vm0, %v755_v34, %v754_v31  ;;  %v9634_v39 = vpack.c.b16 %v9465_v57, %v9465_v57  ;;  %v1040_v40 = vpack.c.b16 %v9469_v58, %v9469_v58  ;;  %v8894_v30 = vld [vmem:[%s11518_s2 + $0x30] ss:$8 sps:$4 sm:$0xff]   ;;  %v9912_v34 = vld [vmem:[%s11519_s3 + $0x24] ss:$8 sps:$4 sm:$0xff]  }
  0xa1   :  { %8124 = vmatmul.mubr.msk.bf16.vlgmr.msra.gmra.mrb[0].mxu1 %vm215_vm1, %v9416_v33  ;;  %384 = vmatpush1.bf16.msra.mxu0 %v9339_v7  ;;  %v9574_v25 = vpack.c.b16 %v756_v35, %v756_v35  ;;  %v1088_v41 = vpack.c.b16 %v9477_v61, %v9477_v61  ;;  %v350_v42 = vlaneseq  ;;  %v9905_v31 = vld [vmem:[%s11519_s3 + $0x10] ss:$8 sps:$4 sm:$0xff]   ;;  %vm6746_vm8 = vcmask 1046534  }
  0xa2   :  { %429 = vmatpush1.bf16.msra.mxu1 %v9321_v4  ;;  %460 = vmatprep.mubr.bf16.mxu1 %v9109_v0  ;;  %vm6749_vm9 = vcmask 1047559   ;;  %vm6873_vm10 = vcmask 1046528   ;;  %vm6913_vm11 = vcmask 1045504   ;;  %vm6829_vm12 = vsmask.f32 7424 }
  0xa3   :  { %430 = vmatprep.subr.bf16.mxu1 %v9334_v6  ;;  %385 = vmatprep.subr.bf16.mxu0 %v9351_v9  ;;  %v9790_v43 = vshrl.u32 %v350_v42, 7  ;;  %v9928_v42 = vld [vmem:[%s11519_s3 + $0x34] ss:$8 sps:$4 sm:$0xff]   ;;  %vm6889_vm13 = vsmask.f32 6400  ;;  %vm6929_vm14 = vcmask 130048  }
  0xa4   :  { %vm6938_vm15 = vcmask 261120  }
  0xa5   :  { %386 = vmatpush1.bf16.msra.mxu0 %v9361_v11  ;;  %v352_v44 = vsub.s32 0, %v9790_v43  ;;  %v356_v46 = vsub.s32 1, %v9790_v43 }
  0xa6   :  { %431 = vmatpush1.bf16.msra.mxu1 %v9345_v8  ;;  %387 = vmatprep.subr.bf16.mxu0 %v9373_v13 }
  0xa7   :  { %432 = vmatprep.subr.bf16.mxu1 %v9356_v10  ;;  %v9812_v48 = vrot.slane %v165_v45, %v356_v46 }
  0xa9   :  { %388 = vmatpush1.bf16.msra.mxu0 %v9385_v15 }
  0xaa   :  { %433 = vmatpush1.bf16.msra.mxu1 %v9366_v12  ;;  %491 = vmatprep.subr.bf16.mxu0 %v9305_v1 }
  0xab   :  { %434 = vmatprep.subr.bf16.mxu1 %v9380_v14 }
  0xac   :  { %8126 = vmatmul.mubr.msk.bf16.vlgmr.msra.gmra.mrb[4].mxu0 %vm215_vm1, %v9481_v62 }
  0xad   :  { %492 = vmatpush1.bf16.msra.mxu0 %v9316_v3  ;;  %523 = vmatprep.mubr.bf16.mxu0 %v9109_v0 }
  0xae   :  { %435 = vmatpush1.bf16.msra.mxu1 %v9390_v16  ;;  %493 = vmatprep.subr.bf16.mxu0 %v9327_v5 }
  0xaf   :  { %539 = vmatprep.subr.bf16.mxu1 %v9310_v2 }
  0xb1   :  { %8127 = vmatmul.mubr.msk.bf16.vlgmr.msra.gmra.mrb[4].mxu1 %vm215_vm1, %v9483_v63  ;;  %494 = vmatpush1.bf16.msra.mxu0 %v9339_v7 }
  0xb2   :  { %540 = vmatpush1.bf16.msra.mxu1 %v9321_v4  ;;  %571 = vmatprep.mubr.bf16.mxu1 %v9109_v0 }
  0xb3   :  { %541 = vmatprep.subr.bf16.mxu1 %v9334_v6  ;;  %495 = vmatprep.subr.bf16.mxu0 %v9351_v9 }
  0xb5   :  { %496 = vmatpush1.bf16.msra.mxu0 %v9361_v11 }
  0xb6   :  { %542 = vmatpush1.bf16.msra.mxu1 %v9345_v8  ;;  %497 = vmatprep.subr.bf16.mxu0 %v9373_v13 }
  0xb7   :  { %543 = vmatprep.subr.bf16.mxu1 %v9356_v10 }
  0xb9   :  { %498 = vmatpush1.bf16.msra.mxu0 %v9385_v15 }
  0xba   :  { %544 = vmatpush1.bf16.msra.mxu1 %v9366_v12  ;;  %602 = vmatprep.subr.bf16.mxu0 %v9305_v1 }
  0xbb   :  { %545 = vmatprep.subr.bf16.mxu1 %v9380_v14 }
  0xbc   :  { %8129 = vmatmul.mubr.msk.bf16.vlgmr.msra.gmra.mrb[8].mxu0 %vm215_vm1, %v9509_v19 }
  0xbd   :  { %603 = vmatpush1.bf16.msra.mxu0 %v9316_v3  ;;  %634 = vmatprep.mubr.bf16.mxu0 %v9109_v0 }
  0xbe   :  { %546 = vmatpush1.bf16.msra.mxu1 %v9390_v16  ;;  %604 = vmatprep.subr.bf16.mxu0 %v9327_v5 }
  0xbf   :  { %650 = vmatprep.subr.bf16.mxu1 %v9310_v2 }
  0xc1   :  { %8130 = vmatmul.mubr.msk.bf16.vlgmr.msra.gmra.mrb[8].mxu1 %vm215_vm1, %v9511_v20  ;;  %605 = vmatpush1.bf16.msra.mxu0 %v9339_v7 }
  0xc2   :  { %651 = vmatpush1.bf16.msra.mxu1 %v9321_v4  ;;  %682 = vmatprep.mubr.bf16.mxu1 %v9109_v0 }
  0xc3   :  { %652 = vmatprep.subr.bf16.mxu1 %v9334_v6  ;;  %606 = vmatprep.subr.bf16.mxu0 %v9351_v9 }
  0xc5   :  { %607 = vmatpush1.bf16.msra.mxu0 %v9361_v11 }
  0xc6   :  { %653 = vmatpush1.bf16.msra.mxu1 %v9345_v8  ;;  %608 = vmatprep.subr.bf16.mxu0 %v9373_v13 }
  0xc7   :  { %654 = vmatprep.subr.bf16.mxu1 %v9356_v10 }
  0xc9   :  { %609 = vmatpush1.bf16.msra.mxu0 %v9385_v15 }
  0xca   :  { %655 = vmatpush1.bf16.msra.mxu1 %v9366_v12  ;;  %713 = vmatprep.subr.bf16.mxu0 %v9305_v1 }
  0xcb   :  { %656 = vmatprep.subr.bf16.mxu1 %v9380_v14 }
  0xcc   :  { %8132 = vmatmul.mubr.msk.bf16.vlgmr.msra.gmra.mrb[12].mxu0 %vm215_vm1, %v9541_v23 }
  0xcd   :  { %714 = vmatpush1.bf16.msra.mxu0 %v9316_v3  ;;  %745 = vmatprep.mubr.bf16.mxu0 %v9109_v0 }
  0xce   :  { %657 = vmatpush1.bf16.msra.mxu1 %v9390_v16  ;;  %715 = vmatprep.subr.bf16.mxu0 %v9327_v5 }
  0xcf   :  { %761 = vmatprep.subr.bf16.mxu1 %v9310_v2 }
  0xd1   :  { %8133 = vmatmul.mubr.msk.bf16.vlgmr.msra.gmra.mrb[12].mxu1 %vm215_vm1, %v9543_v24  ;;  %716 = vmatpush1.bf16.msra.mxu0 %v9339_v7 }
  0xd2   :  { %762 = vmatpush1.bf16.msra.mxu1 %v9321_v4  ;;  %793 = vmatprep.mubr.bf16.mxu1 %v9109_v0 }
  0xd3   :  { %763 = vmatprep.subr.bf16.mxu1 %v9334_v6  ;;  %717 = vmatprep.subr.bf16.mxu0 %v9351_v9 }
  0xd5   :  { %718 = vmatpush1.bf16.msra.mxu0 %v9361_v11 }
  0xd6   :  { %764 = vmatpush1.bf16.msra.mxu1 %v9345_v8  ;;  %719 = vmatprep.subr.bf16.mxu0 %v9373_v13 }
  0xd7   :  { %765 = vmatprep.subr.bf16.mxu1 %v9356_v10 }
  0xd9   :  { %720 = vmatpush1.bf16.msra.mxu0 %v9385_v15 }
  0xda   :  { %766 = vmatpush1.bf16.msra.mxu1 %v9366_v12  ;;  %824 = vmatprep.subr.bf16.mxu0 %v9305_v1 }
  0xdb   :  { %767 = vmatprep.subr.bf16.mxu1 %v9380_v14 }
  0xdc   :  { %8135 = vmatmul.mubr.msk.bf16.vlgmr.msra.gmra.mrb[16].mxu0 %vm215_vm1, %v9572_v36 }
  0xdd   :  { %825 = vmatpush1.bf16.msra.mxu0 %v9316_v3  ;;  %856 = vmatprep.mubr.bf16.mxu0 %v9109_v0 }
  0xde   :  { %768 = vmatpush1.bf16.msra.mxu1 %v9390_v16  ;;  %826 = vmatprep.subr.bf16.mxu0 %v9327_v5 }
  0xdf   :  { %872 = vmatprep.subr.bf16.mxu1 %v9310_v2 }
  0xe1   :  { %8136 = vmatmul.mubr.msk.bf16.vlgmr.msra.gmra.mrb[16].mxu1 %vm215_vm1, %v9574_v25  ;;  %827 = vmatpush1.bf16.msra.mxu0 %v9339_v7 }
  0xe2   :  { %873 = vmatpush1.bf16.msra.mxu1 %v9321_v4  ;;  %904 = vmatprep.mubr.bf16.mxu1 %v9109_v0 }
  0xe3   :  { %874 = vmatprep.subr.bf16.mxu1 %v9334_v6  ;;  %828 = vmatprep.subr.bf16.mxu0 %v9351_v9 }
  0xe5   :  { %829 = vmatpush1.bf16.msra.mxu0 %v9361_v11 }
  0xe6   :  { %875 = vmatpush1.bf16.msra.mxu1 %v9345_v8  ;;  %830 = vmatprep.subr.bf16.mxu0 %v9373_v13 }
  0xe7   :  { %876 = vmatprep.subr.bf16.mxu1 %v9356_v10 }
  0xe9   :  { %831 = vmatpush1.bf16.msra.mxu0 %v9385_v15 }
  0xea   :  { %877 = vmatpush1.bf16.msra.mxu1 %v9366_v12  ;;  %934 = vmatprep.subr.bf16.mxu0 %v9305_v1 }
  0xeb   :  { %878 = vmatprep.subr.bf16.mxu1 %v9380_v14 }
  0xec   :  { %8138 = vmatmul.mubr.msk.bf16.vlgmr.msra.gmra.mrb[20].mxu0 %vm215_vm1, %v9600_v26 }
  0xed   :  { %935 = vmatpush1.bf16.msra.mxu0 %v9316_v3  ;;  %966 = vmatprep.mubr.bf16.mxu0 %v9109_v0 }
  0xee   :  { %879 = vmatpush1.bf16.msra.mxu1 %v9390_v16  ;;  %936 = vmatprep.subr.bf16.mxu0 %v9327_v5 }
  0xef   :  { %982 = vmatprep.subr.bf16.mxu1 %v9310_v2 }
  0xf1   :  { %8139 = vmatmul.mubr.msk.bf16.vlgmr.msra.gmra.mrb[20].mxu1 %vm215_vm1, %v9604_v37  ;;  %937 = vmatpush1.bf16.msra.mxu0 %v9339_v7 }
  0xf2   :  { %983 = vmatpush1.bf16.msra.mxu1 %v9321_v4  ;;  %1014 = vmatprep.mubr.bf16.mxu1 %v9109_v0 }
  0xf3   :  { %984 = vmatprep.subr.bf16.mxu1 %v9334_v6  ;;  %938 = vmatprep.subr.bf16.mxu0 %v9351_v9 }
  0xf5   :  { %939 = vmatpush1.bf16.msra.mxu0 %v9361_v11 }
  0xf6   :  { %985 = vmatpush1.bf16.msra.mxu1 %v9345_v8  ;;  %940 = vmatprep.subr.bf16.mxu0 %v9373_v13 }
  0xf7   :  { %986 = vmatprep.subr.bf16.mxu1 %v9356_v10 }
  0xf9   :  { %941 = vmatpush1.bf16.msra.mxu0 %v9385_v15 }
  0xfa   :  { %987 = vmatpush1.bf16.msra.mxu1 %v9366_v12  ;;  %1044 = vmatprep.subr.bf16.mxu0 %v9305_v1 }
  0xfb   :  { %988 = vmatprep.subr.bf16.mxu1 %v9380_v14 }
  0xfc   :  { %8141 = vmatmul.mubr.msk.bf16.vlgmr.msra.gmra.mrb[24].mxu0 %vm215_vm1, %v9630_v38 }
  0xfd   :  { %1045 = vmatpush1.bf16.msra.mxu0 %v9316_v3  ;;  %1076 = vmatprep.mubr.bf16.mxu0 %v9109_v0 }
  0xfe   :  { %989 = vmatpush1.bf16.msra.mxu1 %v9390_v16  ;;  %1046 = vmatprep.subr.bf16.mxu0 %v9327_v5 }
  0xff   :  { %1092 = vmatprep.subr.bf16.mxu1 %v9310_v2 }
 0x101   :  { %8142 = vmatmul.mubr.msk.bf16.vlgmr.msra.gmra.mrb[24].mxu1 %vm215_vm1, %v9634_v39  ;;  %1047 = vmatpush1.bf16.msra.mxu0 %v9339_v7 }
 0x102   :  { %1093 = vmatpush1.bf16.msra.mxu1 %v9321_v4  ;;  %1124 = vmatprep.mubr.bf16.mxu1 %v9109_v0 }
 0x103   :  { %1094 = vmatprep.subr.bf16.mxu1 %v9334_v6  ;;  %1048 = vmatprep.subr.bf16.mxu0 %v9351_v9 }
 0x105   :  { %1049 = vmatpush1.bf16.msra.mxu0 %v9361_v11 }
 0x106   :  { %1095 = vmatpush1.bf16.msra.mxu1 %v9345_v8  ;;  %1050 = vmatprep.subr.bf16.mxu0 %v9373_v13 }
 0x107   :  { %1096 = vmatprep.subr.bf16.mxu1 %v9356_v10 }
 0x109   :  { %1051 = vmatpush1.bf16.msra.mxu0 %v9385_v15 }
 0x10a   :  { %1097 = vmatpush1.bf16.msra.mxu1 %v9366_v12  ;;  %1148 = vmatprep.subr.bf16.mxu0 %v9305_v1 }
 0x10b   :  { %1098 = vmatprep.subr.bf16.mxu1 %v9380_v14 }
 0x10c   :  { %8144 = vmatmul.mubr.msk.bf16.vlgmr.msra.gmra.mrb[28].mxu0 %vm215_vm1, %v1040_v40 }
 0x10d   :  { %1149 = vmatpush1.bf16.msra.mxu0 %v9316_v3  ;;  %1180 = vmatprep.mubr.bf16.mxu0 %v9109_v0 }
 0x10e   :  { %1099 = vmatpush1.bf16.msra.mxu1 %v9390_v16  ;;  %1150 = vmatprep.subr.bf16.mxu0 %v9327_v5 }
 0x10f   :  { %1189 = vmatprep.subr.bf16.mxu1 %v9310_v2 }
 0x111   :  { %8145 = vmatmul.mubr.msk.bf16.vlgmr.msra.gmra.mrb[28].mxu1 %vm215_vm1, %v1088_v41  ;;  %1151 = vmatpush1.bf16.msra.mxu0 %v9339_v7 }
 0x112   :  { %1190 = vmatpush1.bf16.msra.mxu1 %v9321_v4  ;;  %1221 = vmatprep.mubr.bf16.mxu1 %v9109_v0 }
 0x113   :  { %1191 = vmatprep.subr.bf16.mxu1 %v9334_v6  ;;  %1152 = vmatprep.subr.bf16.mxu0 %v9351_v9 }
 0x115   :  { %1153 = vmatpush1.bf16.msra.mxu0 %v9361_v11 }
 0x116   :  { %1192 = vmatpush1.bf16.msra.mxu1 %v9345_v8  ;;  %1154 = vmatprep.subr.bf16.mxu0 %v9373_v13 }
 0x117   :  { %1193 = vmatprep.subr.bf16.mxu1 %v9356_v10 }
 0x119   :  { %1155 = vmatpush1.bf16.msra.mxu0 %v9385_v15 }
 0x11a   :  { %1194 = vmatpush1.bf16.msra.mxu1 %v9366_v12  ;;  %1245 = vmatprep.subr.bf16.mxu0 %v9305_v1 }
 0x11b   :  { %1195 = vmatprep.subr.bf16.mxu1 %v9380_v14 }
 0x11c   :  { %8147 = vmatmul.mubr.msk.bf16.vlgmr.msra.gmra.mrb[32].mxu0 %vm215_vm1, %v1088_v41 }
 0x11d   :  { %1246 = vmatpush1.bf16.msra.mxu0 %v9316_v3  ;;  %1277 = vmatprep.mubr.bf16.mxu0 %v9109_v0 }
 0x11e   :  { %1196 = vmatpush1.bf16.msra.mxu1 %v9390_v16  ;;  %1247 = vmatprep.subr.bf16.mxu0 %v9327_v5 }
 0x11f   :  { %1286 = vmatprep.subr.bf16.mxu1 %v9310_v2 }
 0x121   :  { %8148 = vmatmul.mubr.msk.bf16.vlgmr.msra.gmra.mrb[32].mxu1 %vm215_vm1, %v1040_v40  ;;  %1248 = vmatpush1.bf16.msra.mxu0 %v9339_v7 }
 0x122   :  { %1287 = vmatpush1.bf16.msra.mxu1 %v9321_v4  ;;  %1318 = vmatprep.mubr.bf16.mxu1 %v9109_v0 }
 0x123   :  { %1288 = vmatprep.subr.bf16.mxu1 %v9334_v6  ;;  %1249 = vmatprep.subr.bf16.mxu0 %v9351_v9 }
 0x125   :  { %1250 = vmatpush1.bf16.msra.mxu0 %v9361_v11 }
 0x126   :  { %1289 = vmatpush1.bf16.msra.mxu1 %v9345_v8  ;;  %1251 = vmatprep.subr.bf16.mxu0 %v9373_v13 }
 0x127   :  { %1290 = vmatprep.subr.bf16.mxu1 %v9356_v10 }
 0x129   :  { %1252 = vmatpush1.bf16.msra.mxu0 %v9385_v15 }
 0x12a   :  { %1291 = vmatpush1.bf16.msra.mxu1 %v9366_v12  ;;  %1342 = vmatprep.subr.bf16.mxu0 %v9305_v1 }
 0x12b   :  { %1292 = vmatprep.subr.bf16.mxu1 %v9380_v14 }
 0x12c   :  { %8150 = vmatmul.mubr.msk.bf16.vlgmr.msra.gmra.mrb[36].mxu0 %vm215_vm1, %v9634_v39 }
 0x12d   :  { %1343 = vmatpush1.bf16.msra.mxu0 %v9316_v3  ;;  %1374 = vmatprep.mubr.bf16.mxu0 %v9109_v0 }
 0x12e   :  { %1293 = vmatpush1.bf16.msra.mxu1 %v9390_v16  ;;  %1344 = vmatprep.subr.bf16.mxu0 %v9327_v5 }
 0x12f   :  { %1383 = vmatprep.subr.bf16.mxu1 %v9310_v2 }
 0x131   :  { %8151 = vmatmul.mubr.msk.bf16.vlgmr.msra.gmra.mrb[36].mxu1 %vm215_vm1, %v9630_v38  ;;  %1345 = vmatpush1.bf16.msra.mxu0 %v9339_v7  ;;  %v9921_v38 = vld [vmem:[%s11519_s3 + $0x20] ss:$8 sps:$4 sm:$0xff]  }
 0x132   :  { %1384 = vmatpush1.bf16.msra.mxu1 %v9321_v4  ;;  %1415 = vmatprep.mubr.bf16.mxu1 %v9109_v0 }
 0x133   :  { %1385 = vmatprep.subr.bf16.mxu1 %v9334_v6  ;;  %1346 = vmatprep.subr.bf16.mxu0 %v9351_v9 }
 0x135   :  { %1347 = vmatpush1.bf16.msra.mxu0 %v9361_v11 }
 0x136   :  { %1386 = vmatpush1.bf16.msra.mxu1 %v9345_v8  ;;  %1348 = vmatprep.subr.bf16.mxu0 %v9373_v13 }
 0x137   :  { %1387 = vmatprep.subr.bf16.mxu1 %v9356_v10 }
 0x139   :  { %1349 = vmatpush1.bf16.msra.mxu0 %v9385_v15 }
 0x13a   :  { %1388 = vmatpush1.bf16.msra.mxu1 %v9366_v12  ;;  %1439 = vmatprep.subr.bf16.mxu0 %v9305_v1 }
 0x13b   :  { %1389 = vmatprep.subr.bf16.mxu1 %v9380_v14 }
 0x13c   :  { %8153 = vmatmul.mubr.msk.bf16.vlgmr.msra.gmra.mrb[40].mxu0 %vm215_vm1, %v9604_v37 }
 0x13d   :  { %1440 = vmatpush1.bf16.msra.mxu0 %v9316_v3  ;;  %1471 = vmatprep.mubr.bf16.mxu0 %v9109_v0 }
 0x13e   :  { %1390 = vmatpush1.bf16.msra.mxu1 %v9390_v16  ;;  %1441 = vmatprep.subr.bf16.mxu0 %v9327_v5 }
 0x13f   :  { %1480 = vmatprep.subr.bf16.mxu1 %v9310_v2 }
 0x141   :  { %8154 = vmatmul.mubr.msk.bf16.vlgmr.msra.gmra.mrb[40].mxu1 %vm215_vm1, %v9600_v26  ;;  %1442 = vmatpush1.bf16.msra.mxu0 %v9339_v7 }
 0x142   :  { %1481 = vmatpush1.bf16.msra.mxu1 %v9321_v4  ;;  %1512 = vmatprep.mubr.bf16.mxu1 %v9109_v0 }
 0x143   :  { %1482 = vmatprep.subr.bf16.mxu1 %v9334_v6  ;;  %1443 = vmatprep.subr.bf16.mxu0 %v9351_v9 }
 0x145   :  { %1444 = vmatpush1.bf16.msra.mxu0 %v9361_v11 }
 0x146   :  { %1483 = vmatpush1.bf16.msra.mxu1 %v9345_v8  ;;  %1445 = vmatprep.subr.bf16.mxu0 %v9373_v13 }
 0x147   :  { %1484 = vmatprep.subr.bf16.mxu1 %v9356_v10 }
 0x149   :  { %1446 = vmatpush1.bf16.msra.mxu0 %v9385_v15 }
 0x14a   :  { %1485 = vmatpush1.bf16.msra.mxu1 %v9366_v12  ;;  %1536 = vmatprep.subr.bf16.mxu0 %v9305_v1 }
 0x14b   :  { %1486 = vmatprep.subr.bf16.mxu1 %v9380_v14 }
 0x14c   :  { %8156 = vmatmul.mubr.msk.bf16.vlgmr.msra.gmra.mrb[44].mxu0 %vm215_vm1, %v9574_v25 }
 0x14d   :  { %1537 = vmatpush1.bf16.msra.mxu0 %v9316_v3  ;;  %1568 = vmatprep.mubr.bf16.mxu0 %v9109_v0 }
 0x14e   :  { %1487 = vmatpush1.bf16.msra.mxu1 %v9390_v16  ;;  %1538 = vmatprep.subr.bf16.mxu0 %v9327_v5 }
 0x14f   :  { %1577 = vmatprep.subr.bf16.mxu1 %v9310_v2 }
 0x151   :  { %8157 = vmatmul.mubr.msk.bf16.vlgmr.msra.gmra.mrb[44].mxu1 %vm215_vm1, %v9572_v36  ;;  %1539 = vmatpush1.bf16.msra.mxu0 %v9339_v7 }
 0x152   :  { %1578 = vmatpush1.bf16.msra.mxu1 %v9321_v4  ;;  %1609 = vmatprep.mubr.bf16.mxu1 %v9109_v0 }
 0x153   :  { %1579 = vmatprep.subr.bf16.mxu1 %v9334_v6  ;;  %1540 = vmatprep.subr.bf16.mxu0 %v9351_v9 }
 0x155   :  { %1541 = vmatpush1.bf16.msra.mxu0 %v9361_v11 }
 0x156   :  { %1580 = vmatpush1.bf16.msra.mxu1 %v9345_v8  ;;  %1542 = vmatprep.subr.bf16.mxu0 %v9373_v13 }
 0x157   :  { %1581 = vmatprep.subr.bf16.mxu1 %v9356_v10 }
 0x159   :  { %1543 = vmatpush1.bf16.msra.mxu0 %v9385_v15 }
 0x15a   :  { %1582 = vmatpush1.bf16.msra.mxu1 %v9366_v12  ;;  %1633 = vmatprep.subr.bf16.mxu0 %v9305_v1 }
 0x15b   :  { %1583 = vmatprep.subr.bf16.mxu1 %v9380_v14 }
 0x15c   :  { %8159 = vmatmul.mubr.msk.bf16.vlgmr.msra.gmra.mrb[48].mxu0 %vm215_vm1, %v9543_v24  ;;  %v9894_v24 = vld [vmem:[%s11519_s3 + $0x14] ss:$8 sps:$4 sm:$0xff]  }
 0x15d   :  { %1634 = vmatpush1.bf16.msra.mxu0 %v9316_v3  ;;  %1665 = vmatprep.mubr.bf16.mxu0 %v9109_v0 }
 0x15e   :  { %1584 = vmatpush1.bf16.msra.mxu1 %v9390_v16  ;;  %1635 = vmatprep.subr.bf16.mxu0 %v9327_v5 }
 0x15f   :  { %1674 = vmatprep.subr.bf16.mxu1 %v9310_v2 }
 0x161   :  { %8160 = vmatmul.mubr.msk.bf16.vlgmr.msra.gmra.mrb[48].mxu1 %vm215_vm1, %v9541_v23  ;;  %1636 = vmatpush1.bf16.msra.mxu0 %v9339_v7  ;;  %v8895_v23 = vld [vmem:[%s11539_s30 + $0x30] ss:$8 sps:$4 sm:$0xff]  }
 0x162   :  { %1675 = vmatpush1.bf16.msra.mxu1 %v9321_v4  ;;  %1706 = vmatprep.mubr.bf16.mxu1 %v9109_v0 }
 0x163   :  { %1676 = vmatprep.subr.bf16.mxu1 %v9334_v6  ;;  %1637 = vmatprep.subr.bf16.mxu0 %v9351_v9 }
 0x165   :  { %1638 = vmatpush1.bf16.msra.mxu0 %v9361_v11 }
 0x166   :  { %1677 = vmatpush1.bf16.msra.mxu1 %v9345_v8  ;;  %1639 = vmatprep.subr.bf16.mxu0 %v9373_v13 }
 0x167   :  { %1678 = vmatprep.subr.bf16.mxu1 %v9356_v10 }
 0x169   :  { %1640 = vmatpush1.bf16.msra.mxu0 %v9385_v15 }
 0x16a   :  { %1679 = vmatpush1.bf16.msra.mxu1 %v9366_v12  ;;  %1730 = vmatprep.subr.bf16.mxu0 %v9305_v1  ;;  %v9806_v1 = vrot.slane %v165_v45, %v352_v44 }
 0x16b   :  { %1680 = vmatprep.subr.bf16.mxu1 %v9380_v14 }
 0x16c   :  { %8162 = vmatmul.mubr.msk.bf16.vlgmr.msra.gmra.mrb[52].mxu0 %vm215_vm1, %v9511_v20 }
 0x16d   :  { %1731 = vmatpush1.bf16.msra.mxu0 %v9316_v3  ;;  %1762 = vmatprep.mubr.bf16.mxu0 %v9109_v0 }
 0x16e   :  { %1681 = vmatpush1.bf16.msra.mxu1 %v9390_v16  ;;  %1732 = vmatprep.subr.bf16.mxu0 %v9327_v5 }
 0x16f   :  { %1771 = vmatprep.subr.bf16.mxu1 %v9310_v2  ;;  %v253_v2 = vpop.f32.mrb[0].mxu0 }
 0x171   :  { %8163 = vmatmul.mubr.msk.bf16.vlgmr.msra.gmra.mrb[52].mxu1 %vm215_vm1, %v9509_v19  ;;  %1733 = vmatpush1.bf16.msra.mxu0 %v9339_v7  ;;  %v8882_v7 = vld [vmem:[%s11518_s2 + $0x4] ss:$8 sps:$4 sm:$0xff]  }
 0x172   :  { %1772 = vmatpush1.bf16.msra.mxu1 %v9321_v4  ;;  %1803 = vmatprep.mubr.bf16.mxu1 %v9109_v0  ;;  %v255_v4 = vpop.f32.mrb[1].mxu0 }
 0x173   :  { %1773 = vmatprep.subr.bf16.mxu1 %v9334_v6  ;;  %v257_v51 = vpop.f32.mrb[2].mxu0  ;;  %1734 = vmatprep.subr.bf16.mxu0 %v9351_v9  ;;  %v8884_v9 = vld [vmem:[%s11518_s2] ss:$8 sps:$4 sm:$0xff]  }
 0x174   :  { %v342_v47 = vpop.f32.mrb[0].mxu1  ;;  %v258_v53 = vpop.f32.mrb[3].mxu0 }
 0x175   :  { %v343_v3 = vadd.f32 %v342_v47, %v253_v2  ;;  %v344_v49 = vpop.f32.mrb[1].mxu1  ;;  %1735 = vmatpush1.bf16.msra.mxu0 %v9361_v11  ;;  %v8886_v11 = vld [vmem:[%s11518_s2 + $0x14] ss:$8 sps:$4 sm:$0xff]  }
 0x176   :  { %v345_v50 = vadd.f32 %v344_v49, %v255_v4  ;;  %1774 = vmatpush1.bf16.msra.mxu1 %v9345_v8  ;;  %v346_v5 = vpop.f32.mrb[2].mxu1  ;;  %1736 = vmatprep.subr.bf16.mxu0 %v9373_v13  ;;  %v8883_v8 = vld [vmem:[%s11539_s30 + $0x4] ss:$8 sps:$4 sm:$0xff]  }
 0x177   :  { %v360_v52 = vadd.f32 %v9806_v1, %v343_v3  ;;  %1775 = vmatprep.subr.bf16.mxu1 %v9356_v10  ;;  %v347_v54 = vpop.f32.mrb[3].mxu1  ;;  %v8885_v10 = vld [vmem:[%s11539_s30] ss:$8 sps:$4 sm:$0xff]   ;;  %v9937_v3 = vld [vmem:[%s11519_s3 + $0x30] ss:$8 sps:$4 sm:$0xff]  }
 0x178   :  { %v361_v55 = vadd.f32 %v9812_v48, %v345_v50 }
 0x179   :  { %1737 = vmatpush1.bf16.msra.mxu0 %v9385_v15 }
 0x17a   :  { %v364_v56 = vcombine.low %v360_v52, %v361_v55  ;;  %1776 = vmatpush1.bf16.msra.mxu1 %v9366_v12  ;;  %1827 = vmatprep.subr.bf16.mxu0 %v8882_v7 }
 0x17b   :  { %1777 = vmatprep.subr.bf16.mxu1 %v9380_v14 }
 0x17c   :  { %8125 = vst.sshfl [vmem:[#allocation2] sm:$0x33 pattern:$0x76325410] %v364_v56  ;;  %8165 = vmatmul.mubr.msk.bf16.vlgmr.msra.gmra.mrb[56].mxu0 %vm215_vm1, %v9483_v63 }
 0x17d   :  { %1828 = vmatpush1.bf16.msra.mxu0 %v8884_v9  ;;  %1859 = vmatprep.mubr.bf16.mxu0 %v9109_v0 }
 0x17e   :  { %1778 = vmatpush1.bf16.msra.mxu1 %v9390_v16  ;;  %1829 = vmatprep.subr.bf16.mxu0 %v8886_v11 }
 0x17f   :  { %1868 = vmatprep.subr.bf16.mxu1 %v8883_v8  ;;  %v415_v12 = vpop.f32.mrb[4].mxu0 }
 0x180   :  { %v417_v16 = vpop.f32.mrb[5].mxu0 }
 0x181   :  { %8166 = vmatmul.mubr.msk.bf16.vlgmr.msra.gmra.mrb[56].mxu1 %vm215_vm1, %v9481_v62  ;;  %v419_v59 = vpop.f32.mrb[6].mxu0  ;;  %1830 = vmatpush1.bf16.msra.mxu0 %v8887_v60 }
 0x182   :  { %1869 = vmatpush1.bf16.msra.mxu1 %v8885_v10  ;;  %1900 = vmatprep.mubr.bf16.mxu1 %v9109_v0  ;;  %v420_v63 = vpop.f32.mrb[7].mxu0 }
 0x183   :  { %1870 = vmatprep.subr.bf16.mxu1 %v9334_v6  ;;  %v8888_v6 = vld [vmem:[%s11539_s30 + $0x10] ss:$8 sps:$4 sm:$0xff]   ;;  %1831 = vmatprep.subr.bf16.mxu0 %v8889_v17 }
 0x184   :  { %v462_v13 = vpop.f32.mrb[4].mxu1 }
 0x185   :  { %v463_v15 = vadd.f32 %v462_v13, %v415_v12  ;;  %v464_v57 = vpop.f32.mrb[5].mxu1  ;;  %1832 = vmatpush1.bf16.msra.mxu0 %v8891_v22 }
 0x186   :  { %v465_v58 = vadd.f32 %v464_v57, %v417_v16  ;;  %1871 = vmatpush1.bf16.msra.mxu1 %v8888_v6  ;;  %v466_v61 = vpop.f32.mrb[6].mxu1  ;;  %1833 = vmatprep.subr.bf16.mxu0 %v8893_v28 }
 0x187   :  { %v469_v62 = vadd.f32 %v463_v15, %v9806_v1  ;;  %1872 = vmatprep.subr.bf16.mxu1 %v8890_v18  ;;  %v467_v19 = vpop.f32.mrb[7].mxu1 }
 0x188   :  { %v470_v20 = vadd.f32 %v465_v58, %v9812_v48 }
 0x189   :  { %1834 = vmatpush1.bf16.msra.mxu0 %v8894_v30 }
 0x18a   :  { %v473_v21 = vcombine.low %v469_v62, %v470_v20  ;;  %1873 = vmatpush1.bf16.msra.mxu1 %v8892_v27  ;;  %1976 = vmatprep.subr.bf16.mxu0 %v9877_v29 }
 0x18b   :  { %1874 = vmatprep.subr.bf16.mxu1 %v9380_v14  ;;  %v9888_v14 = vld [vmem:[%s11519_s3] ss:$8 sps:$4 sm:$0xff]  }
 0x18c   :  { %8128 = vst.sshfl [vmem:[#allocation2 + $0x4] sm:$0x33 pattern:$0x76325410] %v473_v21  ;;  %8168 = vmatmul.mubr.msk.bf16.vlgmr.msra.gmra.mrb[60].mxu0 %vm215_vm1, %v9416_v33 }
 0x18d   :  { %1977 = vmatpush1.bf16.msra.mxu0 %v9888_v14  ;;  %2008 = vmatprep.mubr.bf16.mxu0 %v9109_v0 }
 0x18e   :  { %1875 = vmatpush1.bf16.msra.mxu1 %v8895_v23  ;;  %1978 = vmatprep.subr.bf16.mxu0 %v9894_v24 }
 0x18f   :  { %2067 = vmatprep.subr.bf16.mxu1 %v9877_v29  ;;  %v525_v33 = vpop.f32.mrb[8].mxu0 }
 0x190   :  { %v527_v36 = vpop.f32.mrb[9].mxu0 }
 0x191   :  { %8169 = vmatmul.mubr.msk.bf16.vlgmr.msra.gmra.mrb[60].mxu1 %vm215_vm1, %v9414_v32  ;;  %v529_v37 = vpop.f32.mrb[10].mxu0  ;;  %1979 = vmatpush1.bf16.msra.mxu0 %v9905_v31 }
 0x192   :  { %2068 = vmatpush1.bf16.msra.mxu1 %v9888_v14  ;;  %2099 = vmatprep.mubr.bf16.mxu1 %v9109_v0  ;;  %v530_v41 = vpop.f32.mrb[11].mxu0 }
 0x193   :  { %2069 = vmatprep.subr.bf16.mxu1 %v9894_v24  ;;  %1980 = vmatprep.subr.bf16.mxu0 %v9912_v34 }
 0x194   :  { %v573_v32 = vpop.f32.mrb[8].mxu1 }
 0x195   :  { %v574_v35 = vadd.f32 %v573_v32, %v525_v33  ;;  %v575_v25 = vpop.f32.mrb[9].mxu1  ;;  %1981 = vmatpush1.bf16.msra.mxu0 %v9921_v38 }
 0x196   :  { %v576_v26 = vadd.f32 %v575_v25, %v527_v36  ;;  %v577_v39 = vpop.f32.mrb[10].mxu1  ;;  %2070 = vmatpush1.bf16.msra.mxu1 %v9905_v31  ;;  %1982 = vmatprep.subr.bf16.mxu0 %v9928_v42 }
 0x197   :  { %v580_v40 = vadd.f32 %v574_v35, %v9806_v1  ;;  %v578_v45 = vpop.f32.mrb[11].mxu1  ;;  %2071 = vmatprep.subr.bf16.mxu1 %v9912_v34 }
 0x198   :  { %v581_v2 = vadd.f32 %v576_v26, %v9812_v48 }
 0x199   :  { %1983 = vmatpush1.bf16.msra.mxu0 %v9937_v3 }
 0x19a   :  { %v584_v47 = vcombine.low %v580_v40, %v581_v2  ;;  %2072 = vmatpush1.bf16.msra.mxu1 %v9921_v38  ;;  %2157 = vmatprep.subr.bf16.mxu0 %v9877_v29 }
 0x19b   :  { %2073 = vmatprep.subr.bf16.mxu1 %v9928_v42 }
 0x19c   :  { %8131 = vst.sshfl [vmem:[#allocation2 + $0x8] sm:$0x33 pattern:$0x76325410] %v584_v47  ;;  %2009 = vmatmul.mubr.bf16.vlgmr.msra.gmra.mrb[64].mxu0 %v9109_v0 }
 0x19d   :  { %2158 = vmatpush1.bf16.msra.mxu0 %v9888_v14  ;;  %2189 = vmatprep.mubr.bf16.mxu0 %v9109_v0 }
 0x19e   :  { %2074 = vmatpush1.bf16.msra.mxu1 %v9937_v3  ;;  %2159 = vmatprep.subr.bf16.mxu0 %v9894_v24 }
 0x19f   :  { %2247 = vmatprep.subr.bf16.mxu1 %v9877_v29  ;;  %v636_v4 = vpop.f32.mrb[12].mxu0 }
 0x1a0   :  { %v638_v51 = vpop.f32.mrb[13].mxu0 }
 0x1a1   :  { %v640_v53 = vpop.f32.mrb[14].mxu0  ;;  %2160 = vmatpush1.bf16.msra.mxu0 %v9905_v31 }
 0x1a2   :  { %v641_v56 = vpop.f32.mrb[15].mxu0  ;;  %2161 = vmatprep.subr.bf16.mxu0 %v9912_v34 }
 0x1a4   :  { %v684_v49 = vpop.f32.mrb[12].mxu1 }
 0x1a5   :  { %v685_v50 = vadd.f32 %v684_v49, %v636_v4  ;;  %v686_v5 = vpop.f32.mrb[13].mxu1  ;;  %2162 = vmatpush1.bf16.msra.mxu0 %v9921_v38 }
 0x1a6   :  { %v687_v52 = vadd.f32 %v686_v5, %v638_v51  ;;  %v688_v54 = vpop.f32.mrb[14].mxu1  ;;  %2163 = vmatprep.subr.bf16.mxu0 %v9928_v42 }
 0x1a7   :  { %v691_v55 = vadd.f32 %v685_v50, %v9806_v1  ;;  %v689_v7 = vpop.f32.mrb[15].mxu1 }
 0x1a8   :  { %v692_v8 = vadd.f32 %v687_v52, %v9812_v48 }
 0x1a9   :  { %2164 = vmatpush1.bf16.msra.mxu0 %v9937_v3 }
 0x1aa   :  { %v695_v9 = vcombine.low %v691_v55, %v692_v8  ;;  %2337 = vmatprep.subr.bf16.mxu0 %v9877_v29 }
 0x1ac   :  { %8134 = vst.sshfl [vmem:[#allocation2 + $0xc] sm:$0x33 pattern:$0x76325410] %v695_v9 }
 0x1af   :  { %v747_v10 = vpop.f32.mrb[16].mxu0 }
 0x1b0   :  { %v749_v13 = vpop.f32.mrb[17].mxu0 }
 0x1b1   :  { %v751_v57 = vpop.f32.mrb[18].mxu0 }
 0x1b2   :  { %v752_v60 = vpop.f32.mrb[19].mxu0 }
 0x1b4   :  { %v795_v11 = vpop.f32.mrb[16].mxu1 }
 0x1b5   :  { %v796_v12 = vadd.f32 %v795_v11, %v747_v10  ;;  %v797_v15 = vpop.f32.mrb[17].mxu1 }
 0x1b6   :  { %v798_v16 = vadd.f32 %v797_v15, %v749_v13  ;;  %v799_v58 = vpop.f32.mrb[18].mxu1 }
 0x1b7   :  { %v802_v59 = vadd.f32 %v796_v12, %v9806_v1  ;;  %v800_v6 = vpop.f32.mrb[19].mxu1 }
 0x1b8   :  { %v803_v61 = vadd.f32 %v798_v16, %v9812_v48 }
 0x1ba   :  { %v806_v62 = vcombine.low %v802_v59, %v803_v61 }
 0x1bc   :  { %8137 = vst.sshfl [vmem:[#allocation2 + $0x10] sm:$0x33 pattern:$0x76325410] %v806_v62 }
 0x1bf   :  { %v858_v63 = vpop.f32.mrb[20].mxu0 }
 0x1c0   :  { %v860_v19 = vpop.f32.mrb[21].mxu0 }
 0x1c1   :  { %v862_v22 = vpop.f32.mrb[22].mxu0 }
 0x1c2   :  { %v863_v30 = vpop.f32.mrb[23].mxu0 }
 0x1c4   :  { %v906_v17 = vpop.f32.mrb[20].mxu1 }
 0x1c5   :  { %v907_v18 = vadd.f32 %v906_v17, %v858_v63  ;;  %v908_v20 = vpop.f32.mrb[21].mxu1 }
 0x1c6   :  { %v909_v21 = vadd.f32 %v908_v20, %v860_v19  ;;  %v910_v27 = vpop.f32.mrb[22].mxu1 }
 0x1c7   :  { %v913_v28 = vadd.f32 %v907_v18, %v9806_v1  ;;  %v911_v23 = vpop.f32.mrb[23].mxu1 }
 0x1c8   :  { %v914_v33 = vadd.f32 %v909_v21, %v9812_v48 }
 0x1ca   :  { %v917_v32 = vcombine.low %v913_v28, %v914_v33 }
 0x1cc   :  { %8140 = vst.sshfl [vmem:[#allocation2 + $0x14] sm:$0x33 pattern:$0x76325410] %v917_v32 }
 0x1cf   :  { %v968_v35 = vpop.f32.mrb[24].mxu0 }
 0x1d0   :  { %v970_v26 = vpop.f32.mrb[25].mxu0 }
 0x1d1   :  { %v972_v40 = vpop.f32.mrb[26].mxu0 }
 0x1d2   :  { %v973_v2 = vpop.f32.mrb[27].mxu0 }
 0x1d4   :  { %v1016_v36 = vpop.f32.mrb[24].mxu1 }
 0x1d5   :  { %v1017_v25 = vadd.f32 %v1016_v36, %v968_v35  ;;  %v1018_v37 = vpop.f32.mrb[25].mxu1 }
 0x1d6   :  { %v1019_v39 = vadd.f32 %v1018_v37, %v970_v26  ;;  %v1020_v41 = vpop.f32.mrb[26].mxu1 }
 0x1d7   :  { %v1023_v45 = vadd.f32 %v1017_v25, %v9806_v1  ;;  %v1021_v47 = vpop.f32.mrb[27].mxu1 }
 0x1d8   :  { %v1024_v4 = vadd.f32 %v1019_v39, %v9812_v48 }
 0x1da   :  { %v1027_v49 = vcombine.low %v1023_v45, %v1024_v4 }
 0x1dc   :  { %8143 = vst.sshfl [vmem:[#allocation2 + $0x18] sm:$0x33 pattern:$0x76325410] %v1027_v49 }
 0x1df   :  { %v1078_v50 = vpop.f32.mrb[28].mxu0 }
 0x1e0   :  { %v1080_v52 = vpop.f32.mrb[29].mxu0 }
 0x1e1   :  { %v1082_v55 = vpop.f32.mrb[30].mxu0 }
 0x1e2   :  { %v1083_v8 = vpop.f32.mrb[31].mxu0 }
 0x1e4   :  { %v1126_v51 = vpop.f32.mrb[28].mxu1 }
 0x1e5   :  { %v1127_v5 = vadd.f32 %v1126_v51, %v1078_v50  ;;  %v1128_v53 = vpop.f32.mrb[29].mxu1 }
 0x1e6   :  { %v1129_v54 = vadd.f32 %v1128_v53, %v1080_v52  ;;  %v1130_v56 = vpop.f32.mrb[30].mxu1 }
 0x1e7   :  { %v1133_v7 = vadd.f32 %v1127_v5, %v9806_v1  ;;  %v1131_v9 = vpop.f32.mrb[31].mxu1 }
 0x1e8   :  { %v1134_v10 = vadd.f32 %v1129_v54, %v9812_v48 }
 0x1ea   :  { %v1137_v11 = vcombine.low %v1133_v7, %v1134_v10 }
 0x1ec   :  { %8146 = vst.sshfl [vmem:[#allocation2 + $0x1c] sm:$0x33 pattern:$0x76325410] %v1137_v11 }
 0x1ef   :  { %v1182_v12 = vpop.f32.mrb[32].mxu0 }
 0x1f0   :  { %v1184_v16 = vpop.f32.mrb[33].mxu0 }
 0x1f1   :  { %v1186_v59 = vpop.f32.mrb[34].mxu0 }
 0x1f2   :  { %v1187_v61 = vpop.f32.mrb[35].mxu0 }
 0x1f4   :  { %v1223_v13 = vpop.f32.mrb[32].mxu1 }
 0x1f5   :  { %v1224_v15 = vadd.f32 %v1223_v13, %v1182_v12  ;;  %v1225_v57 = vpop.f32.mrb[33].mxu1 }
 0x1f6   :  { %v1226_v58 = vadd.f32 %v1225_v57, %v1184_v16  ;;  %v1227_v60 = vpop.f32.mrb[34].mxu1 }
 0x1f7   :  { %v1230_v6 = vadd.f32 %v1224_v15, %v9806_v1  ;;  %v1228_v62 = vpop.f32.mrb[35].mxu1 }
 0x1f8   :  { %v1231_v63 = vadd.f32 %v1226_v58, %v9812_v48 }
 0x1fa   :  { %v1234_v17 = vcombine.low %v1230_v6, %v1231_v63 }
 0x1fc   :  { %8149 = vst.sshfl [vmem:[#allocation2 + $0x20] sm:$0x33 pattern:$0x76325410] %v1234_v17 }
 0x1ff   :  { %v1279_v18 = vpop.f32.mrb[36].mxu0 }
 0x200   :  { %v1281_v21 = vpop.f32.mrb[37].mxu0 }
 0x201   :  { %v1283_v28 = vpop.f32.mrb[38].mxu0 }
 0x202   :  { %v1284_v33 = vpop.f32.mrb[39].mxu0 }
 0x204   :  { %v1320_v19 = vpop.f32.mrb[36].mxu1 }
 0x205   :  { %v1321_v20 = vadd.f32 %v1320_v19, %v1279_v18  ;;  %v1322_v22 = vpop.f32.mrb[37].mxu1 }
 0x206   :  { %v1323_v27 = vadd.f32 %v1322_v22, %v1281_v21  ;;  %v1324_v30 = vpop.f32.mrb[38].mxu1 }
 0x207   :  { %v1327_v23 = vadd.f32 %v1321_v20, %v9806_v1  ;;  %v1325_v32 = vpop.f32.mrb[39].mxu1 }
 0x208   :  { %v1328_v35 = vadd.f32 %v1323_v27, %v9812_v48 }
 0x20a   :  { %v1331_v36 = vcombine.low %v1327_v23, %v1328_v35 }
 0x20c   :  { %8152 = vst.sshfl [vmem:[#allocation2 + $0x24] sm:$0x33 pattern:$0x76325410] %v1331_v36 }
 0x20f   :  { %v1376_v25 = vpop.f32.mrb[40].mxu0 }
 0x210   :  { %v1378_v39 = vpop.f32.mrb[41].mxu0 }
 0x211   :  { %v1380_v45 = vpop.f32.mrb[42].mxu0 }
 0x212   :  { %v1381_v4 = vpop.f32.mrb[43].mxu0 }
 0x214   :  { %v1417_v26 = vpop.f32.mrb[40].mxu1 }
 0x215   :  { %v1418_v37 = vadd.f32 %v1417_v26, %v1376_v25  ;;  %v1419_v40 = vpop.f32.mrb[41].mxu1 }
 0x216   :  { %v1420_v41 = vadd.f32 %v1419_v40, %v1378_v39  ;;  %v1421_v2 = vpop.f32.mrb[42].mxu1 }
 0x217   :  { %v1424_v47 = vadd.f32 %v1418_v37, %v9806_v1  ;;  %v1422_v49 = vpop.f32.mrb[43].mxu1 }
 0x218   :  { %v1425_v50 = vadd.f32 %v1420_v41, %v9812_v48 }
 0x21a   :  { %v1428_v51 = vcombine.low %v1424_v47, %v1425_v50 }
 0x21c   :  { %8155 = vst.sshfl [vmem:[#allocation2 + $0x28] sm:$0x33 pattern:$0x76325410] %v1428_v51 }
 0x21f   :  { %v1473_v5 = vpop.f32.mrb[44].mxu0 }
 0x220   :  { %v1475_v54 = vpop.f32.mrb[45].mxu0 }
 0x221   :  { %v1477_v7 = vpop.f32.mrb[46].mxu0 }
 0x222   :  { %v1478_v10 = vpop.f32.mrb[47].mxu0 }
 0x224   :  { %v1514_v52 = vpop.f32.mrb[44].mxu1 }
 0x225   :  { %v1515_v53 = vadd.f32 %v1514_v52, %v1473_v5  ;;  %v1516_v55 = vpop.f32.mrb[45].mxu1 }
 0x226   :  { %v1517_v56 = vadd.f32 %v1516_v55, %v1475_v54  ;;  %v1518_v8 = vpop.f32.mrb[46].mxu1 }
 0x227   :  { %v1521_v9 = vadd.f32 %v1515_v53, %v9806_v1  ;;  %v1519_v11 = vpop.f32.mrb[47].mxu1 }
 0x228   :  { %v1522_v12 = vadd.f32 %v1517_v56, %v9812_v48 }
 0x22a   :  { %v1525_v13 = vcombine.low %v1521_v9, %v1522_v12 }
 0x22c   :  { %8158 = vst.sshfl [vmem:[#allocation2 + $0x2c] sm:$0x33 pattern:$0x76325410] %v1525_v13 }
 0x22f   :  { %v1570_v15 = vpop.f32.mrb[48].mxu0 }
 0x230   :  { %v1572_v58 = vpop.f32.mrb[49].mxu0 }
 0x231   :  { %v1574_v6 = vpop.f32.mrb[50].mxu0 }
 0x232   :  { %v1575_v63 = vpop.f32.mrb[51].mxu0 }
 0x234   :  { %v1611_v16 = vpop.f32.mrb[48].mxu1 }
 0x235   :  { %v1612_v57 = vadd.f32 %v1611_v16, %v1570_v15  ;;  %v1613_v59 = vpop.f32.mrb[49].mxu1 }
 0x236   :  { %v1614_v60 = vadd.f32 %v1613_v59, %v1572_v58  ;;  %v1615_v61 = vpop.f32.mrb[50].mxu1 }
 0x237   :  { %v1618_v62 = vadd.f32 %v1612_v57, %v9806_v1  ;;  %v1616_v17 = vpop.f32.mrb[51].mxu1  ;;  %v9110_v57 = vmov 1983009808  }
 0x238   :  { %v1619_v18 = vadd.f32 %v1614_v60, %v9812_v48  ;;  %v2021_v58 = vunpack.c.l.s4 %v9110_v57 }
 0x23a   :  { %v1622_v19 = vcombine.low %v1618_v62, %v1619_v18  ;;  %v2022_v59 = vunpack.c.0.s8 %v2021_v58 }
 0x23c   :  { %8161 = vst.sshfl [vmem:[#allocation2 + $0x30] sm:$0x33 pattern:$0x76325410] %v1622_v19  ;;  %v9983_v6 = vsub.s32 %v2022_v59, %v9790_v43 }
 0x23f   :  { %v1667_v20 = vpop.f32.mrb[52].mxu0 }
 0x240   :  { %v1669_v27 = vpop.f32.mrb[53].mxu0 }
 0x241   :  { %v1671_v23 = vpop.f32.mrb[54].mxu0 }
 0x242   :  { %v1672_v35 = vpop.f32.mrb[55].mxu0 }
 0x244   :  { %v1708_v21 = vpop.f32.mrb[52].mxu1 }
 0x245   :  { %v1709_v22 = vadd.f32 %v1708_v21, %v1667_v20  ;;  %v1710_v28 = vpop.f32.mrb[53].mxu1 }
 0x246   :  { %v1711_v30 = vadd.f32 %v1710_v28, %v1669_v27  ;;  %v1712_v33 = vpop.f32.mrb[54].mxu1 }
 0x247   :  { %v1715_v32 = vadd.f32 %v1709_v22, %v9806_v1  ;;  %v1713_v36 = vpop.f32.mrb[55].mxu1 }
 0x248   :  { %v1716_v25 = vadd.f32 %v1711_v30, %v9812_v48 }
 0x24a   :  { %v1719_v26 = vcombine.low %v1715_v32, %v1716_v25 }
 0x24c   :  { %8164 = vst.sshfl [vmem:[#allocation2 + $0x34] sm:$0x33 pattern:$0x76325410] %v1719_v26 }
 0x24f   :  { %v1764_v37 = vpop.f32.mrb[56].mxu0 }
 0x250   :  { %v1766_v41 = vpop.f32.mrb[57].mxu0 }
 0x251   :  { %v1768_v47 = vpop.f32.mrb[58].mxu0 }
 0x252   :  { %v1769_v50 = vpop.f32.mrb[59].mxu0 }
 0x254   :  { %v1805_v39 = vpop.f32.mrb[56].mxu1 }
 0x255   :  { %v1806_v40 = vadd.f32 %v1805_v39, %v1764_v37  ;;  %v1807_v45 = vpop.f32.mrb[57].mxu1 }
 0x256   :  { %v1808_v2 = vadd.f32 %v1807_v45, %v1766_v41  ;;  %v1809_v4 = vpop.f32.mrb[58].mxu1 }
 0x257   :  { %v1812_v49 = vadd.f32 %v1806_v40, %v9806_v1  ;;  %v1810_v51 = vpop.f32.mrb[59].mxu1 }
 0x258   :  { %v1813_v5 = vadd.f32 %v1808_v2, %v9812_v48 }
 0x25a   :  { %v1816_v52 = vcombine.low %v1812_v49, %v1813_v5  ;;  %v2062_v49 = vld [vmem:[#allocation2 + $0x4] sm:$0xf] }
 0x25c   :  { %8167 = vst.sshfl [vmem:[#allocation2 + $0x38] sm:$0x33 pattern:$0x76325410] %v1816_v52 }
 0x25f   :  { %v1861_v53 = vpop.f32.mrb[60].mxu0 }
 0x260   :  { %v1863_v56 = vpop.f32.mrb[61].mxu0 }
 0x261   :  { %v1865_v9 = vpop.f32.mrb[62].mxu0 }
 0x262   :  { %v1866_v12 = vpop.f32.mrb[63].mxu0 }
 0x264   :  { %v1902_v54 = vpop.f32.mrb[60].mxu1 }
 0x265   :  { %v1903_v55 = vadd.f32 %v1902_v54, %v1861_v53  ;;  %v1904_v7 = vpop.f32.mrb[61].mxu1 }
 0x266   :  { %v1905_v8 = vadd.f32 %v1904_v7, %v1863_v56  ;;  %v1906_v10 = vpop.f32.mrb[62].mxu1 }
 0x267   :  { %v1909_v11 = vadd.f32 %v1903_v55, %v9806_v1  ;;  %v1907_v13 = vpop.f32.mrb[63].mxu1  ;;  %v1932_v1 = vld [vmem:[#allocation2] sm:$0xf] }
 0x268   :  { %v1910_v15 = vadd.f32 %v1905_v8, %v9812_v48 }
 0x26a   :  { %v1913_v16 = vcombine.low %v1909_v11, %v1910_v15 }
 0x26c   :  { %8170 = vst.sshfl [vmem:[#allocation2 + $0x3c] sm:$0x33 pattern:$0x76325410] %v1913_v16 }
 0x26f   :  { %v2010_v60 = vpop.f32.mrb[64].mxu0 }
 0x270   :  { %v2012_v61 = vpop.f32.mrb[65].mxu0 }
 0x271   :  { %v2019_v62 = vcombine.low %v2010_v60, %v2012_v61  ;;  %v2014_v63 = vpop.f32.mrb[66].mxu0 }
 0x272   :  { %v2015_v17 = vpop.f32.mrb[67].mxu0  ;;  %v2152_v63 = vld [vmem:[#allocation2 + $0x8] sm:$0xf] }
 0x273   :  { %v2026_v18 = vrot.slane %v2019_v62, %v9983_v6 }
 0x275   :  { %v2028_v19 = vadd.f32 %v2026_v18, %v1932_v1 }
 0x277   :  { %v8179_v20 = vmul.f32 -1.442695, %v2028_v19  ;;  %v2036_v48 = vrot.slane %v2028_v19, 2 }
 0x279   :  { %8626 = vpow2.f32 %v8179_v20 }
 0x27a   :  { %8628 = vtanh.f32 %v2036_v48 }
 0x283   :  { %v8627_v21 = vpop.eup %8626 }
 0x284   :  { %v2032_v22 = vadd.f32 1.0, %v8627_v21  ;;  %v8629_v27 = vpop.eup %8628 }
 0x286   :  { %8630 = vrcp.f32 %v2032_v22 }
 0x290   :  { %v8631_v28 = vpop.eup %8630 }
 0x291   :  { %v2040_v30 = vmul.f32 %v8631_v28, %v8629_v27  ;;  %v2039_v23 = vmul.f32 0.0, %v8631_v28 }
 0x293   :  { %2042 = vrot.lane.b32.xlu0 %v2040_v30, %s9105_s22 }
 0x297   :  { %2048 = vrot.lane.b32.xlu0 %v8631_v28, %s9105_s22 }
 0x305   :  { %v2043_v33 = vpop.permute.xlu0 %2042 }
 0x306   :  { %v2045_v32 = vadd.f32 %v2043_v33, %v2039_v23 }
 0x308   :  { %8632 = vtanh.f32 %v2045_v32 }
 0x309   :  { %v2049_v36 = vpop.permute.xlu0 %2048 }
 0x30a   :  { %v2050_v25 = vrot.slane %v2049_v36, 2 }
 0x312   :  { %v8633_v35 = vpop.eup %8632 }
 0x313   :  { %2053 = vrot.lane.b32.xlu1 %v8633_v35, %s9105_s22 }
 0x385   :  { %v2054_v26 = vpop.permute.xlu1 %2053 }
 0x386   :  { %v2056_v37 = vmul.f32 %v2054_v26, %v2050_v25 }
 0x388   :  { %2058 = vst.msk [vmem:[#allocation3] sm:$0x3] %vm2057_vm2, %v2056_v37  ;;  %v2063_v39 = vpack.c.bf16 %v2056_v37, %v2056_v37 }
 0x389   :  { %2061 = vst.msk [vmem:[#allocation3 + $0x1e] sm:$0x3] %vm2060_vm3, %v2056_v37 }
 0x38a   :  { %8180 = vmatmul.mubr.msk.bf16.vlgmr.msra.gmra.mrb[64].mxu1 %vm215_vm1, %v2063_v39 }
 0x38b   :  { %2248 = vmatpush1.bf16.msra.mxu1 %v9888_v14  ;;  %2279 = vmatprep.mubr.bf16.mxu1 %v9109_v0 }
 0x38c   :  { %2249 = vmatprep.subr.bf16.mxu1 %v9894_v24 }
 0x38f   :  { %2250 = vmatpush1.bf16.msra.mxu1 %v9905_v31 }
 0x390   :  { %2251 = vmatprep.subr.bf16.mxu1 %v9912_v34 }
 0x393   :  { %2252 = vmatpush1.bf16.msra.mxu1 %v9921_v38 }
 0x394   :  { %2253 = vmatprep.subr.bf16.mxu1 %v9928_v42 }
 0x397   :  { %2254 = vmatpush1.bf16.msra.mxu1 %v9937_v3 }
 0x398   :  { %2427 = vmatprep.subr.bf16.mxu1 %v9877_v29 }
 0x45d   :  { %v2101_v40 = vpop.f32.mrb[64].mxu1 }
 0x45e   :  { %v2103_v41 = vpop.f32.mrb[65].mxu1 }
 0x45f   :  { %v2110_v45 = vcombine.low %v2101_v40, %v2103_v41  ;;  %v2105_v2 = vpop.f32.mrb[66].mxu1 }
 0x460   :  { %v2106_v47 = vpop.f32.mrb[67].mxu1  ;;  %v2242_v2 = vld [vmem:[#allocation2 + $0xc] sm:$0xf] }
 0x461   :  { %v2117_v4 = vrot.slane %v2110_v45, %v9983_v6 }
 0x463   :  { %v2119_v50 = vadd.f32 %v2117_v4, %v2062_v49 }
 0x465   :  { %v8181_v51 = vmul.f32 -1.442695, %v2119_v50  ;;  %v2127_v5 = vrot.slane %v2119_v50, 2 }
 0x467   :  { %8634 = vpow2.f32 %v8181_v51 }
 0x468   :  { %8636 = vtanh.f32 %v2127_v5 }
 0x471   :  { %v8635_v52 = vpop.eup %8634 }
 0x472   :  { %v2123_v53 = vadd.f32 1.0, %v8635_v52  ;;  %v8637_v54 = vpop.eup %8636 }
 0x474   :  { %8638 = vrcp.f32 %v2123_v53 }
 0x47e   :  { %v8639_v55 = vpop.eup %8638 }
 0x47f   :  { %2139 = vrot.lane.b32.xlu0 %v8639_v55, %s9105_s22  ;;  %v2131_v56 = vmul.f32 %v8639_v55, %v8637_v54  ;;  %v2130_v7 = vmul.f32 %v8639_v55, %v2045_v32 }
 0x481   :  { %2133 = vrot.lane.b32.xlu1 %v2131_v56, %s9105_s22 }
 0x4f1   :  { %v2140_v11 = vpop.permute.xlu0 %2139 }
 0x4f2   :  { %v2141_v12 = vrot.slane %v2140_v11, 2 }
 0x4f3   :  { %v2134_v8 = vpop.permute.xlu1 %2133 }
 0x4f4   :  { %v2136_v9 = vadd.f32 %v2134_v8, %v2130_v7 }
 0x4f6   :  { %8640 = vtanh.f32 %v2136_v9 }
 0x500   :  { %v8641_v10 = vpop.eup %8640 }
 0x501   :  { %2144 = vrot.lane.b32.xlu1 %v8641_v10, %s9105_s22 }
 0x573   :  { %v2145_v13 = vpop.permute.xlu1 %2144 }
 0x574   :  { %v2147_v15 = vmul.f32 %v2145_v13, %v2141_v12 }
 0x576   :  { %2149 = vst.msk [vmem:[#allocation3 + $0x2] sm:$0x3] %vm2057_vm2, %v2147_v15  ;;  %v2153_v16 = vpack.c.bf16 %v2147_v15, %v2147_v15 }
 0x577   :  { %2151 = vst.msk [vmem:[#allocation3 + $0x1c] sm:$0x3] %vm2060_vm3, %v2147_v15 }
 0x578   :  { %8182 = vmatmul.mubr.msk.bf16.vlgmr.msra.gmra.mrb[68].mxu0 %vm215_vm1, %v2153_v16 }
 0x579   :  { %2338 = vmatpush1.bf16.msra.mxu0 %v9888_v14  ;;  %2369 = vmatprep.mubr.bf16.mxu0 %v9109_v0 }
 0x57a   :  { %2339 = vmatprep.subr.bf16.mxu0 %v9894_v24 }
 0x57d   :  { %2340 = vmatpush1.bf16.msra.mxu0 %v9905_v31 }
 0x57e   :  { %2341 = vmatprep.subr.bf16.mxu0 %v9912_v34 }
 0x581   :  { %2342 = vmatpush1.bf16.msra.mxu0 %v9921_v38 }
 0x582   :  { %2343 = vmatprep.subr.bf16.mxu0 %v9928_v42 }
 0x585   :  { %2344 = vmatpush1.bf16.msra.mxu0 %v9937_v3 }
 0x586   :  { %2517 = vmatprep.subr.bf16.mxu0 %v9877_v29 }
 0x64b   :  { %v2191_v57 = vpop.f32.mrb[68].mxu0 }
 0x64c   :  { %v2193_v58 = vpop.f32.mrb[69].mxu0 }
 0x64d   :  { %v2200_v59 = vcombine.low %v2191_v57, %v2193_v58  ;;  %v2195_v60 = vpop.f32.mrb[70].mxu0 }
 0x64e   :  { %v2196_v61 = vpop.f32.mrb[71].mxu0  ;;  %v2332_v60 = vld [vmem:[#allocation2 + $0x10] sm:$0xf] }
 0x64f   :  { %v2207_v62 = vrot.slane %v2200_v59, %v9983_v6 }
 0x651   :  { %v2209_v17 = vadd.f32 %v2207_v62, %v2152_v63 }
 0x653   :  { %v8183_v18 = vmul.f32 -1.442695, %v2209_v17  ;;  %v2217_v1 = vrot.slane %v2209_v17, 2 }
 0x655   :  { %8642 = vpow2.f32 %v8183_v18 }
 0x656   :  { %8644 = vtanh.f32 %v2217_v1 }
 0x65f   :  { %v8643_v19 = vpop.eup %8642 }
 0x660   :  { %v2213_v20 = vadd.f32 1.0, %v8643_v19  ;;  %v8645_v48 = vpop.eup %8644 }
 0x662   :  { %8646 = vrcp.f32 %v2213_v20 }
 0x66c   :  { %v8647_v21 = vpop.eup %8646 }
 0x66d   :  { %2229 = vrot.lane.b32.xlu1 %v8647_v21, %s9105_s22  ;;  %v2221_v22 = vmul.f32 %v8647_v21, %v8645_v48  ;;  %v2220_v27 = vmul.f32 %v8647_v21, %v2136_v9 }
 0x66f   :  { %2223 = vrot.lane.b32.xlu0 %v2221_v22, %s9105_s22 }
 0x6df   :  { %v2230_v33 = vpop.permute.xlu1 %2229 }
 0x6e0   :  { %v2231_v32 = vrot.slane %v2230_v33, 2 }
 0x6e1   :  { %v2224_v28 = vpop.permute.xlu0 %2223 }
 0x6e2   :  { %v2226_v30 = vadd.f32 %v2224_v28, %v2220_v27 }
 0x6e4   :  { %8648 = vtanh.f32 %v2226_v30 }
 0x6ee   :  { %v8649_v23 = vpop.eup %8648 }
 0x6ef   :  { %2234 = vrot.lane.b32.xlu0 %v8649_v23, %s9105_s22 }
 0x761   :  { %v2235_v35 = vpop.permute.xlu0 %2234 }
 0x762   :  { %v2237_v36 = vmul.f32 %v2235_v35, %v2231_v32 }
 0x764   :  { %2239 = vst.msk [vmem:[#allocation3 + $0x4] sm:$0x3] %vm2057_vm2, %v2237_v36  ;;  %v2243_v25 = vpack.c.bf16 %v2237_v36, %v2237_v36 }
 0x765   :  { %2241 = vst.msk [vmem:[#allocation3 + $0x1a] sm:$0x3] %vm2060_vm3, %v2237_v36 }
 0x766   :  { %8184 = vmatmul.mubr.msk.bf16.vlgmr.msra.gmra.mrb[68].mxu1 %vm215_vm1, %v2243_v25 }
 0x767   :  { %2428 = vmatpush1.bf16.msra.mxu1 %v9888_v14  ;;  %2459 = vmatprep.mubr.bf16.mxu1 %v9109_v0 }
 0x768   :  { %2429 = vmatprep.subr.bf16.mxu1 %v9894_v24 }
 0x76b   :  { %2430 = vmatpush1.bf16.msra.mxu1 %v9905_v31 }
 0x76c   :  { %2431 = vmatprep.subr.bf16.mxu1 %v9912_v34 }
 0x76f   :  { %2432 = vmatpush1.bf16.msra.mxu1 %v9921_v38 }
 0x770   :  { %2433 = vmatprep.subr.bf16.mxu1 %v9928_v42 }
 0x773   :  { %2434 = vmatpush1.bf16.msra.mxu1 %v9937_v3 }
 0x774   :  { %2607 = vmatprep.subr.bf16.mxu1 %v9877_v29 }
 0x839   :  { %v2281_v26 = vpop.f32.mrb[68].mxu1 }
 0x83a   :  { %v2283_v37 = vpop.f32.mrb[69].mxu1 }
 0x83b   :  { %v2290_v39 = vcombine.low %v2281_v26, %v2283_v37  ;;  %v2285_v40 = vpop.f32.mrb[70].mxu1 }
 0x83c   :  { %v2286_v41 = vpop.f32.mrb[71].mxu1  ;;  %v2422_v40 = vld [vmem:[#allocation2 + $0x14] sm:$0xf] }
 0x83d   :  { %v2297_v45 = vrot.slane %v2290_v39, %v9983_v6 }
 0x83f   :  { %v2299_v47 = vadd.f32 %v2297_v45, %v2242_v2 }
 0x841   :  { %v8185_v4 = vmul.f32 -1.442695, %v2299_v47  ;;  %v2307_v49 = vrot.slane %v2299_v47, 2 }
 0x843   :  { %8650 = vpow2.f32 %v8185_v4 }
 0x844   :  { %8652 = vtanh.f32 %v2307_v49 }
 0x84d   :  { %v8651_v50 = vpop.eup %8650 }
 0x84e   :  { %v2303_v51 = vadd.f32 1.0, %v8651_v50  ;;  %v8653_v5 = vpop.eup %8652 }
 0x850   :  { %8654 = vrcp.f32 %v2303_v51 }
 0x85a   :  { %v8655_v52 = vpop.eup %8654 }
 0x85b   :  { %2319 = vrot.lane.b32.xlu0 %v8655_v52, %s9105_s22  ;;  %v2311_v53 = vmul.f32 %v8655_v52, %v8653_v5  ;;  %v2310_v54 = vmul.f32 %v8655_v52, %v2226_v30 }
 0x85d   :  { %2313 = vrot.lane.b32.xlu1 %v2311_v53, %s9105_s22 }
 0x8cd   :  { %v2320_v8 = vpop.permute.xlu0 %2319 }
 0x8ce   :  { %v2321_v9 = vrot.slane %v2320_v8, 2 }
 0x8cf   :  { %v2314_v55 = vpop.permute.xlu1 %2313 }
 0x8d0   :  { %v2316_v56 = vadd.f32 %v2314_v55, %v2310_v54 }
 0x8d2   :  { %8656 = vtanh.f32 %v2316_v56 }
 0x8dc   :  { %v8657_v7 = vpop.eup %8656 }
 0x8dd   :  { %2324 = vrot.lane.b32.xlu1 %v8657_v7, %s9105_s22 }
 0x94f   :  { %v2325_v10 = vpop.permute.xlu1 %2324 }
 0x950   :  { %v2327_v11 = vmul.f32 %v2325_v10, %v2321_v9 }
 0x952   :  { %2329 = vst.msk [vmem:[#allocation3 + $0x6] sm:$0x3] %vm2057_vm2, %v2327_v11  ;;  %v2333_v12 = vpack.c.bf16 %v2327_v11, %v2327_v11 }
 0x953   :  { %2331 = vst.msk [vmem:[#allocation3 + $0x18] sm:$0x3] %vm2060_vm3, %v2327_v11 }
 0x954   :  { %8186 = vmatmul.mubr.msk.bf16.vlgmr.msra.gmra.mrb[72].mxu0 %vm215_vm1, %v2333_v12 }
 0x955   :  { %2518 = vmatpush1.bf16.msra.mxu0 %v9888_v14  ;;  %2549 = vmatprep.mubr.bf16.mxu0 %v9109_v0 }
 0x956   :  { %2519 = vmatprep.subr.bf16.mxu0 %v9894_v24 }
 0x959   :  { %2520 = vmatpush1.bf16.msra.mxu0 %v9905_v31 }
 0x95a   :  { %2521 = vmatprep.subr.bf16.mxu0 %v9912_v34 }
 0x95d   :  { %2522 = vmatpush1.bf16.msra.mxu0 %v9921_v38 }
 0x95e   :  { %2523 = vmatprep.subr.bf16.mxu0 %v9928_v42 }
 0x961   :  { %2524 = vmatpush1.bf16.msra.mxu0 %v9937_v3 }
 0x962   :  { %2697 = vmatprep.subr.bf16.mxu0 %v9877_v29 }
 0xa27   :  { %v2371_v13 = vpop.f32.mrb[72].mxu0 }
 0xa28   :  { %v2373_v15 = vpop.f32.mrb[73].mxu0 }
 0xa29   :  { %v2380_v16 = vcombine.low %v2371_v13, %v2373_v15  ;;  %v2375_v57 = vpop.f32.mrb[74].mxu0 }
 0xa2a   :  { %v2376_v58 = vpop.f32.mrb[75].mxu0 }
 0xa2b   :  { %v2387_v59 = vrot.slane %v2380_v16, %v9983_v6 }
 0xa2d   :  { %v2389_v61 = vadd.f32 %v2387_v59, %v2332_v60 }
 0xa2f   :  { %v8187_v62 = vmul.f32 -1.442695, %v2389_v61  ;;  %v2397_v63 = vrot.slane %v2389_v61, 2 }
 0xa31   :  { %8658 = vpow2.f32 %v8187_v62 }
 0xa32   :  { %8660 = vtanh.f32 %v2397_v63 }
 0xa3b   :  { %v8659_v17 = vpop.eup %8658 }
 0xa3c   :  { %v2393_v18 = vadd.f32 1.0, %v8659_v17  ;;  %v8661_v1 = vpop.eup %8660 }
 0xa3e   :  { %8662 = vrcp.f32 %v2393_v18 }
 0xa48   :  { %v8663_v19 = vpop.eup %8662 }
 0xa49   :  { %2409 = vrot.lane.b32.xlu1 %v8663_v19, %s9105_s22  ;;  %v2401_v20 = vmul.f32 %v8663_v19, %v8661_v1  ;;  %v2400_v48 = vmul.f32 %v8663_v19, %v2316_v56 }
 0xa4b   :  { %2403 = vrot.lane.b32.xlu0 %v2401_v20, %s9105_s22  ;;  %v10091_v20 = vld [vmem:[%s11519_s3] ss:$8 sps:$4 sm:$0xff]  }
 0xabb   :  { %v2410_v28 = vpop.permute.xlu1 %2409 }
 0xabc   :  { %v2411_v30 = vrot.slane %v2410_v28, 2  ;;  %v10122_v28 = vld [vmem:[%s11519_s3 + $0x34] ss:$8 sps:$4 sm:$0xff]  }
 0xabd   :  { %v2404_v21 = vpop.permute.xlu0 %2403 }
 0xabe   :  { %v2406_v22 = vadd.f32 %v2404_v21, %v2400_v48  ;;  %v10098_v48 = vld [vmem:[%s11519_s3 + $0x14] ss:$8 sps:$4 sm:$0xff]   ;;  %v10104_v21 = vld [vmem:[%s11519_s3 + $0x10] ss:$8 sps:$4 sm:$0xff]  }
 0xac0   :  { %8664 = vtanh.f32 %v2406_v22 }
 0xaca   :  { %v8665_v27 = vpop.eup %8664 }
 0xacb   :  { %2414 = vrot.lane.b32.xlu0 %v8665_v27, %s9105_s22  ;;  %v10116_v27 = vld [vmem:[%s11519_s3 + $0x20] ss:$8 sps:$4 sm:$0xff]  }
 0xb3d   :  { %v2415_v23 = vpop.permute.xlu0 %2414 }
 0xb3e   :  { %v2417_v33 = vmul.f32 %v2415_v23, %v2411_v30  ;;  %v10129_v30 = vld [vmem:[%s11519_s3 + $0x4] ss:$8 sps:$4 sm:$0xff]  }
 0xb40   :  { %2419 = vst.msk [vmem:[#allocation3 + $0x8] sm:$0x3] %vm2057_vm2, %v2417_v33  ;;  %v2423_v32 = vpack.c.bf16 %v2417_v33, %v2417_v33 }
 0xb41   :  { %2421 = vst.msk [vmem:[#allocation3 + $0x16] sm:$0x3] %vm2060_vm3, %v2417_v33 }
 0xb42   :  { %8188 = vmatmul.mubr.msk.bf16.vlgmr.msra.gmra.mrb[72].mxu1 %vm215_vm1, %v2423_v32 }
 0xb43   :  { %2608 = vmatpush1.bf16.msra.mxu1 %v9888_v14  ;;  %2639 = vmatprep.mubr.bf16.mxu1 %v9109_v0 }
 0xb44   :  { %2609 = vmatprep.subr.bf16.mxu1 %v9894_v24 }
 0xb47   :  { %2610 = vmatpush1.bf16.msra.mxu1 %v9905_v31 }
 0xb48   :  { %2611 = vmatprep.subr.bf16.mxu1 %v9912_v34 }
 0xb4b   :  { %2612 = vmatpush1.bf16.msra.mxu1 %v9921_v38 }
 0xb4c   :  { %2613 = vmatprep.subr.bf16.mxu1 %v9928_v42 }
 0xb4f   :  { %2614 = vmatpush1.bf16.msra.mxu1 %v9937_v3 }
 0xb50   :  { %2785 = vmatprep.subr.bf16.mxu1 %v9877_v29 }
 0xc15   :  { %v2461_v35 = vpop.f32.mrb[72].mxu1 }
 0xc16   :  { %v2463_v36 = vpop.f32.mrb[73].mxu1 }
 0xc17   :  { %v2470_v25 = vcombine.low %v2461_v35, %v2463_v36  ;;  %v2465_v26 = vpop.f32.mrb[74].mxu1 }
 0xc18   :  { %v2466_v37 = vpop.f32.mrb[75].mxu1  ;;  %v2602_v26 = vld [vmem:[#allocation2 + $0x1c] sm:$0xf] }
 0xc19   :  { %v2477_v39 = vrot.slane %v2470_v25, %v9983_v6 }
 0xc1b   :  { %v2479_v41 = vadd.f32 %v2477_v39, %v2422_v40 }
 0xc1d   :  { %v8189_v45 = vmul.f32 -1.442695, %v2479_v41  ;;  %v2487_v2 = vrot.slane %v2479_v41, 2 }
 0xc1f   :  { %8666 = vpow2.f32 %v8189_v45 }
 0xc20   :  { %8668 = vtanh.f32 %v2487_v2 }
 0xc29   :  { %v8667_v47 = vpop.eup %8666 }
 0xc2a   :  { %v2483_v4 = vadd.f32 1.0, %v8667_v47  ;;  %v8669_v49 = vpop.eup %8668 }
 0xc2c   :  { %8670 = vrcp.f32 %v2483_v4 }
 0xc36   :  { %v8671_v50 = vpop.eup %8670 }
 0xc37   :  { %2499 = vrot.lane.b32.xlu0 %v8671_v50, %s9105_s22  ;;  %v2491_v51 = vmul.f32 %v8671_v50, %v8669_v49  ;;  %v2490_v5 = vmul.f32 %v8671_v50, %v2406_v22  ;;  %v10110_v22 = vld [vmem:[%s11519_s3 + $0x24] ss:$8 sps:$4 sm:$0xff]  }
 0xc39   :  { %2493 = vrot.lane.b32.xlu1 %v2491_v51, %s9105_s22 }
 0xca9   :  { %v2500_v55 = vpop.permute.xlu0 %2499 }
 0xcaa   :  { %v2501_v56 = vrot.slane %v2500_v55, 2 }
 0xcab   :  { %v2494_v52 = vpop.permute.xlu1 %2493 }
 0xcac   :  { %v2496_v53 = vadd.f32 %v2494_v52, %v2490_v5 }
 0xcae   :  { %8672 = vtanh.f32 %v2496_v53 }
 0xcb8   :  { %v8673_v54 = vpop.eup %8672 }
 0xcb9   :  { %2504 = vrot.lane.b32.xlu1 %v8673_v54, %s9105_s22 }
 0xd2b   :  { %v2505_v7 = vpop.permute.xlu1 %2504 }
 0xd2c   :  { %v2507_v8 = vmul.f32 %v2505_v7, %v2501_v56  ;;  %v10149_v56 = vld [vmem:[%s11519_s3 + $0x30] ss:$8 sps:$4 sm:$0xff]  }
 0xd2e   :  { %2509 = vst.msk [vmem:[#allocation3 + $0xa] sm:$0x3] %vm2057_vm2, %v2507_v8  ;;  %v2513_v9 = vpack.c.bf16 %v2507_v8, %v2507_v8 }
 0xd2f   :  { %2511 = vst.msk [vmem:[#allocation3 + $0x14] sm:$0x3] %vm2060_vm3, %v2507_v8 }
 0xd30   :  { %8190 = vmatmul.mubr.msk.bf16.vlgmr.msra.gmra.mrb[76].mxu0 %vm215_vm1, %v2513_v9 }
 0xd31   :  { %2698 = vmatpush1.bf16.msra.mxu0 %v9888_v14  ;;  %2729 = vmatprep.mubr.bf16.mxu0 %v9109_v0 }
 0xd32   :  { %2699 = vmatprep.subr.bf16.mxu0 %v9894_v24  ;;  %v2512_v24 = vld [vmem:[#allocation2 + $0x18] sm:$0xf] }
 0xd35   :  { %2700 = vmatpush1.bf16.msra.mxu0 %v9905_v31 }
 0xd36   :  { %2701 = vmatprep.subr.bf16.mxu0 %v9912_v34 }
 0xd39   :  { %2702 = vmatpush1.bf16.msra.mxu0 %v9921_v38 }
 0xd3a   :  { %2703 = vmatprep.subr.bf16.mxu0 %v9928_v42 }
 0xd3d   :  { %2704 = vmatpush1.bf16.msra.mxu0 %v9937_v3 }
 0xd3e   :  { %2873 = vmatprep.subr.bf16.mxu0 %v9877_v29 }
 0xe03   :  { %v2551_v10 = vpop.f32.mrb[76].mxu0 }
 0xe04   :  { %v2553_v11 = vpop.f32.mrb[77].mxu0 }
 0xe05   :  { %v2560_v12 = vcombine.low %v2551_v10, %v2553_v11  ;;  %v2555_v14 = vpop.f32.mrb[78].mxu0 }
 0xe06   :  { %v2556_v13 = vpop.f32.mrb[79].mxu0  ;;  %v2692_v14 = vld [vmem:[#allocation2 + $0x20] sm:$0xf] }
 0xe07   :  { %v2567_v15 = vrot.slane %v2560_v12, %v9983_v6 }
 0xe09   :  { %v2569_v16 = vadd.f32 %v2567_v15, %v2512_v24 }
 0xe0b   :  { %v8191_v31 = vmul.f32 -1.442695, %v2569_v16  ;;  %v2577_v34 = vrot.slane %v2569_v16, 2 }
 0xe0d   :  { %8674 = vpow2.f32 %v8191_v31 }
 0xe0e   :  { %8676 = vtanh.f32 %v2577_v34 }
 0xe17   :  { %v8675_v57 = vpop.eup %8674 }
 0xe18   :  { %v2573_v38 = vadd.f32 1.0, %v8675_v57  ;;  %v8677_v42 = vpop.eup %8676 }
 0xe1a   :  { %8678 = vrcp.f32 %v2573_v38 }
 0xe24   :  { %v8679_v58 = vpop.eup %8678 }
 0xe25   :  { %2589 = vrot.lane.b32.xlu1 %v8679_v58, %s9105_s22  ;;  %v2581_v29 = vmul.f32 %v8679_v58, %v8677_v42  ;;  %v2580_v59 = vmul.f32 %v8679_v58, %v2496_v53 }
 0xe27   :  { %2583 = vrot.lane.b32.xlu0 %v2581_v29, %s9105_s22 }
 0xe97   :  { %v2590_v63 = vpop.permute.xlu1 %2589 }
 0xe98   :  { %v2591_v17 = vrot.slane %v2590_v63, 2 }
 0xe99   :  { %v2584_v60 = vpop.permute.xlu0 %2583 }
 0xe9a   :  { %v2586_v61 = vadd.f32 %v2584_v60, %v2580_v59 }
 0xe9c   :  { %8680 = vtanh.f32 %v2586_v61 }
 0xea6   :  { %v8681_v62 = vpop.eup %8680 }
 0xea7   :  { %2594 = vrot.lane.b32.xlu0 %v8681_v62, %s9105_s22 }
 0xf19   :  { %v2595_v18 = vpop.permute.xlu0 %2594 }
 0xf1a   :  { %v2597_v1 = vmul.f32 %v2595_v18, %v2591_v17 }
 0xf1c   :  { %2599 = vst.msk [vmem:[#allocation3 + $0xc] sm:$0x3] %vm2057_vm2, %v2597_v1  ;;  %v2603_v19 = vpack.c.bf16 %v2597_v1, %v2597_v1 }
 0xf1d   :  { %2601 = vst.msk [vmem:[#allocation3 + $0x12] sm:$0x3] %vm2060_vm3, %v2597_v1 }
 0xf1e   :  { %8192 = vmatmul.mubr.msk.bf16.vlgmr.msra.gmra.mrb[76].mxu1 %vm215_vm1, %v2603_v19 }
 0xf1f   :  { %2786 = vmatpush1.bf16.msra.mxu1 %v10091_v20  ;;  %2817 = vmatprep.mubr.bf16.mxu1 %v9109_v0 }
 0xf20   :  { %2787 = vmatprep.subr.bf16.mxu1 %v10098_v48 }
 0xf23   :  { %2788 = vmatpush1.bf16.msra.mxu1 %v10104_v21 }
 0xf24   :  { %2789 = vmatprep.subr.bf16.mxu1 %v10110_v22 }
 0xf27   :  { %2790 = vmatpush1.bf16.msra.mxu1 %v10116_v27 }
 0xf28   :  { %2791 = vmatprep.subr.bf16.mxu1 %v10122_v28 }
 0xf2b   :  { %2792 = vmatpush1.bf16.msra.mxu1 %v9937_v3 }
 0xf2c   :  { %2961 = vmatprep.subr.bf16.mxu1 %v10129_v30 }
 0xff1   :  { %v2641_v23 = vpop.f32.mrb[76].mxu1 }
 0xff2   :  { %v2643_v33 = vpop.f32.mrb[77].mxu1 }
 0xff3   :  { %v2650_v32 = vcombine.low %v2641_v23, %v2643_v33  ;;  %v2645_v35 = vpop.f32.mrb[78].mxu1 }
 0xff4   :  { %v2646_v36 = vpop.f32.mrb[79].mxu1  ;;  %v2780_v35 = vld [vmem:[#allocation2 + $0x24] sm:$0xf] }
 0xff5   :  { %v2657_v25 = vrot.slane %v2650_v32, %v9983_v6 }
 0xff7   :  { %v2659_v37 = vadd.f32 %v2657_v25, %v2602_v26 }
 0xff9   :  { %v8193_v39 = vmul.f32 -1.442695, %v2659_v37  ;;  %v2667_v40 = vrot.slane %v2659_v37, 2 }
 0xffb   :  { %8682 = vpow2.f32 %v8193_v39 }
 0xffc   :  { %8684 = vtanh.f32 %v2667_v40 }
0x1005   :  { %v8683_v3 = vpop.eup %8682 }
0x1006   :  { %v2663_v41 = vadd.f32 1.0, %v8683_v3  ;;  %v8685_v45 = vpop.eup %8684 }
0x1008   :  { %8686 = vrcp.f32 %v2663_v41 }
0x1012   :  { %v8687_v2 = vpop.eup %8686 }
0x1013   :  { %2679 = vrot.lane.b32.xlu0 %v8687_v2, %s9105_s22  ;;  %v2671_v47 = vmul.f32 %v8687_v2, %v8685_v45  ;;  %v2670_v4 = vmul.f32 %v8687_v2, %v2586_v61 }
0x1015   :  { %2673 = vrot.lane.b32.xlu1 %v2671_v47, %s9105_s22 }
0x1085   :  { %v2680_v5 = vpop.permute.xlu0 %2679 }
0x1086   :  { %v2681_v52 = vrot.slane %v2680_v5, 2 }
0x1087   :  { %v2674_v49 = vpop.permute.xlu1 %2673 }
0x1088   :  { %v2676_v50 = vadd.f32 %v2674_v49, %v2670_v4 }
0x108a   :  { %8688 = vtanh.f32 %v2676_v50 }
0x1094   :  { %v8689_v51 = vpop.eup %8688 }
0x1095   :  { %2684 = vrot.lane.b32.xlu1 %v8689_v51, %s9105_s22 }
0x1107   :  { %v2685_v53 = vpop.permute.xlu1 %2684 }
0x1108   :  { %v2687_v54 = vmul.f32 %v2685_v53, %v2681_v52 }
0x110a   :  { %2689 = vst.msk [vmem:[#allocation3 + $0xe] sm:$0x3] %vm2057_vm2, %v2687_v54  ;;  %v2693_v55 = vpack.c.bf16 %v2687_v54, %v2687_v54 }
0x110b   :  { %2691 = vst.msk [vmem:[#allocation3 + $0x10] sm:$0x3] %vm2060_vm3, %v2687_v54 }
0x110c   :  { %8194 = vmatmul.mubr.msk.bf16.vlgmr.msra.gmra.mrb[80].mxu0 %vm215_vm1, %v2693_v55 }
0x110d   :  { %2874 = vmatpush1.bf16.msra.mxu0 %v10091_v20  ;;  %2905 = vmatprep.mubr.bf16.mxu0 %v9109_v0 }
0x110e   :  { %2875 = vmatprep.subr.bf16.mxu0 %v10098_v48 }
0x1111   :  { %2876 = vmatpush1.bf16.msra.mxu0 %v10104_v21 }
0x1112   :  { %2877 = vmatprep.subr.bf16.mxu0 %v10110_v22 }
0x1115   :  { %2878 = vmatpush1.bf16.msra.mxu0 %v10116_v27 }
0x1116   :  { %2879 = vmatprep.subr.bf16.mxu0 %v10122_v28 }
0x1119   :  { %2880 = vmatpush1.bf16.msra.mxu0 %v10149_v56 }
0x111a   :  { %3049 = vmatprep.subr.bf16.mxu0 %v10129_v30 }
0x11df   :  { %v2731_v7 = vpop.f32.mrb[80].mxu0 }
0x11e0   :  { %v2733_v8 = vpop.f32.mrb[81].mxu0 }
0x11e1   :  { %v2740_v9 = vcombine.low %v2731_v7, %v2733_v8  ;;  %v2735_v10 = vpop.f32.mrb[82].mxu0 }
0x11e2   :  { %v2736_v11 = vpop.f32.mrb[83].mxu0  ;;  %v2868_v10 = vld [vmem:[#allocation2 + $0x28] sm:$0xf] }
0x11e3   :  { %v2747_v12 = vrot.slane %v2740_v9, %v9983_v6 }
0x11e5   :  { %v2749_v13 = vadd.f32 %v2747_v12, %v2692_v14 }
0x11e7   :  { %v8195_v15 = vmul.f32 -1.442695, %v2749_v13  ;;  %v2757_v24 = vrot.slane %v2749_v13, 2 }
0x11e9   :  { %8690 = vpow2.f32 %v8195_v15 }
0x11ea   :  { %8692 = vtanh.f32 %v2757_v24 }
0x11f3   :  { %v8691_v16 = vpop.eup %8690 }
0x11f4   :  { %v2753_v31 = vadd.f32 1.0, %v8691_v16  ;;  %v8693_v34 = vpop.eup %8692 }
0x11f6   :  { %8694 = vrcp.f32 %v2753_v31 }
0x1200   :  { %v8695_v57 = vpop.eup %8694 }
0x1201   :  { %2769 = vrot.lane.b32.xlu1 %v8695_v57, %s9105_s22  ;;  %v2761_v38 = vmul.f32 %v8695_v57, %v8693_v34  ;;  %v2760_v42 = vmul.f32 %v8695_v57, %v2676_v50 }
0x1203   :  { %2763 = vrot.lane.b32.xlu0 %v2761_v38, %s9105_s22 }
0x1273   :  { %v2770_v60 = vpop.permute.xlu1 %2769 }
0x1274   :  { %v2771_v61 = vrot.slane %v2770_v60, 2 }
0x1275   :  { %v2764_v58 = vpop.permute.xlu0 %2763 }
0x1276   :  { %v2766_v29 = vadd.f32 %v2764_v58, %v2760_v42 }
0x1278   :  { %8696 = vtanh.f32 %v2766_v29 }
0x1282   :  { %v8697_v59 = vpop.eup %8696 }
0x1283   :  { %2774 = vrot.lane.b32.xlu0 %v8697_v59, %s9105_s22 }
0x12f5   :  { %v2775_v62 = vpop.permute.xlu0 %2774 }
0x12f6   :  { %v2777_v63 = vmul.f32 %v2775_v62, %v2771_v61 }
0x12f8   :  { %2778 = vst.msk [vmem:[#allocation3 + $0x10] sm:$0x3] %vm2057_vm2, %v2777_v63  ;;  %v2781_v17 = vpack.c.bf16 %v2777_v63, %v2777_v63 }
0x12f9   :  { %2779 = vst.msk [vmem:[#allocation3 + $0xe] sm:$0x3] %vm2060_vm3, %v2777_v63 }
0x12fa   :  { %8196 = vmatmul.mubr.msk.bf16.vlgmr.msra.gmra.mrb[80].mxu1 %vm215_vm1, %v2781_v17 }
0x12fb   :  { %2962 = vmatpush1.bf16.msra.mxu1 %v10091_v20  ;;  %2993 = vmatprep.mubr.bf16.mxu1 %v9109_v0 }
0x12fc   :  { %2963 = vmatprep.subr.bf16.mxu1 %v10098_v48 }
0x12ff   :  { %2964 = vmatpush1.bf16.msra.mxu1 %v10104_v21 }
0x1300   :  { %2965 = vmatprep.subr.bf16.mxu1 %v10110_v22 }
0x1303   :  { %2966 = vmatpush1.bf16.msra.mxu1 %v10116_v27 }
0x1304   :  { %2967 = vmatprep.subr.bf16.mxu1 %v10122_v28 }
0x1307   :  { %2968 = vmatpush1.bf16.msra.mxu1 %v10149_v56 }
0x1308   :  { %3137 = vmatprep.subr.bf16.mxu1 %v10129_v30 }
0x13cd   :  { %v2819_v18 = vpop.f32.mrb[80].mxu1 }
0x13ce   :  { %v2821_v1 = vpop.f32.mrb[81].mxu1 }
0x13cf   :  { %v2828_v19 = vcombine.low %v2819_v18, %v2821_v1  ;;  %v2823_v23 = vpop.f32.mrb[82].mxu1 }
0x13d0   :  { %v2824_v33 = vpop.f32.mrb[83].mxu1  ;;  %v2956_v23 = vld [vmem:[#allocation2 + $0x2c] sm:$0xf] }
0x13d1   :  { %v2835_v32 = vrot.slane %v2828_v19, %v9983_v6 }
0x13d3   :  { %v2837_v36 = vadd.f32 %v2835_v32, %v2780_v35 }
0x13d5   :  { %v8197_v25 = vmul.f32 -1.442695, %v2837_v36  ;;  %v2845_v26 = vrot.slane %v2837_v36, 2 }
0x13d7   :  { %8698 = vpow2.f32 %v8197_v25 }
0x13d8   :  { %8700 = vtanh.f32 %v2845_v26 }
0x13e1   :  { %v8699_v37 = vpop.eup %8698 }
0x13e2   :  { %v2841_v39 = vadd.f32 1.0, %v8699_v37  ;;  %v8701_v40 = vpop.eup %8700 }
0x13e4   :  { %8702 = vrcp.f32 %v2841_v39 }
0x13ee   :  { %v8703_v3 = vpop.eup %8702 }
0x13ef   :  { %2857 = vrot.lane.b32.xlu0 %v8703_v3, %s9105_s22  ;;  %v2849_v41 = vmul.f32 %v8703_v3, %v8701_v40  ;;  %v2848_v45 = vmul.f32 %v8703_v3, %v2766_v29 }
0x13f1   :  { %2851 = vrot.lane.b32.xlu1 %v2849_v41, %s9105_s22 }
0x1461   :  { %v2858_v49 = vpop.permute.xlu0 %2857 }
0x1462   :  { %v2859_v50 = vrot.slane %v2858_v49, 2 }
0x1463   :  { %v2852_v2 = vpop.permute.xlu1 %2851 }
0x1464   :  { %v2854_v47 = vadd.f32 %v2852_v2, %v2848_v45 }
0x1466   :  { %8704 = vtanh.f32 %v2854_v47 }
0x1470   :  { %v8705_v4 = vpop.eup %8704 }
0x1471   :  { %2862 = vrot.lane.b32.xlu1 %v8705_v4, %s9105_s22 }
0x14e3   :  { %v2863_v51 = vpop.permute.xlu1 %2862 }
0x14e4   :  { %v2865_v5 = vmul.f32 %v2863_v51, %v2859_v50 }
0x14e6   :  { %2866 = vst.msk [vmem:[#allocation3 + $0x12] sm:$0x3] %vm2057_vm2, %v2865_v5  ;;  %v2869_v52 = vpack.c.bf16 %v2865_v5, %v2865_v5 }
0x14e7   :  { %2867 = vst.msk [vmem:[#allocation3 + $0xc] sm:$0x3] %vm2060_vm3, %v2865_v5 }
0x14e8   :  { %8198 = vmatmul.mubr.msk.bf16.vlgmr.msra.gmra.mrb[84].mxu0 %vm215_vm1, %v2869_v52 }
0x14e9   :  { %3050 = vmatpush1.bf16.msra.mxu0 %v10091_v20  ;;  %3081 = vmatprep.mubr.bf16.mxu0 %v9109_v0 }
0x14ea   :  { %3051 = vmatprep.subr.bf16.mxu0 %v10098_v48 }
0x14ed   :  { %3052 = vmatpush1.bf16.msra.mxu0 %v10104_v21 }
0x14ee   :  { %3053 = vmatprep.subr.bf16.mxu0 %v10110_v22 }
0x14f1   :  { %3054 = vmatpush1.bf16.msra.mxu0 %v10116_v27 }
0x14f2   :  { %3055 = vmatprep.subr.bf16.mxu0 %v10122_v28 }
0x14f5   :  { %3056 = vmatpush1.bf16.msra.mxu0 %v10149_v56 }
0x14f6   :  { %3225 = vmatprep.subr.bf16.mxu0 %v10129_v30 }
0x15bb   :  { %v2907_v53 = vpop.f32.mrb[84].mxu0 }
0x15bc   :  { %v2909_v54 = vpop.f32.mrb[85].mxu0 }
0x15bd   :  { %v2916_v55 = vcombine.low %v2907_v53, %v2909_v54  ;;  %v2911_v7 = vpop.f32.mrb[86].mxu0 }
0x15be   :  { %v2912_v8 = vpop.f32.mrb[87].mxu0 }
0x15bf   :  { %v2923_v9 = vrot.slane %v2916_v55, %v9983_v6  ;;  %v3044_v55 = vld [vmem:[#allocation2 + $0x30] sm:$0xf] }
0x15c1   :  { %v2925_v11 = vadd.f32 %v2923_v9, %v2868_v10 }
0x15c3   :  { %v8199_v12 = vmul.f32 -1.442695, %v2925_v11  ;;  %v2933_v14 = vrot.slane %v2925_v11, 2 }
0x15c5   :  { %8706 = vpow2.f32 %v8199_v12 }
0x15c6   :  { %8708 = vtanh.f32 %v2933_v14 }
0x15cf   :  { %v8707_v13 = vpop.eup %8706 }
0x15d0   :  { %v2929_v15 = vadd.f32 1.0, %v8707_v13  ;;  %v8709_v24 = vpop.eup %8708 }
0x15d2   :  { %8710 = vrcp.f32 %v2929_v15 }
0x15dc   :  { %v8711_v16 = vpop.eup %8710 }
0x15dd   :  { %2945 = vrot.lane.b32.xlu1 %v8711_v16, %s9105_s22  ;;  %v2937_v31 = vmul.f32 %v8711_v16, %v8709_v24  ;;  %v2936_v34 = vmul.f32 %v8711_v16, %v2854_v47 }
0x15df   :  { %2939 = vrot.lane.b32.xlu0 %v2937_v31, %s9105_s22 }
0x164f   :  { %v2946_v58 = vpop.permute.xlu1 %2945 }
0x1650   :  { %v2947_v29 = vrot.slane %v2946_v58, 2 }
0x1651   :  { %v2940_v57 = vpop.permute.xlu0 %2939 }
0x1652   :  { %v2942_v38 = vadd.f32 %v2940_v57, %v2936_v34 }
0x1654   :  { %8712 = vtanh.f32 %v2942_v38 }
0x165e   :  { %v8713_v42 = vpop.eup %8712 }
0x165f   :  { %2950 = vrot.lane.b32.xlu0 %v8713_v42, %s9105_s22 }
0x16d1   :  { %v2951_v59 = vpop.permute.xlu0 %2950 }
0x16d2   :  { %v2953_v60 = vmul.f32 %v2951_v59, %v2947_v29 }
0x16d4   :  { %2954 = vst.msk [vmem:[#allocation3 + $0x14] sm:$0x3] %vm2057_vm2, %v2953_v60  ;;  %v2957_v61 = vpack.c.bf16 %v2953_v60, %v2953_v60 }
0x16d5   :  { %2955 = vst.msk [vmem:[#allocation3 + $0xa] sm:$0x3] %vm2060_vm3, %v2953_v60 }
0x16d6   :  { %8200 = vmatmul.mubr.msk.bf16.vlgmr.msra.gmra.mrb[84].mxu1 %vm215_vm1, %v2957_v61 }
0x16d7   :  { %3138 = vmatpush1.bf16.msra.mxu1 %v10091_v20  ;;  %3169 = vmatprep.mubr.bf16.mxu1 %v9109_v0 }
0x16d8   :  { %3139 = vmatprep.subr.bf16.mxu1 %v10098_v48 }
0x16db   :  { %3140 = vmatpush1.bf16.msra.mxu1 %v10104_v21 }
0x16dc   :  { %3141 = vmatprep.subr.bf16.mxu1 %v10110_v22 }
0x16df   :  { %3142 = vmatpush1.bf16.msra.mxu1 %v10116_v27 }
0x16e0   :  { %3143 = vmatprep.subr.bf16.mxu1 %v10122_v28 }
0x16e3   :  { %3144 = vmatpush1.bf16.msra.mxu1 %v10149_v56 }
0x16e4   :  { %3313 = vmatprep.subr.bf16.mxu1 %v10129_v30 }
0x17a9   :  { %v2995_v62 = vpop.f32.mrb[84].mxu1 }
0x17aa   :  { %v2997_v63 = vpop.f32.mrb[85].mxu1 }
0x17ab   :  { %v3004_v17 = vcombine.low %v2995_v62, %v2997_v63  ;;  %v2999_v18 = vpop.f32.mrb[86].mxu1  ;;  %v3132_v63 = vld [vmem:[#allocation2 + $0x34] sm:$0xf] }
0x17ac   :  { %v3000_v1 = vpop.f32.mrb[87].mxu1 }
0x17ad   :  { %v3011_v19 = vrot.slane %v3004_v17, %v9983_v6 }
0x17af   :  { %v3013_v33 = vadd.f32 %v3011_v19, %v2956_v23 }
0x17b1   :  { %v8201_v32 = vmul.f32 -1.442695, %v3013_v33  ;;  %v3021_v35 = vrot.slane %v3013_v33, 2 }
0x17b3   :  { %8714 = vpow2.f32 %v8201_v32 }
0x17b4   :  { %8716 = vtanh.f32 %v3021_v35 }
0x17bd   :  { %v8715_v36 = vpop.eup %8714 }
0x17be   :  { %v3017_v25 = vadd.f32 1.0, %v8715_v36  ;;  %v8717_v26 = vpop.eup %8716 }
0x17c0   :  { %8718 = vrcp.f32 %v3017_v25 }
0x17ca   :  { %v8719_v37 = vpop.eup %8718 }
0x17cb   :  { %3033 = vrot.lane.b32.xlu0 %v8719_v37, %s9105_s22  ;;  %v3025_v30 = vmul.f32 %v8719_v37, %v8717_v26  ;;  %v3024_v39 = vmul.f32 %v8719_v37, %v2942_v38 }
0x17cd   :  { %3027 = vrot.lane.b32.xlu1 %v3025_v30, %s9105_s22 }
0x183d   :  { %v3034_v45 = vpop.permute.xlu0 %3033 }
0x183e   :  { %v3035_v2 = vrot.slane %v3034_v45, 2  ;;  %v3220_v45 = vld [vmem:[#allocation2 + $0x38] sm:$0xf] }
0x183f   :  { %v3028_v40 = vpop.permute.xlu1 %3027 }
0x1840   :  { %v3030_v3 = vadd.f32 %v3028_v40, %v3024_v39 }
0x1842   :  { %8720 = vtanh.f32 %v3030_v3 }
0x184c   :  { %v8721_v41 = vpop.eup %8720 }
0x184d   :  { %3038 = vrot.lane.b32.xlu1 %v8721_v41, %s9105_s22 }
0x18bf   :  { %v3039_v47 = vpop.permute.xlu1 %3038 }
0x18c0   :  { %v3041_v4 = vmul.f32 %v3039_v47, %v3035_v2 }
0x18c2   :  { %3042 = vst.msk [vmem:[#allocation3 + $0x16] sm:$0x3] %vm2057_vm2, %v3041_v4  ;;  %v3045_v49 = vpack.c.bf16 %v3041_v4, %v3041_v4 }
0x18c3   :  { %3043 = vst.msk [vmem:[#allocation3 + $0x8] sm:$0x3] %vm2060_vm3, %v3041_v4 }
0x18c4   :  { %8202 = vmatmul.mubr.msk.bf16.vlgmr.msra.gmra.mrb[88].mxu0 %vm215_vm1, %v3045_v49 }
0x18c5   :  { %3226 = vmatpush1.bf16.msra.mxu0 %v10091_v20  ;;  %3257 = vmatprep.mubr.bf16.mxu0 %v9109_v0 }
0x18c6   :  { %3227 = vmatprep.subr.bf16.mxu0 %v10098_v48 }
0x18c9   :  { %3228 = vmatpush1.bf16.msra.mxu0 %v10104_v21 }
0x18ca   :  { %3229 = vmatprep.subr.bf16.mxu0 %v10110_v22 }
0x18cd   :  { %3230 = vmatpush1.bf16.msra.mxu0 %v10116_v27 }
0x18ce   :  { %3231 = vmatprep.subr.bf16.mxu0 %v10122_v28 }
0x18d1   :  { %3232 = vmatpush1.bf16.msra.mxu0 %v10149_v56 }
0x1997   :  { %v3083_v50 = vpop.f32.mrb[88].mxu0 }
0x1998   :  { %v3085_v51 = vpop.f32.mrb[89].mxu0 }
0x1999   :  { %v3092_v5 = vcombine.low %v3083_v50, %v3085_v51  ;;  %v3087_v52 = vpop.f32.mrb[90].mxu0 }
0x199a   :  { %v3088_v53 = vpop.f32.mrb[91].mxu0 }
0x199b   :  { %v3099_v54 = vrot.slane %v3092_v5, %v9983_v6 }
0x199d   :  { %v3101_v7 = vadd.f32 %v3099_v54, %v3044_v55 }
0x199f   :  { %v8203_v8 = vmul.f32 -1.442695, %v3101_v7  ;;  %v3109_v9 = vrot.slane %v3101_v7, 2 }
0x19a1   :  { %8722 = vpow2.f32 %v8203_v8 }
0x19a2   :  { %8724 = vtanh.f32 %v3109_v9 }
0x19ab   :  { %v8723_v10 = vpop.eup %8722 }
0x19ac   :  { %v3105_v11 = vadd.f32 1.0, %v8723_v10  ;;  %v8725_v12 = vpop.eup %8724 }
0x19ae   :  { %8726 = vrcp.f32 %v3105_v11 }
0x19b8   :  { %v8727_v14 = vpop.eup %8726 }
0x19b9   :  { %3121 = vrot.lane.b32.xlu1 %v8727_v14, %s9105_s22  ;;  %v3113_v13 = vmul.f32 %v8727_v14, %v8725_v12  ;;  %v3112_v15 = vmul.f32 %v8727_v14, %v3030_v3 }
0x19bb   :  { %3115 = vrot.lane.b32.xlu0 %v3113_v13, %s9105_s22 }
0x1a2b   :  { %v3122_v34 = vpop.permute.xlu1 %3121 }
0x1a2c   :  { %v3123_v57 = vrot.slane %v3122_v34, 2  ;;  %v3308_v34 = vld [vmem:[#allocation2 + $0x3c] sm:$0xf] }
0x1a2d   :  { %v3116_v24 = vpop.permute.xlu0 %3115 }
0x1a2e   :  { %v3118_v16 = vadd.f32 %v3116_v24, %v3112_v15 }
0x1a30   :  { %8728 = vtanh.f32 %v3118_v16 }
0x1a3a   :  { %v8729_v31 = vpop.eup %8728 }
0x1a3b   :  { %3126 = vrot.lane.b32.xlu0 %v8729_v31, %s9105_s22 }
0x1aad   :  { %v3127_v38 = vpop.permute.xlu0 %3126 }
0x1aae   :  { %v3129_v42 = vmul.f32 %v3127_v38, %v3123_v57 }
0x1ab0   :  { %3130 = vst.msk [vmem:[#allocation3 + $0x18] sm:$0x3] %vm2057_vm2, %v3129_v42  ;;  %v3133_v58 = vpack.c.bf16 %v3129_v42, %v3129_v42 }
0x1ab1   :  { %3131 = vst.msk [vmem:[#allocation3 + $0x6] sm:$0x3] %vm2060_vm3, %v3129_v42 }
0x1ab2   :  { %8204 = vmatmul.mubr.msk.bf16.vlgmr.msra.gmra.mrb[88].mxu1 %vm215_vm1, %v3133_v58 }
0x1ab3   :  { %3314 = vmatpush1.bf16.msra.mxu1 %v10091_v20  ;;  %3345 = vmatprep.mubr.bf16.mxu1 %v9109_v0 }
0x1ab4   :  { %3315 = vmatprep.subr.bf16.mxu1 %v10098_v48 }
0x1ab7   :  { %3316 = vmatpush1.bf16.msra.mxu1 %v10104_v21 }
0x1ab8   :  { %3317 = vmatprep.subr.bf16.mxu1 %v10110_v22 }
0x1abb   :  { %3318 = vmatpush1.bf16.msra.mxu1 %v10116_v27 }
0x1abc   :  { %3319 = vmatprep.subr.bf16.mxu1 %v10122_v28 }
0x1abf   :  { %3320 = vmatpush1.bf16.msra.mxu1 %v10149_v56 }
0x1b85   :  { %v3171_v29 = vpop.f32.mrb[88].mxu1 }
0x1b86   :  { %v3173_v59 = vpop.f32.mrb[89].mxu1 }
0x1b87   :  { %v3180_v60 = vcombine.low %v3171_v29, %v3173_v59  ;;  %v3175_v61 = vpop.f32.mrb[90].mxu1 }
0x1b88   :  { %v3176_v62 = vpop.f32.mrb[91].mxu1 }
0x1b89   :  { %v3187_v20 = vrot.slane %v3180_v60, %v9983_v6  ;;  %v10253_v62 = vld [vmem:[%s11522_s6 + $0x4] ss:$8 sps:$4 sm:$0xff]  }
0x1b8a   :  { %3460 = vmatprep.subr.bf16.mxu0 %v10253_v62 }
0x1b8b   :  { %v3189_v17 = vadd.f32 %v3187_v20, %v3132_v63  ;;  %v10258_v20 = vld [vmem:[%s11521_s5 + $0x4] ss:$8 sps:$4 sm:$0xff]   ;;  %v10263_v63 = vld [vmem:[%s11522_s6] ss:$8 sps:$4 sm:$0xff]  }
0x1b8c   :  { %3544 = vmatprep.subr.bf16.mxu1 %v10258_v20 }
0x1b8d   :  { %v8205_v48 = vmul.f32 -1.442695, %v3189_v17  ;;  %v3197_v21 = vrot.slane %v3189_v17, 2  ;;  %v10268_v17 = vld [vmem:[%s11521_s5] ss:$8 sps:$4 sm:$0xff]  }
0x1b8f   :  { %8730 = vpow2.f32 %v8205_v48  ;;  %v10275_v48 = vld [vmem:[%s11522_s6 + $0x14] ss:$8 sps:$4 sm:$0xff]  }
0x1b90   :  { %8732 = vtanh.f32 %v3197_v21  ;;  %v10282_v21 = vld [vmem:[%s11521_s5 + $0x14] ss:$8 sps:$4 sm:$0xff]  }
0x1b99   :  { %v8731_v18 = vpop.eup %8730 }
0x1b9a   :  { %v3193_v22 = vadd.f32 1.0, %v8731_v18  ;;  %v8733_v27 = vpop.eup %8732  ;;  %v3406_v18 = vld [vmem:[%s11522_s6 + $0x10] sm:$0xff] }
0x1b9c   :  { %8734 = vrcp.f32 %v3193_v22  ;;  %v3407_v22 = vld [vmem:[%s11522_s6 + $0x18] sm:$0xff] }
0x1ba6   :  { %v8735_v28 = vpop.eup %8734 }
0x1ba7   :  { %3209 = vrot.lane.b32.xlu0 %v8735_v28, %s9105_s22  ;;  %v3201_v56 = vmul.f32 %v8735_v28, %v8733_v27  ;;  %v3200_v1 = vmul.f32 %v8735_v28, %v3118_v16  ;;  %v3398_v27 = vld [vmem:[%s11521_s5 + $0x10] sm:$0xff]  ;;  %v3399_v28 = vld [vmem:[%s11521_s5 + $0x18] sm:$0xff] }
0x1ba9   :  { %3203 = vrot.lane.b32.xlu1 %v3201_v56, %s9105_s22 }
0x1c19   :  { %v3210_v32 = vpop.permute.xlu0 %3209 }
0x1c1a   :  { %v3211_v35 = vrot.slane %v3210_v32, 2  ;;  %v10307_v32 = vld [vmem:[%s11522_s6 + $0x24] ss:$8 sps:$4 sm:$0xff]  }
0x1c1b   :  { %v3204_v19 = vpop.permute.xlu1 %3203 }
0x1c1c   :  { %v3206_v23 = vadd.f32 %v3204_v19, %v3200_v1  ;;  %v10298_v19 = vcombine.low %v3406_v18, %v3407_v22  ;;  %v4354_v22 = vld [vmem:[#allocation3 + $0xe] sm:$0x3] }
0x1c1e   :  { %8736 = vtanh.f32 %v3206_v23 }
0x1c28   :  { %v8737_v33 = vpop.eup %8736 }
0x1c29   :  { %3214 = vrot.lane.b32.xlu1 %v8737_v33, %s9105_s22 }
0x1c9b   :  { %v3215_v36 = vpop.permute.xlu1 %3214 }
0x1c9c   :  { %v3217_v25 = vmul.f32 %v3215_v36, %v3211_v35  ;;  %v10312_v35 = vld [vmem:[%s11521_s5 + $0x24] ss:$8 sps:$4 sm:$0xff]   ;;  %v10317_v36 = vld [vmem:[%s11522_s6 + $0x20] ss:$8 sps:$4 sm:$0xff]  }
0x1c9e   :  { %3218 = vst.msk [vmem:[#allocation3 + $0x1a] sm:$0x3] %vm2057_vm2, %v3217_v25  ;;  %v3221_v26 = vpack.c.bf16 %v3217_v25, %v3217_v25 }
0x1c9f   :  { %3219 = vst.msk [vmem:[#allocation3 + $0x4] sm:$0x3] %vm2060_vm3, %v3217_v25  ;;  %v10322_v25 = vld [vmem:[%s11521_s5 + $0x20] ss:$8 sps:$4 sm:$0xff]  }
0x1ca0   :  { %8206 = vmatmul.mubr.msk.bf16.vlgmr.msra.gmra.mrb[92].mxu0 %vm215_vm1, %v3221_v26  ;;  %v10327_v26 = vld [vmem:[%s11522_s6 + $0x34] ss:$8 sps:$4 sm:$0xff]  }
0x1ca1   :  { %3492 = vmatprep.mubr.bf16.mxu0 %v9109_v0  ;;  %3461 = vmatpush1.bf16.msra.mxu0 %v10263_v63 }
0x1ca2   :  { %3462 = vmatprep.subr.bf16.mxu0 %v10275_v48 }
0x1ca5   :  { %3463 = vmatpush1.bf16.msra.mxu0 %v10298_v19 }
0x1ca6   :  { %3464 = vmatprep.subr.bf16.mxu0 %v10307_v32 }
0x1ca9   :  { %3465 = vmatpush1.bf16.msra.mxu0 %v10317_v36 }
0x1caa   :  { %3466 = vmatprep.subr.bf16.mxu0 %v10327_v26 }
0x1d73   :  { %v3259_v37 = vpop.f32.mrb[92].mxu0 }
0x1d74   :  { %v3261_v30 = vpop.f32.mrb[93].mxu0 }
0x1d75   :  { %v3268_v39 = vcombine.low %v3259_v37, %v3261_v30  ;;  %v3263_v40 = vpop.f32.mrb[94].mxu0  ;;  %v10332_v37 = vld [vmem:[%s11521_s5 + $0x34] ss:$8 sps:$4 sm:$0xff]   ;;  %v10341_v30 = vld [vmem:[%s11522_s6 + $0x30] ss:$8 sps:$4 sm:$0xff]  }
0x1d76   :  { %v3264_v3 = vpop.f32.mrb[95].mxu0  ;;  %3467 = vmatpush1.bf16.msra.mxu0 %v10341_v30 }
0x1d77   :  { %v3275_v41 = vrot.slane %v3268_v39, %v9983_v6  ;;  %v10346_v39 = vld [vmem:[%s11521_s5 + $0x30] ss:$8 sps:$4 sm:$0xff]   ;;  %3617 = vmatprep.subr.bf16.mxu0 %v10253_v62 }
0x1d79   :  { %v3277_v2 = vadd.f32 %v3275_v41, %v3220_v45 }
0x1d7b   :  { %v8207_v47 = vmul.f32 -1.442695, %v3277_v2  ;;  %v3285_v4 = vrot.slane %v3277_v2, 2 }
0x1d7d   :  { %8738 = vpow2.f32 %v8207_v47 }
0x1d7e   :  { %8740 = vtanh.f32 %v3285_v4 }
0x1d87   :  { %v8739_v49 = vpop.eup %8738 }
0x1d88   :  { %v3281_v50 = vadd.f32 1.0, %v8739_v49  ;;  %v8741_v51 = vpop.eup %8740 }
0x1d8a   :  { %8742 = vrcp.f32 %v3281_v50 }
0x1d94   :  { %v8743_v5 = vpop.eup %8742 }
0x1d95   :  { %3297 = vrot.lane.b32.xlu1 %v8743_v5, %s9105_s22  ;;  %v3289_v52 = vmul.f32 %v8743_v5, %v8741_v51  ;;  %v3288_v53 = vmul.f32 %v8743_v5, %v3206_v23  ;;  %v10300_v23 = vcombine.low %v3398_v27, %v3399_v28  ;;  %v4352_v27 = vld [vmem:[#allocation3 + $0x10] sm:$0x3]  ;;  %v4355_v28 = vpack.c.bf16 %v4354_v22, %v4354_v22 }
0x1d97   :  { %3291 = vrot.lane.b32.xlu0 %v3289_v52, %s9105_s22 }
0x1e07   :  { %v3298_v8 = vpop.permute.xlu1 %3297 }
0x1e08   :  { %v3299_v9 = vrot.slane %v3298_v8, 2 }
0x1e09   :  { %v3292_v54 = vpop.permute.xlu0 %3291 }
0x1e0a   :  { %v3294_v55 = vadd.f32 %v3292_v54, %v3288_v53  ;;  %v3718_v54 = vld [vmem:[#allocation3 + $0x1a] sm:$0x3] }
0x1e0c   :  { %8744 = vtanh.f32 %v3294_v55 }
0x1e16   :  { %v8745_v7 = vpop.eup %8744 }
0x1e17   :  { %3302 = vrot.lane.b32.xlu0 %v8745_v7, %s9105_s22  ;;  %v3719_v7 = vpack.c.bf16 %v3718_v54, %v3718_v54 }
0x1e89   :  { %v3303_v10 = vpop.permute.xlu0 %3302 }
0x1e8a   :  { %v3305_v11 = vmul.f32 %v3303_v10, %v3299_v9  ;;  %v3824_v9 = vld [vmem:[#allocation3 + $0x18] sm:$0x3]  ;;  %v3822_v10 = vld [vmem:[#allocation3 + $0x6] sm:$0x3] }
0x1e8c   :  { %3306 = vst.msk [vmem:[#allocation3 + $0x1c] sm:$0x3] %vm2057_vm2, %v3305_v11  ;;  %v3309_v12 = vpack.c.bf16 %v3305_v11, %v3305_v11 }
0x1e8d   :  { %3307 = vst.msk [vmem:[#allocation3 + $0x2] sm:$0x3] %vm2060_vm3, %v3305_v11  ;;  %v3825_v11 = vpack.c.bf16 %v3824_v9, %v3824_v9 }
0x1e8e   :  { %8208 = vmatmul.mubr.msk.bf16.vlgmr.msra.gmra.mrb[92].mxu1 %vm215_vm1, %v3309_v12  ;;  %v3823_v12 = vpack.c.bf16 %v3822_v10, %v3822_v10  ;;  %v3412_v10 = vld [vmem:[%s11524_s8] sm:$0x3] }
0x1e8f   :  { %3576 = vmatprep.mubr.bf16.mxu1 %v9109_v0  ;;  %3545 = vmatpush1.bf16.msra.mxu1 %v10268_v17 }
0x1e90   :  { %3546 = vmatprep.subr.bf16.mxu1 %v10282_v21 }
0x1e93   :  { %3547 = vmatpush1.bf16.msra.mxu1 %v10300_v23  ;;  %v3612_v51 = vld [vmem:[#allocation3 + $0x1c] sm:$0x3] }
0x1e94   :  { %3548 = vmatprep.subr.bf16.mxu1 %v10312_v35  ;;  %v3610_v5 = vld [vmem:[#allocation3 + $0x2] sm:$0x3]  ;;  %v3613_v52 = vpack.c.bf16 %v3612_v51, %v3612_v51 }
0x1e95   :  { %v3611_v53 = vpack.c.bf16 %v3610_v5, %v3610_v5  ;;  %v4778_v5 = vld [vmem:[#allocation3 + $0x6] sm:$0x3] }
0x1e97   :  { %3549 = vmatpush1.bf16.msra.mxu1 %v10322_v25 }
0x1e98   :  { %3550 = vmatprep.subr.bf16.mxu1 %v10332_v37 }
0x1e9b   :  { %3551 = vmatpush1.bf16.msra.mxu1 %v10346_v39 }
0x1e9c   :  { %3661 = vmatprep.subr.bf16.mxu1 %v10258_v20 }
0x1f61   :  { %v3347_v14 = vpop.f32.mrb[92].mxu1 }
0x1f62   :  { %v3349_v13 = vpop.f32.mrb[93].mxu1 }
0x1f63   :  { %v3356_v15 = vcombine.low %v3347_v14, %v3349_v13  ;;  %v3351_v24 = vpop.f32.mrb[94].mxu1  ;;  %v3930_v14 = vld [vmem:[#allocation3 + $0x16] sm:$0x3]  ;;  %v3928_v13 = vld [vmem:[#allocation3 + $0x8] sm:$0x3] }
0x1f64   :  { %v3352_v16 = vpop.f32.mrb[95].mxu1  ;;  %v3929_v24 = vpack.c.bf16 %v3928_v13, %v3928_v13  ;;  %v10632_v13 = vrot.slane %v3412_v10, %v356_v46 }
0x1f65   :  { %v3363_v31 = vrot.slane %v3356_v15, %v9983_v6  ;;  %v3931_v15 = vpack.c.bf16 %v3930_v14, %v3930_v14  ;;  %v4036_v16 = vld [vmem:[#allocation3 + $0x14] sm:$0x3] }
0x1f67   :  { %v3365_v57 = vadd.f32 %v3363_v31, %v3308_v34  ;;  %v4034_v31 = vld [vmem:[#allocation3 + $0xa] sm:$0x3]  ;;  %v4037_v34 = vpack.c.bf16 %v4036_v16, %v4036_v16 }
0x1f69   :  { %v8209_v38 = vmul.f32 -1.442695, %v3365_v57  ;;  %v3373_v42 = vrot.slane %v3365_v57, 2  ;;  %v4035_v57 = vpack.c.bf16 %v4034_v31, %v4034_v31 }
0x1f6b   :  { %8746 = vpow2.f32 %v8209_v38  ;;  %v4142_v38 = vld [vmem:[#allocation3 + $0x12] sm:$0x3] }
0x1f6c   :  { %8748 = vtanh.f32 %v3373_v42  ;;  %v4140_v42 = vld [vmem:[#allocation3 + $0xc] sm:$0x3] }
0x1f75   :  { %v8747_v58 = vpop.eup %8746 }
0x1f76   :  { %v3369_v29 = vadd.f32 1.0, %v8747_v58  ;;  %v8749_v59 = vpop.eup %8748  ;;  %v4143_v58 = vpack.c.bf16 %v4142_v38, %v4142_v38 }
0x1f78   :  { %8750 = vrcp.f32 %v3369_v29  ;;  %v4141_v29 = vpack.c.bf16 %v4140_v42, %v4140_v42 }
0x1f82   :  { %v8751_v60 = vpop.eup %8750 }
0x1f83   :  { %3385 = vrot.lane.b32.xlu0 %v8751_v60, %s9105_s22  ;;  %v3377_v61 = vmul.f32 %v8751_v60, %v8749_v59  ;;  %v3376_v56 = vmul.f32 %v8751_v60, %v3294_v55  ;;  %v3716_v55 = vld [vmem:[#allocation3 + $0x4] sm:$0x3]  ;;  %v4248_v59 = vld [vmem:[#allocation3 + $0x10] sm:$0x3]  ;;  %v4246_v60 = vld [vmem:[#allocation3 + $0xe] sm:$0x3] }
0x1f84   :  { %v3717_v8 = vpack.c.bf16 %v3716_v55, %v3716_v55  ;;  %v4247_v18 = vpack.c.bf16 %v4246_v60, %v4246_v60  ;;  %v4884_v55 = vld [vmem:[#allocation3 + $0x4] sm:$0x3] }
0x1f85   :  { %3379 = vrot.lane.b32.xlu1 %v3377_v61, %s9105_s22  ;;  %v4249_v61 = vpack.c.bf16 %v4248_v59, %v4248_v59 }
0x1ff5   :  { %v3386_v3 = vpop.permute.xlu0 %3385 }
0x1ff6   :  { %v3387_v41 = vrot.slane %v3386_v3, 2 }
0x1ff7   :  { %v3380_v1 = vpop.permute.xlu1 %3379 }
0x1ff8   :  { %v3382_v33 = vadd.f32 %v3380_v1, %v3376_v56  ;;  %v4353_v56 = vpack.c.bf16 %v4352_v27, %v4352_v27  ;;  %v4460_v1 = vld [vmem:[#allocation3 + $0xc] sm:$0x3] }
0x1ffa   :  { %8752 = vtanh.f32 %v3382_v33  ;;  %v4458_v33 = vld [vmem:[#allocation3 + $0x12] sm:$0x3] }
0x1ffb   :  { %v4459_v3 = vpack.c.bf16 %v4458_v33, %v4458_v33 }
0x2004   :  { %v8753_v40 = vpop.eup %8752 }
0x2005   :  { %3390 = vrot.lane.b32.xlu1 %v8753_v40, %s9105_s22  ;;  %v4461_v40 = vpack.c.bf16 %v4460_v1, %v4460_v1 }
0x2077   :  { %v3391_v45 = vpop.permute.xlu1 %3390 }
0x2078   :  { %v3393_v2 = vmul.f32 %v3391_v45, %v3387_v41  ;;  %v4566_v41 = vld [vmem:[#allocation3 + $0xa] sm:$0x3]  ;;  %v4564_v45 = vld [vmem:[#allocation3 + $0x14] sm:$0x3] }
0x207a   :  { %3394 = vst.msk [vmem:[#allocation3 + $0x1e] sm:$0x3] %vm2057_vm2, %v3393_v2 }
0x207b   :  { %3395 = vst.msk [vmem:[#allocation3] sm:$0x3] %vm2060_vm3, %v3393_v2  ;;  %v4567_v2 = vpack.c.bf16 %v4566_v41, %v4566_v41 }
0x2081   :  { %v3415_v47 = vld [vmem:[#allocation3 + $0x1e] sm:$0x3] }
0x2082   :  { %v3413_v4 = vld [vmem:[#allocation3] sm:$0x3]  ;;  %v3416_v49 = vpack.c.bf16 %v3415_v47, %v3415_v47  ;;  %v4565_v47 = vpack.c.bf16 %v4564_v45, %v4564_v45 }
0x2083   :  { %v3414_v50 = vpack.c.bf16 %v3413_v4, %v3413_v4  ;;  %v4672_v4 = vld [vmem:[#allocation3 + $0x8] sm:$0x3] }
0x2084   :  { %8218 = vmatmul.mubr.msk.bf16.vlgmr.msra.gmra.mrb[96].mxu0 %vm215_vm1, %v3416_v49  ;;  %v4670_v49 = vld [vmem:[#allocation3 + $0x16] sm:$0x3] }
0x2085   :  { %8227 = vmatmul.mubr.msk.bf16.vlgmr.msra.gmra.mrb[96].mxu1 %vm215_vm1, %v3414_v50  ;;  %3618 = vmatpush1.bf16.msra.mxu0 %v10263_v63  ;;  %v4673_v50 = vpack.c.bf16 %v4672_v4, %v4672_v4  ;;  %v4671_v51 = vpack.c.bf16 %v4670_v49, %v4670_v49  ;;  %v10709_v4 = vld [vmem:[%s11523_s7 + $0x20] ss:$8 sps:$4 sm:$0xff]  }
0x2086   :  { %3662 = vmatpush1.bf16.msra.mxu1 %v10268_v17  ;;  %3619 = vmatprep.subr.bf16.mxu0 %v10275_v48 }
0x2087   :  { %3663 = vmatprep.subr.bf16.mxu1 %v10282_v21  ;;  %3649 = vmatprep.mubr.bf16.mxu0 %v9109_v0 }
0x2088   :  { %3693 = vmatprep.mubr.bf16.mxu1 %v9109_v0 }
0x2089   :  { %3620 = vmatpush1.bf16.msra.mxu0 %v10298_v19 }
0x208a   :  { %3664 = vmatpush1.bf16.msra.mxu1 %v10300_v23  ;;  %3621 = vmatprep.subr.bf16.mxu0 %v10307_v32 }
0x208b   :  { %3665 = vmatprep.subr.bf16.mxu1 %v10312_v35 }
0x208d   :  { %3622 = vmatpush1.bf16.msra.mxu0 %v10317_v36 }
0x208e   :  { %3666 = vmatpush1.bf16.msra.mxu1 %v10322_v25  ;;  %3623 = vmatprep.subr.bf16.mxu0 %v10327_v26 }
0x208f   :  { %3667 = vmatprep.subr.bf16.mxu1 %v10332_v37 }
0x2091   :  { %3624 = vmatpush1.bf16.msra.mxu0 %v10341_v30 }
0x2092   :  { %3668 = vmatpush1.bf16.msra.mxu1 %v10346_v39  ;;  %3723 = vmatprep.subr.bf16.mxu0 %v10253_v62 }
0x2093   :  { %3767 = vmatprep.subr.bf16.mxu1 %v10258_v20 }
0x2094   :  { %8229 = vmatmul.mubr.msk.bf16.vlgmr.msra.gmra.mrb[100].mxu0 %vm215_vm1, %v3613_v52  ;;  %v4776_v52 = vld [vmem:[#allocation3 + $0x18] sm:$0x3] }
0x2095   :  { %8230 = vmatmul.mubr.msk.bf16.vlgmr.msra.gmra.mrb[100].mxu1 %vm215_vm1, %v3611_v53  ;;  %3724 = vmatpush1.bf16.msra.mxu0 %v10263_v63  ;;  %v4779_v53 = vpack.c.bf16 %v4778_v5, %v4778_v5  ;;  %v4777_v54 = vpack.c.bf16 %v4776_v52, %v4776_v52  ;;  %v10716_v5 = vld [vmem:[%s11523_s7 + $0x34] ss:$8 sps:$4 sm:$0xff]  }
0x2096   :  { %3768 = vmatpush1.bf16.msra.mxu1 %v10268_v17  ;;  %3725 = vmatprep.subr.bf16.mxu0 %v10275_v48 }
0x2097   :  { %3769 = vmatprep.subr.bf16.mxu1 %v10282_v21  ;;  %3755 = vmatprep.mubr.bf16.mxu0 %v9109_v0 }
0x2098   :  { %3799 = vmatprep.mubr.bf16.mxu1 %v9109_v0 }
0x2099   :  { %3726 = vmatpush1.bf16.msra.mxu0 %v10298_v19 }
0x209a   :  { %3770 = vmatpush1.bf16.msra.mxu1 %v10300_v23  ;;  %3727 = vmatprep.subr.bf16.mxu0 %v10307_v32 }
0x209b   :  { %3771 = vmatprep.subr.bf16.mxu1 %v10312_v35 }
0x209d   :  { %3728 = vmatpush1.bf16.msra.mxu0 %v10317_v36 }
0x209e   :  { %3772 = vmatpush1.bf16.msra.mxu1 %v10322_v25  ;;  %3729 = vmatprep.subr.bf16.mxu0 %v10327_v26 }
0x209f   :  { %3773 = vmatprep.subr.bf16.mxu1 %v10332_v37 }
0x20a1   :  { %3730 = vmatpush1.bf16.msra.mxu0 %v10341_v30 }
0x20a2   :  { %3774 = vmatpush1.bf16.msra.mxu1 %v10346_v39  ;;  %3829 = vmatprep.subr.bf16.mxu0 %v10253_v62 }
0x20a3   :  { %3873 = vmatprep.subr.bf16.mxu1 %v10258_v20 }
0x20a4   :  { %8232 = vmatmul.mubr.msk.bf16.vlgmr.msra.gmra.mrb[104].mxu0 %vm215_vm1, %v3719_v7  ;;  %v4882_v7 = vld [vmem:[#allocation3 + $0x1a] sm:$0x3] }
0x20a5   :  { %8233 = vmatmul.mubr.msk.bf16.vlgmr.msra.gmra.mrb[104].mxu1 %vm215_vm1, %v3717_v8  ;;  %3830 = vmatpush1.bf16.msra.mxu0 %v10263_v63  ;;  %v4885_v8 = vpack.c.bf16 %v4884_v55, %v4884_v55  ;;  %v4883_v9 = vpack.c.bf16 %v4882_v7, %v4882_v7 }
0x20a6   :  { %3874 = vmatpush1.bf16.msra.mxu1 %v10268_v17  ;;  %3831 = vmatprep.subr.bf16.mxu0 %v10275_v48 }
0x20a7   :  { %3875 = vmatprep.subr.bf16.mxu1 %v10282_v21  ;;  %3861 = vmatprep.mubr.bf16.mxu0 %v9109_v0 }
0x20a8   :  { %3905 = vmatprep.mubr.bf16.mxu1 %v9109_v0 }
0x20a9   :  { %3832 = vmatpush1.bf16.msra.mxu0 %v10298_v19 }
0x20aa   :  { %3876 = vmatpush1.bf16.msra.mxu1 %v10300_v23  ;;  %3833 = vmatprep.subr.bf16.mxu0 %v10307_v32 }
0x20ab   :  { %3877 = vmatprep.subr.bf16.mxu1 %v10312_v35 }
0x20ad   :  { %3834 = vmatpush1.bf16.msra.mxu0 %v10317_v36 }
0x20ae   :  { %3878 = vmatpush1.bf16.msra.mxu1 %v10322_v25  ;;  %3835 = vmatprep.subr.bf16.mxu0 %v10327_v26 }
0x20af   :  { %3879 = vmatprep.subr.bf16.mxu1 %v10332_v37 }
0x20b1   :  { %3836 = vmatpush1.bf16.msra.mxu0 %v10341_v30 }
0x20b2   :  { %3880 = vmatpush1.bf16.msra.mxu1 %v10346_v39  ;;  %3935 = vmatprep.subr.bf16.mxu0 %v10253_v62 }
0x20b3   :  { %3979 = vmatprep.subr.bf16.mxu1 %v10258_v20 }
0x20b4   :  { %8235 = vmatmul.mubr.msk.bf16.vlgmr.msra.gmra.mrb[108].mxu0 %vm215_vm1, %v3825_v11  ;;  %v10626_v11 = vrot.slane %v3412_v10, %v352_v44 }
0x20b5   :  { %8236 = vmatmul.mubr.msk.bf16.vlgmr.msra.gmra.mrb[108].mxu1 %vm215_vm1, %v3823_v12  ;;  %3936 = vmatpush1.bf16.msra.mxu0 %v10263_v63 }
0x20b6   :  { %3980 = vmatpush1.bf16.msra.mxu1 %v10268_v17  ;;  %3937 = vmatprep.subr.bf16.mxu0 %v10275_v48 }
0x20b7   :  { %3981 = vmatprep.subr.bf16.mxu1 %v10282_v21  ;;  %3967 = vmatprep.mubr.bf16.mxu0 %v9109_v0 }
0x20b8   :  { %4011 = vmatprep.mubr.bf16.mxu1 %v9109_v0 }
0x20b9   :  { %3938 = vmatpush1.bf16.msra.mxu0 %v10298_v19 }
0x20ba   :  { %3982 = vmatpush1.bf16.msra.mxu1 %v10300_v23  ;;  %3939 = vmatprep.subr.bf16.mxu0 %v10307_v32 }
0x20bb   :  { %3983 = vmatprep.subr.bf16.mxu1 %v10312_v35 }
0x20bd   :  { %3940 = vmatpush1.bf16.msra.mxu0 %v10317_v36 }
0x20be   :  { %3984 = vmatpush1.bf16.msra.mxu1 %v10322_v25  ;;  %3941 = vmatprep.subr.bf16.mxu0 %v10327_v26 }
0x20bf   :  { %3985 = vmatprep.subr.bf16.mxu1 %v10332_v37 }
0x20c1   :  { %3942 = vmatpush1.bf16.msra.mxu0 %v10341_v30 }
0x20c2   :  { %3986 = vmatpush1.bf16.msra.mxu1 %v10346_v39  ;;  %4041 = vmatprep.subr.bf16.mxu0 %v10253_v62 }
0x20c3   :  { %4085 = vmatprep.subr.bf16.mxu1 %v10258_v20 }
0x20c4   :  { %8238 = vmatmul.mubr.msk.bf16.vlgmr.msra.gmra.mrb[112].mxu0 %vm215_vm1, %v3931_v15 }
0x20c5   :  { %8239 = vmatmul.mubr.msk.bf16.vlgmr.msra.gmra.mrb[112].mxu1 %vm215_vm1, %v3929_v24  ;;  %4042 = vmatpush1.bf16.msra.mxu0 %v10263_v63 }
0x20c6   :  { %4086 = vmatpush1.bf16.msra.mxu1 %v10268_v17  ;;  %4043 = vmatprep.subr.bf16.mxu0 %v10275_v48 }
0x20c7   :  { %4087 = vmatprep.subr.bf16.mxu1 %v10282_v21  ;;  %4073 = vmatprep.mubr.bf16.mxu0 %v9109_v0 }
0x20c8   :  { %4117 = vmatprep.mubr.bf16.mxu1 %v9109_v0 }
0x20c9   :  { %4044 = vmatpush1.bf16.msra.mxu0 %v10298_v19 }
0x20ca   :  { %4088 = vmatpush1.bf16.msra.mxu1 %v10300_v23  ;;  %4045 = vmatprep.subr.bf16.mxu0 %v10307_v32 }
0x20cb   :  { %4089 = vmatprep.subr.bf16.mxu1 %v10312_v35 }
0x20cd   :  { %4046 = vmatpush1.bf16.msra.mxu0 %v10317_v36 }
0x20ce   :  { %4090 = vmatpush1.bf16.msra.mxu1 %v10322_v25  ;;  %4047 = vmatprep.subr.bf16.mxu0 %v10327_v26 }
0x20cf   :  { %4091 = vmatprep.subr.bf16.mxu1 %v10332_v37 }
0x20d1   :  { %4048 = vmatpush1.bf16.msra.mxu0 %v10341_v30 }
0x20d2   :  { %4092 = vmatpush1.bf16.msra.mxu1 %v10346_v39  ;;  %4147 = vmatprep.subr.bf16.mxu0 %v10253_v62 }
0x20d3   :  { %4191 = vmatprep.subr.bf16.mxu1 %v10258_v20 }
0x20d4   :  { %8241 = vmatmul.mubr.msk.bf16.vlgmr.msra.gmra.mrb[116].mxu0 %vm215_vm1, %v4037_v34 }
0x20d5   :  { %8242 = vmatmul.mubr.msk.bf16.vlgmr.msra.gmra.mrb[116].mxu1 %vm215_vm1, %v4035_v57  ;;  %4148 = vmatpush1.bf16.msra.mxu0 %v10263_v63 }
0x20d6   :  { %4192 = vmatpush1.bf16.msra.mxu1 %v10268_v17  ;;  %4149 = vmatprep.subr.bf16.mxu0 %v10275_v48 }
0x20d7   :  { %4193 = vmatprep.subr.bf16.mxu1 %v10282_v21  ;;  %4179 = vmatprep.mubr.bf16.mxu0 %v9109_v0 }
0x20d8   :  { %4223 = vmatprep.mubr.bf16.mxu1 %v9109_v0 }
0x20d9   :  { %4150 = vmatpush1.bf16.msra.mxu0 %v10298_v19 }
0x20da   :  { %4194 = vmatpush1.bf16.msra.mxu1 %v10300_v23  ;;  %4151 = vmatprep.subr.bf16.mxu0 %v10307_v32 }
0x20db   :  { %4195 = vmatprep.subr.bf16.mxu1 %v10312_v35 }
0x20dd   :  { %4152 = vmatpush1.bf16.msra.mxu0 %v10317_v36 }
0x20de   :  { %4196 = vmatpush1.bf16.msra.mxu1 %v10322_v25  ;;  %4153 = vmatprep.subr.bf16.mxu0 %v10327_v26 }
0x20df   :  { %4197 = vmatprep.subr.bf16.mxu1 %v10332_v37 }
0x20e1   :  { %4154 = vmatpush1.bf16.msra.mxu0 %v10341_v30 }
0x20e2   :  { %4198 = vmatpush1.bf16.msra.mxu1 %v10346_v39  ;;  %4253 = vmatprep.subr.bf16.mxu0 %v10253_v62 }
0x20e3   :  { %4297 = vmatprep.subr.bf16.mxu1 %v10258_v20 }
0x20e4   :  { %8244 = vmatmul.mubr.msk.bf16.vlgmr.msra.gmra.mrb[120].mxu0 %vm215_vm1, %v4143_v58  ;;  %v4990_v58 = vld [vmem:[#allocation3 + $0x2] sm:$0x3] }
0x20e5   :  { %8245 = vmatmul.mubr.msk.bf16.vlgmr.msra.gmra.mrb[120].mxu1 %vm215_vm1, %v4141_v29  ;;  %4254 = vmatpush1.bf16.msra.mxu0 %v10263_v63  ;;  %v4988_v29 = vld [vmem:[#allocation3 + $0x1c] sm:$0x3]  ;;  %v4991_v59 = vpack.c.bf16 %v4990_v58, %v4990_v58 }
0x20e6   :  { %4298 = vmatpush1.bf16.msra.mxu1 %v10268_v17  ;;  %4255 = vmatprep.subr.bf16.mxu0 %v10275_v48  ;;  %v4989_v60 = vpack.c.bf16 %v4988_v29, %v4988_v29 }
0x20e7   :  { %4299 = vmatprep.subr.bf16.mxu1 %v10282_v21  ;;  %4285 = vmatprep.mubr.bf16.mxu0 %v9109_v0 }
0x20e8   :  { %4329 = vmatprep.mubr.bf16.mxu1 %v9109_v0 }
0x20e9   :  { %4256 = vmatpush1.bf16.msra.mxu0 %v10298_v19 }
0x20ea   :  { %4300 = vmatpush1.bf16.msra.mxu1 %v10300_v23  ;;  %4257 = vmatprep.subr.bf16.mxu0 %v10307_v32 }
0x20eb   :  { %4301 = vmatprep.subr.bf16.mxu1 %v10312_v35 }
0x20ed   :  { %4258 = vmatpush1.bf16.msra.mxu0 %v10317_v36 }
0x20ee   :  { %4302 = vmatpush1.bf16.msra.mxu1 %v10322_v25  ;;  %4259 = vmatprep.subr.bf16.mxu0 %v10327_v26 }
0x20ef   :  { %4303 = vmatprep.subr.bf16.mxu1 %v10332_v37 }
0x20f1   :  { %4260 = vmatpush1.bf16.msra.mxu0 %v10341_v30 }
0x20f2   :  { %4304 = vmatpush1.bf16.msra.mxu1 %v10346_v39  ;;  %4359 = vmatprep.subr.bf16.mxu0 %v10253_v62 }
0x20f3   :  { %4403 = vmatprep.subr.bf16.mxu1 %v10258_v20 }
0x20f4   :  { %8247 = vmatmul.mubr.msk.bf16.vlgmr.msra.gmra.mrb[124].mxu0 %vm215_vm1, %v4249_v61 }
0x20f5   :  { %8248 = vmatmul.mubr.msk.bf16.vlgmr.msra.gmra.mrb[124].mxu1 %vm215_vm1, %v4247_v18  ;;  %4360 = vmatpush1.bf16.msra.mxu0 %v10263_v63 }
0x20f6   :  { %4404 = vmatpush1.bf16.msra.mxu1 %v10268_v17  ;;  %4361 = vmatprep.subr.bf16.mxu0 %v10275_v48 }
0x20f7   :  { %4405 = vmatprep.subr.bf16.mxu1 %v10282_v21  ;;  %4391 = vmatprep.mubr.bf16.mxu0 %v9109_v0 }
0x20f8   :  { %4435 = vmatprep.mubr.bf16.mxu1 %v9109_v0 }
0x20f9   :  { %4362 = vmatpush1.bf16.msra.mxu0 %v10298_v19 }
0x20fa   :  { %4406 = vmatpush1.bf16.msra.mxu1 %v10300_v23  ;;  %4363 = vmatprep.subr.bf16.mxu0 %v10307_v32 }
0x20fb   :  { %4407 = vmatprep.subr.bf16.mxu1 %v10312_v35 }
0x20fd   :  { %4364 = vmatpush1.bf16.msra.mxu0 %v10317_v36 }
0x20fe   :  { %4408 = vmatpush1.bf16.msra.mxu1 %v10322_v25  ;;  %4365 = vmatprep.subr.bf16.mxu0 %v10327_v26 }
0x20ff   :  { %4409 = vmatprep.subr.bf16.mxu1 %v10332_v37 }
0x2101   :  { %4366 = vmatpush1.bf16.msra.mxu0 %v10341_v30 }
0x2102   :  { %4410 = vmatpush1.bf16.msra.mxu1 %v10346_v39  ;;  %4465 = vmatprep.subr.bf16.mxu0 %v10253_v62 }
0x2103   :  { %4509 = vmatprep.subr.bf16.mxu1 %v10258_v20 }
0x2104   :  { %8250 = vmatmul.mubr.msk.bf16.vlgmr.msra.gmra.mrb[128].mxu0 %vm215_vm1, %v4355_v28 }
0x2105   :  { %8251 = vmatmul.mubr.msk.bf16.vlgmr.msra.gmra.mrb[128].mxu1 %vm215_vm1, %v4353_v56  ;;  %4466 = vmatpush1.bf16.msra.mxu0 %v10263_v63 }
0x2106   :  { %4510 = vmatpush1.bf16.msra.mxu1 %v10268_v17  ;;  %4467 = vmatprep.subr.bf16.mxu0 %v10275_v48 }
0x2107   :  { %4511 = vmatprep.subr.bf16.mxu1 %v10282_v21  ;;  %4497 = vmatprep.mubr.bf16.mxu0 %v9109_v0 }
0x2108   :  { %4541 = vmatprep.mubr.bf16.mxu1 %v9109_v0 }
0x2109   :  { %4468 = vmatpush1.bf16.msra.mxu0 %v10298_v19 }
0x210a   :  { %4512 = vmatpush1.bf16.msra.mxu1 %v10300_v23  ;;  %4469 = vmatprep.subr.bf16.mxu0 %v10307_v32 }
0x210b   :  { %4513 = vmatprep.subr.bf16.mxu1 %v10312_v35 }
0x210d   :  { %4470 = vmatpush1.bf16.msra.mxu0 %v10317_v36 }
0x210e   :  { %4514 = vmatpush1.bf16.msra.mxu1 %v10322_v25  ;;  %4471 = vmatprep.subr.bf16.mxu0 %v10327_v26 }
0x210f   :  { %4515 = vmatprep.subr.bf16.mxu1 %v10332_v37 }
0x2111   :  { %4472 = vmatpush1.bf16.msra.mxu0 %v10341_v30 }
0x2112   :  { %4516 = vmatpush1.bf16.msra.mxu1 %v10346_v39  ;;  %4571 = vmatprep.subr.bf16.mxu0 %v10253_v62 }
0x2113   :  { %4615 = vmatprep.subr.bf16.mxu1 %v10258_v20 }
0x2114   :  { %8253 = vmatmul.mubr.msk.bf16.vlgmr.msra.gmra.mrb[132].mxu0 %vm215_vm1, %v4461_v40 }
0x2115   :  { %8254 = vmatmul.mubr.msk.bf16.vlgmr.msra.gmra.mrb[132].mxu1 %vm215_vm1, %v4459_v3  ;;  %4572 = vmatpush1.bf16.msra.mxu0 %v10263_v63 }
0x2116   :  { %4616 = vmatpush1.bf16.msra.mxu1 %v10268_v17  ;;  %4573 = vmatprep.subr.bf16.mxu0 %v10275_v48 }
0x2117   :  { %4617 = vmatprep.subr.bf16.mxu1 %v10282_v21  ;;  %4603 = vmatprep.mubr.bf16.mxu0 %v9109_v0 }
0x2118   :  { %4647 = vmatprep.mubr.bf16.mxu1 %v9109_v0 }
0x2119   :  { %4574 = vmatpush1.bf16.msra.mxu0 %v10298_v19 }
0x211a   :  { %4618 = vmatpush1.bf16.msra.mxu1 %v10300_v23  ;;  %4575 = vmatprep.subr.bf16.mxu0 %v10307_v32 }
0x211b   :  { %4619 = vmatprep.subr.bf16.mxu1 %v10312_v35 }
0x211d   :  { %4576 = vmatpush1.bf16.msra.mxu0 %v10317_v36 }
0x211e   :  { %4620 = vmatpush1.bf16.msra.mxu1 %v10322_v25  ;;  %4577 = vmatprep.subr.bf16.mxu0 %v10327_v26 }
0x211f   :  { %4621 = vmatprep.subr.bf16.mxu1 %v10332_v37 }
0x2121   :  { %4578 = vmatpush1.bf16.msra.mxu0 %v10341_v30 }
0x2122   :  { %4622 = vmatpush1.bf16.msra.mxu1 %v10346_v39  ;;  %4677 = vmatprep.subr.bf16.mxu0 %v10253_v62 }
0x2123   :  { %4721 = vmatprep.subr.bf16.mxu1 %v10258_v20 }
0x2124   :  { %8256 = vmatmul.mubr.msk.bf16.vlgmr.msra.gmra.mrb[136].mxu0 %vm215_vm1, %v4567_v2 }
0x2125   :  { %8257 = vmatmul.mubr.msk.bf16.vlgmr.msra.gmra.mrb[136].mxu1 %vm215_vm1, %v4565_v47  ;;  %4678 = vmatpush1.bf16.msra.mxu0 %v10263_v63 }
0x2126   :  { %4722 = vmatpush1.bf16.msra.mxu1 %v10268_v17  ;;  %4679 = vmatprep.subr.bf16.mxu0 %v10275_v48 }
0x2127   :  { %4723 = vmatprep.subr.bf16.mxu1 %v10282_v21  ;;  %4709 = vmatprep.mubr.bf16.mxu0 %v9109_v0 }
0x2128   :  { %4753 = vmatprep.mubr.bf16.mxu1 %v9109_v0 }
0x2129   :  { %4680 = vmatpush1.bf16.msra.mxu0 %v10298_v19 }
0x212a   :  { %4724 = vmatpush1.bf16.msra.mxu1 %v10300_v23  ;;  %4681 = vmatprep.subr.bf16.mxu0 %v10307_v32 }
0x212b   :  { %4725 = vmatprep.subr.bf16.mxu1 %v10312_v35 }
0x212d   :  { %4682 = vmatpush1.bf16.msra.mxu0 %v10317_v36 }
0x212e   :  { %4726 = vmatpush1.bf16.msra.mxu1 %v10322_v25  ;;  %4683 = vmatprep.subr.bf16.mxu0 %v10327_v26 }
0x212f   :  { %4727 = vmatprep.subr.bf16.mxu1 %v10332_v37 }
0x2131   :  { %4684 = vmatpush1.bf16.msra.mxu0 %v10341_v30 }
0x2132   :  { %4728 = vmatpush1.bf16.msra.mxu1 %v10346_v39  ;;  %4783 = vmatprep.subr.bf16.mxu0 %v10253_v62 }
0x2133   :  { %4827 = vmatprep.subr.bf16.mxu1 %v10258_v20 }
0x2134   :  { %8259 = vmatmul.mubr.msk.bf16.vlgmr.msra.gmra.mrb[140].mxu0 %vm215_vm1, %v4673_v50 }
0x2135   :  { %8260 = vmatmul.mubr.msk.bf16.vlgmr.msra.gmra.mrb[140].mxu1 %vm215_vm1, %v4671_v51  ;;  %4784 = vmatpush1.bf16.msra.mxu0 %v10263_v63 }
0x2136   :  { %4828 = vmatpush1.bf16.msra.mxu1 %v10268_v17  ;;  %4785 = vmatprep.subr.bf16.mxu0 %v10275_v48 }
0x2137   :  { %4829 = vmatprep.subr.bf16.mxu1 %v10282_v21  ;;  %4815 = vmatprep.mubr.bf16.mxu0 %v9109_v0 }
0x2138   :  { %4859 = vmatprep.mubr.bf16.mxu1 %v9109_v0 }
0x2139   :  { %4786 = vmatpush1.bf16.msra.mxu0 %v10298_v19 }
0x213a   :  { %4830 = vmatpush1.bf16.msra.mxu1 %v10300_v23  ;;  %4787 = vmatprep.subr.bf16.mxu0 %v10307_v32 }
0x213b   :  { %4831 = vmatprep.subr.bf16.mxu1 %v10312_v35 }
0x213d   :  { %4788 = vmatpush1.bf16.msra.mxu0 %v10317_v36 }
0x213e   :  { %4832 = vmatpush1.bf16.msra.mxu1 %v10322_v25  ;;  %4789 = vmatprep.subr.bf16.mxu0 %v10327_v26 }
0x213f   :  { %4833 = vmatprep.subr.bf16.mxu1 %v10332_v37 }
0x2141   :  { %4790 = vmatpush1.bf16.msra.mxu0 %v10341_v30 }
0x2142   :  { %4834 = vmatpush1.bf16.msra.mxu1 %v10346_v39  ;;  %4889 = vmatprep.subr.bf16.mxu0 %v10253_v62 }
0x2143   :  { %4933 = vmatprep.subr.bf16.mxu1 %v10258_v20 }
0x2144   :  { %8262 = vmatmul.mubr.msk.bf16.vlgmr.msra.gmra.mrb[144].mxu0 %vm215_vm1, %v4779_v53 }
0x2145   :  { %8263 = vmatmul.mubr.msk.bf16.vlgmr.msra.gmra.mrb[144].mxu1 %vm215_vm1, %v4777_v54  ;;  %4890 = vmatpush1.bf16.msra.mxu0 %v10263_v63  ;;  %v10725_v54 = vld [vmem:[%s11523_s7 + $0x30] ss:$8 sps:$4 sm:$0xff]  }
0x2146   :  { %4934 = vmatpush1.bf16.msra.mxu1 %v10268_v17  ;;  %4891 = vmatprep.subr.bf16.mxu0 %v10275_v48 }
0x2147   :  { %4935 = vmatprep.subr.bf16.mxu1 %v10282_v21  ;;  %4921 = vmatprep.mubr.bf16.mxu0 %v9109_v0 }
0x2148   :  { %4965 = vmatprep.mubr.bf16.mxu1 %v9109_v0 }
0x2149   :  { %4892 = vmatpush1.bf16.msra.mxu0 %v10298_v19 }
0x214a   :  { %4936 = vmatpush1.bf16.msra.mxu1 %v10300_v23  ;;  %4893 = vmatprep.subr.bf16.mxu0 %v10307_v32 }
0x214b   :  { %4937 = vmatprep.subr.bf16.mxu1 %v10312_v35 }
0x214d   :  { %4894 = vmatpush1.bf16.msra.mxu0 %v10317_v36 }
0x214e   :  { %4938 = vmatpush1.bf16.msra.mxu1 %v10322_v25  ;;  %4895 = vmatprep.subr.bf16.mxu0 %v10327_v26 }
0x214f   :  { %4939 = vmatprep.subr.bf16.mxu1 %v10332_v37 }
0x2151   :  { %4896 = vmatpush1.bf16.msra.mxu0 %v10341_v30 }
0x2152   :  { %4940 = vmatpush1.bf16.msra.mxu1 %v10346_v39  ;;  %4995 = vmatprep.subr.bf16.mxu0 %v10253_v62 }
0x2153   :  { %5039 = vmatprep.subr.bf16.mxu1 %v10258_v20 }
0x2154   :  { %8265 = vmatmul.mubr.msk.bf16.vlgmr.msra.gmra.mrb[148].mxu0 %vm215_vm1, %v4885_v8 }
0x2155   :  { %8266 = vmatmul.mubr.msk.bf16.vlgmr.msra.gmra.mrb[148].mxu1 %vm215_vm1, %v4883_v9  ;;  %4996 = vmatpush1.bf16.msra.mxu0 %v10263_v63 }
0x2156   :  { %5040 = vmatpush1.bf16.msra.mxu1 %v10268_v17  ;;  %4997 = vmatprep.subr.bf16.mxu0 %v10275_v48 }
0x2157   :  { %5041 = vmatprep.subr.bf16.mxu1 %v10282_v21  ;;  %v3494_v12 = vpop.f32.mrb[96].mxu0  ;;  %5027 = vmatprep.mubr.bf16.mxu0 %v9109_v0 }
0x2158   :  { %v3578_v14 = vpop.f32.mrb[96].mxu1  ;;  %5071 = vmatprep.mubr.bf16.mxu1 %v9109_v0  ;;  %v3496_v24 = vpop.f32.mrb[97].mxu0 }
0x2159   :  { %v3579_v15 = vadd.f32 %v3578_v14, %v3494_v12  ;;  %v3580_v16 = vpop.f32.mrb[97].mxu1  ;;  %4998 = vmatpush1.bf16.msra.mxu0 %v10298_v19  ;;  %v3498_v44 = vpop.f32.mrb[98].mxu0 }
0x215a   :  { %v3581_v31 = vadd.f32 %v3580_v16, %v3496_v24  ;;  %5042 = vmatpush1.bf16.msra.mxu1 %v10300_v23  ;;  %v3582_v34 = vpop.f32.mrb[98].mxu1  ;;  %v3499_v38 = vpop.f32.mrb[99].mxu0  ;;  %4999 = vmatprep.subr.bf16.mxu0 %v10307_v32 }
0x215b   :  { %v3596_v57 = vadd.f32 %v10626_v11, %v3579_v15  ;;  %v3583_v43 = vpop.f32.mrb[99].mxu1  ;;  %5043 = vmatprep.subr.bf16.mxu1 %v10312_v35 }
0x215c   :  { %v3597_v46 = vadd.f32 %v10632_v13, %v3581_v31 }
0x215d   :  { %5000 = vmatpush1.bf16.msra.mxu0 %v10317_v36 }
0x215e   :  { %v3600_v42 = vcombine.low %v3596_v57, %v3597_v46  ;;  %5044 = vmatpush1.bf16.msra.mxu1 %v10322_v25  ;;  %5001 = vmatprep.subr.bf16.mxu0 %v10327_v26 }
0x215f   :  { %5045 = vmatprep.subr.bf16.mxu1 %v10332_v37 }
0x2160   :  { %8228 = vst.sshfl [vmem:[#allocation2] sm:$0x33 pattern:$0x76325410] %v3600_v42 }
0x2161   :  { %5002 = vmatpush1.bf16.msra.mxu0 %v10341_v30 }
0x2162   :  { %5046 = vmatpush1.bf16.msra.mxu1 %v10346_v39  ;;  %5101 = vmatprep.subr.bf16.mxu0 %v10253_v62 }
0x2163   :  { %5145 = vmatprep.subr.bf16.mxu1 %v10258_v20 }
0x2164   :  { %8268 = vmatmul.mubr.msk.bf16.vlgmr.msra.gmra.mrb[152].mxu0 %vm215_vm1, %v4991_v59 }
0x2165   :  { %8269 = vmatmul.mubr.msk.bf16.vlgmr.msra.gmra.mrb[152].mxu1 %vm215_vm1, %v4989_v60  ;;  %5102 = vmatpush1.bf16.msra.mxu0 %v10263_v63 }
0x2166   :  { %5146 = vmatpush1.bf16.msra.mxu1 %v10268_v17  ;;  %5103 = vmatprep.subr.bf16.mxu0 %v10275_v48 }
0x2167   :  { %5147 = vmatprep.subr.bf16.mxu1 %v10282_v21  ;;  %v3651_v61 = vpop.f32.mrb[100].mxu0  ;;  %5133 = vmatprep.mubr.bf16.mxu0 %v9109_v0 }
0x2168   :  { %v3695_v18 = vpop.f32.mrb[100].mxu1  ;;  %5177 = vmatprep.mubr.bf16.mxu1 %v9109_v0  ;;  %v3653_v20 = vpop.f32.mrb[101].mxu0 }
0x2169   :  { %v3696_v62 = vadd.f32 %v3695_v18, %v3651_v61  ;;  %v3697_v22 = vpop.f32.mrb[101].mxu1  ;;  %v3655_v28 = vpop.f32.mrb[102].mxu0  ;;  %5104 = vmatpush1.bf16.msra.mxu0 %v10298_v19  ;;  %v10671_v19 = vld [vmem:[%s11523_s7 + $0x4] ss:$8 sps:$4 sm:$0xff]  }
0x216a   :  { %v3698_v27 = vadd.f32 %v3697_v22, %v3653_v20  ;;  %v3699_v56 = vpop.f32.mrb[102].mxu1  ;;  %5148 = vmatpush1.bf16.msra.mxu1 %v10300_v23  ;;  %v3656_v17 = vpop.f32.mrb[103].mxu0  ;;  %5105 = vmatprep.subr.bf16.mxu0 %v10307_v32  ;;  %v5096_v23 = vld [vmem:[#allocation3] sm:$0x3]  ;;  %v5094_v32 = vld [vmem:[#allocation3 + $0x1e] sm:$0x3] }
0x216b   :  { %v3702_v63 = vadd.f32 %v3696_v62, %v10626_v11  ;;  %v3700_v48 = vpop.f32.mrb[103].mxu1  ;;  %5149 = vmatprep.subr.bf16.mxu1 %v10312_v35  ;;  %v10678_v35 = vld [vmem:[%s11523_s7] ss:$8 sps:$4 sm:$0xff]  }
0x216c   :  { %v3703_v21 = vadd.f32 %v3698_v27, %v10632_v13 }
0x216d   :  { %5106 = vmatpush1.bf16.msra.mxu0 %v10317_v36  ;;  %v5097_v36 = vpack.c.bf16 %v5096_v23, %v5096_v23 }
0x216e   :  { %v3706_v1 = vcombine.low %v3702_v63, %v3703_v21  ;;  %5150 = vmatpush1.bf16.msra.mxu1 %v10322_v25  ;;  %5107 = vmatprep.subr.bf16.mxu0 %v10327_v26  ;;  %v5095_v25 = vpack.c.bf16 %v5094_v32, %v5094_v32  ;;  %v10684_v26 = vld [vmem:[%s11523_s7 + $0x14] ss:$8 sps:$4 sm:$0xff]  }
0x216f   :  { %5151 = vmatprep.subr.bf16.mxu1 %v10332_v37  ;;  %v10693_v37 = vld [vmem:[%s11523_s7 + $0x10] ss:$8 sps:$4 sm:$0xff]  }
0x2170   :  { %8231 = vst.sshfl [vmem:[#allocation2 + $0x4] sm:$0x33 pattern:$0x76325410] %v3706_v1 }
0x2171   :  { %5108 = vmatpush1.bf16.msra.mxu0 %v10341_v30  ;;  %v10700_v30 = vld [vmem:[%s11523_s7 + $0x24] ss:$8 sps:$4 sm:$0xff]  }
0x2172   :  { %5152 = vmatpush1.bf16.msra.mxu1 %v10346_v39  ;;  %5249 = vmatprep.subr.bf16.mxu0 %v10671_v19 }
0x2173   :  { %5338 = vmatprep.subr.bf16.mxu1 %v10671_v19 }
0x2174   :  { %8271 = vmatmul.mubr.msk.bf16.vlgmr.msra.gmra.mrb[156].mxu0 %vm215_vm1, %v5097_v36 }
0x2175   :  { %8272 = vmatmul.mubr.msk.bf16.vlgmr.msra.gmra.mrb[156].mxu1 %vm215_vm1, %v5095_v25  ;;  %5250 = vmatpush1.bf16.msra.mxu0 %v10678_v35 }
0x2176   :  { %5281 = vmatprep.mubr.bf16.mxu0 %v9109_v0  ;;  %5251 = vmatprep.subr.bf16.mxu0 %v10684_v26 }
0x2177   :  { %5339 = vmatpush1.bf16.msra.mxu1 %v10678_v35  ;;  %v3757_v39 = vpop.f32.mrb[104].mxu0  ;;  %5370 = vmatprep.mubr.bf16.mxu1 %v9109_v0 }
0x2178   :  { %v3801_v33 = vpop.f32.mrb[104].mxu1  ;;  %5340 = vmatprep.subr.bf16.mxu1 %v10684_v26  ;;  %v3759_v3 = vpop.f32.mrb[105].mxu0 }
0x2179   :  { %v3802_v40 = vadd.f32 %v3801_v33, %v3757_v39  ;;  %v3803_v41 = vpop.f32.mrb[105].mxu1  ;;  %v3761_v2 = vpop.f32.mrb[106].mxu0  ;;  %5252 = vmatpush1.bf16.msra.mxu0 %v10693_v37 }
0x217a   :  { %v3804_v45 = vadd.f32 %v3803_v41, %v3759_v3  ;;  %v3805_v47 = vpop.f32.mrb[106].mxu1  ;;  %v3762_v50 = vpop.f32.mrb[107].mxu0  ;;  %5253 = vmatprep.subr.bf16.mxu0 %v10700_v30 }
0x217b   :  { %v3808_v49 = vadd.f32 %v3802_v40, %v10626_v11  ;;  %v3806_v51 = vpop.f32.mrb[107].mxu1  ;;  %5341 = vmatpush1.bf16.msra.mxu1 %v10693_v37 }
0x217c   :  { %v3809_v52 = vadd.f32 %v3804_v45, %v10632_v13  ;;  %5342 = vmatprep.subr.bf16.mxu1 %v10700_v30 }
0x217d   :  { %5254 = vmatpush1.bf16.msra.mxu0 %v10709_v4 }
0x217e   :  { %v3812_v53 = vcombine.low %v3808_v49, %v3809_v52  ;;  %5255 = vmatprep.subr.bf16.mxu0 %v10716_v5 }
0x217f   :  { %5343 = vmatpush1.bf16.msra.mxu1 %v10709_v4 }
0x2180   :  { %8234 = vst.sshfl [vmem:[#allocation2 + $0x8] sm:$0x33 pattern:$0x76325410] %v3812_v53  ;;  %5344 = vmatprep.subr.bf16.mxu1 %v10716_v5 }
0x2181   :  { %5256 = vmatpush1.bf16.msra.mxu0 %v10725_v54 }
0x2182   :  { %5428 = vmatprep.subr.bf16.mxu0 %v10671_v19 }
0x2183   :  { %5345 = vmatpush1.bf16.msra.mxu1 %v10725_v54 }
0x2184   :  { %5518 = vmatprep.subr.bf16.mxu1 %v10671_v19  ;;  %5282 = vmatmul.mubr.bf16.vlgmr.msra.gmra.mrb[160].mxu0 %v9109_v0 }
0x2185   :  { %5429 = vmatpush1.bf16.msra.mxu0 %v10678_v35  ;;  %5460 = vmatprep.mubr.bf16.mxu0 %v9109_v0 }
0x2186   :  { %5430 = vmatprep.subr.bf16.mxu0 %v10684_v26 }
0x2187   :  { %v3863_v55 = vpop.f32.mrb[108].mxu0 }
0x2188   :  { %v3907_v7 = vpop.f32.mrb[108].mxu1  ;;  %v3865_v9 = vpop.f32.mrb[109].mxu0 }
0x2189   :  { %v3908_v8 = vadd.f32 %v3907_v7, %v3863_v55  ;;  %v3909_v10 = vpop.f32.mrb[109].mxu1  ;;  %v3867_v14 = vpop.f32.mrb[110].mxu0  ;;  %5431 = vmatpush1.bf16.msra.mxu0 %v10693_v37 }
0x218a   :  { %v3910_v12 = vadd.f32 %v3909_v10, %v3865_v9  ;;  %v3911_v15 = vpop.f32.mrb[110].mxu1  ;;  %v3868_v16 = vpop.f32.mrb[111].mxu0  ;;  %5432 = vmatprep.subr.bf16.mxu0 %v10700_v30 }
0x218b   :  { %v3914_v24 = vadd.f32 %v3908_v8, %v10626_v11  ;;  %v3912_v31 = vpop.f32.mrb[111].mxu1 }
0x218c   :  { %v3915_v44 = vadd.f32 %v3910_v12, %v10632_v13 }
0x218d   :  { %5433 = vmatpush1.bf16.msra.mxu0 %v10709_v4 }
0x218e   :  { %v3918_v34 = vcombine.low %v3914_v24, %v3915_v44  ;;  %5434 = vmatprep.subr.bf16.mxu0 %v10716_v5 }
0x2190   :  { %8237 = vst.sshfl [vmem:[#allocation2 + $0xc] sm:$0x33 pattern:$0x76325410] %v3918_v34 }
0x2191   :  { %5435 = vmatpush1.bf16.msra.mxu0 %v10725_v54 }
0x2192   :  { %5608 = vmatprep.subr.bf16.mxu0 %v10671_v19 }
0x2197   :  { %v3969_v57 = vpop.f32.mrb[112].mxu0 }
0x2198   :  { %v4013_v38 = vpop.f32.mrb[112].mxu1  ;;  %v3971_v46 = vpop.f32.mrb[113].mxu0 }
0x2199   :  { %v4014_v43 = vadd.f32 %v4013_v38, %v3969_v57  ;;  %v4015_v42 = vpop.f32.mrb[113].mxu1  ;;  %v3973_v29 = vpop.f32.mrb[114].mxu0 }
0x219a   :  { %v4016_v58 = vadd.f32 %v4015_v42, %v3971_v46  ;;  %v4017_v59 = vpop.f32.mrb[114].mxu1  ;;  %v3974_v61 = vpop.f32.mrb[115].mxu0 }
0x219b   :  { %v4020_v60 = vadd.f32 %v4014_v43, %v10626_v11  ;;  %v4018_v18 = vpop.f32.mrb[115].mxu1 }
0x219c   :  { %v4021_v62 = vadd.f32 %v4016_v58, %v10632_v13 }
0x219e   :  { %v4024_v20 = vcombine.low %v4020_v60, %v4021_v62 }
0x21a0   :  { %8240 = vst.sshfl [vmem:[#allocation2 + $0x10] sm:$0x33 pattern:$0x76325410] %v4024_v20 }
0x21a7   :  { %v4075_v22 = vpop.f32.mrb[116].mxu0 }
0x21a8   :  { %v4119_v27 = vpop.f32.mrb[116].mxu1  ;;  %v4077_v56 = vpop.f32.mrb[117].mxu0 }
0x21a9   :  { %v4120_v28 = vadd.f32 %v4119_v27, %v4075_v22  ;;  %v4121_v63 = vpop.f32.mrb[117].mxu1  ;;  %v4079_v48 = vpop.f32.mrb[118].mxu0 }
0x21aa   :  { %v4122_v17 = vadd.f32 %v4121_v63, %v4077_v56  ;;  %v4123_v21 = vpop.f32.mrb[118].mxu1  ;;  %v4080_v23 = vpop.f32.mrb[119].mxu0 }
0x21ab   :  { %v4126_v1 = vadd.f32 %v4120_v28, %v10626_v11  ;;  %v4124_v32 = vpop.f32.mrb[119].mxu1 }
0x21ac   :  { %v4127_v36 = vadd.f32 %v4122_v17, %v10632_v13 }
0x21ae   :  { %v4130_v25 = vcombine.low %v4126_v1, %v4127_v36 }
0x21b0   :  { %8243 = vst.sshfl [vmem:[#allocation2 + $0x14] sm:$0x33 pattern:$0x76325410] %v4130_v25 }
0x21b7   :  { %v4181_v39 = vpop.f32.mrb[120].mxu0 }
0x21b8   :  { %v4225_v33 = vpop.f32.mrb[120].mxu1  ;;  %v4183_v3 = vpop.f32.mrb[121].mxu0 }
0x21b9   :  { %v4226_v40 = vadd.f32 %v4225_v33, %v4181_v39  ;;  %v4227_v41 = vpop.f32.mrb[121].mxu1  ;;  %v4185_v2 = vpop.f32.mrb[122].mxu0 }
0x21ba   :  { %v4228_v45 = vadd.f32 %v4227_v41, %v4183_v3  ;;  %v4229_v47 = vpop.f32.mrb[122].mxu1  ;;  %v4186_v50 = vpop.f32.mrb[123].mxu0 }
0x21bb   :  { %v4232_v49 = vadd.f32 %v4226_v40, %v10626_v11  ;;  %v4230_v51 = vpop.f32.mrb[123].mxu1 }
0x21bc   :  { %v4233_v52 = vadd.f32 %v4228_v45, %v10632_v13 }
0x21be   :  { %v4236_v53 = vcombine.low %v4232_v49, %v4233_v52 }
0x21c0   :  { %8246 = vst.sshfl [vmem:[#allocation2 + $0x18] sm:$0x33 pattern:$0x76325410] %v4236_v53 }
0x21c7   :  { %v4287_v55 = vpop.f32.mrb[124].mxu0 }
0x21c8   :  { %v4331_v7 = vpop.f32.mrb[124].mxu1  ;;  %v4289_v9 = vpop.f32.mrb[125].mxu0 }
0x21c9   :  { %v4332_v8 = vadd.f32 %v4331_v7, %v4287_v55  ;;  %v4333_v10 = vpop.f32.mrb[125].mxu1  ;;  %v4291_v14 = vpop.f32.mrb[126].mxu0 }
0x21ca   :  { %v4334_v12 = vadd.f32 %v4333_v10, %v4289_v9  ;;  %v4335_v15 = vpop.f32.mrb[126].mxu1  ;;  %v4292_v16 = vpop.f32.mrb[127].mxu0 }
0x21cb   :  { %v4338_v24 = vadd.f32 %v4332_v8, %v10626_v11  ;;  %v4336_v31 = vpop.f32.mrb[127].mxu1 }
0x21cc   :  { %v4339_v44 = vadd.f32 %v4334_v12, %v10632_v13 }
0x21ce   :  { %v4342_v34 = vcombine.low %v4338_v24, %v4339_v44 }
0x21d0   :  { %8249 = vst.sshfl [vmem:[#allocation2 + $0x1c] sm:$0x33 pattern:$0x76325410] %v4342_v34 }
0x21d7   :  { %v4393_v57 = vpop.f32.mrb[128].mxu0 }
0x21d8   :  { %v4437_v38 = vpop.f32.mrb[128].mxu1  ;;  %v4395_v46 = vpop.f32.mrb[129].mxu0 }
0x21d9   :  { %v4438_v43 = vadd.f32 %v4437_v38, %v4393_v57  ;;  %v4439_v42 = vpop.f32.mrb[129].mxu1  ;;  %v4397_v29 = vpop.f32.mrb[130].mxu0 }
0x21da   :  { %v4440_v58 = vadd.f32 %v4439_v42, %v4395_v46  ;;  %v4441_v59 = vpop.f32.mrb[130].mxu1  ;;  %v4398_v61 = vpop.f32.mrb[131].mxu0 }
0x21db   :  { %v4444_v60 = vadd.f32 %v4438_v43, %v10626_v11  ;;  %v4442_v18 = vpop.f32.mrb[131].mxu1 }
0x21dc   :  { %v4445_v62 = vadd.f32 %v4440_v58, %v10632_v13 }
0x21de   :  { %v4448_v20 = vcombine.low %v4444_v60, %v4445_v62 }
0x21e0   :  { %8252 = vst.sshfl [vmem:[#allocation2 + $0x20] sm:$0x33 pattern:$0x76325410] %v4448_v20 }
0x21e7   :  { %v4499_v22 = vpop.f32.mrb[132].mxu0 }
0x21e8   :  { %v4543_v27 = vpop.f32.mrb[132].mxu1  ;;  %v4501_v56 = vpop.f32.mrb[133].mxu0 }
0x21e9   :  { %v4544_v28 = vadd.f32 %v4543_v27, %v4499_v22  ;;  %v4545_v63 = vpop.f32.mrb[133].mxu1  ;;  %v4503_v48 = vpop.f32.mrb[134].mxu0 }
0x21ea   :  { %v4546_v17 = vadd.f32 %v4545_v63, %v4501_v56  ;;  %v4547_v21 = vpop.f32.mrb[134].mxu1  ;;  %v4504_v23 = vpop.f32.mrb[135].mxu0 }
0x21eb   :  { %v4550_v1 = vadd.f32 %v4544_v28, %v10626_v11  ;;  %v4548_v32 = vpop.f32.mrb[135].mxu1 }
0x21ec   :  { %v4551_v36 = vadd.f32 %v4546_v17, %v10632_v13 }
0x21ee   :  { %v4554_v25 = vcombine.low %v4550_v1, %v4551_v36 }
0x21f0   :  { %8255 = vst.sshfl [vmem:[#allocation2 + $0x24] sm:$0x33 pattern:$0x76325410] %v4554_v25 }
0x21f7   :  { %v4605_v39 = vpop.f32.mrb[136].mxu0 }
0x21f8   :  { %v4649_v33 = vpop.f32.mrb[136].mxu1  ;;  %v4607_v3 = vpop.f32.mrb[137].mxu0 }
0x21f9   :  { %v4650_v40 = vadd.f32 %v4649_v33, %v4605_v39  ;;  %v4651_v41 = vpop.f32.mrb[137].mxu1  ;;  %v4609_v2 = vpop.f32.mrb[138].mxu0 }
0x21fa   :  { %v4652_v45 = vadd.f32 %v4651_v41, %v4607_v3  ;;  %v4653_v47 = vpop.f32.mrb[138].mxu1  ;;  %v4610_v50 = vpop.f32.mrb[139].mxu0 }
0x21fb   :  { %v4656_v49 = vadd.f32 %v4650_v40, %v10626_v11  ;;  %v4654_v51 = vpop.f32.mrb[139].mxu1 }
0x21fc   :  { %v4657_v52 = vadd.f32 %v4652_v45, %v10632_v13 }
0x21fe   :  { %v4660_v53 = vcombine.low %v4656_v49, %v4657_v52 }
0x2200   :  { %8258 = vst.sshfl [vmem:[#allocation2 + $0x28] sm:$0x33 pattern:$0x76325410] %v4660_v53 }
0x2207   :  { %v4711_v55 = vpop.f32.mrb[140].mxu0 }
0x2208   :  { %v4755_v7 = vpop.f32.mrb[140].mxu1  ;;  %v4713_v9 = vpop.f32.mrb[141].mxu0 }
0x2209   :  { %v4756_v8 = vadd.f32 %v4755_v7, %v4711_v55  ;;  %v4757_v10 = vpop.f32.mrb[141].mxu1  ;;  %v4715_v14 = vpop.f32.mrb[142].mxu0 }
0x220a   :  { %v4758_v12 = vadd.f32 %v4757_v10, %v4713_v9  ;;  %v4759_v15 = vpop.f32.mrb[142].mxu1  ;;  %v4716_v16 = vpop.f32.mrb[143].mxu0 }
0x220b   :  { %v4762_v24 = vadd.f32 %v4756_v8, %v10626_v11  ;;  %v4760_v31 = vpop.f32.mrb[143].mxu1 }
0x220c   :  { %v4763_v44 = vadd.f32 %v4758_v12, %v10632_v13 }
0x220e   :  { %v4766_v34 = vcombine.low %v4762_v24, %v4763_v44 }
0x2210   :  { %8261 = vst.sshfl [vmem:[#allocation2 + $0x2c] sm:$0x33 pattern:$0x76325410] %v4766_v34 }
0x2217   :  { %v4817_v57 = vpop.f32.mrb[144].mxu0 }
0x2218   :  { %v4861_v38 = vpop.f32.mrb[144].mxu1  ;;  %v4819_v46 = vpop.f32.mrb[145].mxu0 }
0x2219   :  { %v4862_v43 = vadd.f32 %v4861_v38, %v4817_v57  ;;  %v4863_v42 = vpop.f32.mrb[145].mxu1  ;;  %v4821_v29 = vpop.f32.mrb[146].mxu0 }
0x221a   :  { %v4864_v58 = vadd.f32 %v4863_v42, %v4819_v46  ;;  %v4865_v59 = vpop.f32.mrb[146].mxu1  ;;  %v4822_v61 = vpop.f32.mrb[147].mxu0  ;;  %v5208_v29 = vld [vmem:[#allocation2] sm:$0xf] }
0x221b   :  { %v4868_v60 = vadd.f32 %v4862_v43, %v10626_v11  ;;  %v4866_v18 = vpop.f32.mrb[147].mxu1 }
0x221c   :  { %v4869_v62 = vadd.f32 %v4864_v58, %v10632_v13 }
0x221e   :  { %v4872_v20 = vcombine.low %v4868_v60, %v4869_v62 }
0x2220   :  { %8264 = vst.sshfl [vmem:[#allocation2 + $0x30] sm:$0x33 pattern:$0x76325410] %v4872_v20 }
0x2227   :  { %v4923_v22 = vpop.f32.mrb[148].mxu0 }
0x2228   :  { %v4967_v27 = vpop.f32.mrb[148].mxu1  ;;  %v4925_v56 = vpop.f32.mrb[149].mxu0 }
0x2229   :  { %v4968_v28 = vadd.f32 %v4967_v27, %v4923_v22  ;;  %v4969_v63 = vpop.f32.mrb[149].mxu1  ;;  %v4927_v48 = vpop.f32.mrb[150].mxu0 }
0x222a   :  { %v4970_v17 = vadd.f32 %v4969_v63, %v4925_v56  ;;  %v4971_v21 = vpop.f32.mrb[150].mxu1  ;;  %v4928_v23 = vpop.f32.mrb[151].mxu0 }
0x222b   :  { %v4974_v1 = vadd.f32 %v4968_v28, %v10626_v11  ;;  %v4972_v32 = vpop.f32.mrb[151].mxu1 }
0x222c   :  { %v4975_v36 = vadd.f32 %v4970_v17, %v10632_v13 }
0x222e   :  { %v4978_v25 = vcombine.low %v4974_v1, %v4975_v36 }
0x2230   :  { %8267 = vst.sshfl [vmem:[#allocation2 + $0x34] sm:$0x33 pattern:$0x76325410] %v4978_v25 }
0x2237   :  { %v5029_v39 = vpop.f32.mrb[152].mxu0 }
0x2238   :  { %v5073_v33 = vpop.f32.mrb[152].mxu1  ;;  %v5031_v3 = vpop.f32.mrb[153].mxu0 }
0x2239   :  { %v5074_v40 = vadd.f32 %v5073_v33, %v5029_v39  ;;  %v5075_v41 = vpop.f32.mrb[153].mxu1  ;;  %v5033_v2 = vpop.f32.mrb[154].mxu0 }
0x223a   :  { %v5076_v45 = vadd.f32 %v5075_v41, %v5031_v3  ;;  %v5077_v47 = vpop.f32.mrb[154].mxu1  ;;  %v5034_v50 = vpop.f32.mrb[155].mxu0 }
0x223b   :  { %v5080_v49 = vadd.f32 %v5074_v40, %v10626_v11  ;;  %v5078_v51 = vpop.f32.mrb[155].mxu1  ;;  %v5333_v40 = vld [vmem:[#allocation2 + $0x4] sm:$0xf] }
0x223c   :  { %v5081_v52 = vadd.f32 %v5076_v45, %v10632_v13 }
0x223e   :  { %v5084_v53 = vcombine.low %v5080_v49, %v5081_v52 }
0x2240   :  { %8270 = vst.sshfl [vmem:[#allocation2 + $0x38] sm:$0x33 pattern:$0x76325410] %v5084_v53 }
0x2247   :  { %v5135_v55 = vpop.f32.mrb[156].mxu0 }
0x2248   :  { %v5179_v7 = vpop.f32.mrb[156].mxu1  ;;  %v5137_v9 = vpop.f32.mrb[157].mxu0 }
0x2249   :  { %v5180_v8 = vadd.f32 %v5179_v7, %v5135_v55  ;;  %v5181_v10 = vpop.f32.mrb[157].mxu1  ;;  %v5139_v14 = vpop.f32.mrb[158].mxu0 }
0x224a   :  { %v5182_v12 = vadd.f32 %v5181_v10, %v5137_v9  ;;  %v5183_v15 = vpop.f32.mrb[158].mxu1  ;;  %v5140_v16 = vpop.f32.mrb[159].mxu0 }
0x224b   :  { %v5186_v24 = vadd.f32 %v5180_v8, %v10626_v11  ;;  %v5184_v31 = vpop.f32.mrb[159].mxu1 }
0x224c   :  { %v5187_v44 = vadd.f32 %v5182_v12, %v10632_v13 }
0x224e   :  { %v5190_v34 = vcombine.low %v5186_v24, %v5187_v44 }
0x2250   :  { %8273 = vst.sshfl [vmem:[#allocation2 + $0x3c] sm:$0x33 pattern:$0x76325410] %v5190_v34 }
0x2257   :  { %v5283_v57 = vpop.f32.mrb[160].mxu0 }
0x2258   :  { %v5285_v38 = vpop.f32.mrb[161].mxu0 }
0x2259   :  { %v5292_v43 = vcombine.low %v5283_v57, %v5285_v38  ;;  %v5287_v46 = vpop.f32.mrb[162].mxu0  ;;  %v5423_v57 = vld [vmem:[#allocation2 + $0x8] sm:$0xf] }
0x225a   :  { %v5288_v42 = vpop.f32.mrb[163].mxu0 }
0x225b   :  { %v5299_v58 = vrot.slane %v5292_v43, %v9983_v6 }
0x225d   :  { %v5301_v59 = vadd.f32 %v5299_v58, %v5208_v29 }
0x225f   :  { %v8282_v60 = vmul.f32 -1.442695, %v5301_v59  ;;  %v5309_v61 = vrot.slane %v5301_v59, 2 }
0x2261   :  { %8754 = vpow2.f32 %v8282_v60 }
0x2262   :  { %8756 = vtanh.f32 %v5309_v61 }
0x226b   :  { %v8755_v18 = vpop.eup %8754 }
0x226c   :  { %v5305_v11 = vadd.f32 1.0, %v8755_v18  ;;  %v8757_v62 = vpop.eup %8756 }
0x226e   :  { %8758 = vrcp.f32 %v5305_v11 }
0x2278   :  { %v8759_v13 = vpop.eup %8758 }
0x2279   :  { %5321 = vrot.lane.b32.xlu1 %v8759_v13, %s9105_s22  ;;  %v5313_v20 = vmul.f32 %v8759_v13, %v8757_v62  ;;  %v5312_v22 = vmul.f32 0.0, %v8759_v13 }
0x227b   :  { %5315 = vrot.lane.b32.xlu0 %v5313_v20, %s9105_s22 }
0x22eb   :  { %v5322_v63 = vpop.permute.xlu1 %5321 }
0x22ec   :  { %v5323_v17 = vrot.slane %v5322_v63, 2 }
0x22ed   :  { %v5316_v27 = vpop.permute.xlu0 %5315 }
0x22ee   :  { %v5318_v28 = vadd.f32 %v5316_v27, %v5312_v22 }
0x22f0   :  { %8760 = vtanh.f32 %v5318_v28 }
0x22fa   :  { %v8761_v56 = vpop.eup %8760 }
0x22fb   :  { %5326 = vrot.lane.b32.xlu0 %v8761_v56, %s9105_s22 }
0x236d   :  { %v5327_v48 = vpop.permute.xlu0 %5326 }
0x236e   :  { %v5329_v21 = vmul.f32 %v5327_v48, %v5323_v17 }
0x2370   :  { %5330 = vst.msk [vmem:[#allocation4] sm:$0x3] %vm2057_vm2, %v5329_v21  ;;  %v5334_v1 = vpack.c.bf16 %v5329_v21, %v5329_v21 }
0x2371   :  { %5332 = vst.msk [vmem:[#allocation4 + $0x1e] sm:$0x3] %vm2060_vm3, %v5329_v21 }
0x2372   :  { %8283 = vmatmul.mubr.msk.bf16.vlgmr.msra.gmra.mrb[160].mxu1 %vm215_vm1, %v5334_v1 }
0x2373   :  { %5519 = vmatpush1.bf16.msra.mxu1 %v10678_v35  ;;  %5550 = vmatprep.mubr.bf16.mxu1 %v9109_v0 }
0x2374   :  { %5520 = vmatprep.subr.bf16.mxu1 %v10684_v26 }
0x2377   :  { %5521 = vmatpush1.bf16.msra.mxu1 %v10693_v37 }
0x2378   :  { %5522 = vmatprep.subr.bf16.mxu1 %v10700_v30 }
0x237b   :  { %5523 = vmatpush1.bf16.msra.mxu1 %v10709_v4 }
0x237c   :  { %5524 = vmatprep.subr.bf16.mxu1 %v10716_v5 }
0x237f   :  { %5525 = vmatpush1.bf16.msra.mxu1 %v10725_v54 }
0x2380   :  { %5698 = vmatprep.subr.bf16.mxu1 %v10671_v19 }
0x2445   :  { %v5372_v23 = vpop.f32.mrb[160].mxu1 }
0x2446   :  { %v5374_v32 = vpop.f32.mrb[161].mxu1 }
0x2447   :  { %v5381_v36 = vcombine.low %v5372_v23, %v5374_v32  ;;  %v5376_v25 = vpop.f32.mrb[162].mxu1  ;;  %v5513_v23 = vld [vmem:[#allocation2 + $0xc] sm:$0xf] }
0x2448   :  { %v5377_v39 = vpop.f32.mrb[163].mxu1 }
0x2449   :  { %v5388_v33 = vrot.slane %v5381_v36, %v9983_v6 }
0x244b   :  { %v5390_v3 = vadd.f32 %v5388_v33, %v5333_v40 }
0x244d   :  { %v8284_v41 = vmul.f32 -1.442695, %v5390_v3  ;;  %v5398_v45 = vrot.slane %v5390_v3, 2 }
0x244f   :  { %8762 = vpow2.f32 %v8284_v41 }
0x2450   :  { %8764 = vtanh.f32 %v5398_v45 }
0x2459   :  { %v8763_v2 = vpop.eup %8762 }
0x245a   :  { %v5394_v47 = vadd.f32 1.0, %v8763_v2  ;;  %v8765_v49 = vpop.eup %8764 }
0x245c   :  { %8766 = vrcp.f32 %v5394_v47 }
0x2466   :  { %v8767_v50 = vpop.eup %8766 }
0x2467   :  { %5410 = vrot.lane.b32.xlu0 %v8767_v50, %s9105_s22  ;;  %v5402_v51 = vmul.f32 %v8767_v50, %v8765_v49  ;;  %v5401_v52 = vmul.f32 %v8767_v50, %v5318_v28 }
0x2469   :  { %5404 = vrot.lane.b32.xlu1 %v5402_v51, %s9105_s22 }
0x24d9   :  { %v5411_v8 = vpop.permute.xlu0 %5410 }
0x24da   :  { %v5412_v9 = vrot.slane %v5411_v8, 2 }
0x24db   :  { %v5405_v53 = vpop.permute.xlu1 %5404 }
0x24dc   :  { %v5407_v55 = vadd.f32 %v5405_v53, %v5401_v52 }
0x24de   :  { %8768 = vtanh.f32 %v5407_v55 }
0x24e8   :  { %v8769_v7 = vpop.eup %8768 }
0x24e9   :  { %5415 = vrot.lane.b32.xlu1 %v8769_v7, %s9105_s22 }
0x255b   :  { %v5416_v10 = vpop.permute.xlu1 %5415 }
0x255c   :  { %v5418_v12 = vmul.f32 %v5416_v10, %v5412_v9 }
0x255e   :  { %5420 = vst.msk [vmem:[#allocation4 + $0x2] sm:$0x3] %vm2057_vm2, %v5418_v12  ;;  %v5424_v14 = vpack.c.bf16 %v5418_v12, %v5418_v12 }
0x255f   :  { %5422 = vst.msk [vmem:[#allocation4 + $0x1c] sm:$0x3] %vm2060_vm3, %v5418_v12 }
0x2560   :  { %8285 = vmatmul.mubr.msk.bf16.vlgmr.msra.gmra.mrb[164].mxu0 %vm215_vm1, %v5424_v14 }
0x2561   :  { %5609 = vmatpush1.bf16.msra.mxu0 %v10678_v35  ;;  %5640 = vmatprep.mubr.bf16.mxu0 %v9109_v0 }
0x2562   :  { %5610 = vmatprep.subr.bf16.mxu0 %v10684_v26 }
0x2565   :  { %5611 = vmatpush1.bf16.msra.mxu0 %v10693_v37 }
0x2566   :  { %5612 = vmatprep.subr.bf16.mxu0 %v10700_v30 }
0x2569   :  { %5613 = vmatpush1.bf16.msra.mxu0 %v10709_v4 }
0x256a   :  { %5614 = vmatprep.subr.bf16.mxu0 %v10716_v5 }
0x256d   :  { %5615 = vmatpush1.bf16.msra.mxu0 %v10725_v54 }
0x256e   :  { %5788 = vmatprep.subr.bf16.mxu0 %v10671_v19 }
0x2633   :  { %v5462_v15 = vpop.f32.mrb[164].mxu0 }
0x2634   :  { %v5464_v24 = vpop.f32.mrb[165].mxu0 }
0x2635   :  { %v5471_v16 = vcombine.low %v5462_v15, %v5464_v24  ;;  %v5466_v31 = vpop.f32.mrb[166].mxu0  ;;  %v5603_v15 = vld [vmem:[#allocation2 + $0x10] sm:$0xf] }
0x2636   :  { %v5467_v44 = vpop.f32.mrb[167].mxu0 }
0x2637   :  { %v5478_v34 = vrot.slane %v5471_v16, %v9983_v6 }
0x2639   :  { %v5480_v38 = vadd.f32 %v5478_v34, %v5423_v57 }
0x263b   :  { %v8286_v43 = vmul.f32 -1.442695, %v5480_v38  ;;  %v5488_v46 = vrot.slane %v5480_v38, 2 }
0x263d   :  { %8770 = vpow2.f32 %v8286_v43 }
0x263e   :  { %8772 = vtanh.f32 %v5488_v46 }
0x2647   :  { %v8771_v42 = vpop.eup %8770 }
0x2648   :  { %v5484_v58 = vadd.f32 1.0, %v8771_v42  ;;  %v8773_v29 = vpop.eup %8772 }
0x264a   :  { %8774 = vrcp.f32 %v5484_v58 }
0x2654   :  { %v8775_v59 = vpop.eup %8774 }
0x2655   :  { %5500 = vrot.lane.b32.xlu1 %v8775_v59, %s9105_s22  ;;  %v5492_v60 = vmul.f32 %v8775_v59, %v8773_v29  ;;  %v5491_v61 = vmul.f32 %v8775_v59, %v5407_v55 }
0x2657   :  { %5494 = vrot.lane.b32.xlu0 %v5492_v60, %s9105_s22 }
0x26c7   :  { %v5501_v13 = vpop.permute.xlu1 %5500 }
0x26c8   :  { %v5502_v20 = vrot.slane %v5501_v13, 2 }
0x26c9   :  { %v5495_v18 = vpop.permute.xlu0 %5494 }
0x26ca   :  { %v5497_v11 = vadd.f32 %v5495_v18, %v5491_v61 }
0x26cc   :  { %8776 = vtanh.f32 %v5497_v11 }
0x26d6   :  { %v8777_v62 = vpop.eup %8776 }
0x26d7   :  { %5505 = vrot.lane.b32.xlu0 %v8777_v62, %s9105_s22 }
0x2749   :  { %v5506_v22 = vpop.permute.xlu0 %5505 }
0x274a   :  { %v5508_v27 = vmul.f32 %v5506_v22, %v5502_v20 }
0x274c   :  { %5510 = vst.msk [vmem:[#allocation4 + $0x4] sm:$0x3] %vm2057_vm2, %v5508_v27  ;;  %v5514_v28 = vpack.c.bf16 %v5508_v27, %v5508_v27 }
0x274d   :  { %5512 = vst.msk [vmem:[#allocation4 + $0x1a] sm:$0x3] %vm2060_vm3, %v5508_v27 }
0x274e   :  { %8287 = vmatmul.mubr.msk.bf16.vlgmr.msra.gmra.mrb[164].mxu1 %vm215_vm1, %v5514_v28 }
0x274f   :  { %5699 = vmatpush1.bf16.msra.mxu1 %v10678_v35  ;;  %5730 = vmatprep.mubr.bf16.mxu1 %v9109_v0 }
0x2750   :  { %5700 = vmatprep.subr.bf16.mxu1 %v10684_v26 }
0x2753   :  { %5701 = vmatpush1.bf16.msra.mxu1 %v10693_v37 }
0x2754   :  { %5702 = vmatprep.subr.bf16.mxu1 %v10700_v30 }
0x2757   :  { %5703 = vmatpush1.bf16.msra.mxu1 %v10709_v4 }
0x2758   :  { %5704 = vmatprep.subr.bf16.mxu1 %v10716_v5 }
0x275b   :  { %5705 = vmatpush1.bf16.msra.mxu1 %v10725_v54 }
0x275c   :  { %5878 = vmatprep.subr.bf16.mxu1 %v10671_v19 }
0x2821   :  { %v5552_v56 = vpop.f32.mrb[164].mxu1 }
0x2822   :  { %v5554_v63 = vpop.f32.mrb[165].mxu1 }
0x2823   :  { %v5561_v17 = vcombine.low %v5552_v56, %v5554_v63  ;;  %v5556_v48 = vpop.f32.mrb[166].mxu1  ;;  %v5693_v56 = vld [vmem:[#allocation2 + $0x14] sm:$0xf] }
0x2824   :  { %v5557_v21 = vpop.f32.mrb[167].mxu1 }
0x2825   :  { %v5568_v1 = vrot.slane %v5561_v17, %v9983_v6 }
0x2827   :  { %v5570_v32 = vadd.f32 %v5568_v1, %v5513_v23 }
0x2829   :  { %v8288_v36 = vmul.f32 -1.442695, %v5570_v32  ;;  %v5578_v25 = vrot.slane %v5570_v32, 2 }
0x282b   :  { %8778 = vpow2.f32 %v8288_v36 }
0x282c   :  { %8780 = vtanh.f32 %v5578_v25 }
0x2835   :  { %v8779_v39 = vpop.eup %8778 }
0x2836   :  { %v5574_v33 = vadd.f32 1.0, %v8779_v39  ;;  %v8781_v40 = vpop.eup %8780 }
0x2838   :  { %8782 = vrcp.f32 %v5574_v33 }
0x2842   :  { %v8783_v3 = vpop.eup %8782 }
0x2843   :  { %5590 = vrot.lane.b32.xlu0 %v8783_v3, %s9105_s22  ;;  %v5582_v41 = vmul.f32 %v8783_v3, %v8781_v40  ;;  %v5581_v45 = vmul.f32 %v8783_v3, %v5497_v11 }
0x2845   :  { %5584 = vrot.lane.b32.xlu1 %v5582_v41, %s9105_s22 }
0x28b5   :  { %v5591_v50 = vpop.permute.xlu0 %5590 }
0x28b6   :  { %v5592_v51 = vrot.slane %v5591_v50, 2 }
0x28b7   :  { %v5585_v2 = vpop.permute.xlu1 %5584 }
0x28b8   :  { %v5587_v47 = vadd.f32 %v5585_v2, %v5581_v45 }
0x28ba   :  { %8784 = vtanh.f32 %v5587_v47 }
0x28c4   :  { %v8785_v49 = vpop.eup %8784 }
0x28c5   :  { %5595 = vrot.lane.b32.xlu1 %v8785_v49, %s9105_s22 }
0x2937   :  { %v5596_v52 = vpop.permute.xlu1 %5595 }
0x2938   :  { %v5598_v53 = vmul.f32 %v5596_v52, %v5592_v51 }
0x293a   :  { %5600 = vst.msk [vmem:[#allocation4 + $0x6] sm:$0x3] %vm2057_vm2, %v5598_v53  ;;  %v5604_v55 = vpack.c.bf16 %v5598_v53, %v5598_v53 }
0x293b   :  { %5602 = vst.msk [vmem:[#allocation4 + $0x18] sm:$0x3] %vm2060_vm3, %v5598_v53 }
0x293c   :  { %8289 = vmatmul.mubr.msk.bf16.vlgmr.msra.gmra.mrb[168].mxu0 %vm215_vm1, %v5604_v55 }
0x293d   :  { %5789 = vmatpush1.bf16.msra.mxu0 %v10678_v35  ;;  %5820 = vmatprep.mubr.bf16.mxu0 %v9109_v0 }
0x293e   :  { %5790 = vmatprep.subr.bf16.mxu0 %v10684_v26 }
0x2941   :  { %5791 = vmatpush1.bf16.msra.mxu0 %v10693_v37 }
0x2942   :  { %5792 = vmatprep.subr.bf16.mxu0 %v10700_v30 }
0x2945   :  { %5793 = vmatpush1.bf16.msra.mxu0 %v10709_v4 }
0x2946   :  { %5794 = vmatprep.subr.bf16.mxu0 %v10716_v5 }
0x2949   :  { %5795 = vmatpush1.bf16.msra.mxu0 %v10725_v54 }
0x294a   :  { %5968 = vmatprep.subr.bf16.mxu0 %v10671_v19 }
0x2a0f   :  { %v5642_v7 = vpop.f32.mrb[168].mxu0 }
0x2a10   :  { %v5644_v8 = vpop.f32.mrb[169].mxu0 }
0x2a11   :  { %v5651_v9 = vcombine.low %v5642_v7, %v5644_v8  ;;  %v5646_v10 = vpop.f32.mrb[170].mxu0 }
0x2a12   :  { %v5647_v12 = vpop.f32.mrb[171].mxu0 }
0x2a13   :  { %v5658_v14 = vrot.slane %v5651_v9, %v9983_v6 }
0x2a15   :  { %v5660_v24 = vadd.f32 %v5658_v14, %v5603_v15 }
0x2a17   :  { %v8290_v16 = vmul.f32 -1.442695, %v5660_v24  ;;  %v5668_v31 = vrot.slane %v5660_v24, 2 }
0x2a19   :  { %8786 = vpow2.f32 %v8290_v16 }
0x2a1a   :  { %8788 = vtanh.f32 %v5668_v31 }
0x2a23   :  { %v8787_v44 = vpop.eup %8786 }
0x2a24   :  { %v5664_v34 = vadd.f32 1.0, %v8787_v44  ;;  %v8789_v57 = vpop.eup %8788 }
0x2a26   :  { %8790 = vrcp.f32 %v5664_v34 }
0x2a30   :  { %v8791_v38 = vpop.eup %8790 }
0x2a31   :  { %5680 = vrot.lane.b32.xlu1 %v8791_v38, %s9105_s22  ;;  %v5672_v43 = vmul.f32 %v8791_v38, %v8789_v57  ;;  %v5671_v46 = vmul.f32 %v8791_v38, %v5587_v47  ;;  %v10876_v38 = vld [vmem:[%s11523_s7] ss:$8 sps:$4 sm:$0xff]  }
0x2a33   :  { %5674 = vrot.lane.b32.xlu0 %v5672_v43, %s9105_s22  ;;  %v10883_v43 = vld [vmem:[%s11523_s7 + $0x14] ss:$8 sps:$4 sm:$0xff]  }
0x2aa3   :  { %v5681_v59 = vpop.permute.xlu1 %5680 }
0x2aa4   :  { %v5682_v60 = vrot.slane %v5681_v59, 2 }
0x2aa5   :  { %v5675_v42 = vpop.permute.xlu0 %5674 }
0x2aa6   :  { %v5677_v58 = vadd.f32 %v5675_v42, %v5671_v46  ;;  %v10889_v46 = vld [vmem:[%s11523_s7 + $0x10] ss:$8 sps:$4 sm:$0xff]   ;;  %v10895_v42 = vld [vmem:[%s11523_s7 + $0x24] ss:$8 sps:$4 sm:$0xff]  }
0x2aa8   :  { %8792 = vtanh.f32 %v5677_v58 }
0x2ab2   :  { %v8793_v29 = vpop.eup %8792 }
0x2ab3   :  { %5685 = vrot.lane.b32.xlu0 %v8793_v29, %s9105_s22 }
0x2b25   :  { %v5686_v61 = vpop.permute.xlu0 %5685 }
0x2b26   :  { %v5688_v18 = vmul.f32 %v5686_v61, %v5682_v60 }
0x2b28   :  { %5690 = vst.msk [vmem:[#allocation4 + $0x8] sm:$0x3] %vm2057_vm2, %v5688_v18  ;;  %v5694_v11 = vpack.c.bf16 %v5688_v18, %v5688_v18 }
0x2b29   :  { %5692 = vst.msk [vmem:[#allocation4 + $0x16] sm:$0x3] %vm2060_vm3, %v5688_v18 }
0x2b2a   :  { %8291 = vmatmul.mubr.msk.bf16.vlgmr.msra.gmra.mrb[168].mxu1 %vm215_vm1, %v5694_v11 }
0x2b2b   :  { %5879 = vmatpush1.bf16.msra.mxu1 %v10678_v35  ;;  %5910 = vmatprep.mubr.bf16.mxu1 %v9109_v0 }
0x2b2c   :  { %5880 = vmatprep.subr.bf16.mxu1 %v10684_v26 }
0x2b2f   :  { %5881 = vmatpush1.bf16.msra.mxu1 %v10693_v37 }
0x2b30   :  { %5882 = vmatprep.subr.bf16.mxu1 %v10700_v30 }
0x2b33   :  { %5883 = vmatpush1.bf16.msra.mxu1 %v10709_v4 }
0x2b34   :  { %5884 = vmatprep.subr.bf16.mxu1 %v10716_v5 }
0x2b37   :  { %5885 = vmatpush1.bf16.msra.mxu1 %v10725_v54 }
0x2b38   :  { %6056 = vmatprep.subr.bf16.mxu1 %v10671_v19 }
0x2bfd   :  { %v5732_v62 = vpop.f32.mrb[168].mxu1 }
0x2bfe   :  { %v5734_v13 = vpop.f32.mrb[169].mxu1 }
0x2bff   :  { %v5741_v20 = vcombine.low %v5732_v62, %v5734_v13  ;;  %v5736_v22 = vpop.f32.mrb[170].mxu1  ;;  %v5873_v62 = vld [vmem:[#allocation2 + $0x1c] sm:$0xf] }
0x2c00   :  { %v5737_v27 = vpop.f32.mrb[171].mxu1 }
0x2c01   :  { %v5748_v28 = vrot.slane %v5741_v20, %v9983_v6 }
0x2c03   :  { %v5750_v63 = vadd.f32 %v5748_v28, %v5693_v56 }
0x2c05   :  { %v8292_v17 = vmul.f32 -1.442695, %v5750_v63  ;;  %v5758_v48 = vrot.slane %v5750_v63, 2 }
0x2c07   :  { %8794 = vpow2.f32 %v8292_v17 }
0x2c08   :  { %8796 = vtanh.f32 %v5758_v48 }
0x2c11   :  { %v8795_v21 = vpop.eup %8794 }
0x2c12   :  { %v5754_v1 = vadd.f32 1.0, %v8795_v21  ;;  %v8797_v23 = vpop.eup %8796 }
0x2c14   :  { %8798 = vrcp.f32 %v5754_v1 }
0x2c1e   :  { %v8799_v32 = vpop.eup %8798 }
0x2c1f   :  { %5770 = vrot.lane.b32.xlu0 %v8799_v32, %s9105_s22  ;;  %v5762_v36 = vmul.f32 %v8799_v32, %v8797_v23  ;;  %v5761_v25 = vmul.f32 %v8799_v32, %v5677_v58  ;;  %v10904_v58 = vld [vmem:[%s11523_s7 + $0x4] ss:$8 sps:$4 sm:$0xff]  }
0x2c21   :  { %5764 = vrot.lane.b32.xlu1 %v5762_v36, %s9105_s22 }
0x2c91   :  { %v5771_v3 = vpop.permute.xlu0 %5770 }
0x2c92   :  { %v5772_v41 = vrot.slane %v5771_v3, 2 }
0x2c93   :  { %v5765_v39 = vpop.permute.xlu1 %5764 }
0x2c94   :  { %v5767_v33 = vadd.f32 %v5765_v39, %v5761_v25  ;;  %v10922_v25 = vld [vmem:[%s11523_s7 + $0x20] ss:$8 sps:$4 sm:$0xff]   ;;  %v10928_v39 = vld [vmem:[%s11523_s7 + $0x34] ss:$8 sps:$4 sm:$0xff]  }
0x2c96   :  { %8800 = vtanh.f32 %v5767_v33 }
0x2ca0   :  { %v8801_v40 = vpop.eup %8800 }
0x2ca1   :  { %5775 = vrot.lane.b32.xlu1 %v8801_v40, %s9105_s22 }
0x2d13   :  { %v5776_v45 = vpop.permute.xlu1 %5775 }
0x2d14   :  { %v5778_v2 = vmul.f32 %v5776_v45, %v5772_v41 }
0x2d16   :  { %5780 = vst.msk [vmem:[#allocation4 + $0xa] sm:$0x3] %vm2057_vm2, %v5778_v2  ;;  %v5784_v47 = vpack.c.bf16 %v5778_v2, %v5778_v2 }
0x2d17   :  { %5782 = vst.msk [vmem:[#allocation4 + $0x14] sm:$0x3] %vm2060_vm3, %v5778_v2 }
0x2d18   :  { %8293 = vmatmul.mubr.msk.bf16.vlgmr.msra.gmra.mrb[172].mxu0 %vm215_vm1, %v5784_v47 }
0x2d19   :  { %5969 = vmatpush1.bf16.msra.mxu0 %v10678_v35  ;;  %6000 = vmatprep.mubr.bf16.mxu0 %v9109_v0 }
0x2d1a   :  { %5970 = vmatprep.subr.bf16.mxu0 %v10684_v26  ;;  %v5783_v26 = vld [vmem:[#allocation2 + $0x18] sm:$0xf] }
0x2d1d   :  { %5971 = vmatpush1.bf16.msra.mxu0 %v10693_v37 }
0x2d1e   :  { %5972 = vmatprep.subr.bf16.mxu0 %v10700_v30 }
0x2d21   :  { %5973 = vmatpush1.bf16.msra.mxu0 %v10709_v4 }
0x2d22   :  { %5974 = vmatprep.subr.bf16.mxu0 %v10716_v5 }
0x2d25   :  { %5975 = vmatpush1.bf16.msra.mxu0 %v10725_v54 }
0x2d26   :  { %6144 = vmatprep.subr.bf16.mxu0 %v10671_v19 }
0x2deb   :  { %v5822_v49 = vpop.f32.mrb[172].mxu0 }
0x2dec   :  { %v5824_v50 = vpop.f32.mrb[173].mxu0 }
0x2ded   :  { %v5831_v51 = vcombine.low %v5822_v49, %v5824_v50  ;;  %v5826_v35 = vpop.f32.mrb[174].mxu0  ;;  %v5963_v49 = vld [vmem:[#allocation2 + $0x20] sm:$0xf] }
0x2dee   :  { %v5827_v52 = vpop.f32.mrb[175].mxu0 }
0x2def   :  { %v5838_v53 = vrot.slane %v5831_v51, %v9983_v6 }
0x2df1   :  { %v5840_v55 = vadd.f32 %v5838_v53, %v5783_v26 }
0x2df3   :  { %v8294_v37 = vmul.f32 -1.442695, %v5840_v55  ;;  %v5848_v30 = vrot.slane %v5840_v55, 2 }
0x2df5   :  { %8802 = vpow2.f32 %v8294_v37 }
0x2df6   :  { %8804 = vtanh.f32 %v5848_v30 }
0x2dff   :  { %v8803_v7 = vpop.eup %8802 }
0x2e00   :  { %v5844_v8 = vadd.f32 1.0, %v8803_v7  ;;  %v8805_v9 = vpop.eup %8804 }
0x2e02   :  { %8806 = vrcp.f32 %v5844_v8 }
0x2e0c   :  { %v8807_v10 = vpop.eup %8806 }
0x2e0d   :  { %5860 = vrot.lane.b32.xlu1 %v8807_v10, %s9105_s22  ;;  %v5852_v19 = vmul.f32 %v8807_v10, %v8805_v9  ;;  %v5851_v12 = vmul.f32 %v8807_v10, %v5767_v33  ;;  %v10934_v33 = vld [vmem:[%s11523_s7 + $0x30] ss:$8 sps:$4 sm:$0xff]   ;;  %s9111_s7 = smov 32  }
0x2e0f   :  { %5854 = vrot.lane.b32.xlu0 %v5852_v19, %s9105_s22 }
0x2e7f   :  { %v5861_v16 = vpop.permute.xlu1 %5860 }
0x2e80   :  { %v5862_v31 = vrot.slane %v5861_v16, 2 }
0x2e81   :  { %v5855_v14 = vpop.permute.xlu0 %5854 }
0x2e82   :  { %v5857_v15 = vadd.f32 %v5855_v14, %v5851_v12 }
0x2e84   :  { %8808 = vtanh.f32 %v5857_v15 }
0x2e8e   :  { %v8809_v24 = vpop.eup %8808 }
0x2e8f   :  { %5865 = vrot.lane.b32.xlu0 %v8809_v24, %s9105_s22 }
0x2f01   :  { %v5866_v44 = vpop.permute.xlu0 %5865 }
0x2f02   :  { %v5868_v34 = vmul.f32 %v5866_v44, %v5862_v31 }
0x2f04   :  { %5870 = vst.msk [vmem:[#allocation4 + $0xc] sm:$0x3] %vm2057_vm2, %v5868_v34  ;;  %v5874_v57 = vpack.c.bf16 %v5868_v34, %v5868_v34 }
0x2f05   :  { %5872 = vst.msk [vmem:[#allocation4 + $0x12] sm:$0x3] %vm2060_vm3, %v5868_v34 }
0x2f06   :  { %8295 = vmatmul.mubr.msk.bf16.vlgmr.msra.gmra.mrb[172].mxu1 %vm215_vm1, %v5874_v57 }
0x2f07   :  { %6057 = vmatpush1.bf16.msra.mxu1 %v10876_v38  ;;  %6088 = vmatprep.mubr.bf16.mxu1 %v9109_v0 }
0x2f08   :  { %6058 = vmatprep.subr.bf16.mxu1 %v10883_v43 }
0x2f0b   :  { %6059 = vmatpush1.bf16.msra.mxu1 %v10889_v46 }
0x2f0c   :  { %6060 = vmatprep.subr.bf16.mxu1 %v10895_v42 }
0x2f0f   :  { %6061 = vmatpush1.bf16.msra.mxu1 %v10709_v4 }
0x2f10   :  { %6062 = vmatprep.subr.bf16.mxu1 %v10716_v5 }
0x2f13   :  { %6063 = vmatpush1.bf16.msra.mxu1 %v10725_v54 }
0x2f14   :  { %6232 = vmatprep.subr.bf16.mxu1 %v10904_v58 }
0x2fd9   :  { %v5912_v29 = vpop.f32.mrb[172].mxu1 }
0x2fda   :  { %v5914_v59 = vpop.f32.mrb[173].mxu1 }
0x2fdb   :  { %v5921_v60 = vcombine.low %v5912_v29, %v5914_v59  ;;  %v5916_v61 = vpop.f32.mrb[174].mxu1  ;;  %v6051_v29 = vld [vmem:[#allocation2 + $0x24] sm:$0xf] }
0x2fdc   :  { %v5917_v18 = vpop.f32.mrb[175].mxu1 }
0x2fdd   :  { %v5928_v11 = vrot.slane %v5921_v60, %v9983_v6 }
0x2fdf   :  { %v5930_v4 = vadd.f32 %v5928_v11, %v5873_v62 }
0x2fe1   :  { %v8296_v13 = vmul.f32 -1.442695, %v5930_v4  ;;  %v5938_v5 = vrot.slane %v5930_v4, 2 }
0x2fe3   :  { %8810 = vpow2.f32 %v8296_v13 }
0x2fe4   :  { %8812 = vtanh.f32 %v5938_v5 }
0x2fed   :  { %v8811_v54 = vpop.eup %8810 }
0x2fee   :  { %v5934_v20 = vadd.f32 1.0, %v8811_v54  ;;  %v8813_v22 = vpop.eup %8812 }
0x2ff0   :  { %8814 = vrcp.f32 %v5934_v20 }
0x2ffa   :  { %v8815_v27 = vpop.eup %8814 }
0x2ffb   :  { %5950 = vrot.lane.b32.xlu0 %v8815_v27, %s9105_s22  ;;  %v5942_v28 = vmul.f32 %v8815_v27, %v8813_v22  ;;  %v5941_v56 = vmul.f32 %v8815_v27, %v5857_v15 }
0x2ffd   :  { %5944 = vrot.lane.b32.xlu1 %v5942_v28, %s9105_s22 }
0x306d   :  { %v5951_v21 = vpop.permute.xlu0 %5950 }
0x306e   :  { %v5952_v1 = vrot.slane %v5951_v21, 2 }
0x306f   :  { %v5945_v63 = vpop.permute.xlu1 %5944 }
0x3070   :  { %v5947_v17 = vadd.f32 %v5945_v63, %v5941_v56 }
0x3072   :  { %8816 = vtanh.f32 %v5947_v17 }
0x307c   :  { %v8817_v48 = vpop.eup %8816 }
0x307d   :  { %5955 = vrot.lane.b32.xlu1 %v8817_v48, %s9105_s22 }
0x30ef   :  { %v5956_v23 = vpop.permute.xlu1 %5955 }
0x30f0   :  { %v5958_v32 = vmul.f32 %v5956_v23, %v5952_v1 }
0x30f2   :  { %5960 = vst.msk [vmem:[#allocation4 + $0xe] sm:$0x3] %vm2057_vm2, %v5958_v32  ;;  %v5964_v36 = vpack.c.bf16 %v5958_v32, %v5958_v32 }
0x30f3   :  { %5962 = vst.msk [vmem:[#allocation4 + $0x10] sm:$0x3] %vm2060_vm3, %v5958_v32 }
0x30f4   :  { %8297 = vmatmul.mubr.msk.bf16.vlgmr.msra.gmra.mrb[176].mxu0 %vm215_vm1, %v5964_v36 }
0x30f5   :  { %6145 = vmatpush1.bf16.msra.mxu0 %v10876_v38  ;;  %6176 = vmatprep.mubr.bf16.mxu0 %v9109_v0 }
0x30f6   :  { %6146 = vmatprep.subr.bf16.mxu0 %v10883_v43 }
0x30f9   :  { %6147 = vmatpush1.bf16.msra.mxu0 %v10889_v46 }
0x30fa   :  { %6148 = vmatprep.subr.bf16.mxu0 %v10895_v42 }
0x30fd   :  { %6149 = vmatpush1.bf16.msra.mxu0 %v10922_v25 }
0x30fe   :  { %6150 = vmatprep.subr.bf16.mxu0 %v10928_v39 }
0x3101   :  { %6151 = vmatpush1.bf16.msra.mxu0 %v10934_v33 }
0x3102   :  { %6320 = vmatprep.subr.bf16.mxu0 %v10904_v58 }
0x31c7   :  { %v6002_v40 = vpop.f32.mrb[176].mxu0 }
0x31c8   :  { %v6004_v3 = vpop.f32.mrb[177].mxu0 }
0x31c9   :  { %v6011_v41 = vcombine.low %v6002_v40, %v6004_v3  ;;  %v6006_v45 = vpop.f32.mrb[178].mxu0  ;;  %v6139_v40 = vld [vmem:[#allocation2 + $0x28] sm:$0xf] }
0x31ca   :  { %v6007_v2 = vpop.f32.mrb[179].mxu0 }
0x31cb   :  { %v6018_v47 = vrot.slane %v6011_v41, %v9983_v6 }
0x31cd   :  { %v6020_v50 = vadd.f32 %v6018_v47, %v5963_v49 }
0x31cf   :  { %v8298_v51 = vmul.f32 -1.442695, %v6020_v50  ;;  %v6028_v35 = vrot.slane %v6020_v50, 2 }
0x31d1   :  { %8818 = vpow2.f32 %v8298_v51 }
0x31d2   :  { %8820 = vtanh.f32 %v6028_v35 }
0x31db   :  { %v8819_v52 = vpop.eup %8818 }
0x31dc   :  { %v6024_v53 = vadd.f32 1.0, %v8819_v52  ;;  %v8821_v26 = vpop.eup %8820 }
0x31de   :  { %8822 = vrcp.f32 %v6024_v53 }
0x31e8   :  { %v8823_v55 = vpop.eup %8822 }
0x31e9   :  { %6040 = vrot.lane.b32.xlu1 %v8823_v55, %s9105_s22  ;;  %v6032_v37 = vmul.f32 %v8823_v55, %v8821_v26  ;;  %v6031_v30 = vmul.f32 %v8823_v55, %v5947_v17 }
0x31eb   :  { %6034 = vrot.lane.b32.xlu0 %v6032_v37, %s9105_s22 }
0x325b   :  { %v6041_v10 = vpop.permute.xlu1 %6040 }
0x325c   :  { %v6042_v19 = vrot.slane %v6041_v10, 2 }
0x325d   :  { %v6035_v7 = vpop.permute.xlu0 %6034 }
0x325e   :  { %v6037_v8 = vadd.f32 %v6035_v7, %v6031_v30 }
0x3260   :  { %8824 = vtanh.f32 %v6037_v8 }
0x326a   :  { %v8825_v9 = vpop.eup %8824 }
0x326b   :  { %6045 = vrot.lane.b32.xlu0 %v8825_v9, %s9105_s22 }
0x32dd   :  { %v6046_v12 = vpop.permute.xlu0 %6045 }
0x32de   :  { %v6048_v14 = vmul.f32 %v6046_v12, %v6042_v19 }
0x32e0   :  { %6049 = vst.msk [vmem:[#allocation4 + $0x10] sm:$0x3] %vm2057_vm2, %v6048_v14  ;;  %v6052_v15 = vpack.c.bf16 %v6048_v14, %v6048_v14 }
0x32e1   :  { %6050 = vst.msk [vmem:[#allocation4 + $0xe] sm:$0x3] %vm2060_vm3, %v6048_v14 }
0x32e2   :  { %8299 = vmatmul.mubr.msk.bf16.vlgmr.msra.gmra.mrb[176].mxu1 %vm215_vm1, %v6052_v15 }
0x32e3   :  { %6233 = vmatpush1.bf16.msra.mxu1 %v10876_v38  ;;  %6264 = vmatprep.mubr.bf16.mxu1 %v9109_v0 }
0x32e4   :  { %6234 = vmatprep.subr.bf16.mxu1 %v10883_v43 }
0x32e7   :  { %6235 = vmatpush1.bf16.msra.mxu1 %v10889_v46 }
0x32e8   :  { %6236 = vmatprep.subr.bf16.mxu1 %v10895_v42 }
0x32eb   :  { %6237 = vmatpush1.bf16.msra.mxu1 %v10922_v25 }
0x32ec   :  { %6238 = vmatprep.subr.bf16.mxu1 %v10928_v39 }
0x32ef   :  { %6239 = vmatpush1.bf16.msra.mxu1 %v10934_v33 }
0x32f0   :  { %6408 = vmatprep.subr.bf16.mxu1 %v10904_v58 }
0x33b5   :  { %v6090_v24 = vpop.f32.mrb[176].mxu1 }
0x33b6   :  { %v6092_v16 = vpop.f32.mrb[177].mxu1 }
0x33b7   :  { %v6099_v31 = vcombine.low %v6090_v24, %v6092_v16  ;;  %v6094_v44 = vpop.f32.mrb[178].mxu1  ;;  %v6227_v24 = vld [vmem:[#allocation2 + $0x2c] sm:$0xf] }
0x33b8   :  { %v6095_v34 = vpop.f32.mrb[179].mxu1 }
0x33b9   :  { %v6106_v57 = vrot.slane %v6099_v31, %v9983_v6 }
0x33bb   :  { %v6108_v59 = vadd.f32 %v6106_v57, %v6051_v29 }
0x33bd   :  { %v8300_v60 = vmul.f32 -1.442695, %v6108_v59  ;;  %v6116_v61 = vrot.slane %v6108_v59, 2 }
0x33bf   :  { %8826 = vpow2.f32 %v8300_v60 }
0x33c0   :  { %8828 = vtanh.f32 %v6116_v61 }
0x33c9   :  { %v8827_v18 = vpop.eup %8826 }
0x33ca   :  { %v6112_v11 = vadd.f32 1.0, %v8827_v18  ;;  %v8829_v62 = vpop.eup %8828 }
0x33cc   :  { %8830 = vrcp.f32 %v6112_v11 }
0x33d6   :  { %v8831_v4 = vpop.eup %8830 }
0x33d7   :  { %6128 = vrot.lane.b32.xlu0 %v8831_v4, %s9105_s22  ;;  %v6120_v13 = vmul.f32 %v8831_v4, %v8829_v62  ;;  %v6119_v5 = vmul.f32 %v8831_v4, %v6037_v8 }
0x33d9   :  { %6122 = vrot.lane.b32.xlu1 %v6120_v13, %s9105_s22 }
0x3449   :  { %v6129_v27 = vpop.permute.xlu0 %6128 }
0x344a   :  { %v6130_v28 = vrot.slane %v6129_v27, 2 }
0x344b   :  { %v6123_v54 = vpop.permute.xlu1 %6122 }
0x344c   :  { %v6125_v20 = vadd.f32 %v6123_v54, %v6119_v5 }
0x344e   :  { %8832 = vtanh.f32 %v6125_v20 }
0x3458   :  { %v8833_v22 = vpop.eup %8832 }
0x3459   :  { %6133 = vrot.lane.b32.xlu1 %v8833_v22, %s9105_s22 }
0x34cb   :  { %v6134_v56 = vpop.permute.xlu1 %6133 }
0x34cc   :  { %v6136_v63 = vmul.f32 %v6134_v56, %v6130_v28 }
0x34ce   :  { %6137 = vst.msk [vmem:[#allocation4 + $0x12] sm:$0x3] %vm2057_vm2, %v6136_v63  ;;  %v6140_v17 = vpack.c.bf16 %v6136_v63, %v6136_v63 }
0x34cf   :  { %6138 = vst.msk [vmem:[#allocation4 + $0xc] sm:$0x3] %vm2060_vm3, %v6136_v63 }
0x34d0   :  { %8301 = vmatmul.mubr.msk.bf16.vlgmr.msra.gmra.mrb[180].mxu0 %vm215_vm1, %v6140_v17  ;;  %v6315_v17 = vld [vmem:[#allocation2 + $0x30] sm:$0xf] }
0x34d1   :  { %6321 = vmatpush1.bf16.msra.mxu0 %v10876_v38  ;;  %6352 = vmatprep.mubr.bf16.mxu0 %v9109_v0 }
0x34d2   :  { %6322 = vmatprep.subr.bf16.mxu0 %v10883_v43 }
0x34d5   :  { %6323 = vmatpush1.bf16.msra.mxu0 %v10889_v46 }
0x34d6   :  { %6324 = vmatprep.subr.bf16.mxu0 %v10895_v42 }
0x34d9   :  { %6325 = vmatpush1.bf16.msra.mxu0 %v10922_v25 }
0x34da   :  { %6326 = vmatprep.subr.bf16.mxu0 %v10928_v39 }
0x34dd   :  { %6327 = vmatpush1.bf16.msra.mxu0 %v10934_v33 }
0x34de   :  { %6496 = vmatprep.subr.bf16.mxu0 %v10904_v58 }
0x35a3   :  { %v6178_v48 = vpop.f32.mrb[180].mxu0 }
0x35a4   :  { %v6180_v21 = vpop.f32.mrb[181].mxu0 }
0x35a5   :  { %v6187_v1 = vcombine.low %v6178_v48, %v6180_v21  ;;  %v6182_v23 = vpop.f32.mrb[182].mxu0 }
0x35a6   :  { %v6183_v32 = vpop.f32.mrb[183].mxu0 }
0x35a7   :  { %v6194_v36 = vrot.slane %v6187_v1, %v9983_v6 }
0x35a9   :  { %v6196_v3 = vadd.f32 %v6194_v36, %v6139_v40 }
0x35ab   :  { %v8302_v41 = vmul.f32 -1.442695, %v6196_v3  ;;  %v6204_v45 = vrot.slane %v6196_v3, 2 }
0x35ad   :  { %8834 = vpow2.f32 %v8302_v41 }
0x35ae   :  { %8836 = vtanh.f32 %v6204_v45 }
0x35b7   :  { %v8835_v2 = vpop.eup %8834 }
0x35b8   :  { %v6200_v47 = vadd.f32 1.0, %v8835_v2  ;;  %v8837_v49 = vpop.eup %8836 }
0x35ba   :  { %8838 = vrcp.f32 %v6200_v47 }
0x35c4   :  { %v8839_v50 = vpop.eup %8838 }
0x35c5   :  { %6216 = vrot.lane.b32.xlu1 %v8839_v50, %s9105_s22  ;;  %v6208_v51 = vmul.f32 %v8839_v50, %v8837_v49  ;;  %v6207_v35 = vmul.f32 %v8839_v50, %v6125_v20 }
0x35c7   :  { %6210 = vrot.lane.b32.xlu0 %v6208_v51, %s9105_s22 }
0x3637   :  { %v6217_v55 = vpop.permute.xlu1 %6216 }
0x3638   :  { %v6218_v37 = vrot.slane %v6217_v55, 2 }
0x3639   :  { %v6211_v52 = vpop.permute.xlu0 %6210 }
0x363a   :  { %v6213_v53 = vadd.f32 %v6211_v52, %v6207_v35 }
0x363c   :  { %8840 = vtanh.f32 %v6213_v53 }
0x3646   :  { %v8841_v26 = vpop.eup %8840 }
0x3647   :  { %6221 = vrot.lane.b32.xlu0 %v8841_v26, %s9105_s22 }
0x36b9   :  { %v6222_v30 = vpop.permute.xlu0 %6221 }
0x36ba   :  { %v6224_v7 = vmul.f32 %v6222_v30, %v6218_v37 }
0x36bc   :  { %6225 = vst.msk [vmem:[#allocation4 + $0x14] sm:$0x3] %vm2057_vm2, %v6224_v7  ;;  %v6228_v8 = vpack.c.bf16 %v6224_v7, %v6224_v7 }
0x36bd   :  { %6226 = vst.msk [vmem:[#allocation4 + $0xa] sm:$0x3] %vm2060_vm3, %v6224_v7 }
0x36be   :  { %8303 = vmatmul.mubr.msk.bf16.vlgmr.msra.gmra.mrb[180].mxu1 %vm215_vm1, %v6228_v8 }
0x36bf   :  { %6409 = vmatpush1.bf16.msra.mxu1 %v10876_v38  ;;  %6440 = vmatprep.mubr.bf16.mxu1 %v9109_v0 }
0x36c0   :  { %6410 = vmatprep.subr.bf16.mxu1 %v10883_v43 }
0x36c3   :  { %6411 = vmatpush1.bf16.msra.mxu1 %v10889_v46 }
0x36c4   :  { %6412 = vmatprep.subr.bf16.mxu1 %v10895_v42 }
0x36c7   :  { %6413 = vmatpush1.bf16.msra.mxu1 %v10922_v25 }
0x36c8   :  { %6414 = vmatprep.subr.bf16.mxu1 %v10928_v39 }
0x36cb   :  { %6415 = vmatpush1.bf16.msra.mxu1 %v10934_v33 }
0x36cc   :  { %6584 = vmatprep.subr.bf16.mxu1 %v10904_v58 }
0x3791   :  { %v6266_v9 = vpop.f32.mrb[180].mxu1 }
0x3792   :  { %v6268_v10 = vpop.f32.mrb[181].mxu1 }
0x3793   :  { %v6275_v19 = vcombine.low %v6266_v9, %v6268_v10  ;;  %v6270_v12 = vpop.f32.mrb[182].mxu1 }
0x3794   :  { %v6271_v14 = vpop.f32.mrb[183].mxu1 }
0x3795   :  { %v6282_v15 = vrot.slane %v6275_v19, %v9983_v6 }
0x3797   :  { %v6284_v16 = vadd.f32 %v6282_v15, %v6227_v24 }
0x3799   :  { %v8304_v31 = vmul.f32 -1.442695, %v6284_v16  ;;  %v6292_v44 = vrot.slane %v6284_v16, 2 }
0x379b   :  { %8842 = vpow2.f32 %v8304_v31 }
0x379c   :  { %8844 = vtanh.f32 %v6292_v44 }
0x37a5   :  { %v8843_v34 = vpop.eup %8842 }
0x37a6   :  { %v6288_v57 = vadd.f32 1.0, %v8843_v34  ;;  %v8845_v29 = vpop.eup %8844 }
0x37a8   :  { %8846 = vrcp.f32 %v6288_v57 }
0x37b2   :  { %v8847_v59 = vpop.eup %8846 }
0x37b3   :  { %6304 = vrot.lane.b32.xlu0 %v8847_v59, %s9105_s22  ;;  %v6296_v58 = vmul.f32 %v8847_v59, %v8845_v29  ;;  %v6295_v60 = vmul.f32 %v8847_v59, %v6213_v53 }
0x37b5   :  { %6298 = vrot.lane.b32.xlu1 %v6296_v58, %s9105_s22 }
0x3825   :  { %v6305_v62 = vpop.permute.xlu0 %6304 }
0x3826   :  { %v6306_v4 = vrot.slane %v6305_v62, 2 }
0x3827   :  { %v6299_v61 = vpop.permute.xlu1 %6298 }
0x3828   :  { %v6301_v18 = vadd.f32 %v6299_v61, %v6295_v60  ;;  %v6491_v60 = vld [vmem:[#allocation2 + $0x38] sm:$0xf] }
0x382a   :  { %8848 = vtanh.f32 %v6301_v18 }
0x3834   :  { %v8849_v11 = vpop.eup %8848 }
0x3835   :  { %6309 = vrot.lane.b32.xlu1 %v8849_v11, %s9105_s22 }
0x38a7   :  { %v6310_v13 = vpop.permute.xlu1 %6309 }
0x38a8   :  { %v6312_v5 = vmul.f32 %v6310_v13, %v6306_v4 }
0x38aa   :  { %6313 = vst.msk [vmem:[#allocation4 + $0x16] sm:$0x3] %vm2057_vm2, %v6312_v5  ;;  %v6316_v54 = vpack.c.bf16 %v6312_v5, %v6312_v5 }
0x38ab   :  { %6314 = vst.msk [vmem:[#allocation4 + $0x8] sm:$0x3] %vm2060_vm3, %v6312_v5 }
0x38ac   :  { %8305 = vmatmul.mubr.msk.bf16.vlgmr.msra.gmra.mrb[184].mxu0 %vm215_vm1, %v6316_v54 }
0x38ad   :  { %6497 = vmatpush1.bf16.msra.mxu0 %v10876_v38  ;;  %6528 = vmatprep.mubr.bf16.mxu0 %v9109_v0 }
0x38ae   :  { %6498 = vmatprep.subr.bf16.mxu0 %v10883_v43 }
0x38b1   :  { %6499 = vmatpush1.bf16.msra.mxu0 %v10889_v46 }
0x38b2   :  { %6500 = vmatprep.subr.bf16.mxu0 %v10895_v42 }
0x38b5   :  { %6501 = vmatpush1.bf16.msra.mxu0 %v10922_v25 }
0x38b6   :  { %6502 = vmatprep.subr.bf16.mxu0 %v10928_v39 }
0x38b9   :  { %6503 = vmatpush1.bf16.msra.mxu0 %v10934_v33 }
0x397f   :  { %v6354_v20 = vpop.f32.mrb[184].mxu0 }
0x3980   :  { %v6356_v22 = vpop.f32.mrb[185].mxu0 }
0x3981   :  { %v6363_v27 = vcombine.low %v6354_v20, %v6356_v22  ;;  %v6358_v28 = vpop.f32.mrb[186].mxu0 }
0x3982   :  { %v6359_v56 = vpop.f32.mrb[187].mxu0 }
0x3983   :  { %v6370_v63 = vrot.slane %v6363_v27, %v9983_v6 }
0x3985   :  { %v6372_v48 = vadd.f32 %v6370_v63, %v6315_v17 }
0x3987   :  { %v8306_v21 = vmul.f32 -1.442695, %v6372_v48  ;;  %v6380_v1 = vrot.slane %v6372_v48, 2 }
0x3989   :  { %8850 = vpow2.f32 %v8306_v21 }
0x398a   :  { %8852 = vtanh.f32 %v6380_v1 }
0x3993   :  { %v8851_v23 = vpop.eup %8850 }
0x3994   :  { %v6376_v32 = vadd.f32 1.0, %v8851_v23  ;;  %v8853_v36 = vpop.eup %8852 }
0x3996   :  { %8854 = vrcp.f32 %v6376_v32 }
0x39a0   :  { %v8855_v40 = vpop.eup %8854 }
0x39a1   :  { %6392 = vrot.lane.b32.xlu1 %v8855_v40, %s9105_s22  ;;  %v6384_v3 = vmul.f32 %v8855_v40, %v8853_v36  ;;  %v6383_v41 = vmul.f32 %v8855_v40, %v6301_v18 }
0x39a3   :  { %6386 = vrot.lane.b32.xlu0 %v6384_v3, %s9105_s22 }
0x3a13   :  { %v6393_v49 = vpop.permute.xlu1 %6392 }
0x3a14   :  { %v6394_v50 = vrot.slane %v6393_v49, 2 }
0x3a15   :  { %v6387_v45 = vpop.permute.xlu0 %6386 }
0x3a16   :  { %v6389_v2 = vadd.f32 %v6387_v45, %v6383_v41  ;;  %v6579_v41 = vld [vmem:[#allocation2 + $0x3c] sm:$0xf] }
0x3a18   :  { %8856 = vtanh.f32 %v6389_v2 }
0x3a22   :  { %v8857_v47 = vpop.eup %8856 }
0x3a23   :  { %6397 = vrot.lane.b32.xlu0 %v8857_v47, %s9105_s22 }
0x3a95   :  { %v6398_v51 = vpop.permute.xlu0 %6397 }
0x3a96   :  { %v6400_v35 = vmul.f32 %v6398_v51, %v6394_v50 }
0x3a98   :  { %6401 = vst.msk [vmem:[#allocation4 + $0x18] sm:$0x3] %vm2057_vm2, %v6400_v35  ;;  %v6404_v52 = vpack.c.bf16 %v6400_v35, %v6400_v35 }
0x3a99   :  { %6402 = vst.msk [vmem:[#allocation4 + $0x6] sm:$0x3] %vm2060_vm3, %v6400_v35 }
0x3a9a   :  { %8307 = vmatmul.mubr.msk.bf16.vlgmr.msra.gmra.mrb[184].mxu1 %vm215_vm1, %v6404_v52 }
0x3a9b   :  { %6585 = vmatpush1.bf16.msra.mxu1 %v10876_v38  ;;  %6616 = vmatprep.mubr.bf16.mxu1 %v9109_v0  ;;  %v6403_v0 = vld [vmem:[#allocation2 + $0x34] sm:$0xf] }
0x3a9c   :  { %6586 = vmatprep.subr.bf16.mxu1 %v10883_v43 }
0x3a9f   :  { %6587 = vmatpush1.bf16.msra.mxu1 %v10889_v46 }
0x3aa0   :  { %6588 = vmatprep.subr.bf16.mxu1 %v10895_v42 }
0x3aa3   :  { %6589 = vmatpush1.bf16.msra.mxu1 %v10922_v25 }
0x3aa4   :  { %6590 = vmatprep.subr.bf16.mxu1 %v10928_v39 }
0x3aa7   :  { %6591 = vmatpush1.bf16.msra.mxu1 %v10934_v33 }
0x3b6d   :  { %v6442_v53 = vpop.f32.mrb[184].mxu1 }
0x3b6e   :  { %v6444_v26 = vpop.f32.mrb[185].mxu1 }
0x3b6f   :  { %v6451_v55 = vcombine.low %v6442_v53, %v6444_v26  ;;  %v6446_v37 = vpop.f32.mrb[186].mxu1 }
0x3b70   :  { %v6447_v30 = vpop.f32.mrb[187].mxu1  ;;  %v6674_v37 = vld [vmem:[#allocation4 + $0xe] sm:$0x3] }
0x3b71   :  { %v6458_v38 = vrot.slane %v6451_v55, %v9983_v6  ;;  %v6676_v30 = vld [vmem:[#allocation4 + $0x12] sm:$0x3] }
0x3b73   :  { %v6460_v7 = vadd.f32 %v6458_v38, %v6403_v0  ;;  %v6673_v38 = vld [vmem:[#allocation4 + $0xc] sm:$0x3]  ;;  %v6675_v0 = vld [vmem:[#allocation4 + $0x10] sm:$0x3] }
0x3b75   :  { %v8308_v43 = vmul.f32 -1.442695, %v6460_v7  ;;  %v6468_v46 = vrot.slane %v6460_v7, 2  ;;  %v6677_v7 = vld [vmem:[#allocation4 + $0x14] sm:$0x3] }
0x3b77   :  { %8858 = vpow2.f32 %v8308_v43  ;;  %v6690_v43 = vpack.c.bf16 %v6674_v37, %v6674_v37 }
0x3b78   :  { %8860 = vtanh.f32 %v6468_v46  ;;  %v6692_v46 = vpack.c.bf16 %v6676_v30, %v6676_v30 }
0x3b81   :  { %v8859_v8 = vpop.eup %8858 }
0x3b82   :  { %v6464_v42 = vadd.f32 1.0, %v8859_v8  ;;  %v8861_v25 = vpop.eup %8860 }
0x3b84   :  { %8862 = vrcp.f32 %v6464_v42  ;;  %v6672_v42 = vld [vmem:[#allocation4 + $0xa] sm:$0x3] }
0x3b8e   :  { %v8863_v39 = vpop.eup %8862 }
0x3b8f   :  { %6480 = vrot.lane.b32.xlu0 %v8863_v39, %s9105_s22  ;;  %v6472_v33 = vmul.f32 %v8863_v39, %v8861_v25  ;;  %v6471_v9 = vmul.f32 %v8863_v39, %v6389_v2  ;;  %v6689_v25 = vpack.c.bf16 %v6673_v38, %v6673_v38  ;;  %v6691_v39 = vpack.c.bf16 %v6675_v0, %v6675_v0 }
0x3b91   :  { %6474 = vrot.lane.b32.xlu1 %v6472_v33, %s9105_s22  ;;  %v6678_v33 = vld [vmem:[#allocation4 + $0x16] sm:$0x3] }
0x3c01   :  { %v6481_v14 = vpop.permute.xlu0 %6480 }
0x3c02   :  { %v6482_v15 = vrot.slane %v6481_v14, 2  ;;  %v6688_v14 = vpack.c.bf16 %v6672_v42, %v6672_v42 }
0x3c03   :  { %v6475_v10 = vpop.permute.xlu1 %6474 }
0x3c04   :  { %v6477_v19 = vadd.f32 %v6475_v10, %v6471_v9  ;;  %v6693_v9 = vpack.c.bf16 %v6677_v7, %v6677_v7 }
0x3c06   :  { %8864 = vtanh.f32 %v6477_v19 }
0x3c10   :  { %v8865_v12 = vpop.eup %8864 }
0x3c11   :  { %6485 = vrot.lane.b32.xlu1 %v8865_v12, %s9105_s22  ;;  %v6679_v12 = vld [vmem:[#allocation4 + $0x18] sm:$0x3] }
0x3c83   :  { %v6486_v24 = vpop.permute.xlu1 %6485 }
0x3c84   :  { %v6488_v16 = vmul.f32 %v6486_v24, %v6482_v15  ;;  %v11034_v15 = vunpack.c.l.b16 %v6690_v43  ;;  %v6724_v24 = vunpack.c.l.b16 %v6692_v46 }
0x3c86   :  { %6489 = vst.msk [vmem:[#allocation4 + $0x1a] sm:$0x3] %vm2057_vm2, %v6488_v16  ;;  %v6492_v31 = vpack.c.bf16 %v6488_v16, %v6488_v16 }
0x3c87   :  { %6490 = vst.msk [vmem:[#allocation4 + $0x4] sm:$0x3] %vm2060_vm3, %v6488_v16 }
0x3c88   :  { %8309 = vmatmul.mubr.msk.bf16.vlgmr.msra.gmra.mrb[188].mxu0 %vm215_vm1, %v6492_v31  ;;  %v6694_v31 = vpack.c.bf16 %v6678_v33, %v6678_v33 }
0x3d5b   :  { %v6530_v44 = vpop.f32.mrb[188].mxu0 }
0x3d5c   :  { %v6532_v34 = vpop.f32.mrb[189].mxu0 }
0x3d5d   :  { %v6539_v57 = vcombine.low %v6530_v44, %v6532_v34  ;;  %v6534_v29 = vpop.f32.mrb[190].mxu0  ;;  %v11036_v44 = vunpack.c.l.b16 %v6689_v25  ;;  %v6723_v34 = vunpack.c.l.b16 %v6691_v39 }
0x3d5e   :  { %v6535_v59 = vpop.f32.mrb[191].mxu0  ;;  %v6725_v29 = vunpack.c.l.b16 %v6693_v9 }
0x3d5f   :  { %v6546_v58 = vrot.slane %v6539_v57, %v9983_v6 }
0x3d61   :  { %v6548_v61 = vadd.f32 %v6546_v58, %v6491_v60  ;;  %v6670_v58 = vld [vmem:[#allocation4 + $0x6] sm:$0x3] }
0x3d63   :  { %v8310_v18 = vmul.f32 -1.442695, %v6548_v61  ;;  %v6556_v11 = vrot.slane %v6548_v61, 2  ;;  %v6695_v61 = vpack.c.bf16 %v6679_v12, %v6679_v12 }
0x3d65   :  { %8866 = vpow2.f32 %v8310_v18  ;;  %v6669_v18 = vld [vmem:[#allocation4 + $0x4] sm:$0x3] }
0x3d66   :  { %8868 = vtanh.f32 %v6556_v11  ;;  %v11040_v11 = vunpack.c.l.b16 %v6688_v14 }
0x3d6f   :  { %v8867_v62 = vpop.eup %8866 }
0x3d70   :  { %v6552_v4 = vadd.f32 1.0, %v8867_v62  ;;  %v8869_v13 = vpop.eup %8868  ;;  %v6748_v62 = vrot.slane %v11034_v15, 1 }
0x3d72   :  { %8870 = vrcp.f32 %v6552_v4  ;;  %v6751_v4 = vrot.slane %v6724_v24, 7 }
0x3d7c   :  { %v8871_v5 = vpop.eup %8870 }
0x3d7d   :  { %6568 = vrot.lane.b32.xlu1 %v8871_v5, %s9105_s22  ;;  %v6560_v54 = vmul.f32 %v8871_v5, %v8869_v13  ;;  %v6559_v20 = vmul.f32 %v8871_v5, %v6477_v19  ;;  %v6671_v19 = vld [vmem:[#allocation4 + $0x8] sm:$0x3]  ;;  %v6795_v13 = vrot.slane %v11034_v15, 2  ;;  %v6680_v5 = vld [vmem:[#allocation4 + $0x1a] sm:$0x3] }
0x3d7e   :  { %v6687_v60 = vpack.c.bf16 %v6671_v19, %v6671_v19 }
0x3d7f   :  { %6562 = vrot.lane.b32.xlu0 %v6560_v54, %s9105_s22  ;;  %v6726_v54 = vunpack.c.l.b16 %v6694_v31 }
0x3def   :  { %v6569_v56 = vpop.permute.xlu1 %6568 }
0x3df0   :  { %v6570_v63 = vrot.slane %v6569_v56, 2 }
0x3df1   :  { %v6563_v22 = vpop.permute.xlu0 %6562 }
0x3df2   :  { %v6565_v27 = vadd.f32 %v6563_v22, %v6559_v20  ;;  %v6745_v20 = vrot.slane %v11036_v44, 2  ;;  %v6793_v22 = vrot.slane %v11036_v44, 3 }
0x3df4   :  { %8872 = vtanh.f32 %v6565_v27 }
0x3dfe   :  { %v8873_v28 = vpop.eup %8872 }
0x3dff   :  { %6573 = vrot.lane.b32.xlu0 %v8873_v28, %s9105_s22 }
0x3e71   :  { %v6574_v17 = vpop.permute.xlu0 %6573 }
0x3e72   :  { %v6576_v48 = vmul.f32 %v6574_v17, %v6570_v63  ;;  %v6686_v63 = vpack.c.bf16 %v6670_v58, %v6670_v58  ;;  %v6753_v17 = vrot.slane %v6725_v29, 6 }
0x3e74   :  { %6577 = vst.msk [vmem:[#allocation4 + $0x1c] sm:$0x3] %vm2057_vm2, %v6576_v48  ;;  %v6580_v21 = vpack.c.bf16 %v6576_v48, %v6576_v48 }
0x3e75   :  { %6578 = vst.msk [vmem:[#allocation4 + $0x2] sm:$0x3] %vm2060_vm3, %v6576_v48  ;;  %v6685_v48 = vpack.c.bf16 %v6669_v18, %v6669_v18 }
0x3e76   :  { %8311 = vmatmul.mubr.msk.bf16.vlgmr.msra.gmra.mrb[188].mxu1 %vm215_vm1, %v6580_v21  ;;  %v6719_v21 = vunpack.c.l.b16 %v6687_v60 }
0x3e78   :  { %v6789_v43 = vrot.slane %v6719_v21, 5 }
0x3e7b   :  { %v6681_v28 = vld [vmem:[#allocation4 + $0x1c] sm:$0x3] }
0x3e7c   :  { %v6668_v59 = vld [vmem:[#allocation4 + $0x2] sm:$0x3] }
0x3e7d   :  { %v6684_v56 = vpack.c.bf16 %v6668_v59, %v6668_v59 }
0x3f49   :  { %v6618_v1 = vpop.f32.mrb[188].mxu1 }
0x3f4a   :  { %v6620_v23 = vpop.f32.mrb[189].mxu1 }
0x3f4b   :  { %v6627_v32 = vcombine.low %v6618_v1, %v6620_v23  ;;  %v6622_v36 = vpop.f32.mrb[190].mxu1  ;;  %v6727_v1 = vunpack.c.l.b16 %v6695_v61  ;;  %v6799_v23 = vrot.slane %v6725_v29, 7 }
0x3f4c   :  { %v6623_v40 = vpop.f32.mrb[191].mxu1  ;;  %v6742_v36 = vrot.slane %v11040_v11, 3 }
0x3f4d   :  { %v6634_v3 = vrot.slane %v6627_v32, %v9983_v6  ;;  %v6696_v32 = vpack.c.bf16 %v6680_v5, %v6680_v5  ;;  %v6752_v40 = vsel %vm172_vm0, %v6751_v4, %v6723_v34  ;;  %v6803_v19 = vrot.slane %v6727_v1, 5 }
0x3f4f   :  { %v6636_v45 = vadd.f32 %v6634_v3, %v6579_v41  ;;  %v6697_v41 = vpack.c.bf16 %v6681_v28, %v6681_v28  ;;  %v6728_v38 = vunpack.c.l.b16 %v6696_v32 }
0x3f51   :  { %v8312_v2 = vmul.f32 -1.442695, %v6636_v45  ;;  %v6644_v47 = vrot.slane %v6636_v45, 2  ;;  %v6755_v45 = vrot.slane %v6726_v54, 5  ;;  %v6729_v0 = vunpack.c.l.b16 %v6697_v41 }
0x3f52   :  { %v6759_v14 = vrot.slane %v6728_v38, 3 }
0x3f53   :  { %8874 = vpow2.f32 %v8312_v2  ;;  %v6791_v2 = vrot.slane %v11040_v11, 4  ;;  %v6761_v31 = vrot.slane %v6729_v0, 2  ;;  %v6807_v18 = vrot.slane %v6729_v0, 3 }
0x3f54   :  { %8876 = vtanh.f32 %v6644_v47  ;;  %v6801_v47 = vrot.slane %v6726_v54, 6 }
0x3f5d   :  { %v8875_v49 = vpop.eup %8874 }
0x3f5e   :  { %v6640_v50 = vadd.f32 1.0, %v8875_v49  ;;  %v8877_v51 = vpop.eup %8876  ;;  %v6716_v49 = vunpack.c.l.b16 %v6684_v56 }
0x3f60   :  { %8878 = vrcp.f32 %v6640_v50  ;;  %v6718_v50 = vunpack.c.l.b16 %v6686_v63  ;;  %v6731_v25 = vrot.slane %v6716_v49, 7 }
0x3f62   :  { %v6736_v39 = vrot.slane %v6718_v50, 5 }
0x3f6a   :  { %v8879_v35 = vpop.eup %8878 }
0x3f6b   :  { %6656 = vrot.lane.b32.xlu0 %v8879_v35, %s9105_s22  ;;  %v6648_v52 = vmul.f32 %v8879_v35, %v8877_v51  ;;  %v6647_v53 = vmul.f32 %v8879_v35, %v6565_v27  ;;  %v6797_v27 = vrot.slane %v6723_v34, 1  ;;  %v6754_v51 = vsel %vm6734_vm4, %v6753_v17, %v6752_v40 }
0x3f6c   :  { %v6756_v7 = vsel %vm6737_vm5, %v6755_v45, %v6754_v51  ;;  %v8591_v45 = vld [vmem:[#allocation10] sm:$0xff]  }
0x3f6d   :  { %6650 = vrot.lane.b32.xlu1 %v6648_v52, %s9105_s22  ;;  %v6798_v3 = vsel %vm172_vm0, %v6724_v24, %v6797_v27  ;;  %8428 = vmatprep.subr.bf16.mxu0 %v8591_v45 }
0x3f6e   :  { %8429 = vmatpush3.bf16.msra.mxu0 %v8591_v45 }
0x3fdd   :  { %v6657_v8 = vpop.permute.xlu0 %6656 }
0x3fde   :  { %v6658_v10 = vrot.slane %v6657_v8, 2 }
0x3fdf   :  { %v6651_v26 = vpop.permute.xlu1 %6650 }
0x3fe0   :  { %v6653_v55 = vadd.f32 %v6651_v26, %v6647_v53  ;;  %v6717_v53 = vunpack.c.l.b16 %v6685_v48  ;;  %v6739_v26 = vrot.slane %v6719_v21, 4 }
0x3fe2   :  { %8880 = vtanh.f32 %v6653_v55  ;;  %v6757_v55 = vrot.slane %v6727_v1, 4  ;;  %v6733_v33 = vrot.slane %v6717_v53, 6  ;;  %v6785_v34 = vrot.slane %v6717_v53, 7  ;;  %v8592_v53 = vld [vmem:[#allocation10 + $0x8] sm:$0xff]  }
0x3fe3   :  { %8430 = vmatprep.subr.bf16.mxu0 %v8592_v53 }
0x3fe4   :  { %v6758_v9 = vsel %vm6740_vm6, %v6757_v55, %v6756_v7  ;;  %8431 = vmatpush3.bf16.msra.mxu0 %v8592_v53 }
0x3fe5   :  { %v6760_v4 = vsel %vm6743_vm7, %v6759_v14, %v6758_v9 }
0x3fe6   :  { %v6762_v28 = vsel %vm6746_vm8, %v6761_v31, %v6760_v4 }
0x3fec   :  { %v8881_v6 = vpop.eup %8880 }
0x3fed   :  { %6661 = vrot.lane.b32.xlu1 %v8881_v6, %s9105_s22  ;;  %v6800_v6 = vsel %vm6734_vm4, %v6799_v23, %v6798_v3 }
0x3fee   :  { %v6802_v46 = vsel %vm6737_vm5, %v6801_v47, %v6800_v6 }
0x3fef   :  { %v6804_v63 = vsel %vm6740_vm6, %v6803_v19, %v6802_v46 }
0x405f   :  { %v6662_v16 = vpop.permute.xlu1 %6661 }
0x4060   :  { %v6664_v57 = vmul.f32 %v6662_v16, %v6658_v10  ;;  %v6787_v10 = vrot.slane %v6718_v50, 6 }
0x4062   :  { %6665 = vst.msk [vmem:[#allocation4 + $0x1e] sm:$0x3] %vm2057_vm2, %v6664_v57  ;;  %vm7153_vm2 = vcmask 654336  }
0x4063   :  { %6666 = vst.msk [vmem:[#allocation4] sm:$0x3] %vm2060_vm3, %v6664_v57  ;;  %v6805_v57 = vrot.slane %v6728_v38, 4  ;;  %vm9115_vm3 = vmmov 0  }
0x4065   :  { %v6806_v1 = vsel %vm6743_vm7, %v6805_v57, %v6804_v63 }
0x4066   :  { %v6808_v32 = vsel %vm6746_vm8, %v6807_v18, %v6806_v1 }
0x4069   :  { %v6682_v52 = vld [vmem:[#allocation4 + $0x1e] sm:$0x3] }
0x406a   :  { %v6667_v35 = vld [vmem:[#allocation4] sm:$0x3]  ;;  %v6698_v30 = vpack.c.bf16 %v6682_v52, %v6682_v52 }
0x406b   :  { %v6683_v37 = vpack.c.bf16 %v6667_v35, %v6667_v35 }
0x406c   :  { %v6730_v42 = vunpack.c.l.b16 %v6698_v30 }
0x406d   :  { %v6715_v8 = vunpack.c.l.b16 %v6683_v37 }
0x406e   :  { %v6763_v59 = vrot.slane %v6730_v42, 1  ;;  %v6809_v54 = vrot.slane %v6730_v42, 2  ;;  %v8593_v42 = vld [vmem:[#allocation10 + $0x10] sm:$0xff]  }
0x406f   :  { %v6732_v12 = vsel %vm172_vm0, %v6731_v25, %v6715_v8  ;;  %v6783_v24 = vrot.slane %v6715_v8, 1  ;;  %8432 = vmatprep.subr.bf16.mxu0 %v8593_v42 }
0x4070   :  { %v6735_v16 = vsel %vm6734_vm4, %v6733_v33, %v6732_v12  ;;  %v6764_v48 = vsel %vm6749_vm9, %v6763_v59, %v6762_v28  ;;  %v6810_v40 = vsel %vm6749_vm9, %v6809_v54, %v6808_v32  ;;  %8433 = vmatpush3.bf16.msra.mxu0 %v8593_v42 }
0x4071   :  { %v6738_v29 = vsel %vm6737_vm5, %v6736_v39, %v6735_v16  ;;  %v6784_v58 = vsel %vm172_vm0, %v6716_v49, %v6783_v24  ;;  %vm6947_vm0 = vcmask 392192  }
0x4072   :  { %v6741_v60 = vsel %vm6740_vm6, %v6739_v26, %v6738_v29  ;;  %v6786_v61 = vsel %vm6734_vm4, %v6785_v34, %v6784_v58  ;;  %vm7449_vm4 = vcmask 1040384  }
0x4073   :  { %v6744_v11 = vsel %vm6743_vm7, %v6742_v36, %v6741_v60  ;;  %v6788_v5 = vsel %vm6737_vm5, %v6787_v10, %v6786_v61  ;;  %v8594_v60 = vld [vmem:[#allocation10 + $0x18] sm:$0xff]   ;;  %v8595_v61 = vld [vmem:[#allocation10 + $0x20] sm:$0xff]   ;;  %vm7451_vm5 = vcmask 1041408  }
0x4074   :  { %v6747_v27 = vsel %vm6746_vm8, %v6745_v20, %v6744_v11  ;;  %v6790_v56 = vsel %vm6740_vm6, %v6789_v43, %v6788_v5  ;;  %8434 = vmatprep.subr.bf16.mxu0 %v8594_v60  ;;  %vm7453_vm6 = vcmask 1042432  }
0x4075   :  { %v6750_v17 = vsel %vm6749_vm9, %v6748_v62, %v6747_v27  ;;  %v6792_v21 = vsel %vm6743_vm7, %v6791_v2, %v6790_v56  ;;  %8435 = vmatpush3.bf16.msra.mxu0 %v8594_v60  ;;  %vm7455_vm7 = vcmask 1043456  }
0x4076   :  { %v6765_v23 = vpack.c.b16 %v6764_v48, %v6750_v17  ;;  %v6794_v20 = vsel %vm6746_vm8, %v6793_v22, %v6792_v21  ;;  %8436 = vmatprep.subr.bf16.mxu0 %v8595_v61  ;;  %vm7457_vm8 = vcmask 1044480  }
0x4077   :  { %v6796_v36 = vsel %vm6749_vm9, %v6795_v13, %v6794_v20  ;;  %vm7912_vm9 = vcmask 517120  }
0x4078   :  { %6767 = vxpose.xlu0.c.b16.start.end [1/1] (short) (narrow) %v6765_v23, 64  ;;  %v6811_v62 = vpack.c.b16 %v6810_v40, %v6796_v36 }
0x4079   :  { %8437 = vmatpush3.bf16.msra.mxu0 %v8595_v61 }
0x407a   :  { %6813 = vxpose.xlu1.c.b16.start.end [1/1] (short) (narrow) %v6811_v62, 64 }
0x40de   :  { %v11084_v3 = vpop.trf.xlu0 }
0x40df   :  { %v6833_v44 = vshll.u32 %v11084_v3, 16  ;;  %v6874_v22 = vrot.slane %v11084_v3, 1  ;;  %v6831_v26 = vshrl.u32 %v11084_v3, 16  ;;  %v6914_v6 = vrot.slane %v11084_v3, 2 }
0x40e0   :  { %v11086_v41 = vpop.trf.xlu1 }
0x40e1   :  { %v7007_v49 = vrot.slane %v11086_v41, 1  ;;  %v6835_v30 = vrot.slane %v6833_v44, 1  ;;  %v7045_v0 = vrot.slane %v11086_v41, 2  ;;  %v6890_v25 = vrot.slane %v6831_v26, 1 }
0x40e2   :  { %v11088_v2 = vpop.trf.xlu0  ;;  %v6891_v39 = vrot.slane %v6833_v44, 2  ;;  %v6967_v33 = vshll.u32 %v11086_v41, 16  ;;  %v6965_v31 = vshrl.u32 %v11086_v41, 16 }
0x40e3   :  { %v6875_v15 = vrot.slane %v11088_v2, 1  ;;  %v6838_v13 = vshll.u32 %v11088_v2, 16  ;;  %v6842_v50 = vshrl.u32 %v11088_v2, 16  ;;  %v6915_v52 = vrot.slane %v11088_v2, 2 }
0x40e4   :  { %v11094_v47 = vpop.trf.xlu1  ;;  %v6836_v10 = vor.u32 %v6835_v30, %v6831_v26  ;;  %v6892_v34 = vor.u32 %v6891_v39, %v6890_v25  ;;  %v6969_v58 = vrot.slane %v6967_v33, 1  ;;  %v7022_v27 = vrot.slane %v6965_v31, 1 }
0x40e5   :  { %v6876_v51 = vsel %vm6873_vm10, %v6874_v22, %v6875_v15  ;;  %v7008_v35 = vrot.slane %v11094_v47, 1  ;;  %v7046_v37 = vrot.slane %v11094_v47, 2  ;;  %v6916_v7 = vsel %vm6913_vm11, %v6914_v6, %v6915_v52 }
0x40e6   :  { %6881 = vrot.lane.b32.xlu0 %v6876_v51, %s9111_s7  ;;  %v11108_v38 = vpop.trf.xlu0  ;;  %v6840_v43 = vrot.slane %v6838_v13, 1  ;;  %v6893_v46 = vrot.slane %v6842_v50, 1  ;;  %v6894_v8 = vrot.slane %v6838_v13, 2  ;;  %v6972_v12 = vshll.u32 %v11094_v47, 16 }
0x40e7   :  { %v7009_v55 = vsel %vm6873_vm10, %v7007_v49, %v7008_v35  ;;  %v7047_v9 = vsel %vm6913_vm11, %v7045_v0, %v7046_v37  ;;  %v6877_v19 = vrot.slane %v11108_v38, 1  ;;  %v6976_v14 = vshrl.u32 %v11094_v47, 16 }
0x40e8   :  { %7014 = vrot.lane.b32.xlu1 %v7009_v55, %s9111_s7  ;;  %v6841_v24 = vsel %vm6829_vm12, %v6836_v10, %v6840_v43  ;;  %v6895_v16 = vor.u32 %v6894_v8, %v6893_v46  ;;  %v6846_v57 = vshll.u32 %v11108_v38, 16  ;;  %v6917_v59 = vrot.slane %v11108_v38, 2  ;;  %v11145_v23 = vpop.trf.xlu1 }
0x40e9   :  { %v6878_v29 = vsel %vm6873_vm10, %v6875_v15, %v6877_v19  ;;  %v6974_v11 = vrot.slane %v6972_v12, 1  ;;  %v7025_v4 = vrot.slane %v6976_v14, 1  ;;  %v7026_v5 = vrot.slane %v6972_v12, 2 }
0x40ea   :  { %6921 = vrot.lane.b32.xlu0 %v6916_v7, %s9105_s22  ;;  %v6896_v18 = vsel %vm6889_vm13, %v6892_v34, %v6895_v16  ;;  %v6850_v54 = vshrl.u32 %v11108_v38, 16  ;;  %v6918_v28 = vsel %vm6913_vm11, %v6915_v52, %v6917_v59  ;;  %v6970_v56 = vor.u32 %v6969_v58, %v6965_v31  ;;  %v11148_v20 = vpop.trf.xlu0 }
0x40eb   :  { %v6848_v63 = vrot.slane %v6846_v57, 1  ;;  %v7023_v17 = vrot.slane %v6967_v33, 2  ;;  %v6844_v21 = vor.u32 %v6842_v50, %v6840_v43  ;;  %v11143_v1 = vor.u32 %v7026_v5, %v7025_v4 }
0x40ec   :  { %7052 = vrot.lane.b32.xlu1 %v7047_v9, %s9105_s22  ;;  %v6975_v48 = vsel %vm6829_vm12, %v6970_v56, %v6974_v11  ;;  %v6897_v40 = vrot.slane %v6850_v54, 1  ;;  %v6898_v62 = vrot.slane %v6846_v57, 2  ;;  %v7010_v44 = vrot.slane %v11145_v23, 1  ;;  %v11164_v51 = vpop.trf.xlu1 }
0x40ed   :  { %v6849_v32 = vsel %vm6829_vm12, %v6844_v21, %v6848_v63  ;;  %v7024_v36 = vor.u32 %v7023_v17, %v7022_v27  ;;  %v6919_v22 = vrot.slane %v11148_v20, 2  ;;  %v6879_v50 = vrot.slane %v11148_v20, 1 }
0x40ee   :  { %6861 = vrot.lane.b32.xlu0 %v6841_v24, %s9112_s29  ;;  %v6899_v15 = vor.u32 %v6898_v62, %v6897_v40  ;;  %v7011_v13 = vsel %vm6873_vm10, %v7008_v35, %v7010_v44  ;;  %v6980_v52 = vshll.u32 %v11145_v23, 16  ;;  %v7012_v35 = vrot.slane %v11164_v51, 1 }
0x40ef   :  { %v7028_v45 = vsel %vm6889_vm13, %v7024_v36, %v11143_v1  ;;  %v6880_v53 = vsel %vm6873_vm10, %v6877_v19, %v6879_v50  ;;  %v6854_v26 = vshll.u32 %v11148_v20, 16  ;;  %v6858_v55 = vshrl.u32 %v11148_v20, 16 }
0x40f0   :  { %6883 = vrot.lane.b32.xlu1 %v6878_v29, %s9111_s7  ;;  %v6900_v49 = vsel %vm6889_vm13, %v6895_v16, %v6899_v15  ;;  %v6920_v6 = vsel %vm6913_vm11, %v6917_v59, %v6919_v22  ;;  %v6982_v30 = vrot.slane %v6980_v52, 1  ;;  %v7013_v0 = vsel %vm6873_vm10, %v7010_v44, %v7012_v35 }
0x40f1   :  { %v6978_v7 = vor.u32 %v6976_v14, %v6974_v11  ;;  %v6984_v43 = vshrl.u32 %v11145_v23, 16  ;;  %v6856_v46 = vrot.slane %v6854_v26, 1  ;;  %v6852_v42 = vor.u32 %v6850_v54, %v6848_v63 }
0x40f2   :  { %6905 = vrot.lane.b32.xlu0 %v6896_v18, %s9113_s14  ;;  %v6901_v25 = vrot.slane %v6858_v55, 1  ;;  %v6902_v39 = vrot.slane %v6854_v26, 2  ;;  %v7030_v12 = vrot.slane %v6980_v52, 2  ;;  %v7050_v14 = vrot.slane %v11164_v51, 2 }
0x40f3   :  { %v6983_v8 = vsel %vm6829_vm12, %v6978_v7, %v6982_v30  ;;  %v6860_v33 = vor.u32 %v6858_v55, %v6856_v46  ;;  %v6857_v9 = vsel %vm6829_vm12, %v6852_v42, %v6856_v46  ;;  %v7029_v19 = vrot.slane %v6984_v43, 1 }
0x40f4   :  { %6923 = vrot.lane.b32.xlu1 %v6918_v28, %s9105_s22  ;;  %v6903_v10 = vor.u32 %v6902_v39, %v6901_v25  ;;  %v6988_v24 = vshll.u32 %v11164_v51, 16  ;;  %v6992_v16 = vshrl.u32 %v11164_v51, 16  ;;  %v7048_v31 = vrot.slane %v11145_v23, 2 }
0x40f5   :  { %v7031_v57 = vor.u32 %v7030_v12, %v7029_v19  ;;  %v6986_v59 = vor.u32 %v6984_v43, %v6982_v30 }
0x40f6   :  { %6995 = vrot.lane.b32.xlu0 %v6975_v48, %s9112_s29  ;;  %v6904_v34 = vsel %vm6889_vm13, %v6899_v15, %v6903_v10  ;;  %v7051_v29 = vsel %vm6913_vm11, %v7048_v31, %v7050_v14  ;;  %v6990_v58 = vrot.slane %v6988_v24, 1  ;;  %v7033_v60 = vrot.slane %v6992_v16, 1 }
0x40f7   :  { %v7034_v61 = vrot.slane %v6988_v24, 2  ;;  %v7032_v18 = vsel %vm6889_vm13, %v11143_v1, %v7031_v57  ;;  %v7049_v5 = vsel %vm6913_vm11, %v7046_v37, %v7048_v31 }
0x40f8   :  { %6863 = vrot.lane.b32.xlu1 %v6849_v32, %s9112_s29  ;;  %v6991_v11 = vsel %vm6829_vm12, %v6986_v59, %v6990_v58  ;;  %v6994_v27 = vor.u32 %v6992_v16, %v6990_v58 }
0x40f9   :  { %v7035_v4 = vor.u32 %v7034_v61, %v7033_v60 }
0x40fa   :  { %7037 = vrot.lane.b32.xlu0 %v7028_v45, %s9113_s14 }
0x40fb   :  { %v7036_v54 = vsel %vm6889_vm13, %v7031_v57, %v7035_v4 }
0x40fc   :  { %6927 = vrot.lane.b32.xlu1 %v6919_v22, %s9105_s22 }
0x40fe   :  { %7016 = vrot.lane.b32.xlu0 %v7011_v13, %s9111_s7 }
0x4100   :  { %6907 = vrot.lane.b32.xlu1 %v6900_v49, %s9113_s14 }
0x4102   :  { %6887 = vrot.lane.b32.xlu0 %v6879_v50, %s9111_s7 }
0x4104   :  { %6885 = vrot.lane.b32.xlu1 %v6880_v53, %s9111_s7 }
0x4106   :  { %6925 = vrot.lane.b32.xlu0 %v6920_v6, %s9105_s22 }
0x4108   :  { %7018 = vrot.lane.b32.xlu1 %v7013_v0, %s9111_s7 }
0x410a   :  { %6997 = vrot.lane.b32.xlu0 %v6983_v8, %s9112_s29 }
0x410c   :  { %6867 = vrot.lane.b32.xlu1 %v6860_v33, %s9112_s29 }
0x410e   :  { %6865 = vrot.lane.b32.xlu0 %v6857_v9, %s9112_s29 }
0x4110   :  { %6911 = vrot.lane.b32.xlu1 %v6903_v10, %s9113_s14 }
0x4112   :  { %6909 = vrot.lane.b32.xlu0 %v6904_v34, %s9113_s14 }
0x4114   :  { %7056 = vrot.lane.b32.xlu1 %v7051_v29, %s9105_s22 }
0x4116   :  { %7039 = vrot.lane.b32.xlu0 %v7032_v18, %s9113_s14 }
0x4118   :  { %6999 = vrot.lane.b32.xlu1 %v6991_v11, %s9112_s29 }
0x411a   :  { %7054 = vrot.lane.b32.xlu0 %v7049_v5, %s9105_s22 }
0x411c   :  { %7041 = vrot.lane.b32.xlu1 %v7036_v54, %s9113_s14 }
0x411e   :  { %7001 = vrot.lane.b32.xlu0 %v6994_v27, %s9112_s29 }
0x4120   :  { %7020 = vrot.lane.b32.xlu1 %v7012_v35, %s9111_s7 }
0x4122   :  { %7043 = vrot.lane.b32.xlu0 %v7035_v4, %s9113_s14 }
0x4124   :  { %7058 = vrot.lane.b32.xlu1 %v7050_v14, %s9105_s22 }
0x4158   :  { %v6882_v28 = vpop.permute.xlu0 %6881 }
0x415a   :  { %v7015_v56 = vpop.permute.xlu1 %7014 }
0x415c   :  { %v6922_v63 = vpop.permute.xlu0 %6921 }
0x415e   :  { %v7053_v17 = vpop.permute.xlu1 %7052 }
0x4160   :  { %v6862_v37 = vpop.permute.xlu0 %6861 }
0x4161   :  { %v6931_v48 = vsel %vm6929_vm14, %v11084_v3, %v6862_v37 }
0x4162   :  { %v6884_v21 = vpop.permute.xlu1 %6883  ;;  %v6940_v1 = vsel %vm6938_vm15, %v6931_v48, %v6882_v28 }
0x4164   :  { %v6906_v32 = vpop.permute.xlu0 %6905 }
0x4165   :  { %v6949_v36 = vsel %vm6947_vm0, %v6940_v1, %v6906_v32 }
0x4166   :  { %v6924_v40 = vpop.permute.xlu1 %6923  ;;  %v6957_v62 = vsel %vm215_vm1, %v6949_v36, %v6922_v63  ;;  %v8597_v36 = vld [vmem:[%s11527_s11 + $0x80] sm:$0xff]  }
0x4167   :  { %8438 = vmatprep.mubr.msk.bf16.mxu0 %vm7153_vm2, %v6957_v62  ;;  %v8598_v62 = vld [vmem:[%s11527_s11] sm:$0xff]  }
0x4168   :  { %v6996_v45 = vpop.permute.xlu0 %6995 }
0x4169   :  { %v7061_v30 = vsel %vm6929_vm14, %v11086_v41, %v6996_v45  ;;  %v8599_v45 = vld [vmem:[%s11527_s11 + $0x48] sm:$0xff]  }
0x416a   :  { %v6864_v44 = vpop.permute.xlu1 %6863 }
0x416b   :  { %v6933_v3 = vsel %vm6929_vm14, %v11088_v2, %v6864_v44  ;;  %v7069_v2 = vsel %vm6938_vm15, %v7061_v30, %v7015_v56  ;;  %v8600_v44 = vld [vmem:[%s11527_s11 + $0x88] sm:$0xff]  }
0x416c   :  { %v7038_v22 = vpop.permute.xlu0 %7037  ;;  %v6942_v49 = vsel %vm6938_vm15, %v6933_v3, %v6884_v21  ;;  %v8603_v3 = vld [vmem:[%s11527_s11 + $0x90] sm:$0xff]   ;;  %v8613_v30 = vld [vmem:[%s11527_s11 + $0x28] sm:$0xff]  }
0x416d   :  { %v7077_v43 = vsel %vm6947_vm0, %v7069_v2, %v7038_v22  ;;  %v8601_v22 = vld [vmem:[%s11527_s11 + $0x8] sm:$0xff]   ;;  %v8615_v2 = vld [vmem:[%s11527_s11 + $0xb0] sm:$0xff]  }
0x416e   :  { %v6928_v15 = vpop.permute.xlu1 %6927  ;;  %v7085_v25 = vsel %vm215_vm1, %v7077_v43, %v7053_v17  ;;  %v8617_v43 = vld [vmem:[%s11527_s11 + $0x78] sm:$0xff]  }
0x416f   :  { %v7096_v12 = vrot.slane %v7085_v25, 2 }
0x4170   :  { %v7017_v13 = vpop.permute.xlu0 %7016 }
0x4172   :  { %v6908_v50 = vpop.permute.xlu1 %6907 }
0x4173   :  { %v6951_v52 = vsel %vm6947_vm0, %v6942_v49, %v6908_v50  ;;  %v8605_v49 = vld [vmem:[%s11527_s11 + $0x58] sm:$0xff]  }
0x4174   :  { %v6959_v53 = vsel %vm215_vm1, %v6951_v52, %v6924_v40  ;;  %v6888_v35 = vpop.permute.xlu0 %6887  ;;  %v9114_v40 = vmov 0.0   ;;  %v8606_v50 = vld [vmem:[%s11527_s11 + $0x98] sm:$0xff]  }
0x4175   :  { %8439 = vmatmul.mubr.msk.bf16.vlgmr.msra.gmra.mrb[192].mxu0 %vm7153_vm2, %v6959_v53  ;;  %8454 = vmatprep.subr.bf16.mxu0 %v9114_v40  ;;  %v8607_v52 = vld [vmem:[%s11527_s11 + $0x18] sm:$0xff]   ;;  %v8608_v53 = vld [vmem:[%s11527_s11 + $0x60] sm:$0xff]  }
0x4176   :  { %v6886_v26 = vpop.permute.xlu1 %6885  ;;  %8455 = vmatpush3.bf16.msra.mxu0 %v8597_v36 }
0x4177   :  { %8456 = vmatprep.subr.bf16.mxu0 %v9114_v40 }
0x4178   :  { %v6926_v55 = vpop.permute.xlu0 %6925 }
0x417a   :  { %v7019_v6 = vpop.permute.xlu1 %7018  ;;  %8457 = vmatpush3.bf16.msra.mxu0 %v8600_v44 }
0x417b   :  { %8458 = vmatprep.subr.bf16.mxu0 %v9114_v40 }
0x417c   :  { %v6998_v0 = vpop.permute.xlu0 %6997 }
0x417d   :  { %v7063_v16 = vsel %vm6929_vm14, %v11094_v47, %v6998_v0  ;;  %v8614_v0 = vld [vmem:[%s11527_s11 + $0x70] sm:$0xff]  }
0x417e   :  { %v6868_v7 = vpop.permute.xlu1 %6867  ;;  %v7071_v57 = vsel %vm6938_vm15, %v7063_v16, %v7017_v13  ;;  %v8604_v13 = vld [vmem:[%s11527_s11 + $0x10] sm:$0xff]   ;;  %8459 = vmatpush3.bf16.msra.mxu0 %v8603_v3 }
0x417f   :  { %v6937_v46 = vsel %vm6929_vm14, %v11148_v20, %v6868_v7  ;;  %8460 = vmatprep.subr.bf16.mxu0 %v9114_v40  ;;  %v8616_v7 = vld [vmem:[%s11527_s11 + $0x30] sm:$0xff]  }
0x4180   :  { %v6866_v8 = vpop.permute.xlu0 %6865  ;;  %v6946_v33 = vsel %vm6938_vm15, %v6937_v46, %v6888_v35  ;;  %v8609_v35 = vld [vmem:[%s11527_s11 + $0xa0] sm:$0xff]   ;;  %v8618_v46 = vld [vmem:[%s11527_s11 + $0xb8] sm:$0xff]  }
0x4181   :  { %v6935_v42 = vsel %vm6929_vm14, %v11108_v38, %v6866_v8  ;;  %v8619_v8 = vld [vmem:[%s11527_s11 + $0x38] sm:$0xff]  }
0x4182   :  { %v6912_v39 = vpop.permute.xlu1 %6911  ;;  %v6944_v10 = vsel %vm6938_vm15, %v6935_v42, %v6886_v26  ;;  %8461 = vmatpush3.bf16.msra.mxu0 %v8606_v50  ;;  %v8610_v26 = vld [vmem:[%s11527_s11 + $0x20] sm:$0xff]   ;;  %v11347_v42 = vld [vmem:[#allocation11] ss:$0 sm:$0xff] }
0x4183   :  { %v6955_v41 = vsel %vm6947_vm0, %v6946_v33, %v6912_v39  ;;  %8462 = vmatprep.subr.bf16.mxu0 %v9114_v40 }
0x4184   :  { %v6963_v9 = vsel %vm215_vm1, %v6955_v41, %v6928_v15  ;;  %v6910_v19 = vpop.permute.xlu0 %6909  ;;  %v8602_v15 = vld [vmem:[%s11527_s11 + $0x50] sm:$0xff]  }
0x4185   :  { %v6953_v14 = vsel %vm6947_vm0, %v6944_v10, %v6910_v19  ;;  %v7105_v38 = vsel %vm6913_vm11, %v6963_v9, %v7096_v12 }
0x4186   :  { %v7057_v20 = vpop.permute.xlu1 %7056  ;;  %v6961_v24 = vsel %vm215_vm1, %v6953_v14, %v6926_v55  ;;  %8463 = vmatpush3.bf16.msra.mxu0 %v8609_v35  ;;  %v8611_v55 = vld [vmem:[%s11527_s11 + $0x68] sm:$0xff]  }
0x4187   :  { %8442 = vmatprep.mubr.msk.bf16.mxu0 %vm7153_vm2, %v6961_v24  ;;  %8464 = vmatprep.subr.bf16.mxu0 %v9114_v40 }
0x4188   :  { %8443 = vmatmul.mubr.msk.bf16.gmra.mrb[196].mxu0 %vm7153_vm2, %v7105_v38  ;;  %v7040_v31 = vpop.permute.xlu0 %7039 }
0x4189   :  { %v7079_v59 = vsel %vm6947_vm0, %v7071_v57, %v7040_v31 }
0x418a   :  { %v7000_v34 = vpop.permute.xlu1 %6999 }
0x418b   :  { %v7065_v29 = vsel %vm6929_vm14, %v11145_v23, %v7000_v34 }
0x418c   :  { %v7055_v58 = vpop.permute.xlu0 %7054  ;;  %v7073_v18 = vsel %vm6938_vm15, %v7065_v29, %v7019_v6  ;;  %v8612_v6 = vld [vmem:[%s11527_s11 + $0xa8] sm:$0xff]  }
0x418d   :  { %v7087_v60 = vsel %vm215_vm1, %v7079_v59, %v7055_v58  ;;  %8465 = vmatpush3.bf16.msra.mxu0 %v8612_v6 }
0x418e   :  { %v7097_v61 = vrot.slane %v7087_v60, 2  ;;  %v7042_v11 = vpop.permute.xlu1 %7041  ;;  %8466 = vmatprep.subr.bf16.mxu0 %v9114_v40 }
0x418f   :  { %v7081_v47 = vsel %vm6947_vm0, %v7073_v18, %v7042_v11 }
0x4190   :  { %v7089_v4 = vsel %vm215_vm1, %v7081_v47, %v7057_v20  ;;  %v7002_v5 = vpop.permute.xlu0 %7001  ;;  %v7098_v54 = vsel %vm6913_vm11, %v7096_v12, %v7097_v61 }
0x4191   :  { %v7099_v27 = vrot.slane %v7089_v4, 2  ;;  %v7067_v23 = vsel %vm6929_vm14, %v11164_v51, %v7002_v5  ;;  %8446 = vmatprep.mubr.msk.bf16.mxu0 %vm7153_vm2, %v7098_v54  ;;  %v8596_v51 = vld [vmem:[%s11527_s11 + $0x40] sm:$0xff]   ;;  %8467 = vmatpush3.bf16.msra.mxu0 %v8615_v2 }
0x4192   :  { %v7021_v28 = vpop.permute.xlu1 %7020  ;;  %8375 = vmatprep.subr.bf16.mxu1 %v8596_v51  ;;  %8468 = vmatprep.subr.bf16.mxu0 %v9114_v40 }
0x4193   :  { %v7075_v56 = vsel %vm6938_vm15, %v7067_v23, %v7021_v28  ;;  %v7100_v63 = vsel %vm6913_vm11, %v7097_v61, %v7099_v27  ;;  %8376 = vmatpush3.bf16.msra.mxu1 %v8598_v62 }
0x4194   :  { %8447 = vmatmul.mubr.msk.bf16.gmra.mrb[200].mxu0 %vm7153_vm2, %v7100_v63  ;;  %v7044_v17 = vpop.permute.xlu0 %7043  ;;  %8377 = vmatprep.subr.bf16.mxu1 %v8599_v45 }
0x4195   :  { %v7083_v37 = vsel %vm6947_vm0, %v7075_v56, %v7044_v17  ;;  %8469 = vmatpush3.bf16.msra.mxu0 %v8618_v46 }
0x4196   :  { %v7059_v48 = vpop.permute.xlu1 %7058 }
0x4197   :  { %v7091_v21 = vsel %vm215_vm1, %v7083_v37, %v7059_v48  ;;  %8378 = vmatpush3.bf16.msra.mxu1 %v8601_v22 }
0x4198   :  { %v7101_v1 = vrot.slane %v7091_v21, 2  ;;  %8379 = vmatprep.subr.bf16.mxu1 %v8602_v15 }
0x419a   :  { %v7102_v32 = vsel %vm6913_vm11, %v7099_v27, %v7101_v1 }
0x419b   :  { %8450 = vmatprep.mubr.msk.bf16.mxu0 %vm7153_vm2, %v7102_v32  ;;  %8380 = vmatpush3.bf16.msra.mxu1 %v8604_v13 }
0x419c   :  { %8451 = vmatmul.mubr.msk.bf16.gmra.mrb[204].mxu0 %vm7153_vm2, %v7101_v1  ;;  %8381 = vmatprep.subr.bf16.mxu1 %v8605_v49 }
0x419d   :  { %8470 = vmatprep.mubr.msk.bf16.mxu0 %vm9115_vm3, %v9114_v40 }
0x419f   :  { %8382 = vmatpush3.bf16.msra.mxu1 %v8607_v52 }
0x41a0   :  { %8383 = vmatprep.subr.bf16.mxu1 %v8608_v53 }
0x41a3   :  { %8384 = vmatpush3.bf16.msra.mxu1 %v8610_v26 }
0x41a4   :  { %8385 = vmatprep.subr.bf16.mxu1 %v8611_v55 }
0x41a7   :  { %8386 = vmatpush3.bf16.msra.mxu1 %v8613_v30 }
0x41a8   :  { %8387 = vmatprep.subr.bf16.mxu1 %v8614_v0 }
0x41ab   :  { %8388 = vmatpush3.bf16.msra.mxu1 %v8616_v7 }
0x41ac   :  { %8389 = vmatprep.subr.bf16.mxu1 %v8617_v43 }
0x41af   :  { %8390 = vmatpush3.bf16.msra.mxu1 %v8619_v8 }
0x41b0   :  { %8482 = vmatprep.subr.bf16.mxu1 %v9114_v40 }
0x4248   :  { %v8440_v25 = vpop.f32.mrb[192].mxu0 }
0x4249   :  { %v7217_v39 = vadd.f32 %v8440_v25, %v11347_v42  ;;  %v7208_v33 = vpop.f32.mrb[193].mxu0 }
0x424a   :  { %v7209_v41 = vadd.f32 %v11347_v42, %v7208_v33  ;;  %v8441_v9 = vpop.f32.mrb[194].mxu0 }
0x424b   :  { %v7272_v10 = vmax.f32 %v7217_v39, 0.0  ;;  %v7220_v19 = vadd.f32 %v8441_v9, %v11347_v42  ;;  %v7211_v12 = vpop.f32.mrb[195].mxu0 }
0x424c   :  { %v7270_v14 = vmax.f32 %v7209_v41, 0.0  ;;  %v7212_v20 = vadd.f32 %v11347_v42, %v7211_v12 }
0x424d   :  { %v11353_v24 = vmax.f32 %v7220_v19, 0.0  ;;  %v7304_v16 = vrot.slane %v7272_v10, 1  ;;  %v7363_v31 = vrot.slane %v7272_v10, 2 }
0x424e   :  { %v7271_v38 = vmax.f32 %v7212_v20, 0.0  ;;  %v7301_v29 = vrot.slane %v7270_v14, 1  ;;  %v7360_v59 = vrot.slane %v7270_v14, 2 }
0x424f   :  { %v7306_v34 = vrot.slane %v11353_v24, 1  ;;  %v7365_v57 = vrot.slane %v11353_v24, 2 }
0x4250   :  { %v7302_v58 = vrot.slane %v7271_v38, 1  ;;  %v7361_v60 = vrot.slane %v7271_v38, 2 }
0x4251   :  { %v7307_v61 = vsel %vm6873_vm10, %v7304_v16, %v7306_v34  ;;  %v7366_v18 = vsel %vm6913_vm11, %v7363_v31, %v7365_v57 }
0x4252   :  { %v7347_v11 = vmax.f32 %v7272_v10, %v7307_v61  ;;  %v7303_v47 = vsel %vm6873_vm10, %v7301_v29, %v7302_v58  ;;  %v7305_v4 = vsel %vm6873_vm10, %v7302_v58, %v7304_v16  ;;  %v7362_v5 = vsel %vm6913_vm11, %v7360_v59, %v7361_v60 }
0x4253   :  { %v7345_v54 = vmax.f32 %v7270_v14, %v7303_v47  ;;  %v7346_v27 = vmax.f32 %v7271_v38, %v7305_v4  ;;  %v7364_v23 = vsel %vm6913_vm11, %v7361_v60, %v7363_v31 }
0x4254   :  { %v7406_v28 = vmax.f32 %v7347_v11, %v7366_v18 }
0x4255   :  { %v7404_v56 = vmax.f32 %v7345_v54, %v7362_v5  ;;  %v7405_v63 = vmax.f32 %v7346_v27, %v7364_v23 }
0x4256   :  { %v7430_v62 = vrot.slane %v7406_v28, 4  ;;  %v7432_v15 = vrot.slane %v7406_v28, 6 }
0x4257   :  { %v7420_v17 = vrot.slane %v7404_v56, 2  ;;  %v7422_v37 = vrot.slane %v7404_v56, 4  ;;  %v7425_v48 = vrot.slane %v7405_v63, 6  ;;  %v7427_v32 = vrot.slane %v7405_v63, 2 }
0x4259   :  { %v7450_v21 = vsel %vm7449_vm4, %v7404_v56, %v7420_v17 }
0x425a   :  { %v7452_v1 = vsel %vm7451_vm5, %v7450_v21, %v7422_v37 }
0x425b   :  { %v7454_v51 = vsel %vm7453_vm6, %v7452_v1, %v7425_v48  ;;  %v8444_v36 = vpop.f32.mrb[196].mxu0 }
0x425c   :  { %v7456_v45 = vsel %vm7455_vm7, %v7454_v51, %v7405_v63  ;;  %v7233_v44 = vadd.f32 %v8444_v36, %v11347_v42  ;;  %v7224_v22 = vpop.f32.mrb[197].mxu0 }
0x425d   :  { %v7458_v3 = vsel %vm7457_vm8, %v7456_v45, %v7427_v32  ;;  %v7225_v13 = vadd.f32 %v11347_v42, %v7224_v22  ;;  %v8445_v49 = vpop.f32.mrb[198].mxu0 }
0x425e   :  { %v7276_v50 = vmax.f32 %v7233_v44, 0.0  ;;  %v7236_v52 = vadd.f32 %v8445_v49, %v11347_v42  ;;  %v7227_v53 = vpop.f32.mrb[199].mxu0  ;;  %v7459_v35 = vsel %vm6913_vm11, %v7458_v3, %v7430_v62 }
0x425f   :  { %v7274_v26 = vmax.f32 %v7225_v13, 0.0  ;;  %v7228_v55 = vadd.f32 %v11347_v42, %v7227_v53  ;;  %v11374_v6 = vsel %vm6873_vm10, %v7459_v35, %v7432_v15 }
0x4260   :  { %v11376_v30 = vmax.f32 %v7236_v52, 0.0  ;;  %v7312_v43 = vrot.slane %v7276_v50, 1  ;;  %v7371_v46 = vrot.slane %v7276_v50, 2 }
0x4261   :  { %v7308_v0 = vrot.slane %v7274_v26, 1  ;;  %v7367_v2 = vrot.slane %v7274_v26, 2  ;;  %v7275_v7 = vmax.f32 %v7228_v55, 0.0 }
0x4262   :  { %v7314_v8 = vrot.slane %v11376_v30, 1  ;;  %v7373_v25 = vrot.slane %v11376_v30, 2 }
0x4263   :  { %v7309_v39 = vsel %vm6873_vm10, %v7306_v34, %v7308_v0  ;;  %v7368_v33 = vsel %vm6913_vm11, %v7365_v57, %v7367_v2  ;;  %v7310_v41 = vrot.slane %v7275_v7, 1  ;;  %v7369_v9 = vrot.slane %v7275_v7, 2 }
0x4264   :  { %v7348_v10 = vmax.f32 %v11353_v24, %v7309_v39  ;;  %v7315_v19 = vsel %vm6873_vm10, %v7312_v43, %v7314_v8  ;;  %v7374_v12 = vsel %vm6913_vm11, %v7371_v46, %v7373_v25 }
0x4265   :  { %v7351_v14 = vmax.f32 %v7276_v50, %v7315_v19  ;;  %v7311_v20 = vsel %vm6873_vm10, %v7308_v0, %v7310_v41  ;;  %v7313_v38 = vsel %vm6873_vm10, %v7310_v41, %v7312_v43  ;;  %v7370_v16 = vsel %vm6913_vm11, %v7367_v2, %v7369_v9 }
0x4266   :  { %v7407_v31 = vmax.f32 %v7348_v10, %v7368_v33  ;;  %v7349_v29 = vmax.f32 %v7274_v26, %v7311_v20  ;;  %v7350_v34 = vmax.f32 %v7275_v7, %v7313_v38  ;;  %v7372_v57 = vsel %vm6913_vm11, %v7369_v9, %v7371_v46 }
0x4267   :  { %v7410_v59 = vmax.f32 %v7351_v14, %v7374_v12  ;;  %v8448_v58 = vpop.f32.mrb[200].mxu0 }
0x4268   :  { %v7435_v60 = vrot.slane %v7407_v31, 2  ;;  %v7437_v24 = vrot.slane %v7407_v31, 4  ;;  %v7408_v61 = vmax.f32 %v7349_v29, %v7370_v16  ;;  %v7409_v18 = vmax.f32 %v7350_v34, %v7372_v57  ;;  %v7240_v11 = vpop.f32.mrb[201].mxu0 }
0x4269   :  { %v7469_v47 = vrot.slane %v7410_v59, 2  ;;  %v7249_v4 = vadd.f32 %v8448_v58, %v11347_v42  ;;  %v7241_v5 = vadd.f32 %v11347_v42, %v7240_v11  ;;  %v8449_v54 = vpop.f32.mrb[202].mxu0  ;;  %v7471_v63 = vrot.slane %v7410_v59, 4 }
0x426a   :  { %v7461_v27 = vsel %vm7449_vm4, %v7407_v31, %v7435_v60  ;;  %v7440_v23 = vrot.slane %v7408_v61, 6  ;;  %v7243_v28 = vpop.f32.mrb[203].mxu0  ;;  %v7442_v17 = vrot.slane %v7408_v61, 2  ;;  %v7445_v48 = vrot.slane %v7409_v18, 4 }
0x426b   :  { %v7462_v56 = vsel %vm7451_vm5, %v7461_v27, %v7437_v24  ;;  %v7280_v37 = vmax.f32 %v7249_v4, 0.0  ;;  %v7278_v1 = vmax.f32 %v7241_v5, 0.0  ;;  %v7252_v32 = vadd.f32 %v8449_v54, %v11347_v42 }
0x426c   :  { %v7463_v21 = vsel %vm7453_vm6, %v7462_v56, %v7440_v23  ;;  %v7498_v51 = vsel %vm7449_vm4, %v7410_v59, %v7469_v47  ;;  %v7447_v36 = vrot.slane %v7409_v18, 6  ;;  %v7244_v45 = vadd.f32 %v11347_v42, %v7243_v28 }
0x426d   :  { %v7464_v62 = vsel %vm7455_vm7, %v7463_v21, %v7408_v61  ;;  %v7316_v44 = vrot.slane %v7278_v1, 1  ;;  %v7375_v22 = vrot.slane %v7278_v1, 2  ;;  %v11398_v15 = vmax.f32 %v7252_v32, 0.0 }
0x426e   :  { %v7465_v3 = vsel %vm7457_vm8, %v7464_v62, %v7442_v17  ;;  %v7320_v13 = vrot.slane %v7280_v37, 1  ;;  %v7379_v49 = vrot.slane %v7280_v37, 2  ;;  %v7279_v50 = vmax.f32 %v7244_v45, 0.0 }
0x426f   :  { %v8452_v52 = vpop.f32.mrb[204].mxu0  ;;  %v7466_v53 = vsel %vm6913_vm11, %v7465_v3, %v7445_v48  ;;  %v7317_v35 = vsel %vm6873_vm10, %v7314_v8, %v7316_v44  ;;  %v7376_v26 = vsel %vm6913_vm11, %v7373_v25, %v7375_v22  ;;  %v7322_v55 = vrot.slane %v11398_v15, 1 }
0x4270   :  { %v7381_v0 = vrot.slane %v11398_v15, 2  ;;  %v7256_v2 = vpop.f32.mrb[205].mxu0  ;;  %v7352_v7 = vmax.f32 %v11376_v30, %v7317_v35  ;;  %v7318_v43 = vrot.slane %v7279_v50, 1  ;;  %v7377_v46 = vrot.slane %v7279_v50, 2 }
0x4271   :  { %v7265_v39 = vadd.f32 %v8452_v52, %v11347_v42  ;;  %v8453_v33 = vpop.f32.mrb[206].mxu0  ;;  %v7323_v41 = vsel %vm6873_vm10, %v7320_v13, %v7322_v55  ;;  %v7257_v8 = vadd.f32 %v11347_v42, %v7256_v2  ;;  %v11412_v25 = vsel %vm6873_vm10, %v7466_v53, %v7447_v36 }
0x4272   :  { %v7382_v9 = vsel %vm6913_vm11, %v7379_v49, %v7381_v0  ;;  %v7259_v10 = vpop.f32.mrb[207].mxu0  ;;  %v7411_v19 = vmax.f32 %v7352_v7, %v7376_v26  ;;  %v7355_v12 = vmax.f32 %v7280_v37, %v7323_v41  ;;  %v7319_v14 = vsel %vm6873_vm10, %v7316_v44, %v7318_v43 }
0x4273   :  { %v7321_v30 = vsel %vm6873_vm10, %v7318_v43, %v7320_v13  ;;  %v7353_v20 = vmax.f32 %v7278_v1, %v7319_v14  ;;  %v7378_v16 = vsel %vm6913_vm11, %v7375_v22, %v7377_v46  ;;  %v7380_v31 = vsel %vm6913_vm11, %v7377_v46, %v7379_v49 }
0x4274   :  { %v7354_v38 = vmax.f32 %v7279_v50, %v7321_v30  ;;  %v7499_v29 = vsel %vm7451_vm5, %v7498_v51, %v7471_v63  ;;  %v7474_v34 = vrot.slane %v7411_v19, 6  ;;  %v7414_v57 = vmax.f32 %v7355_v12, %v7382_v9 }
0x4275   :  { %v7284_v59 = vmax.f32 %v7265_v39, 0.0  ;;  %v7412_v58 = vmax.f32 %v7353_v20, %v7378_v16  ;;  %v7282_v24 = vmax.f32 %v7257_v8, 0.0  ;;  %v7260_v61 = vadd.f32 %v11347_v42, %v7259_v10 }
0x4276   :  { %v7413_v60 = vmax.f32 %v7354_v38, %v7380_v31  ;;  %v7476_v18 = vrot.slane %v7411_v19, 2  ;;  %v7500_v11 = vsel %vm7453_vm6, %v7499_v29, %v7474_v34  ;;  %v7537_v47 = vrot.slane %v11374_v6, 1 }
0x4277   :  { %v7545_v4 = vrot.slane %v11374_v6, 2  ;;  %v7501_v5 = vsel %vm7455_vm7, %v7500_v11, %v7411_v19  ;;  %v7489_v54 = vrot.slane %v7414_v57, 6  ;;  %v7479_v27 = vrot.slane %v7412_v58, 4 }
0x4278   :  { %v7484_v23 = vrot.slane %v7413_v60, 2  ;;  %v7491_v28 = vrot.slane %v7414_v57, 2  ;;  %v7486_v56 = vrot.slane %v7413_v60, 4  ;;  %v7328_v63 = vrot.slane %v7284_v59, 1 }
0x4279   :  { %v7324_v17 = vrot.slane %v7282_v24, 1  ;;  %v7383_v48 = vrot.slane %v7282_v24, 2  ;;  %v7283_v42 = vmax.f32 %v7260_v61, 0.0  ;;  %v7502_v21 = vsel %vm7457_vm8, %v7501_v5, %v7476_v18 }
0x427a   :  { %v7505_v37 = vsel %vm7449_vm4, %v7413_v60, %v7484_v23  ;;  %v7481_v1 = vrot.slane %v7412_v58, 6  ;;  %v7503_v36 = vsel %vm6913_vm11, %v7502_v21, %v7479_v27  ;;  %v7359_v13 = vmax.f32 %v7284_v59, %v7328_v63 }
0x427b   :  { %v7506_v32 = vsel %vm7451_vm5, %v7505_v37, %v7486_v56  ;;  %v7325_v51 = vsel %vm6873_vm10, %v7322_v55, %v7324_v17  ;;  %v7384_v44 = vsel %vm6913_vm11, %v7381_v0, %v7383_v48  ;;  %v7326_v22 = vrot.slane %v7283_v42, 1 }
0x427c   :  { %v7507_v62 = vsel %vm7453_vm6, %v7506_v32, %v7489_v54  ;;  %v7356_v45 = vmax.f32 %v11398_v15, %v7325_v51  ;;  %v7387_v49 = vrot.slane %v7284_v59, 2  ;;  %v7385_v50 = vrot.slane %v7283_v42, 2 }
0x427d   :  { %v7508_v3 = vsel %vm7455_vm7, %v7507_v62, %v7414_v57  ;;  %v7327_v53 = vsel %vm6873_vm10, %v7324_v17, %v7326_v22  ;;  %v7329_v35 = vsel %vm6873_vm10, %v7326_v22, %v7328_v63  ;;  %v7504_v26 = vsel %vm6873_vm10, %v7503_v36, %v7481_v1 }
0x427e   :  { %v7415_v52 = vmax.f32 %v7356_v45, %v7384_v44  ;;  %v7357_v55 = vmax.f32 %v7282_v24, %v7327_v53  ;;  %v7358_v2 = vmax.f32 %v7283_v42, %v7329_v35  ;;  %v7386_v7 = vsel %vm6913_vm11, %v7383_v48, %v7385_v50 }
0x427f   :  { %v7388_v15 = vsel %vm6913_vm11, %v7385_v50, %v7387_v49  ;;  %v7538_v46 = vrot.slane %v11412_v25, 1  ;;  %v7540_v39 = vrot.slane %v7504_v26, 1  ;;  %v7546_v9 = vrot.slane %v11412_v25, 2 }
0x4280   :  { %v7494_v0 = vrot.slane %v7415_v52, 4  ;;  %v7496_v43 = vrot.slane %v7415_v52, 6  ;;  %v7416_v33 = vmax.f32 %v7357_v55, %v7386_v7  ;;  %v7417_v41 = vmax.f32 %v7358_v2, %v7388_v15  ;;  %v8620_v55 = vld [vmem:[%s11529_s13] sm:$0xff]   ;;  %v8621_v2 = vld [vmem:[%s11529_s13 + $0x8] sm:$0xff]   ;;  %v8622_v7 = vld [vmem:[%s11529_s13 + $0x10] sm:$0xff]  }
0x4281   :  { %v7548_v8 = vrot.slane %v7504_v26, 2  ;;  %v7539_v10 = vsel %vm6873_vm10, %v7537_v47, %v7538_v46  ;;  %v7541_v19 = vsel %vm6873_vm10, %v7538_v46, %v7540_v39  ;;  %v7585_v12 = vpack.c.bf16 %v11412_v25, %v11374_v6  ;;  %v8623_v15 = vld [vmem:[%s11529_s13 + $0x18] sm:$0xff]  }
0x4282   :  { %v7509_v14 = vsel %vm7457_vm8, %v7508_v3, %v7491_v28  ;;  %v7418_v30 = vmax.f32 %v7359_v13, %v7387_v49  ;;  %v7513_v20 = vrot.slane %v7416_v33, 2  ;;  %v7515_v38 = vrot.slane %v7416_v33, 4 }
0x4283   :  { %v7586_v16 = vpack.c.bf16 %v7541_v19, %v7539_v10  ;;  %v7547_v31 = vsel %vm6913_vm11, %v7545_v4, %v7546_v9  ;;  %v7549_v29 = vsel %vm6913_vm11, %v7546_v9, %v7548_v8  ;;  %v7510_v34 = vsel %vm6913_vm11, %v7509_v14, %v7494_v0 }
0x4284   :  { %v7518_v57 = vrot.slane %v7417_v41, 6  ;;  %v7527_v59 = vsel %vm7449_vm4, %v7416_v33, %v7513_v20  ;;  %v7587_v58 = vpack.c.bf16 %v7549_v29, %v7547_v31  ;;  %v7511_v60 = vsel %vm6873_vm10, %v7510_v34, %v7496_v43 }
0x4285   :  { %v7528_v6 = vsel %vm7451_vm5, %v7527_v59, %v7515_v38  ;;  %7825 = vmatprep.mubr.bf16.mxu1 %v7586_v16  ;;  %v7555_v25 = vrot.slane %v7511_v60, 1  ;;  %v7559_v24 = vrot.slane %v7511_v60, 2  ;;  %v7520_v61 = vrot.slane %v7417_v41, 2 }
0x4286   :  { %v7529_v18 = vsel %vm7453_vm6, %v7528_v6, %v7518_v57  ;;  %8471 = vmatmul.mubr.bf16.vlgmr.msra.gmra.mrb[208].mxu0 %v7587_v58  ;;  %7826 = vmatmul.mubr.bf16.vlgmr.msra.gmra.mrb[192].mxu1 %v7585_v12  ;;  %v7523_v11 = vrot.slane %v7418_v30, 4  ;;  %v7525_v54 = vrot.slane %v7418_v30, 6 }
0x4287   :  { %v7530_v47 = vsel %vm7455_vm7, %v7529_v18, %v7417_v41  ;;  %8474 = vmatprep.mubr.msk.bf16.mxu0 %vm9115_vm3, %v9114_v40  ;;  %v7556_v4 = vsel %vm6873_vm10, %v7540_v39, %v7555_v25  ;;  %v7560_v5 = vsel %vm6913_vm11, %v7548_v8, %v7559_v24  ;;  %8483 = vmatpush3.bf16.msra.mxu1 %v8620_v55 }
0x4288   :  { %v7531_v27 = vsel %vm7457_vm8, %v7530_v47, %v7520_v61  ;;  %v7582_v23 = vsel %vm7451_vm5, %v7504_v26, %v7560_v5  ;;  %v7563_v37 = vrot.slane %v7556_v4, 2  ;;  %v7566_v51 = vrot.slane %v7560_v5, 2  ;;  %8484 = vmatprep.subr.bf16.mxu1 %v9114_v40 }
0x4289   :  { %v7532_v28 = vsel %vm6913_vm11, %v7531_v27, %v7523_v11 }
0x428a   :  { %v7533_v56 = vsel %vm6873_vm10, %v7532_v28, %v7525_v54 }
0x428b   :  { %v7557_v63 = vrot.slane %v7533_v56, 1  ;;  %v7561_v17 = vrot.slane %v7533_v56, 2  ;;  %8485 = vmatpush3.bf16.msra.mxu1 %v8621_v2 }
0x428c   :  { %8486 = vmatprep.subr.bf16.mxu1 %v9114_v40 }
0x428d   :  { %v7558_v48 = vsel %vm6873_vm10, %v7555_v25, %v7557_v63  ;;  %v7569_v42 = vrot.slane %v7557_v63, 2  ;;  %v7562_v21 = vsel %vm6913_vm11, %v7559_v24, %v7561_v17  ;;  %v7571_v1 = vrot.slane %v7561_v17, 2 }
0x428e   :  { %v7564_v32 = vrot.slane %v7558_v48, 2  ;;  %v7567_v36 = vrot.slane %v7562_v21, 2  ;;  %v7588_v62 = vpack.c.bf16 %v7562_v21, %v7582_v23  ;;  %v7591_v26 = vpack.c.bf16 %v7561_v17, %v7561_v17 }
0x428f   :  { %v7592_v53 = vpack.c.bf16 %v7569_v42, %v7569_v42  ;;  %v7593_v35 = vpack.c.bf16 %v7571_v1, %v7571_v1  ;;  %8487 = vmatpush3.bf16.msra.mxu1 %v8622_v7  ;;  %vm7922_vm10 = vcmask 523266  }
0x4290   :  { %v7565_v45 = vsel %vm6913_vm11, %v7563_v37, %v7564_v32  ;;  %v7570_v44 = vsel %vm6913_vm11, %v7564_v32, %v7569_v42  ;;  %v7568_v22 = vsel %vm6913_vm11, %v7566_v51, %v7567_v36  ;;  %v7572_v3 = vsel %vm6913_vm11, %v7567_v36, %v7571_v1  ;;  %8488 = vmatprep.subr.bf16.mxu1 %v9114_v40 }
0x4291   :  { %v7583_v13 = vsel %vm7451_vm5, %v7540_v39, %v7565_v45  ;;  %v7584_v49 = vsel %vm7451_vm5, %v7548_v8, %v7568_v22  ;;  %v8327_v39 = vld [vmem:[#allocation13] ss:$0 sm:$0xff]  ;;  %vm7925_vm11 = vcmask 519168  }
0x4292   :  { %v7589_v50 = vpack.c.bf16 %v7570_v44, %v7583_v13  ;;  %v7590_v52 = vpack.c.bf16 %v7572_v3, %v7584_v49 }
0x4293   :  { %8489 = vmatpush3.bf16.msra.mxu1 %v8623_v15 }
0x4294   :  { %7833 = vmatprep.mubr.bf16.mxu1 %v7589_v50  ;;  %8475 = vmatmul.mubr.bf16.gmra.mrb[212].mxu0 %v7590_v52 }
0x4295   :  { %7834 = vmatmul.mubr.bf16.gmra.mrb[196].mxu1 %v7588_v62  ;;  %8478 = vmatprep.mubr.msk.bf16.mxu0 %vm9115_vm3, %v9114_v40 }
0x4296   :  { %7841 = vmatprep.mubr.bf16.mxu1 %v7592_v53  ;;  %8494 = vmatprep.subr.bf16.mxu1 %v9114_v40 }
0x429c   :  { %8479 = vmatmul.mubr.bf16.gmra.mrb[216].mxu0 %v7593_v35 }
0x429d   :  { %7842 = vmatmul.mubr.bf16.gmra.mrb[200].mxu1 %v7591_v26 }
0x429e   :  { %8490 = vmatprep.mubr.msk.bf16.mxu1 %vm9115_vm3, %v9114_v40 }
0x4359   :  { %v7883_v0 = vpop.f32.mrb[208].mxu0  ;;  %v8391_v43 = vpop.f32.mrb[192].mxu1 }
0x435a   :  { %v8472_v46 = vpop.f32.mrb[209].mxu0  ;;  %v8392_v33 = vpop.f32.mrb[193].mxu1 }
0x435b   :  { %v8393_v41 = vadd.f32 %v8392_v33, %v8391_v43  ;;  %v7886_v9 = vpop.f32.mrb[210].mxu0  ;;  %v8394_v8 = vpop.f32.mrb[194].mxu1 }
0x435c   :  { %v8473_v10 = vpop.f32.mrb[211].mxu0  ;;  %v8395_v19 = vpop.f32.mrb[195].mxu1 }
0x435d   :  { %v7828_v12 = vadd.f32 %v8393_v41, %v8327_v39  ;;  %v8396_v14 = vadd.f32 %v8395_v19, %v8394_v8  ;;  %v8624_v41 = vld [vmem:[%s11531_s15] sm:$0xff]   ;;  %v8625_v8 = vld [vmem:[%s11531_s15 + $0x8] sm:$0xff]   ;;  %s9066_s15 = scalar_lea.vmem %s8096_s19, 32 }
0x435e   :  { %v8352_v10 = vld [vmem:[#allocation14] ss:$0 sm:$0xff]  ;;  %p9067_p0 = scmp.ne.s32.totalorder %s8096_s19, %s9066_s15  ;;  %p9072_p2 = scmp.lt.s32.totalorder %s9066_s15, %s9066_s15 }
0x435f   :  { %v7884_v30 = vadd.f32 %v7883_v0, %v7828_v12  ;;  %v7831_v20 = vadd.f32 %v8396_v14, %v8327_v39 }
0x4360   :  { %p9073_p3 = por %p9072_p2, %p9071_p1 }
0x4361   :  { %v7905_v38 = vmax.f32 %v7884_v30, 0.0  ;;  %v7887_v16 = vadd.f32 %v7886_v9, %v7831_v20 }
0x4362   :  { %p9074_p4 = pnand %p9073_p3, %p9067_p0 }
0x4363   :  { %v7906_v31 = vmax.f32 %v7887_v16, 0.0  ;;  %v7910_v29 = vsel %vm215_vm1, %v7905_v38, -inf }
0x4365   :  { %v7911_v34 = vsel %vm215_vm1, %v7906_v31, -inf  ;;  %v8358_v31 = vld [vmem:[#allocation16] ss:$0 sm:$0xff] }
0x4366   :  { %v7914_v57 = vmax.f32 %v7910_v29, %v7911_v34 }
0x4367   :  { %v7891_v59 = vpop.f32.mrb[212].mxu0 }
0x4368   :  { %v8397_v58 = vpop.f32.mrb[196].mxu1  ;;  %v8476_v60 = vpop.f32.mrb[213].mxu0 }
0x4369   :  { %v8398_v6 = vpop.f32.mrb[197].mxu1  ;;  %v7894_v25 = vpop.f32.mrb[214].mxu0 }
0x436a   :  { %v8399_v24 = vadd.f32 %v8398_v6, %v8397_v58  ;;  %v8400_v61 = vpop.f32.mrb[198].mxu1  ;;  %v8477_v18 = vpop.f32.mrb[215].mxu0 }
0x436b   :  { %v8401_v11 = vpop.f32.mrb[199].mxu1 }
0x436c   :  { %v7836_v47 = vadd.f32 %v8399_v24, %v8327_v39  ;;  %v8402_v4 = vadd.f32 %v8401_v11, %v8400_v61 }
0x436e   :  { %v7892_v5 = vadd.f32 %v7891_v59, %v7836_v47  ;;  %v7839_v54 = vadd.f32 %v8402_v4, %v8327_v39 }
0x436f   :  { %v7899_v27 = vpop.f32.mrb[216].mxu0 }
0x4370   :  { %v7907_v23 = vmax.f32 %v7892_v5, 0.0  ;;  %v7895_v28 = vadd.f32 %v7894_v25, %v7839_v54  ;;  %v8403_v56 = vpop.f32.mrb[200].mxu1  ;;  %v8480_v63 = vpop.f32.mrb[217].mxu0 }
0x4371   :  { %v8404_v17 = vpop.f32.mrb[201].mxu1  ;;  %v7902_v37 = vpop.f32.mrb[218].mxu0 }
0x4372   :  { %v7913_v48 = vsel %vm7912_vm9, %v7907_v23, -inf  ;;  %v7908_v42 = vmax.f32 %v7895_v28, 0.0  ;;  %v8405_v21 = vadd.f32 %v8404_v17, %v8403_v56  ;;  %v8406_v1 = vpop.f32.mrb[202].mxu1  ;;  %v8481_v32 = vpop.f32.mrb[219].mxu0  ;;  %v7923_v62 = vsel %vm7922_vm10, %v7907_v23, -inf }
0x4373   :  { %v7915_v51 = vmax.f32 %v7914_v57, %v7913_v48  ;;  %v8407_v36 = vpop.f32.mrb[203].mxu1 }
0x4374   :  { %v7924_v45 = vsel %vm215_vm1, %v7908_v42, -inf  ;;  %v7844_v44 = vadd.f32 %v8405_v21, %v8327_v39 }
0x4375   :  { %v7916_v22 = vrot.slane %v7915_v51, 4  ;;  %v7927_v3 = vmax.f32 %v7923_v62, %v7924_v45 }
0x4376   :  { %v7900_v13 = vadd.f32 %v7899_v27, %v7844_v44 }
0x4377   :  { %v7917_v49 = vmax.f32 %v7915_v51, %v7916_v22 }
0x4378   :  { %v7909_v50 = vmax.f32 %v7900_v13, 0.0 }
0x4379   :  { %v7918_v53 = vrot.slane %v7917_v49, 2 }
0x437a   :  { %v7926_v52 = vsel %vm7925_vm11, %v7909_v50, -inf }
0x437b   :  { %v7928_v35 = vmax.f32 %v7927_v3, %v7926_v52  ;;  %v7919_v55 = vmax.f32 %v7917_v49, %v7918_v53 }
0x437d   :  { %v7929_v26 = vrot.slane %v7928_v35, 4  ;;  %v7920_v15 = vrot.slane %v7919_v55, 1 }
0x437f   :  { %v7930_v2 = vmax.f32 %v7928_v35, %v7929_v26  ;;  %v7921_v46 = vmax.f32 %v7919_v55, %v7920_v15 }
0x4381   :  { %v7931_v7 = vrot.slane %v7930_v2, 2 }
0x4383   :  { %v7932_v0 = vmax.f32 %v7930_v2, %v7931_v7 }
0x4385   :  { %v7933_v43 = vrot.slane %v7932_v0, 1 }
0x4387   :  { %v7934_v33 = vmax.f32 %v7932_v0, %v7933_v43 }
0x4389   :  { %v7935_v39 = vsel %vm7449_vm4, %v7921_v46, %v7934_v33 }
0x438a   :  { %v7936_v9 = vpack.c.bf16 %v7935_v39, %v7935_v39 }
0x438c   :  { %8491 = vmatmul.mubr.msk.bf16.vlgmr.msra.gmra.mrb[204].mxu1 %vm215_vm1, %v7936_v9  ;;  %vm8087_vm1 = vcmask 25600  }
0x438d   :  { %8495 = vmatpush3.bf16.msra.mxu1 %v8624_v41  ;;  %8498 = vmatprep.mubr.msk.bf16.mxu1 %vm9115_vm3, %v9114_v40 }
0x438e   :  { %8496 = vmatprep.subr.bf16.mxu1 %v9114_v40 }
0x4391   :  { %8497 = vmatpush3.bf16.msra.mxu1 %v8625_v8 }
0x445f   :  { %v8013_v19 = vpop.f32.mrb[204].mxu1 }
0x4460   :  { %v8014_v12 = vadd.f32 %v8352_v10, %v8013_v19  ;;  %v8492_v14 = vpop.f32.mrb[205].mxu1 }
0x4461   :  { %v8016_v30 = vpop.f32.mrb[206].mxu1 }
0x4462   :  { %v8019_v20 = vmax.f32 %v8014_v12, 0.0  ;;  %v8493_v38 = vpop.f32.mrb[207].mxu1 }
0x4464   :  { %v8020_v16 = vpack.c.bf16 %v8019_v20, %v8019_v20 }
0x4466   :  { %8499 = vmatmul.mubr.msk.bf16.vlgmr.msra.gmra.mrb[208].mxu1 %vm6938_vm15, %v8020_v16 }
0x4539   :  { %v8081_v29 = vpop.f32.mrb[208].mxu1 }
0x453a   :  { %v8082_v40 = vadd.f32 %v8358_v31, %v8081_v29  ;;  %v8500_v34 = vpop.f32.mrb[209].mxu1 }
0x453b   :  { %v8084_v57 = vpop.f32.mrb[210].mxu1 }
0x453c   :  { %v8501_v59 = vpop.f32.mrb[211].mxu1  ;;  %8088 = vst.msk [vmem:[#allocation17] sm:$0x3] %vm8087_vm1, %v8082_v40 }
0x453d   :  { %9077 = shalt.err (!%p9074_p4)
}
0x453e   :  { %s9078_s20 = scalar_lea.hbm %s11533_s17, 32 }
0x453f   :  { %p9079_p5 = scmp.ne.s32.totalorder %s11533_s17, %s9078_s20  ;;  %p9082_p6 = scmp.lt.u32.totalorder %s9078_s20, %s11533_s17 }
0x4541   :  { %p9084_p7 = pnand %p9082_p6, %p9079_p5 }
0x4543   :  { %9087 = shalt.err (!%p9084_p7)
}
0x4544   :  { %8098 = dma.vmem_to_hbm [thread:$0]  %s8096_s19, 32, %s11533_s17, [#allocation7]  }
0x4545   :  { %9096 = dma.done.wait [#allocation7], 32  }
0x4546   :  { %9097 = vsyncadd [#allocation7], 4294967264 }
0x4547   :  { %8102 = vsyncpa [#allocation6], 1 }
0x4548   :  { %8103 = vsyncpa [#allocation9], 1 }
0x4549   :  { %8104 = vsyncpa [#allocation12], 1 }
0x454a   :  { %8105 = vsyncpa [#allocation15], 1 }
0x454b   :  { %8106 = vsyncpa [#allocation7], 1 }

</bundles_post_ra>
